<compile_context>
chip_gen: v7x
topology: tpu7x:2x2x1
jax: 0.10.0
libtpu: 0.0.40
codegen_flags: <defaults>
</compile_context>

<pallas_src>
import functools

import jax
import jax.numpy as jnp
import numpy as np
from jax.experimental import pallas as pl
from jax.experimental.pallas import tpu as pltpu


def _upsample_conv_kernel(x_ref, me_ref, mo_ref, b_ref, o_ref, *,
                          img_h, mask_batch):
    """One tile of output row-pairs (flattened over batch and image rows).

    x_ref : (N*H + 2, W*C)   flattened input rows, one zero row at each end (f32)
    me_ref: (2*W*C, Wo*C)    folded weights, even output rows   (compute dtype)
    mo_ref: (2*W*C, Wo*C)    folded weights, odd output rows    (compute dtype)
    b_ref : (1, 2*Wo*C)      bias replicated per output pixel   (f32)
    o_ref : (r_tile, 2*Wo*C) lanes [0:Wo*C) = even rows, [Wo*C:) = odd rows
    """
    r_tile = o_ref.shape[0]
    row0 = pl.multiple_of(pl.program_id(0) * r_tile, r_tile)

    # Padded row r+1 holds image row r, so the three row neighbours of output
    # row-pair r are padded rows r / r+1 / r+2.
    prev = x_ref[pl.ds(row0, r_tile), :]        # rows r-1 (aligned start)
    cur = x_ref[pl.ds(row0 + 1, r_tile), :]     # rows r
    nxt = x_ref[pl.ds(row0 + 2, r_tile), :]     # rows r+1

    if mask_batch:
        # Zero row-neighbour contributions that would leak across image
        # boundaries after flattening (N, H) -> N*H rows.  (The very top and
        # bottom of the whole batch are already the two zero pad rows.)
        y = (row0 + jax.lax.broadcasted_iota(jnp.int32, (r_tile, 1), 0)) % img_h
        prev = jnp.where(y > 0, prev, jnp.zeros_like(prev))
        nxt = jnp.where(y < img_h - 1, nxt, jnp.zeros_like(nxt))

    cdt = me_ref.dtype
    even_lhs = jnp.concatenate([prev, cur], axis=1).astype(cdt)   # (r_tile, 2*W*C)
    odd_lhs = jnp.concatenate([cur, nxt], axis=1).astype(cdt)     # (r_tile, 2*W*C)

    even = jnp.dot(even_lhs, me_ref[...], preferred_element_type=jnp.float32)
    odd = jnp.dot(odd_lhs, mo_ref[...], preferred_element_type=jnp.float32)
    out = jnp.concatenate([even, odd], axis=1) + b_ref[0, :]      # single bias pass
    o_ref[...] = out.astype(o_ref.dtype)


def _fold_weights(weight_oihw, bias, w_in, compute_dtype):
    """Fold nearest-2x column upsample + zero pad + 3x3 column taps + mixing.

    Returns
      m_even: (2*W*C, Wo*C)  rows [0:WC) act on x[y-1], rows [WC:) on x[y]
      m_odd : (2*W*C, Wo*C)  rows [0:WC) act on x[y],   rows [WC:) on x[y+1]
      b_ext : (1, 2*Wo*C)    bias replicated per output pixel (f32)
    """
    c = weight_oihw.shape[0]
    wo = 2 * w_in
    # sel[dx, xi, xo] = 1 iff upsampled column u = xo-1+dx is in range and
    # comes from original column xi = u // 2 (column zero-pad by exclusion).
    sel = np.zeros((3, w_in, wo), np.float32)
    xo = np.arange(wo)
    for dx in range(3):
        u = xo - 1 + dx
        valid = (u >= 0) & (u < wo)
        sel[dx, u[valid] // 2, xo[valid]] = 1.0

    # mcol[ky, xi, ci, xo, co] = sum_dx sel[dx, xi, xo] * w[co, ci, ky, dx]
    mcol = jnp.einsum("dio,ckyd->yikoc", jnp.asarray(sel), weight_oihw,
                      precision=jax.lax.Precision.HIGHEST)
    mcol = mcol.reshape(3, w_in * c, wo * c)

    # Even output row 2y   = x[y-1] @ mcol[0]           + x[y]   @ (mcol[1]+mcol[2])
    # Odd  output row 2y+1 = x[y]   @ (mcol[0]+mcol[1]) + x[y+1] @ mcol[2]
    m_even = jnp.concatenate([mcol[0], mcol[1] + mcol[2]], axis=0).astype(compute_dtype)
    m_odd = jnp.concatenate([mcol[0] + mcol[1], mcol[2]], axis=0).astype(compute_dtype)
    b_ext = jnp.tile(bias.astype(jnp.float32), 2 * wo)[None, :]
    return m_even, m_odd, b_ext


def _pick_row_tile(n_rows, cap=256, min_rows=128, min_steps=8):
    """Largest multiple-of-8 divisor of n_rows (<= cap); when possible prefer a
    tile that is both MXU-fat (>= min_rows) and leaves >= min_steps grid steps
    so the pipeline primes and v7x's two TensorCores both get work."""
    divs = [d for d in range(8, min(n_rows, cap) + 1, 8) if n_rows % d == 0]
    if not divs:
        return n_rows
    good = [d for d in divs if d >= min_rows and n_rows // d >= min_steps]
    return max(good) if good else max(divs)


@functools.partial(jax.jit, static_argnames=("use_bf16",))
def upsample_forward_nhwc(x_nhwc, weight_oihw, bias, use_bf16=True):
    """NHWC fast path: no layout transposes around the kernel."""
    n, h, w, c = x_nhwc.shape
    ho, wo = 2 * h, 2 * w
    wc = w * c
    out_l = 2 * wo * c
    rows = n * h

    cdt = jnp.bfloat16 if use_bf16 else jnp.float32
    m_even, m_odd, b_ext = _fold_weights(weight_oihw, bias, w, cdt)

    # Flatten (N, H) -> rows and add one zero row at each end.  This is a
    # single pass over the (4x smaller than the output) input and fuses with
    # any upstream layout change.  x stays f32 in HBM; the matmul LHS is cast
    # to bf16 inside the kernel.
    xf = x_nhwc.reshape(rows, wc).astype(jnp.float32)
    xpad = jnp.pad(xf, ((1, 1), (0, 0)))                       # (rows+2, W*C)

    r_tile = _pick_row_tile(rows)
    grid = (rows // r_tile,)

    kernel = functools.partial(_upsample_conv_kernel, img_h=h, mask_batch=n > 1)

    # Actual MXU work of the two banded matmuls per row-pair.
    flops = 2 * rows * 2 * (2 * wc) * (wo * c)
    bytes_accessed = (xpad.size * 4
                      + (m_even.size + m_odd.size) * m_even.dtype.itemsize
                      + b_ext.size * 4
                      + rows * out_l * x_nhwc.dtype.itemsize)
    cost = pl.CostEstimate(flops=int(flops), transcendentals=0,
                           bytes_accessed=int(bytes_accessed))

    vmem_est = (2 * xpad.size * 4
                + 2 * (m_even.size + m_odd.size) * m_even.dtype.itemsize
                + 2 * b_ext.size * 4
                + 2 * r_tile * out_l * 4)
    vmem_limit = int(min(max(2 * vmem_est, 16 << 20), 64 << 20))

    out = pl.pallas_call(
        kernel,
        out_shape=jax.ShapeDtypeStruct((rows, out_l), x_nhwc.dtype),
        grid_spec=pltpu.PrefetchScalarGridSpec(
            num_scalar_prefetch=0,
            grid=grid,
            in_specs=[
                pl.BlockSpec((rows + 2, wc), lambda t: (0, 0)),      # resident input
                pl.BlockSpec((2 * wc, wo * c), lambda t: (0, 0)),    # m_even (const)
                pl.BlockSpec((2 * wc, wo * c), lambda t: (0, 0)),    # m_odd  (const)
                pl.BlockSpec((1, out_l), lambda t: (0, 0)),          # bias   (const)
            ],
            out_specs=pl.BlockSpec((r_tile, out_l), lambda t: (t, 0)),
        ),
        compiler_params=pltpu.CompilerParams(
            dimension_semantics=("parallel",),
            vmem_limit_bytes=vmem_limit),
        cost_estimate=cost,
    )(xpad, m_even, m_odd, b_ext)

    # (rows, 2*Wo*C) row-major is exactly (N, Ho, Wo, C): free reshape.
    return out.reshape(n, h, 2, wo, c).reshape(n, ho, wo, c)


@functools.partial(jax.jit, static_argnames=("use_bf16",))
def upsample_forward(x_nchw, weight_oihw, bias, use_bf16=True):
    """F.interpolate(x, scale_factor=2, mode='nearest') + Conv2d(C, C, 3, pad=1).

    NCHW in / NCHW out (PyTorch contract).  The transposes here exist only to
    honour that layout; NHWC callers should use `upsample_forward_nhwc`.
    """
    x_nhwc = jnp.transpose(x_nchw, (0, 2, 3, 1))
    out_nhwc = upsample_forward_nhwc(x_nhwc, weight_oihw, bias, use_bf16=use_bf16)
    return jnp.transpose(out_nhwc, (0, 3, 1, 2))


def _reference(x_nchw, weight_oihw, bias):
    """Pure-JAX reference (nearest x2 upsample + conv), NCHW."""
    x = jnp.repeat(jnp.repeat(x_nchw, 2, axis=2), 2, axis=3)
    out = jax.lax.conv_general_dilated(
        x, weight_oihw, window_strides=(1, 1), padding=((1, 1), (1, 1)),
        dimension_numbers=("NCHW", "OIHW", "NCHW"),
        precision=jax.lax.Precision.HIGHEST)
    return out + bias.reshape(1, -1, 1, 1)


if __name__ == "__main__":
    key = jax.random.PRNGKey(0)
    N, C, H, W = 2, 4, 16, 16

    kx, kw, kb = jax.random.split(key, 3)
    x = jax.random.normal(kx, (N, C, H, W), dtype=jnp.float32)

    # Deterministic Conv2d-style init: U(-k, k), k = 1/sqrt(fan_in)
    fan_in = C * 3 * 3
    bound = 1.0 / np.sqrt(fan_in)
    weight = jax.random.uniform(kw, (C, C, 3, 3), jnp.float32, -bound, bound)
    bias = jax.random.uniform(kb, (C,), jnp.float32, -bound, bound)

    ref = jax.block_until_ready(_reference(x, weight, bias))

    # Exact-numerics path (f32 MXU operands): tight check proves the folding.
    out_f32 = jax.block_until_ready(upsample_forward(x, weight, bias, use_bf16=False))
    assert out_f32.shape == (N, C, 2 * H, 2 * W), out_f32.shape
    np.testing.assert_allclose(np.asarray(out_f32), np.asarray(ref),
                               rtol=1e-5, atol=1e-5)

    # Default fast path (bf16 MXU operands, f32 accumulation).
    out = jax.block_until_ready(upsample_forward(x, weight, bias))
    assert out.shape == (N, C, 2 * H, 2 * W), out.shape
    np.testing.assert_allclose(np.asarray(out), np.asarray(ref),
                               rtol=3e-2, atol=3e-2)

    print("KERNEL_OK")
</pallas_src>

<mosaic_0001>
module attributes {stable_mosaic.version = 11 : i64} {
  func.func @_upsample_conv_kernel(%arg0: i32, %arg1: memref<34x64xf32, #tpu.memory_space<vmem>>, %arg2: memref<128x128xf32, #tpu.memory_space<vmem>>, %arg3: memref<128x128xf32, #tpu.memory_space<vmem>>, %arg4: memref<1x256xf32, #tpu.memory_space<vmem>>, %arg5: memref<32x256xf32, #tpu.memory_space<vmem>>) attributes {dimension_semantics = [#tpu.dimension_semantics<parallel>], iteration_bounds = array<i64: 1>, scalar_prefetch = 0 : i64, scratch_operands = 0 : i64, tpu.core_type = #tpu.core_type<tc>, window_params = [{pipeline_mode = #tpu.pipeline_mode<synchronous>, transform_indices = @transform_0, window_bounds = array<i64: 34, 64>}, {pipeline_mode = #tpu.pipeline_mode<synchronous>, transform_indices = @transform_1, window_bounds = array<i64: 128, 128>}, {pipeline_mode = #tpu.pipeline_mode<synchronous>, transform_indices = @transform_2, window_bounds = array<i64: 128, 128>}, {pipeline_mode = #tpu.pipeline_mode<synchronous>, transform_indices = @transform_3, window_bounds = array<i64: 1, 256>}, {transform_indices = @transform_4, window_bounds = array<i64: 32, 256>}]} {
    %c32_i32 = arith.constant 32 : i32
    %0 = arith.muli %arg0, %c32_i32 : i32
    %1 = tpu.assume_multiple %0, 32 : i32
    %2 = arith.index_cast %1 : i32 to index
    %c0 = arith.constant 0 : index
    %3 = vector.load %arg1[%2, %c0] : memref<34x64xf32, #tpu.memory_space<vmem>>, vector<32x64xf32>
    %c1_i32 = arith.constant 1 : i32
    %4 = arith.addi %1, %c1_i32 : i32
    %5 = arith.index_cast %4 : i32 to index
    %c0_0 = arith.constant 0 : index
    %6 = vector.load %arg1[%5, %c0_0] : memref<34x64xf32, #tpu.memory_space<vmem>>, vector<32x64xf32>
    %c2_i32 = arith.constant 2 : i32
    %7 = arith.addi %1, %c2_i32 : i32
    %8 = arith.index_cast %7 : i32 to index
    %c0_1 = arith.constant 0 : index
    %9 = vector.load %arg1[%8, %c0_1] : memref<34x64xf32, #tpu.memory_space<vmem>>, vector<32x64xf32>
    %10 = tpu.iota {dimensions = array<i32: 0>} : vector<32x1xi32>
    %11 = vector.broadcast %1 : i32 to vector<32x1xi32>
    %12 = arith.addi %11, %10 : vector<32x1xi32>
    %c16_i32 = arith.constant 16 : i32
    %c0_i32 = arith.constant 0 : i32
    %13 = arith.cmpi eq, %c16_i32, %c0_i32 : i32
    %c1_i32_2 = arith.constant 1 : i32
    %14 = arith.select %13, %c1_i32_2, %c16_i32 : i32
    %15 = vector.broadcast %14 : i32 to vector<32x1xi32>
    %16 = arith.remsi %12, %15 : vector<32x1xi32>
    %c0_i32_3 = arith.constant 0 : i32
    %17 = vector.broadcast %c0_i32_3 : i32 to vector<32x1xi32>
    %18 = arith.cmpi ne, %16, %17 : vector<32x1xi32>
    %c0_i32_4 = arith.constant 0 : i32
    %19 = vector.broadcast %c0_i32_4 : i32 to vector<32x1xi32>
    %20 = arith.cmpi slt, %16, %19 : vector<32x1xi32>
    %c0_i32_5 = arith.constant 0 : i32
    %21 = arith.cmpi slt, %14, %c0_i32_5 : i32
    %22 = vector.broadcast %21 : i1 to vector<32x1xi1>
    %23 = vector.broadcast %22 : vector<32x1xi1> to vector<32x1xi1>
    %24 = arith.xori %20, %23 : vector<32x1xi1>
    %25 = arith.andi %24, %18 : vector<32x1xi1>
    %26 = vector.broadcast %14 : i32 to vector<32x1xi32>
    %27 = arith.addi %16, %26 : vector<32x1xi32>
    %28 = arith.select %25, %27, %16 : vector<32x1xi1>, vector<32x1xi32>
    %c0_i32_6 = arith.constant 0 : i32
    %29 = vector.broadcast %c0_i32_6 : i32 to vector<32x1xi32>
    %30 = arith.cmpi sgt, %28, %29 : vector<32x1xi32>
    %cst = arith.constant 0.000000e+00 : f32
    %31 = vector.broadcast %cst : f32 to vector<32x64xf32>
    %32 = vector.shape_cast %30 : vector<32x1xi1> to vector<32x1xi1>
    %33 = vector.broadcast %32 : vector<32x1xi1> to vector<32x64xi1>
    %34 = arith.select %33, %3, %31 : vector<32x64xi1>, vector<32x64xf32>
    %c15_i32 = arith.constant 15 : i32
    %35 = vector.broadcast %c15_i32 : i32 to vector<32x1xi32>
    %36 = arith.cmpi slt, %28, %35 : vector<32x1xi32>
    %cst_7 = arith.constant 0.000000e+00 : f32
    %37 = vector.broadcast %cst_7 : f32 to vector<32x64xf32>
    %38 = vector.shape_cast %36 : vector<32x1xi1> to vector<32x1xi1>
    %39 = vector.broadcast %38 : vector<32x1xi1> to vector<32x64xi1>
    %40 = arith.select %39, %9, %37 : vector<32x64xi1>, vector<32x64xf32>
    %41 = tpu.concatenate %34, %6 in 1 : vector<32x64xf32>, vector<32x64xf32> -> vector<32x128xf32>
    %42 = tpu.concatenate %6, %40 in 1 : vector<32x64xf32>, vector<32x64xf32> -> vector<32x128xf32>
    %c0_8 = arith.constant 0 : index
    %c0_9 = arith.constant 0 : index
    %43 = vector.load %arg2[%c0_8, %c0_9] : memref<128x128xf32, #tpu.memory_space<vmem>>, vector<128x128xf32>
    %cst_10 = arith.constant dense<0.000000e+00> : vector<32x128xf32>
    %44 = tpu.matmul %41, %43, %cst_10 {dimension_numbers = #tpu.dot_dimension_numbers<[1], [0], [0], [1], [0, 0, 1, 1], [], []>} : vector<32x128xf32>, vector<128x128xf32>, vector<32x128xf32> -> vector<32x128xf32>
    %c0_11 = arith.constant 0 : index
    %c0_12 = arith.constant 0 : index
    %45 = vector.load %arg3[%c0_11, %c0_12] : memref<128x128xf32, #tpu.memory_space<vmem>>, vector<128x128xf32>
    %cst_13 = arith.constant dense<0.000000e+00> : vector<32x128xf32>
    %46 = tpu.matmul %42, %45, %cst_13 {dimension_numbers = #tpu.dot_dimension_numbers<[1], [0], [0], [1], [0, 0, 1, 1], [], []>} : vector<32x128xf32>, vector<128x128xf32>, vector<32x128xf32> -> vector<32x128xf32>
    %47 = tpu.concatenate %44, %46 in 1 : vector<32x128xf32>, vector<32x128xf32> -> vector<32x256xf32>
    %c0_14 = arith.constant 0 : index
    %c0_15 = arith.constant 0 : index
    %48 = vector.load %arg4[%c0_14, %c0_15] : memref<1x256xf32, #tpu.memory_space<vmem>>, vector<1x256xf32>
    %49 = vector.shape_cast %48 : vector<1x256xf32> to vector<256xf32>
    %50 = vector.shape_cast %49 : vector<256xf32> to vector<1x256xf32>
    %51 = vector.broadcast %50 : vector<1x256xf32> to vector<32x256xf32>
    %52 = arith.addf %47, %51 : vector<32x256xf32>
    %c0_16 = arith.constant 0 : index
    %c0_17 = arith.constant 0 : index
    %53 = vector.load %arg5[%c0_16, %c0_17] : memref<32x256xf32, #tpu.memory_space<vmem>>, vector<32x256xf32>
    tpu.vector_store %arg5[%c0_16, %c0_17], %52 {strides = array<i32>} : memref<32x256xf32, #tpu.memory_space<vmem>>, vector<32x256xf32>,
    return
  }
  func.func @transform_0(%arg0: i32) -> (i32, i32) {
    %c0_i32 = arith.constant 0 : i32
    %c0_i32_0 = arith.constant 0 : i32
    %c0_i32_1 = arith.constant 0 : i32
    return %c0_i32, %c0_i32_0 : i32, i32
  }
  func.func @transform_1(%arg0: i32) -> (i32, i32) {
    %c0_i32 = arith.constant 0 : i32
    %c0_i32_0 = arith.constant 0 : i32
    %c0_i32_1 = arith.constant 0 : i32
    return %c0_i32, %c0_i32_0 : i32, i32
  }
  func.func @transform_2(%arg0: i32) -> (i32, i32) {
    %c0_i32 = arith.constant 0 : i32
    %c0_i32_0 = arith.constant 0 : i32
    %c0_i32_1 = arith.constant 0 : i32
    return %c0_i32, %c0_i32_0 : i32, i32
  }
  func.func @transform_3(%arg0: i32) -> (i32, i32) {
    %c0_i32 = arith.constant 0 : i32
    %c0_i32_0 = arith.constant 0 : i32
    %c0_i32_1 = arith.constant 0 : i32
    return %c0_i32, %c0_i32_0 : i32, i32
  }
  func.func @transform_4(%arg0: i32) -> (i32, i32) {
    %c0_i32 = arith.constant 0 : i32
    %c0_i32_0 = arith.constant 0 : i32
    return %arg0, %c0_i32 : i32, i32
  }
}

</mosaic_0001>

<bundles_post_ra>
// kernel: squeeze.6
= control target key start
LH: loop header
LB: loop body
LE: loop exit
PB: predicated region body
PF: predicated region fallthrough
CT: control target
= control target key end

     0   :  { %vm5_vm0 = vcmask 1041409   ;;  %vm9_vm1 = vcmask 1042434   ;;  %vm13_vm2 = vcmask 1043459   ;;  %vm17_vm3 = vcmask 1044484   ;;  %s11215_s27 = smov 124   ;;  %s11216_s12 = smov 120   ;;  %s20937_s0 = inlined_call_operand.vmem [shape: f32[1,16,4,32,4], index: 0, kind: input, shape index: {}]   ;;  %s20938_s1 = inlined_call_operand.vmem [shape: f32[64,128], index: 1, kind: output, shape index: {}]  }
   0x1   :  { %vm21_vm4 = vcmask 1045509   ;;  %vm25_vm5 = vcmask 1046534   ;;  %vm29_vm6 = vcmask 1047559   ;;  %v9000_v0 = vld [vmem:[%s20937_s0 + $0x11f] sm:$0x1]   ;;  %s11217_s25 = smov 116  }
   0x2   :  { %v9001_v1 = vld [vmem:[%s20937_s0 + $0x13e] sm:$0x2]   ;;  %s11218_s15 = smov 112   ;;  %s11219_s29 = smov 108   ;;  %vm31_vm7 = vcmask 31744   ;;  %vm296_vm8 = vcmask 1048544  }
   0x3   :  { %v9002_v2 = vld [vmem:[%s20937_s0 + $0x15d] sm:$0x4]   ;;  %v338_v4 = vsel %vm5_vm0, %v9001_v1, %v9000_v0  ;;  %s11220_s18 = smov 104   ;;  %s11221_s3 = smov 100   ;;  %vm575_vm9 = vcmask 1015744   ;;  %vm854_vm10 = vcmask 982944  }
   0x4   :  { %v9003_v3 = vld [vmem:[%s20937_s0 + $0x17c] sm:$0x8]   ;;  %v342_v8 = vsel %vm9_vm1, %v9002_v2, %v338_v4  ;;  %s11222_s20 = smov 96   ;;  %s11223_s13 = smov 92   ;;  %vm1133_vm11 = vcmask 950144   ;;  %vm1412_vm12 = vcmask 917344  }
   0x5   :  { %v9004_v5 = vld [vmem:[%s20937_s0 + $0x19b] sm:$0x10]   ;;  %v346_v12 = vsel %vm13_vm2, %v9003_v3, %v342_v8  ;;  %s11225_s17 = smov 84   ;;  %s11226_s22 = smov 80   ;;  %vm1691_vm13 = vcmask 884544   ;;  %vm1970_vm14 = vcmask 851744  }
   0x6   :  { %v9005_v6 = vld [vmem:[%s20937_s0 + $0x1ba] sm:$0x20]   ;;  %v350_v17 = vsel %vm17_vm3, %v9004_v5, %v346_v12  ;;  %s11227_s26 = smov 76   ;;  %vm2249_vm15 = vcmask 818944   ;;  %s11229_s30 = smov 68  }
   0x7   :  { %v9006_v7 = vld [vmem:[%s20937_s0 + $0x1d9] sm:$0x40]   ;;  %v354_v22 = vsel %vm21_vm4, %v9005_v6, %v350_v17  ;;  %s11230_s6 = smov 64   ;;  %s11231_s5 = smov 60  }
   0x8   :  { %v9007_v9 = vld [vmem:[%s20937_s0 + $0x1f8] sm:$0x80]   ;;  %v358_v27 = vsel %vm25_vm5, %v9006_v7, %v354_v22  ;;  %s11232_s10 = smov 56   ;;  %s11233_s16 = smov 52  }
   0x9   :  { %v8983_v10 = vld [vmem:[%s20937_s0 + $0x1f] sm:$0x1]   ;;  %v362_v33 = vsel %vm29_vm6, %v9007_v9, %v358_v27  ;;  %s11236_s24 = smov 40   ;;  %s11239_s4 = smov 28  }
   0xa   :  { %v8984_v11 = vld [vmem:[%s20937_s0 + $0x3e] sm:$0x2]   ;;  %363 = vrot.lane.b32.xlu1 %v362_v33, %s11215_s27  ;;  %s11241_s8 = smov 20   ;;  %s11244_s19 = smov 8  }
   0xb   :  { %v269_v13 = vsel %vm5_vm0, %v8984_v11, %v8983_v10  ;;  %v8985_v14 = vld [vmem:[%s20937_s0 + $0x5d] sm:$0x4]  }
   0xc   :  { %v8986_v15 = vld [vmem:[%s20937_s0 + $0x7c] sm:$0x8]   ;;  %v273_v18 = vsel %vm9_vm1, %v8985_v14, %v269_v13 }
   0xd   :  { %v8987_v16 = vld [vmem:[%s20937_s0 + $0x9b] sm:$0x10]   ;;  %v277_v23 = vsel %vm13_vm2, %v8986_v15, %v273_v18 }
   0xe   :  { %v8988_v19 = vld [vmem:[%s20937_s0 + $0xba] sm:$0x20]   ;;  %v281_v28 = vsel %vm17_vm3, %v8987_v16, %v277_v23 }
   0xf   :  { %v8989_v20 = vld [vmem:[%s20937_s0 + $0xd9] sm:$0x40]   ;;  %v285_v34 = vsel %vm21_vm4, %v8988_v19, %v281_v28 }
  0x10   :  { %v8990_v21 = vld [vmem:[%s20937_s0 + $0xf8] sm:$0x80]   ;;  %v289_v39 = vsel %vm25_vm5, %v8989_v20, %v285_v34 }
  0x11   :  { %v9009_v24 = vld [vmem:[%s20937_s0 + $0x51f] sm:$0x1]   ;;  %v293_v44 = vsel %vm29_vm6, %v8990_v21, %v289_v39 }
  0x12   :  { %v9010_v25 = vld [vmem:[%s20937_s0 + $0x53e] sm:$0x2]   ;;  %294 = vrot.lane.b32.xlu0 %v293_v44, %s11215_s27 }
  0x13   :  { %v9011_v26 = vld [vmem:[%s20937_s0 + $0x55d] sm:$0x4]   ;;  %v373_v29 = vsel %vm5_vm0, %v9010_v25, %v9009_v24 }
  0x14   :  { %v9012_v30 = vld [vmem:[%s20937_s0 + $0x57c] sm:$0x8]   ;;  %v377_v35 = vsel %vm9_vm1, %v9011_v26, %v373_v29 }
  0x15   :  { %v9013_v31 = vld [vmem:[%s20937_s0 + $0x59b] sm:$0x10]   ;;  %v381_v40 = vsel %vm13_vm2, %v9012_v30, %v377_v35 }
  0x16   :  { %v9014_v32 = vld [vmem:[%s20937_s0 + $0x5ba] sm:$0x20]   ;;  %v385_v45 = vsel %vm17_vm3, %v9013_v31, %v381_v40 }
  0x17   :  { %v9015_v36 = vld [vmem:[%s20937_s0 + $0x5d9] sm:$0x40]   ;;  %v389_v50 = vsel %vm21_vm4, %v9014_v32, %v385_v45 }
  0x18   :  { %v9016_v37 = vld [vmem:[%s20937_s0 + $0x5f8] sm:$0x80]   ;;  %v393_v55 = vsel %vm25_vm5, %v9015_v36, %v389_v50  ;;  %v9062_v50 = vld [vmem:[%s20937_s0 + $0x41e] sm:$0x1]  }
  0x19   :  { %v8991_v38 = vld [vmem:[%s20937_s0 + $0x41f] sm:$0x1]   ;;  %v397_v61 = vsel %vm29_vm6, %v9016_v37, %v393_v55 }
  0x1a   :  { %v8992_v41 = vld [vmem:[%s20937_s0 + $0x43e] sm:$0x2]   ;;  %398 = vrot.lane.b32.xlu1 %v397_v61, %s11215_s27 }
  0x1b   :  { %v8993_v42 = vld [vmem:[%s20937_s0 + $0x45d] sm:$0x4]   ;;  %v303_v46 = vsel %vm5_vm0, %v8992_v41, %v8991_v38 }
  0x1c   :  { %v8994_v43 = vld [vmem:[%s20937_s0 + $0x47c] sm:$0x8]   ;;  %v307_v51 = vsel %vm9_vm1, %v8993_v42, %v303_v46 }
  0x1d   :  { %v8995_v47 = vld [vmem:[%s20937_s0 + $0x49b] sm:$0x10]   ;;  %v311_v56 = vsel %vm13_vm2, %v8994_v43, %v307_v51  ;;  %v9063_v51 = vld [vmem:[%s20937_s0 + $0x43d] sm:$0x2]  }
  0x1e   :  { %v8996_v48 = vld [vmem:[%s20937_s0 + $0x4ba] sm:$0x20]   ;;  %v315_v62 = vsel %vm17_vm3, %v8995_v47, %v311_v56  ;;  %v582_v55 = vsel %vm5_vm0, %v9063_v51, %v9062_v50  ;;  %v9065_v56 = vld [vmem:[%s20937_s0 + $0x47b] sm:$0x8]  }
  0x1f   :  { %v8997_v49 = vld [vmem:[%s20937_s0 + $0x4d9] sm:$0x40]   ;;  %v319_v3 = vsel %vm21_vm4, %v8996_v48, %v315_v62  ;;  %v9068_v62 = vld [vmem:[%s20937_s0 + $0x4d8] sm:$0x40]  }
  0x20   :  { %v8998_v52 = vld [vmem:[%s20937_s0 + $0x4f8] sm:$0x80]   ;;  %v323_v8 = vsel %vm25_vm5, %v8997_v49, %v319_v3  ;;  %v9055_v3 = vld [vmem:[%s20937_s0 + $0x3d] sm:$0x2]  }
  0x21   :  { %v9027_v53 = vld [vmem:[%s20937_s0 + $0x61f] sm:$0x1]   ;;  %v327_v14 = vsel %vm29_vm6, %v8998_v52, %v323_v8  ;;  %v9064_v52 = vld [vmem:[%s20937_s0 + $0x45c] sm:$0x4]  }
  0x22   :  { %v9028_v54 = vld [vmem:[%s20937_s0 + $0x63e] sm:$0x2]   ;;  %328 = vrot.lane.b32.xlu0 %v327_v14, %s11215_s27  ;;  %v586_v61 = vsel %vm9_vm1, %v9064_v52, %v582_v55  ;;  %v9061_v14 = vld [vmem:[%s20937_s0 + $0xf7] sm:$0x80]  }
  0x23   :  { %v443_v57 = vsel %vm5_vm0, %v9028_v54, %v9027_v53  ;;  %v9029_v58 = vld [vmem:[%s20937_s0 + $0x65d] sm:$0x4]   ;;  %v9101_v50 = vld [vmem:[%s20937_s0 + $0x67b] sm:$0x8]  }
  0x24   :  { %v9030_v59 = vld [vmem:[%s20937_s0 + $0x67c] sm:$0x8]   ;;  %v447_v63 = vsel %vm9_vm1, %v9029_v58, %v443_v57  ;;  %v9066_v57 = vld [vmem:[%s20937_s0 + $0x49a] sm:$0x10]  }
  0x25   :  { %v9031_v60 = vld [vmem:[%s20937_s0 + $0x69b] sm:$0x10]   ;;  %v451_v4 = vsel %vm13_vm2, %v9030_v59, %v447_v63  ;;  %v9067_v58 = vld [vmem:[%s20937_s0 + $0x4b9] sm:$0x20]  }
  0x26   :  { %v9032_v0 = vld [vmem:[%s20937_s0 + $0x6ba] sm:$0x20]   ;;  %v455_v9 = vsel %vm17_vm3, %v9031_v60, %v451_v4  ;;  %v9069_v63 = vld [vmem:[%s20937_s0 + $0x4f7] sm:$0x80]  }
  0x27   :  { %v9033_v1 = vld [vmem:[%s20937_s0 + $0x6d9] sm:$0x40]   ;;  %v459_v15 = vsel %vm21_vm4, %v9032_v0, %v455_v9  ;;  %v9054_v0 = vld [vmem:[%s20937_s0 + $0x1e] sm:$0x1]  }
  0x28   :  { %v9034_v2 = vld [vmem:[%s20937_s0 + $0x6f8] sm:$0x80]   ;;  %v463_v20 = vsel %vm25_vm5, %v9033_v1, %v459_v15  ;;  %v9056_v4 = vld [vmem:[%s20937_s0 + $0x5c] sm:$0x4]   ;;  %v548_v8 = vsel %vm5_vm0, %v9055_v3, %v9054_v0 }
  0x29   :  { %v9018_v5 = vld [vmem:[%s20937_s0 + $0x21f] sm:$0x1]   ;;  %v467_v25 = vsel %vm29_vm6, %v9034_v2, %v463_v20  ;;  %v590_v2 = vsel %vm13_vm2, %v9065_v56, %v586_v61  ;;  %v9058_v9 = vld [vmem:[%s20937_s0 + $0x9a] sm:$0x10]  }
  0x2a   :  { %v9019_v6 = vld [vmem:[%s20937_s0 + $0x23e] sm:$0x2]   ;;  %468 = vrot.lane.b32.xlu1 %v467_v25, %s11215_s27  ;;  %v9080_v15 = vld [vmem:[%s20937_s0 + $0x51e] sm:$0x1]  }
  0x2b   :  { %v9020_v7 = vld [vmem:[%s20937_s0 + $0x25d] sm:$0x4]   ;;  %v408_v10 = vsel %vm5_vm0, %v9019_v6, %v9018_v5  ;;  %v9057_v5 = vld [vmem:[%s20937_s0 + $0x7b] sm:$0x8]  }
  0x2c   :  { %v9021_v11 = vld [vmem:[%s20937_s0 + $0x27c] sm:$0x8]   ;;  %v412_v16 = vsel %vm9_vm1, %v9020_v7, %v408_v10  ;;  %v594_v7 = vsel %vm17_vm3, %v9066_v57, %v590_v2  ;;  %v9059_v10 = vld [vmem:[%s20937_s0 + $0xb9] sm:$0x20]  }
  0x2d   :  { %v9022_v12 = vld [vmem:[%s20937_s0 + $0x29b] sm:$0x10]   ;;  %v416_v21 = vsel %vm13_vm2, %v9021_v11, %v412_v16  ;;  %v9060_v11 = vld [vmem:[%s20937_s0 + $0xd8] sm:$0x40]  }
  0x2e   :  { %v9023_v13 = vld [vmem:[%s20937_s0 + $0x2ba] sm:$0x20]   ;;  %v420_v26 = vsel %vm17_vm3, %v9022_v12, %v416_v21  ;;  %v598_v12 = vsel %vm21_vm4, %v9067_v58, %v594_v7  ;;  %v9081_v16 = vld [vmem:[%s20937_s0 + $0x53d] sm:$0x2]  }
  0x2f   :  { %v9024_v17 = vld [vmem:[%s20937_s0 + $0x2d9] sm:$0x40]   ;;  %v424_v31 = vsel %vm21_vm4, %v9023_v13, %v420_v26  ;;  %v552_v13 = vsel %vm9_vm1, %v9056_v4, %v548_v8  ;;  %v9082_v20 = vld [vmem:[%s20937_s0 + $0x55c] sm:$0x4]  }
  0x30   :  { %v9025_v18 = vld [vmem:[%s20937_s0 + $0x2f8] sm:$0x80]   ;;  %v428_v36 = vsel %vm25_vm5, %v9024_v17, %v424_v31  ;;  %v602_v17 = vsel %vm25_vm5, %v9068_v62, %v598_v12  ;;  %v9083_v21 = vld [vmem:[%s20937_s0 + $0x57b] sm:$0x8]  }
  0x31   :  { %v9045_v19 = vld [vmem:[%s20937_s0 + $0x71f] sm:$0x1]   ;;  %v432_v42 = vsel %vm29_vm6, %v9025_v18, %v428_v36  ;;  %v556_v18 = vsel %vm13_vm2, %v9057_v5, %v552_v13  ;;  %v9085_v26 = vld [vmem:[%s20937_s0 + $0x5b9] sm:$0x20]  }
  0x32   :  { %v9046_v22 = vld [vmem:[%s20937_s0 + $0x73e] sm:$0x2]   ;;  %433 = vrot.lane.b32.xlu0 %v432_v42, %s11215_s27  ;;  %v9071_v31 = vld [vmem:[%s20937_s0 + $0x11e] sm:$0x1]  }
  0x33   :  { %v9047_v23 = vld [vmem:[%s20937_s0 + $0x75d] sm:$0x4]   ;;  %v513_v27 = vsel %vm5_vm0, %v9046_v22, %v9045_v19  ;;  %v652_v19 = vsel %vm5_vm0, %v9081_v16, %v9080_v15  ;;  %v9084_v22 = vld [vmem:[%s20937_s0 + $0x59a] sm:$0x10]  }
  0x34   :  { %v9048_v24 = vld [vmem:[%s20937_s0 + $0x77c] sm:$0x8]   ;;  %v517_v32 = vsel %vm9_vm1, %v9047_v23, %v513_v27  ;;  %v606_v23 = vsel %vm29_vm6, %v9069_v63, %v602_v17  ;;  %v656_v25 = vsel %vm9_vm1, %v9082_v20, %v652_v19  ;;  %v9086_v27 = vld [vmem:[%s20937_s0 + $0x5d8] sm:$0x40]  }
  0x35   :  { %v9049_v28 = vld [vmem:[%s20937_s0 + $0x79b] sm:$0x10]   ;;  %v521_v37 = vsel %vm13_vm2, %v9048_v24, %v517_v32  ;;  %v560_v24 = vsel %vm17_vm3, %v9058_v9, %v556_v18  ;;  %v9072_v32 = vld [vmem:[%s20937_s0 + $0x13d] sm:$0x2]  }
  0x36   :  { %v9050_v29 = vld [vmem:[%s20937_s0 + $0x7ba] sm:$0x20]   ;;  %v525_v43 = vsel %vm17_vm3, %v9049_v28, %v521_v37  ;;  %v9087_v28 = vld [vmem:[%s20937_s0 + $0x5f7] sm:$0x80]   ;;  %v617_v36 = vsel %vm5_vm0, %v9072_v32, %v9071_v31 }
  0x37   :  { %v9051_v30 = vld [vmem:[%s20937_s0 + $0x7d9] sm:$0x40]   ;;  %v529_v48 = vsel %vm21_vm4, %v9050_v29, %v525_v43  ;;  %v564_v29 = vsel %vm21_vm4, %v9059_v10, %v560_v24  ;;  %v9074_v37 = vld [vmem:[%s20937_s0 + $0x17b] sm:$0x8]  }
  0x38   :  { %v9052_v33 = vld [vmem:[%s20937_s0 + $0x7f8] sm:$0x80]   ;;  %v533_v53 = vsel %vm25_vm5, %v9051_v30, %v529_v48  ;;  %v660_v30 = vsel %vm13_vm2, %v9083_v21, %v656_v25  ;;  %v9077_v43 = vld [vmem:[%s20937_s0 + $0x1d8] sm:$0x40]  }
  0x39   :  { %v9036_v34 = vld [vmem:[%s20937_s0 + $0x31f] sm:$0x1]   ;;  %v537_v59 = vsel %vm29_vm6, %v9052_v33, %v533_v53  ;;  %v9073_v33 = vld [vmem:[%s20937_s0 + $0x15c] sm:$0x4]  }
  0x3a   :  { %v9037_v35 = vld [vmem:[%s20937_s0 + $0x33e] sm:$0x2]   ;;  %538 = vrot.lane.b32.xlu1 %v537_v59, %s11215_s27  ;;  %v621_v42 = vsel %vm9_vm1, %v9073_v33, %v617_v36  ;;  %v9099_v48 = vld [vmem:[%s20937_s0 + $0x63d] sm:$0x2]  }
  0x3b   :  { %v478_v38 = vsel %vm5_vm0, %v9037_v35, %v9036_v34  ;;  %v9038_v39 = vld [vmem:[%s20937_s0 + $0x35d] sm:$0x4]   ;;  %v568_v34 = vsel %vm25_vm5, %v9060_v11, %v564_v29  ;;  %v664_v35 = vsel %vm17_vm3, %v9084_v22, %v660_v30  ;;  %v9103_v55 = vld [vmem:[%s20937_s0 + $0x6b9] sm:$0x20]  }
  0x3c   :  { %v9039_v40 = vld [vmem:[%s20937_s0 + $0x37c] sm:$0x8]   ;;  %v482_v44 = vsel %vm9_vm1, %v9038_v39, %v478_v38  ;;  %v9075_v38 = vld [vmem:[%s20937_s0 + $0x19a] sm:$0x10]  }
  0x3d   :  { %v9040_v41 = vld [vmem:[%s20937_s0 + $0x39b] sm:$0x10]   ;;  %v486_v49 = vsel %vm13_vm2, %v9039_v40, %v482_v44  ;;  %v9076_v39 = vld [vmem:[%s20937_s0 + $0x1b9] sm:$0x20]   ;;  %v572_v40 = vsel %vm29_vm6, %v9061_v14, %v568_v34 }
  0x3e   :  { %v9041_v45 = vld [vmem:[%s20937_s0 + $0x3ba] sm:$0x20]   ;;  %v490_v54 = vsel %vm17_vm3, %v9040_v41, %v486_v49  ;;  %607 = vrot.lane.b32.xlu1 %v606_v23, %s11216_s12  ;;  %v668_v41 = vsel %vm21_vm4, %v9085_v26, %v664_v35  ;;  %v9078_v44 = vld [vmem:[%s20937_s0 + $0x1f7] sm:$0x80]  }
  0x3f   :  { %v9042_v46 = vld [vmem:[%s20937_s0 + $0x3d9] sm:$0x40]   ;;  %v494_v60 = vsel %vm21_vm4, %v9041_v45, %v490_v54  ;;  %v9098_v45 = vld [vmem:[%s20937_s0 + $0x61e] sm:$0x1]  }
  0x40   :  { %v9043_v47 = vld [vmem:[%s20937_s0 + $0x3f8] sm:$0x80]   ;;  %v498_v1 = vsel %vm25_vm5, %v9042_v46, %v494_v60  ;;  %v672_v46 = vsel %vm25_vm5, %v9086_v27, %v668_v41  ;;  %v9100_v49 = vld [vmem:[%s20937_s0 + $0x65c] sm:$0x4]   ;;  %v722_v53 = vsel %vm5_vm0, %v9099_v48, %v9098_v45  ;;  %v9133_v41 = vld [vmem:[%s20937_s0 + $0x41d] sm:$0x1]  }
  0x41   :  { %v502_v6 = vsel %vm29_vm6, %v9043_v47, %v498_v1  ;;  %v625_v47 = vsel %vm13_vm2, %v9074_v37, %v621_v42  ;;  %v676_v51 = vsel %vm29_vm6, %v9087_v28, %v672_v46  ;;  %v9102_v54 = vld [vmem:[%s20937_s0 + $0x69a] sm:$0x10]   ;;  %v726_v58 = vsel %vm9_vm1, %v9100_v49, %v722_v53  ;;  %v9134_v42 = vld [vmem:[%s20937_s0 + $0x43c] sm:$0x2]  }
  0x42   :  { %503 = vrot.lane.b32.xlu0 %v502_v6, %s11215_s27  ;;  %v629_v52 = vsel %vm17_vm3, %v9075_v38, %v625_v47  ;;  %v9104_v56 = vld [vmem:[%s20937_s0 + $0x6d8] sm:$0x40]   ;;  %677 = vrot.lane.b32.xlu1 %v676_v51, %s11216_s12  ;;  %v730_v63 = vsel %vm13_vm2, %v9101_v50, %v726_v58  ;;  %v861_v45 = vsel %vm5_vm0, %v9134_v42, %v9133_v41  ;;  %v9135_v46 = vld [vmem:[%s20937_s0 + $0x45b] sm:$0x4]  }
  0x43   :  { %v633_v57 = vsel %vm21_vm4, %v9076_v39, %v629_v52  ;;  %v9105_v59 = vld [vmem:[%s20937_s0 + $0x6f7] sm:$0x80]   ;;  %v734_v5 = vsel %vm17_vm3, %v9102_v54, %v730_v63  ;;  %v9136_v47 = vld [vmem:[%s20937_s0 + $0x47a] sm:$0x8]   ;;  %v865_v51 = vsel %vm9_vm1, %v9135_v46, %v861_v45 }
  0x44   :  { %v9089_v60 = vld [vmem:[%s20937_s0 + $0x21e] sm:$0x1]   ;;  %v637_v62 = vsel %vm25_vm5, %v9077_v43, %v633_v57  ;;  %v738_v10 = vsel %vm21_vm4, %v9103_v55, %v734_v5  ;;  %v9137_v48 = vld [vmem:[%s20937_s0 + $0x499] sm:$0x10]  }
  0x45   :  { %v9090_v61 = vld [vmem:[%s20937_s0 + $0x23d] sm:$0x2]   ;;  %v641_v4 = vsel %vm29_vm6, %v9078_v44, %v637_v62  ;;  %v742_v15 = vsel %vm25_vm5, %v9104_v56, %v738_v10  ;;  %v9138_v52 = vld [vmem:[%s20937_s0 + $0x4b8] sm:$0x20]   ;;  %v869_v56 = vsel %vm13_vm2, %v9136_v47, %v865_v51 }
  0x46   :  { %573 = vrot.lane.b32.xlu0 %v572_v40, %s11216_s12  ;;  %v687_v0 = vsel %vm5_vm0, %v9090_v61, %v9089_v60  ;;  %v9091_v1 = vld [vmem:[%s20937_s0 + $0x25c] sm:$0x4]   ;;  %v746_v21 = vsel %vm29_vm6, %v9105_v59, %v742_v15  ;;  %v9139_v53 = vld [vmem:[%s20937_s0 + $0x4d7] sm:$0x40]   ;;  %v873_v61 = vsel %vm17_vm3, %v9137_v48, %v869_v56 }
  0x47   :  { %v9092_v2 = vld [vmem:[%s20937_s0 + $0x27b] sm:$0x8]   ;;  %v691_v6 = vsel %vm9_vm1, %v9091_v1, %v687_v0  ;;  %747 = vrot.lane.b32.xlu1 %v746_v21, %s11216_s12  ;;  %v9140_v54 = vld [vmem:[%s20937_s0 + $0x4f6] sm:$0x80]  }
  0x48   :  { %v9093_v3 = vld [vmem:[%s20937_s0 + $0x29a] sm:$0x10]   ;;  %v695_v11 = vsel %vm13_vm2, %v9092_v2, %v691_v6  ;;  %v9125_v57 = vld [vmem:[%s20937_s0 + $0x1d] sm:$0x1]  }
  0x49   :  { %v9094_v7 = vld [vmem:[%s20937_s0 + $0x2b9] sm:$0x20]   ;;  %v699_v16 = vsel %vm17_vm3, %v9093_v3, %v695_v11  ;;  %v9126_v58 = vld [vmem:[%s20937_s0 + $0x3c] sm:$0x2]   ;;  %v877_v3 = vsel %vm21_vm4, %v9138_v52, %v873_v61 }
  0x4a   :  { %v9095_v8 = vld [vmem:[%s20937_s0 + $0x2d8] sm:$0x40]   ;;  %642 = vrot.lane.b32.xlu0 %v641_v4, %s11216_s12  ;;  %v703_v22 = vsel %vm21_vm4, %v9094_v7, %v699_v16  ;;  %v9127_v59 = vld [vmem:[%s20937_s0 + $0x5b] sm:$0x4]   ;;  %v827_v62 = vsel %vm5_vm0, %v9126_v58, %v9125_v57 }
  0x4b   :  { %v9096_v9 = vld [vmem:[%s20937_s0 + $0x2f7] sm:$0x80]   ;;  %v707_v27 = vsel %vm25_vm5, %v9095_v8, %v703_v22  ;;  %v9128_v63 = vld [vmem:[%s20937_s0 + $0x7a] sm:$0x8]   ;;  %v831_v4 = vsel %vm9_vm1, %v9127_v59, %v827_v62  ;;  %v881_v8 = vsel %vm25_vm5, %v9139_v53, %v877_v3 }
  0x4c   :  { %v9116_v12 = vld [vmem:[%s20937_s0 + $0x71e] sm:$0x1]   ;;  %v711_v32 = vsel %vm29_vm6, %v9096_v9, %v707_v27  ;;  %v9129_v0 = vld [vmem:[%s20937_s0 + $0x99] sm:$0x10]   ;;  %v835_v9 = vsel %vm13_vm2, %v9128_v63, %v831_v4 }
  0x4d   :  { %v9117_v13 = vld [vmem:[%s20937_s0 + $0x73d] sm:$0x2]   ;;  %v9130_v1 = vld [vmem:[%s20937_s0 + $0xb8] sm:$0x20]  }
  0x4e   :  { %v9118_v14 = vld [vmem:[%s20937_s0 + $0x75c] sm:$0x4]   ;;  %v792_v17 = vsel %vm5_vm0, %v9117_v13, %v9116_v12  ;;  %712 = vrot.lane.b32.xlu0 %v711_v32, %s11216_s12  ;;  %v9131_v5 = vld [vmem:[%s20937_s0 + $0xd7] sm:$0x40]   ;;  %v885_v13 = vsel %vm29_vm6, %v9140_v54, %v881_v8 }
  0x4f   :  { %v9119_v18 = vld [vmem:[%s20937_s0 + $0x77b] sm:$0x8]   ;;  %v796_v23 = vsel %vm9_vm1, %v9118_v14, %v792_v17  ;;  %v9132_v6 = vld [vmem:[%s20937_s0 + $0xf6] sm:$0x80]   ;;  %v839_v14 = vsel %vm17_vm3, %v9129_v0, %v835_v9 }
  0x50   :  { %v9120_v19 = vld [vmem:[%s20937_s0 + $0x79a] sm:$0x10]   ;;  %v800_v28 = vsel %vm13_vm2, %v9119_v18, %v796_v23  ;;  %v9151_v7 = vld [vmem:[%s20937_s0 + $0x51d] sm:$0x1]  }
  0x51   :  { %v9121_v20 = vld [vmem:[%s20937_s0 + $0x7b9] sm:$0x20]   ;;  %v804_v33 = vsel %vm17_vm3, %v9120_v19, %v800_v28  ;;  %v9152_v10 = vld [vmem:[%s20937_s0 + $0x53c] sm:$0x2]   ;;  %v843_v19 = vsel %vm21_vm4, %v9130_v1, %v839_v14 }
  0x52   :  { %v9122_v24 = vld [vmem:[%s20937_s0 + $0x7d8] sm:$0x40]   ;;  %v808_v38 = vsel %vm21_vm4, %v9121_v20, %v804_v33  ;;  %v9153_v11 = vld [vmem:[%s20937_s0 + $0x55b] sm:$0x4]   ;;  %v931_v15 = vsel %vm5_vm0, %v9152_v10, %v9151_v7 }
  0x53   :  { %v9123_v25 = vld [vmem:[%s20937_s0 + $0x7f7] sm:$0x80]   ;;  %v812_v43 = vsel %vm25_vm5, %v9122_v24, %v808_v38  ;;  %v9154_v12 = vld [vmem:[%s20937_s0 + $0x57a] sm:$0x8]   ;;  %v935_v20 = vsel %vm9_vm1, %v9153_v11, %v931_v15  ;;  %v847_v24 = vsel %vm25_vm5, %v9131_v5, %v843_v19 }
  0x54   :  { %v9107_v26 = vld [vmem:[%s20937_s0 + $0x31e] sm:$0x1]   ;;  %v816_v49 = vsel %vm29_vm6, %v9123_v25, %v812_v43  ;;  %v9155_v16 = vld [vmem:[%s20937_s0 + $0x599] sm:$0x10]   ;;  %v939_v25 = vsel %vm13_vm2, %v9154_v12, %v935_v20 }
  0x55   :  { %v9108_v29 = vld [vmem:[%s20937_s0 + $0x33d] sm:$0x2]   ;;  %817 = vrot.lane.b32.xlu1 %v816_v49, %s11216_s12  ;;  %v9156_v17 = vld [vmem:[%s20937_s0 + $0x5b8] sm:$0x20]  }
  0x56   :  { %v9109_v30 = vld [vmem:[%s20937_s0 + $0x35c] sm:$0x4]   ;;  %v757_v34 = vsel %vm5_vm0, %v9108_v29, %v9107_v26  ;;  %v9157_v18 = vld [vmem:[%s20937_s0 + $0x5d7] sm:$0x40]  }
  0x57   :  { %v9110_v31 = vld [vmem:[%s20937_s0 + $0x37b] sm:$0x8]   ;;  %v761_v39 = vsel %vm9_vm1, %v9109_v30, %v757_v34  ;;  %v9158_v21 = vld [vmem:[%s20937_s0 + $0x5f6] sm:$0x80]   ;;  %v851_v30 = vsel %vm29_vm6, %v9132_v6, %v847_v24 }
  0x58   :  { %v9111_v35 = vld [vmem:[%s20937_s0 + $0x39a] sm:$0x10]   ;;  %v765_v44 = vsel %vm13_vm2, %v9110_v31, %v761_v39  ;;  %v9142_v22 = vld [vmem:[%s20937_s0 + $0x11d] sm:$0x1]   ;;  %v943_v31 = vsel %vm17_vm3, %v9155_v16, %v939_v25 }
  0x59   :  { %v9112_v36 = vld [vmem:[%s20937_s0 + $0x3b9] sm:$0x20]   ;;  %v769_v50 = vsel %vm17_vm3, %v9111_v35, %v765_v44  ;;  %886 = vrot.lane.b32.xlu1 %v885_v13, %s11217_s25  ;;  %v9143_v23 = vld [vmem:[%s20937_s0 + $0x13c] sm:$0x2]  }
  0x5a   :  { %v9113_v37 = vld [vmem:[%s20937_s0 + $0x3d8] sm:$0x40]   ;;  %v773_v55 = vsel %vm21_vm4, %v9112_v36, %v769_v50  ;;  %v896_v26 = vsel %vm5_vm0, %v9143_v23, %v9142_v22  ;;  %v9144_v27 = vld [vmem:[%s20937_s0 + $0x15b] sm:$0x4]   ;;  %v947_v36 = vsel %vm21_vm4, %v9156_v17, %v943_v31 }
  0x5b   :  { %v9114_v40 = vld [vmem:[%s20937_s0 + $0x3f7] sm:$0x80]   ;;  %v777_v60 = vsel %vm25_vm5, %v9113_v37, %v773_v55  ;;  %v9145_v28 = vld [vmem:[%s20937_s0 + $0x17a] sm:$0x8]   ;;  %v900_v32 = vsel %vm9_vm1, %v9144_v27, %v896_v26  ;;  %v951_v41 = vsel %vm25_vm5, %v9157_v18, %v947_v36  ;;  %v9205_v36 = vld [vmem:[%s20937_s0 + $0x43b] sm:$0x2]  }
  0x5c   :  { %v781_v2 = vsel %vm29_vm6, %v9114_v40, %v777_v60  ;;  %v9146_v29 = vld [vmem:[%s20937_s0 + $0x199] sm:$0x10]   ;;  %v904_v37 = vsel %vm13_vm2, %v9145_v28, %v900_v32  ;;  %v955_v47 = vsel %vm29_vm6, %v9158_v21, %v951_v41  ;;  %v9207_v41 = vld [vmem:[%s20937_s0 + $0x479] sm:$0x8]  }
  0x5d   :  { %782 = vrot.lane.b32.xlu0 %v781_v2, %s11216_s12  ;;  %v9147_v33 = vld [vmem:[%s20937_s0 + $0x1b8] sm:$0x20]   ;;  %v908_v42 = vsel %vm17_vm3, %v9146_v29, %v904_v37  ;;  %956 = vrot.lane.b32.xlu1 %v955_v47, %s11217_s25  ;;  %v9206_v37 = vld [vmem:[%s20937_s0 + $0x45a] sm:$0x4]   ;;  %s11242_s12 = smov 16  }
  0x5e   :  { %v9148_v34 = vld [vmem:[%s20937_s0 + $0x1d7] sm:$0x40]   ;;  %v912_v48 = vsel %vm21_vm4, %v9147_v33, %v908_v42  ;;  %v9208_v42 = vld [vmem:[%s20937_s0 + $0x498] sm:$0x10]  }
  0x5f   :  { %v9149_v35 = vld [vmem:[%s20937_s0 + $0x1f6] sm:$0x80]   ;;  %v916_v53 = vsel %vm25_vm5, %v9148_v34, %v912_v48  ;;  %v9211_v47 = vld [vmem:[%s20937_s0 + $0x4f5] sm:$0x80]  }
  0x60   :  { %v9169_v38 = vld [vmem:[%s20937_s0 + $0x61d] sm:$0x1]   ;;  %v920_v58 = vsel %vm29_vm6, %v9149_v35, %v916_v53  ;;  %v9204_v35 = vld [vmem:[%s20937_s0 + $0x41c] sm:$0x1]  }
  0x61   :  { %852 = vrot.lane.b32.xlu0 %v851_v30, %s11217_s25  ;;  %v9170_v39 = vld [vmem:[%s20937_s0 + $0x63c] sm:$0x2]   ;;  %v9196_v48 = vld [vmem:[%s20937_s0 + $0x1c] sm:$0x1]  }
  0x62   :  { %v9171_v40 = vld [vmem:[%s20937_s0 + $0x65b] sm:$0x4]   ;;  %v1001_v43 = vsel %vm5_vm0, %v9170_v39, %v9169_v38  ;;  %v9199_v53 = vld [vmem:[%s20937_s0 + $0x79] sm:$0x8]  }
  0x63   :  { %v9172_v44 = vld [vmem:[%s20937_s0 + $0x67a] sm:$0x8]   ;;  %v1005_v49 = vsel %vm9_vm1, %v9171_v40, %v1001_v43  ;;  %v1140_v40 = vsel %vm5_vm0, %v9205_v36, %v9204_v35  ;;  %v9209_v43 = vld [vmem:[%s20937_s0 + $0x4b7] sm:$0x20]  }
  0x64   :  { %v9173_v45 = vld [vmem:[%s20937_s0 + $0x699] sm:$0x10]   ;;  %v1009_v54 = vsel %vm13_vm2, %v9172_v44, %v1005_v49 }
  0x65   :  { %v9174_v46 = vld [vmem:[%s20937_s0 + $0x6b8] sm:$0x20]   ;;  %v1013_v59 = vsel %vm17_vm3, %v9173_v45, %v1009_v54  ;;  %921 = vrot.lane.b32.xlu0 %v920_v58, %s11217_s25  ;;  %v1144_v45 = vsel %vm9_vm1, %v9206_v37, %v1140_v40  ;;  %v9201_v58 = vld [vmem:[%s20937_s0 + $0xb7] sm:$0x20]  }
  0x66   :  { %v9175_v50 = vld [vmem:[%s20937_s0 + $0x6d7] sm:$0x40]   ;;  %v1017_v0 = vsel %vm21_vm4, %v9174_v46, %v1013_v59  ;;  %v9210_v46 = vld [vmem:[%s20937_s0 + $0x4d6] sm:$0x40]  }
  0x67   :  { %v9176_v51 = vld [vmem:[%s20937_s0 + $0x6f6] sm:$0x80]   ;;  %v1021_v5 = vsel %vm25_vm5, %v9175_v50, %v1017_v0  ;;  %v1148_v50 = vsel %vm13_vm2, %v9207_v41, %v1144_v45  ;;  %v9202_v59 = vld [vmem:[%s20937_s0 + $0xd6] sm:$0x40]  }
  0x68   :  { %v9160_v52 = vld [vmem:[%s20937_s0 + $0x21d] sm:$0x1]   ;;  %v1025_v11 = vsel %vm29_vm6, %v9176_v51, %v1021_v5  ;;  %v9197_v51 = vld [vmem:[%s20937_s0 + $0x3b] sm:$0x2]  }
  0x69   :  { %v9161_v55 = vld [vmem:[%s20937_s0 + $0x23c] sm:$0x2]   ;;  %1026 = vrot.lane.b32.xlu1 %v1025_v11, %s11217_s25  ;;  %v9223_v0 = vld [vmem:[%s20937_s0 + $0x53b] sm:$0x2]  }
  0x6a   :  { %v9162_v56 = vld [vmem:[%s20937_s0 + $0x25b] sm:$0x4]   ;;  %v966_v60 = vsel %vm5_vm0, %v9161_v55, %v9160_v52  ;;  %v9198_v52 = vld [vmem:[%s20937_s0 + $0x5a] sm:$0x4]   ;;  %v1152_v55 = vsel %vm17_vm3, %v9208_v42, %v1148_v50 }
  0x6b   :  { %v9163_v57 = vld [vmem:[%s20937_s0 + $0x27a] sm:$0x8]   ;;  %v970_v1 = vsel %vm9_vm1, %v9162_v56, %v966_v60  ;;  %v1106_v56 = vsel %vm5_vm0, %v9197_v51, %v9196_v48  ;;  %v1156_v60 = vsel %vm21_vm4, %v9209_v43, %v1152_v55  ;;  %v9225_v5 = vld [vmem:[%s20937_s0 + $0x579] sm:$0x8]  }
  0x6c   :  { %v9164_v61 = vld [vmem:[%s20937_s0 + $0x299] sm:$0x10]   ;;  %v974_v6 = vsel %vm13_vm2, %v9163_v57, %v970_v1  ;;  %v9200_v57 = vld [vmem:[%s20937_s0 + $0x98] sm:$0x10]   ;;  %v1160_v1 = vsel %vm25_vm5, %v9210_v46, %v1156_v60 }
  0x6d   :  { %v9165_v62 = vld [vmem:[%s20937_s0 + $0x2b8] sm:$0x20]   ;;  %v978_v12 = vsel %vm17_vm3, %v9164_v61, %v974_v6  ;;  %v1110_v61 = vsel %vm9_vm1, %v9198_v52, %v1106_v56  ;;  %v9226_v6 = vld [vmem:[%s20937_s0 + $0x598] sm:$0x10]  }
  0x6e   :  { %v9166_v63 = vld [vmem:[%s20937_s0 + $0x2d7] sm:$0x40]   ;;  %v982_v17 = vsel %vm21_vm4, %v9165_v62, %v978_v12  ;;  %v9203_v62 = vld [vmem:[%s20937_s0 + $0xf5] sm:$0x80]  }
  0x6f   :  { %v9167_v2 = vld [vmem:[%s20937_s0 + $0x2f6] sm:$0x80]   ;;  %v986_v22 = vsel %vm25_vm5, %v9166_v63, %v982_v17  ;;  %v9222_v63 = vld [vmem:[%s20937_s0 + $0x51c] sm:$0x1]  }
  0x70   :  { %v9187_v3 = vld [vmem:[%s20937_s0 + $0x71d] sm:$0x1]   ;;  %v990_v28 = vsel %vm29_vm6, %v9167_v2, %v986_v22  ;;  %v1114_v2 = vsel %vm13_vm2, %v9199_v53, %v1110_v61  ;;  %v9228_v11 = vld [vmem:[%s20937_s0 + $0x5d6] sm:$0x40]  }
  0x71   :  { %v9188_v4 = vld [vmem:[%s20937_s0 + $0x73c] sm:$0x2]   ;;  %991 = vrot.lane.b32.xlu0 %v990_v28, %s11217_s25  ;;  %v9229_v12 = vld [vmem:[%s20937_s0 + $0x5f5] sm:$0x80]  }
  0x72   :  { %v1071_v7 = vsel %vm5_vm0, %v9188_v4, %v9187_v3  ;;  %v9189_v8 = vld [vmem:[%s20937_s0 + $0x75b] sm:$0x4]   ;;  %v1210_v3 = vsel %vm5_vm0, %v9223_v0, %v9222_v63  ;;  %v9224_v4 = vld [vmem:[%s20937_s0 + $0x55a] sm:$0x4]  }
  0x73   :  { %v9190_v9 = vld [vmem:[%s20937_s0 + $0x77a] sm:$0x8]   ;;  %v1075_v13 = vsel %vm9_vm1, %v9189_v8, %v1071_v7  ;;  %v1164_v7 = vsel %vm29_vm6, %v9211_v47, %v1160_v1  ;;  %v1118_v8 = vsel %vm17_vm3, %v9200_v57, %v1114_v2  ;;  %v9215_v17 = vld [vmem:[%s20937_s0 + $0x15a] sm:$0x4]  }
  0x74   :  { %v9191_v10 = vld [vmem:[%s20937_s0 + $0x799] sm:$0x10]   ;;  %v1079_v18 = vsel %vm13_vm2, %v9190_v9, %v1075_v13  ;;  %v1214_v9 = vsel %vm9_vm1, %v9224_v4, %v1210_v3  ;;  %v1122_v13 = vsel %vm21_vm4, %v9201_v58, %v1118_v8  ;;  %v9217_v22 = vld [vmem:[%s20937_s0 + $0x198] sm:$0x10]  }
  0x75   :  { %v9192_v14 = vld [vmem:[%s20937_s0 + $0x7b8] sm:$0x20]   ;;  %v1083_v23 = vsel %vm17_vm3, %v9191_v10, %v1079_v18  ;;  %v9227_v10 = vld [vmem:[%s20937_s0 + $0x5b7] sm:$0x20]   ;;  %v1126_v18 = vsel %vm25_vm5, %v9202_v59, %v1122_v13 }
  0x76   :  { %v9193_v15 = vld [vmem:[%s20937_s0 + $0x7d7] sm:$0x40]   ;;  %v1087_v29 = vsel %vm21_vm4, %v9192_v14, %v1083_v23  ;;  %v1218_v14 = vsel %vm13_vm2, %v9225_v5, %v1214_v9  ;;  %v9218_v23 = vld [vmem:[%s20937_s0 + $0x1b7] sm:$0x20]  }
  0x77   :  { %v9194_v16 = vld [vmem:[%s20937_s0 + $0x7f6] sm:$0x80]   ;;  %v1091_v33 = vsel %vm25_vm5, %v9193_v15, %v1087_v29  ;;  %v9213_v15 = vld [vmem:[%s20937_s0 + $0x11c] sm:$0x1]  }
  0x78   :  { %v9178_v19 = vld [vmem:[%s20937_s0 + $0x31d] sm:$0x1]   ;;  %v1095_v38 = vsel %vm29_vm6, %v9194_v16, %v1091_v33  ;;  %v9214_v16 = vld [vmem:[%s20937_s0 + $0x13b] sm:$0x2]  }
  0x79   :  { %v9179_v20 = vld [vmem:[%s20937_s0 + $0x33c] sm:$0x2]   ;;  %1096 = vrot.lane.b32.xlu1 %v1095_v38, %s11217_s25  ;;  %v9220_v28 = vld [vmem:[%s20937_s0 + $0x1f5] sm:$0x80]  }
  0x7a   :  { %v9180_v21 = vld [vmem:[%s20937_s0 + $0x35b] sm:$0x4]   ;;  %v1036_v24 = vsel %vm5_vm0, %v9179_v20, %v9178_v19  ;;  %v1222_v19 = vsel %vm17_vm3, %v9226_v6, %v1218_v14  ;;  %v1175_v20 = vsel %vm5_vm0, %v9214_v16, %v9213_v15  ;;  %v9240_v29 = vld [vmem:[%s20937_s0 + $0x61c] sm:$0x1]  }
  0x7b   :  { %v9181_v25 = vld [vmem:[%s20937_s0 + $0x37a] sm:$0x8]   ;;  %v1040_v30 = vsel %vm9_vm1, %v9180_v21, %v1036_v24  ;;  %v9216_v21 = vld [vmem:[%s20937_s0 + $0x179] sm:$0x8]   ;;  %v1130_v24 = vsel %vm29_vm6, %v9203_v62, %v1126_v18 }
  0x7c   :  { %v9182_v26 = vld [vmem:[%s20937_s0 + $0x399] sm:$0x10]   ;;  %v1044_v34 = vsel %vm13_vm2, %v9181_v25, %v1040_v30  ;;  %v1226_v25 = vsel %vm21_vm4, %v9227_v10, %v1222_v19  ;;  %v9242_v33 = vld [vmem:[%s20937_s0 + $0x65a] sm:$0x4]  }
  0x7d   :  { %v9183_v27 = vld [vmem:[%s20937_s0 + $0x3b8] sm:$0x20]   ;;  %v1048_v39 = vsel %vm17_vm3, %v9182_v26, %v1044_v34  ;;  %1165 = vrot.lane.b32.xlu1 %v1164_v7, %s11218_s15  ;;  %v1179_v26 = vsel %vm9_vm1, %v9215_v17, %v1175_v20  ;;  %v1230_v30 = vsel %vm25_vm5, %v9228_v11, %v1226_v25  ;;  %v9243_v34 = vld [vmem:[%s20937_s0 + $0x679] sm:$0x8]   ;;  %v9275_v25 = vld [vmem:[%s20937_s0 + $0x41b] sm:$0x1]  }
  0x7e   :  { %v9184_v31 = vld [vmem:[%s20937_s0 + $0x3d7] sm:$0x40]   ;;  %v1052_v44 = vsel %vm21_vm4, %v9183_v27, %v1048_v39  ;;  %v9219_v27 = vld [vmem:[%s20937_s0 + $0x1d6] sm:$0x40]   ;;  %v1234_v35 = vsel %vm29_vm6, %v9229_v12, %v1230_v30  ;;  %v9277_v30 = vld [vmem:[%s20937_s0 + $0x459] sm:$0x4]  }
  0x7f   :  { %v9185_v32 = vld [vmem:[%s20937_s0 + $0x3f6] sm:$0x80]   ;;  %v1056_v49 = vsel %vm25_vm5, %v9184_v31, %v1052_v44  ;;  %v1183_v31 = vsel %vm13_vm2, %v9216_v21, %v1179_v26  ;;  %v9244_v38 = vld [vmem:[%s20937_s0 + $0x698] sm:$0x10]   ;;  %v9276_v26 = vld [vmem:[%s20937_s0 + $0x43a] sm:$0x2]  }
  0x80   :  { %v1060_v54 = vsel %vm29_vm6, %v9185_v32, %v1056_v49  ;;  %v9241_v32 = vld [vmem:[%s20937_s0 + $0x63b] sm:$0x2]   ;;  %v1187_v36 = vsel %vm17_vm3, %v9217_v22, %v1183_v31  ;;  %v9278_v31 = vld [vmem:[%s20937_s0 + $0x478] sm:$0x8]  }
  0x81   :  { %1061 = vrot.lane.b32.xlu0 %v1060_v54, %s11217_s25  ;;  %v1280_v37 = vsel %vm5_vm0, %v9241_v32, %v9240_v29  ;;  %v9245_v39 = vld [vmem:[%s20937_s0 + $0x6b7] sm:$0x20]   ;;  %1235 = vrot.lane.b32.xlu1 %v1234_v35, %s11218_s15  ;;  %v1191_v41 = vsel %vm21_vm4, %v9218_v23, %v1187_v36  ;;  %v1419_v29 = vsel %vm5_vm0, %v9276_v26, %v9275_v25  ;;  %v9279_v32 = vld [vmem:[%s20937_s0 + $0x497] sm:$0x10]   ;;  %s11228_s25 = smov 72  }
  0x82   :  { %v9246_v40 = vld [vmem:[%s20937_s0 + $0x6d6] sm:$0x40]   ;;  %v1284_v42 = vsel %vm9_vm1, %v9242_v33, %v1280_v37  ;;  %v1195_v46 = vsel %vm25_vm5, %v9219_v27, %v1191_v41  ;;  %v1423_v35 = vsel %vm9_vm1, %v9277_v30, %v1419_v29  ;;  %v9280_v36 = vld [vmem:[%s20937_s0 + $0x4b6] sm:$0x20]  }
  0x83   :  { %v9247_v43 = vld [vmem:[%s20937_s0 + $0x6f5] sm:$0x80]   ;;  %v1288_v47 = vsel %vm13_vm2, %v9243_v34, %v1284_v42  ;;  %v1199_v52 = vsel %vm29_vm6, %v9220_v28, %v1195_v46  ;;  %v9281_v37 = vld [vmem:[%s20937_s0 + $0x4d5] sm:$0x40]  }
  0x84   :  { %v9231_v44 = vld [vmem:[%s20937_s0 + $0x21c] sm:$0x1]   ;;  %v1292_v53 = vsel %vm17_vm3, %v9244_v38, %v1288_v47  ;;  %v9282_v38 = vld [vmem:[%s20937_s0 + $0x4f4] sm:$0x80]  }
  0x85   :  { %1131 = vrot.lane.b32.xlu0 %v1130_v24, %s11218_s15  ;;  %v9232_v45 = vld [vmem:[%s20937_s0 + $0x23b] sm:$0x2]   ;;  %v1296_v58 = vsel %vm21_vm4, %v9245_v39, %v1292_v53  ;;  %v9267_v41 = vld [vmem:[%s20937_s0 + $0x1b] sm:$0x1]  }
  0x86   :  { %v1245_v48 = vsel %vm5_vm0, %v9232_v45, %v9231_v44  ;;  %v9233_v49 = vld [vmem:[%s20937_s0 + $0x25a] sm:$0x4]   ;;  %v1300_v63 = vsel %vm25_vm5, %v9246_v40, %v1296_v58  ;;  %v1427_v40 = vsel %vm13_vm2, %v9278_v31, %v1423_v35  ;;  %v9268_v42 = vld [vmem:[%s20937_s0 + $0x3a] sm:$0x2]  }
  0x87   :  { %v9234_v50 = vld [vmem:[%s20937_s0 + $0x279] sm:$0x8]   ;;  %v1249_v54 = vsel %vm9_vm1, %v9233_v49, %v1245_v48  ;;  %v1304_v5 = vsel %vm29_vm6, %v9247_v43, %v1300_v63  ;;  %v9269_v43 = vld [vmem:[%s20937_s0 + $0x59] sm:$0x4]   ;;  %v1431_v45 = vsel %vm17_vm3, %v9279_v32, %v1427_v40  ;;  %v1385_v46 = vsel %vm5_vm0, %v9268_v42, %v9267_v41 }
  0x88   :  { %v9235_v51 = vld [vmem:[%s20937_s0 + $0x298] sm:$0x10]   ;;  %v1253_v59 = vsel %vm13_vm2, %v9234_v50, %v1249_v54  ;;  %1305 = vrot.lane.b32.xlu1 %v1304_v5, %s11218_s15  ;;  %v9270_v47 = vld [vmem:[%s20937_s0 + $0x78] sm:$0x8]  }
  0x89   :  { %v9236_v55 = vld [vmem:[%s20937_s0 + $0x2b7] sm:$0x20]   ;;  %1200 = vrot.lane.b32.xlu0 %v1199_v52, %s11218_s15  ;;  %v1257_v0 = vsel %vm17_vm3, %v9235_v51, %v1253_v59  ;;  %v9271_v48 = vld [vmem:[%s20937_s0 + $0x97] sm:$0x10]   ;;  %v1435_v51 = vsel %vm21_vm4, %v9280_v36, %v1431_v45  ;;  %v1389_v52 = vsel %vm9_vm1, %v9269_v43, %v1385_v46 }
  0x8a   :  { %v9237_v56 = vld [vmem:[%s20937_s0 + $0x2d6] sm:$0x40]   ;;  %v1261_v6 = vsel %vm21_vm4, %v9236_v55, %v1257_v0  ;;  %v9272_v49 = vld [vmem:[%s20937_s0 + $0xb6] sm:$0x20]  }
  0x8b   :  { %v9238_v57 = vld [vmem:[%s20937_s0 + $0x2f5] sm:$0x80]   ;;  %v1265_v11 = vsel %vm25_vm5, %v9237_v56, %v1261_v6  ;;  %v9273_v53 = vld [vmem:[%s20937_s0 + $0xd5] sm:$0x40]   ;;  %v1439_v56 = vsel %vm25_vm5, %v9281_v37, %v1435_v51 }
  0x8c   :  { %v9258_v60 = vld [vmem:[%s20937_s0 + $0x71c] sm:$0x1]   ;;  %v1269_v16 = vsel %vm29_vm6, %v9238_v57, %v1265_v11  ;;  %v9274_v54 = vld [vmem:[%s20937_s0 + $0xf4] sm:$0x80]   ;;  %v1393_v57 = vsel %vm13_vm2, %v9270_v47, %v1389_v52 }
  0x8d   :  { %v9259_v61 = vld [vmem:[%s20937_s0 + $0x73b] sm:$0x2]   ;;  %1270 = vrot.lane.b32.xlu0 %v1269_v16, %s11218_s15  ;;  %v9293_v55 = vld [vmem:[%s20937_s0 + $0x51b] sm:$0x1]  }
  0x8e   :  { %v9260_v62 = vld [vmem:[%s20937_s0 + $0x75a] sm:$0x4]   ;;  %v1350_v1 = vsel %vm5_vm0, %v9259_v61, %v9258_v60  ;;  %v9294_v58 = vld [vmem:[%s20937_s0 + $0x53a] sm:$0x2]   ;;  %v1443_v61 = vsel %vm29_vm6, %v9282_v38, %v1439_v56 }
  0x8f   :  { %v9261_v2 = vld [vmem:[%s20937_s0 + $0x779] sm:$0x8]   ;;  %v1354_v7 = vsel %vm9_vm1, %v9260_v62, %v1350_v1  ;;  %v9295_v59 = vld [vmem:[%s20937_s0 + $0x559] sm:$0x4]   ;;  %v1397_v62 = vsel %vm17_vm3, %v9271_v48, %v1393_v57  ;;  %v1489_v63 = vsel %vm5_vm0, %v9294_v58, %v9293_v55 }
  0x90   :  { %v9262_v3 = vld [vmem:[%s20937_s0 + $0x798] sm:$0x10]   ;;  %v1358_v12 = vsel %vm13_vm2, %v9261_v2, %v1354_v7  ;;  %v9296_v60 = vld [vmem:[%s20937_s0 + $0x578] sm:$0x8]  }
  0x91   :  { %v9263_v4 = vld [vmem:[%s20937_s0 + $0x7b7] sm:$0x20]   ;;  %v1362_v17 = vsel %vm17_vm3, %v9262_v3, %v1358_v12  ;;  %v9297_v0 = vld [vmem:[%s20937_s0 + $0x597] sm:$0x10]   ;;  %v1401_v3 = vsel %vm21_vm4, %v9272_v49, %v1397_v62 }
  0x92   :  { %v9264_v8 = vld [vmem:[%s20937_s0 + $0x7d6] sm:$0x40]   ;;  %v1366_v22 = vsel %vm21_vm4, %v9263_v4, %v1362_v17  ;;  %v9298_v1 = vld [vmem:[%s20937_s0 + $0x5b6] sm:$0x20]   ;;  %v1493_v4 = vsel %vm9_vm1, %v9295_v59, %v1489_v63 }
  0x93   :  { %v9265_v9 = vld [vmem:[%s20937_s0 + $0x7f5] sm:$0x80]   ;;  %v1370_v27 = vsel %vm25_vm5, %v9264_v8, %v1366_v22  ;;  %v9299_v2 = vld [vmem:[%s20937_s0 + $0x5d5] sm:$0x40]   ;;  %v1405_v8 = vsel %vm25_vm5, %v9273_v53, %v1401_v3 }
  0x94   :  { %v9249_v10 = vld [vmem:[%s20937_s0 + $0x31c] sm:$0x1]   ;;  %v1374_v33 = vsel %vm29_vm6, %v9265_v9, %v1370_v27  ;;  %v9300_v5 = vld [vmem:[%s20937_s0 + $0x5f4] sm:$0x80]   ;;  %v1497_v9 = vsel %vm13_vm2, %v9296_v60, %v1493_v4 }
  0x95   :  { %v9250_v13 = vld [vmem:[%s20937_s0 + $0x33b] sm:$0x2]   ;;  %1375 = vrot.lane.b32.xlu1 %v1374_v33, %s11218_s15  ;;  %v9284_v6 = vld [vmem:[%s20937_s0 + $0x11b] sm:$0x1]  }
  0x96   :  { %v9251_v14 = vld [vmem:[%s20937_s0 + $0x35a] sm:$0x4]   ;;  %v1315_v18 = vsel %vm5_vm0, %v9250_v13, %v9249_v10  ;;  %v9285_v7 = vld [vmem:[%s20937_s0 + $0x13a] sm:$0x2]  }
  0x97   :  { %v9252_v15 = vld [vmem:[%s20937_s0 + $0x379] sm:$0x8]   ;;  %v1319_v23 = vsel %vm9_vm1, %v9251_v14, %v1315_v18  ;;  %v1454_v10 = vsel %vm5_vm0, %v9285_v7, %v9284_v6  ;;  %v9286_v11 = vld [vmem:[%s20937_s0 + $0x159] sm:$0x4]   ;;  %v1409_v14 = vsel %vm29_vm6, %v9274_v54, %v1405_v8 }
  0x98   :  { %v9253_v19 = vld [vmem:[%s20937_s0 + $0x398] sm:$0x10]   ;;  %v1323_v28 = vsel %vm13_vm2, %v9252_v15, %v1319_v23  ;;  %v9287_v12 = vld [vmem:[%s20937_s0 + $0x178] sm:$0x8]   ;;  %v1501_v15 = vsel %vm17_vm3, %v9297_v0, %v1497_v9  ;;  %v1458_v16 = vsel %vm9_vm1, %v9286_v11, %v1454_v10 }
  0x99   :  { %v9254_v20 = vld [vmem:[%s20937_s0 + $0x3b7] sm:$0x20]   ;;  %v1327_v34 = vsel %vm17_vm3, %v9253_v19, %v1323_v28  ;;  %1444 = vrot.lane.b32.xlu1 %v1443_v61, %s11219_s29  ;;  %v9288_v13 = vld [vmem:[%s20937_s0 + $0x197] sm:$0x10]  }
  0x9a   :  { %v9255_v21 = vld [vmem:[%s20937_s0 + $0x3d6] sm:$0x40]   ;;  %v1331_v39 = vsel %vm21_vm4, %v9254_v20, %v1327_v34  ;;  %v9289_v17 = vld [vmem:[%s20937_s0 + $0x1b6] sm:$0x20]   ;;  %v1505_v20 = vsel %vm21_vm4, %v9298_v1, %v1501_v15 }
  0x9b   :  { %v9256_v24 = vld [vmem:[%s20937_s0 + $0x3f5] sm:$0x80]   ;;  %v1335_v44 = vsel %vm25_vm5, %v9255_v21, %v1331_v39  ;;  %v9290_v18 = vld [vmem:[%s20937_s0 + $0x1d5] sm:$0x40]   ;;  %v1462_v21 = vsel %vm13_vm2, %v9287_v12, %v1458_v16  ;;  %v1509_v25 = vsel %vm25_vm5, %v9299_v2, %v1505_v20  ;;  %v9347_v20 = vld [vmem:[%s20937_s0 + $0x439] sm:$0x2]  }
  0x9c   :  { %v1339_v50 = vsel %vm29_vm6, %v9256_v24, %v1335_v44  ;;  %v9291_v19 = vld [vmem:[%s20937_s0 + $0x1f4] sm:$0x80]   ;;  %v1466_v26 = vsel %vm17_vm3, %v9288_v13, %v1462_v21  ;;  %v1513_v31 = vsel %vm29_vm6, %v9300_v5, %v1509_v25  ;;  %v9348_v21 = vld [vmem:[%s20937_s0 + $0x458] sm:$0x4]  }
  0x9d   :  { %1340 = vrot.lane.b32.xlu0 %v1339_v50, %s11218_s15  ;;  %v9311_v22 = vld [vmem:[%s20937_s0 + $0x61b] sm:$0x1]   ;;  %v1470_v32 = vsel %vm21_vm4, %v9289_v17, %v1466_v26  ;;  %1514 = vrot.lane.b32.xlu1 %v1513_v31, %s11219_s29  ;;  %v9349_v25 = vld [vmem:[%s20937_s0 + $0x477] sm:$0x8]   ;;  %s11224_s15 = smov 88  }
  0x9e   :  { %v9312_v23 = vld [vmem:[%s20937_s0 + $0x63a] sm:$0x2]   ;;  %v1474_v37 = vsel %vm25_vm5, %v9290_v18, %v1470_v32  ;;  %v9350_v26 = vld [vmem:[%s20937_s0 + $0x496] sm:$0x10]  }
  0x9f   :  { %v9313_v24 = vld [vmem:[%s20937_s0 + $0x659] sm:$0x4]   ;;  %v1559_v27 = vsel %vm5_vm0, %v9312_v23, %v9311_v22  ;;  %v1478_v42 = vsel %vm29_vm6, %v9291_v19, %v1474_v37  ;;  %v9346_v19 = vld [vmem:[%s20937_s0 + $0x41a] sm:$0x1]  }
  0xa0   :  { %v9314_v28 = vld [vmem:[%s20937_s0 + $0x678] sm:$0x8]   ;;  %v1563_v33 = vsel %vm9_vm1, %v9313_v24, %v1559_v27  ;;  %v1698_v24 = vsel %vm5_vm0, %v9347_v20, %v9346_v19  ;;  %v9351_v27 = vld [vmem:[%s20937_s0 + $0x4b5] sm:$0x20]  }
  0xa1   :  { %1410 = vrot.lane.b32.xlu0 %v1409_v14, %s11219_s29  ;;  %v9315_v29 = vld [vmem:[%s20937_s0 + $0x697] sm:$0x10]   ;;  %v1567_v38 = vsel %vm13_vm2, %v9314_v28, %v1563_v33  ;;  %v9353_v31 = vld [vmem:[%s20937_s0 + $0x4f3] sm:$0x80]  }
  0xa2   :  { %v9316_v30 = vld [vmem:[%s20937_s0 + $0x6b6] sm:$0x20]   ;;  %v1571_v43 = vsel %vm17_vm3, %v9315_v29, %v1567_v38  ;;  %v1702_v29 = vsel %vm9_vm1, %v9348_v21, %v1698_v24  ;;  %v9338_v32 = vld [vmem:[%s20937_s0 + $0x1a] sm:$0x1]  }
  0xa3   :  { %v9317_v34 = vld [vmem:[%s20937_s0 + $0x6d5] sm:$0x40]   ;;  %v1575_v48 = vsel %vm21_vm4, %v9316_v30, %v1571_v43  ;;  %v9352_v30 = vld [vmem:[%s20937_s0 + $0x4d4] sm:$0x40]  }
  0xa4   :  { %v9318_v35 = vld [vmem:[%s20937_s0 + $0x6f4] sm:$0x80]   ;;  %v1579_v53 = vsel %vm25_vm5, %v9317_v34, %v1575_v48  ;;  %v1706_v34 = vsel %vm13_vm2, %v9349_v25, %v1702_v29  ;;  %v9341_v37 = vld [vmem:[%s20937_s0 + $0x77] sm:$0x8]  }
  0xa5   :  { %v9302_v36 = vld [vmem:[%s20937_s0 + $0x21b] sm:$0x1]   ;;  %1479 = vrot.lane.b32.xlu0 %v1478_v42, %s11219_s29  ;;  %v1583_v59 = vsel %vm29_vm6, %v9318_v35, %v1579_v53  ;;  %v9339_v35 = vld [vmem:[%s20937_s0 + $0x39] sm:$0x2]  }
  0xa6   :  { %v9303_v39 = vld [vmem:[%s20937_s0 + $0x23a] sm:$0x2]   ;;  %1584 = vrot.lane.b32.xlu1 %v1583_v59, %s11219_s29  ;;  %v9343_v42 = vld [vmem:[%s20937_s0 + $0xb5] sm:$0x20]  }
  0xa7   :  { %v9304_v40 = vld [vmem:[%s20937_s0 + $0x259] sm:$0x4]   ;;  %v1524_v44 = vsel %vm5_vm0, %v9303_v39, %v9302_v36  ;;  %v9340_v36 = vld [vmem:[%s20937_s0 + $0x58] sm:$0x4]   ;;  %v1710_v39 = vsel %vm17_vm3, %v9350_v26, %v1706_v34 }
  0xa8   :  { %v9305_v41 = vld [vmem:[%s20937_s0 + $0x278] sm:$0x8]   ;;  %v1528_v49 = vsel %vm9_vm1, %v9304_v40, %v1524_v44  ;;  %v1664_v40 = vsel %vm5_vm0, %v9339_v35, %v9338_v32  ;;  %v9344_v43 = vld [vmem:[%s20937_s0 + $0xd4] sm:$0x40]   ;;  %v1714_v44 = vsel %vm21_vm4, %v9351_v27, %v1710_v39 }
  0xa9   :  { %v9306_v45 = vld [vmem:[%s20937_s0 + $0x297] sm:$0x10]   ;;  %v1532_v54 = vsel %vm13_vm2, %v9305_v41, %v1528_v49  ;;  %v9342_v41 = vld [vmem:[%s20937_s0 + $0x96] sm:$0x10]   ;;  %v1718_v49 = vsel %vm25_vm5, %v9352_v30, %v1714_v44 }
  0xaa   :  { %v9307_v46 = vld [vmem:[%s20937_s0 + $0x2b6] sm:$0x20]   ;;  %v1536_v60 = vsel %vm17_vm3, %v9306_v45, %v1532_v54  ;;  %v1668_v45 = vsel %vm9_vm1, %v9340_v36, %v1664_v40  ;;  %v9365_v48 = vld [vmem:[%s20937_s0 + $0x539] sm:$0x2]  }
  0xab   :  { %v9308_v47 = vld [vmem:[%s20937_s0 + $0x2d5] sm:$0x40]   ;;  %v1540_v1 = vsel %vm21_vm4, %v9307_v46, %v1536_v60  ;;  %v9345_v46 = vld [vmem:[%s20937_s0 + $0xf3] sm:$0x80]  }
  0xac   :  { %v9309_v50 = vld [vmem:[%s20937_s0 + $0x2f4] sm:$0x80]   ;;  %v1544_v6 = vsel %vm25_vm5, %v9308_v47, %v1540_v1  ;;  %v9364_v47 = vld [vmem:[%s20937_s0 + $0x51a] sm:$0x1]  }
  0xad   :  { %v9329_v51 = vld [vmem:[%s20937_s0 + $0x71b] sm:$0x1]   ;;  %v1548_v12 = vsel %vm29_vm6, %v9309_v50, %v1544_v6  ;;  %v1672_v50 = vsel %vm13_vm2, %v9341_v37, %v1668_v45  ;;  %v9367_v53 = vld [vmem:[%s20937_s0 + $0x577] sm:$0x8]  }
  0xae   :  { %v9330_v52 = vld [vmem:[%s20937_s0 + $0x73a] sm:$0x2]   ;;  %1549 = vrot.lane.b32.xlu0 %v1548_v12, %s11219_s29  ;;  %v9368_v54 = vld [vmem:[%s20937_s0 + $0x596] sm:$0x10]  }
  0xaf   :  { %v1629_v55 = vsel %vm5_vm0, %v9330_v52, %v9329_v51  ;;  %v9331_v56 = vld [vmem:[%s20937_s0 + $0x759] sm:$0x4]   ;;  %v1768_v51 = vsel %vm5_vm0, %v9365_v48, %v9364_v47  ;;  %v9366_v52 = vld [vmem:[%s20937_s0 + $0x558] sm:$0x4]  }
  0xb0   :  { %v9332_v57 = vld [vmem:[%s20937_s0 + $0x778] sm:$0x8]   ;;  %v1633_v61 = vsel %vm9_vm1, %v9331_v56, %v1629_v55  ;;  %v1722_v55 = vsel %vm29_vm6, %v9353_v31, %v1718_v49  ;;  %v1676_v56 = vsel %vm17_vm3, %v9342_v41, %v1672_v50  ;;  %v9370_v59 = vld [vmem:[%s20937_s0 + $0x5d4] sm:$0x40]  }
  0xb1   :  { %v9333_v58 = vld [vmem:[%s20937_s0 + $0x797] sm:$0x10]   ;;  %v1637_v2 = vsel %vm13_vm2, %v9332_v57, %v1633_v61  ;;  %v1772_v57 = vsel %vm9_vm1, %v9366_v52, %v1768_v51  ;;  %v9371_v60 = vld [vmem:[%s20937_s0 + $0x5f3] sm:$0x80]   ;;  %v1680_v61 = vsel %vm21_vm4, %v9343_v42, %v1676_v56  ;;  %v12717_v42 = vpop.permute.xlu1 %363  }
  0xb2   :  { %v9334_v62 = vld [vmem:[%s20937_s0 + $0x7b6] sm:$0x20]   ;;  %v1641_v7 = vsel %vm17_vm3, %v9333_v58, %v1637_v2  ;;  %v9369_v58 = vld [vmem:[%s20937_s0 + $0x5b5] sm:$0x20]   ;;  %v1684_v2 = vsel %vm25_vm5, %v9344_v43, %v1680_v61 }
  0xb3   :  { %v9335_v63 = vld [vmem:[%s20937_s0 + $0x7d5] sm:$0x40]   ;;  %v1645_v13 = vsel %vm21_vm4, %v9334_v62, %v1641_v7  ;;  %v1776_v62 = vsel %vm13_vm2, %v9367_v53, %v1772_v57  ;;  %v9357_v1 = vld [vmem:[%s20937_s0 + $0x158] sm:$0x4]  }
  0xb4   :  { %v9336_v0 = vld [vmem:[%s20937_s0 + $0x7f4] sm:$0x80]   ;;  %v1649_v17 = vsel %vm25_vm5, %v9335_v63, %v1645_v13  ;;  %v9355_v63 = vld [vmem:[%s20937_s0 + $0x11a] sm:$0x1]  }
  0xb5   :  { %v9320_v3 = vld [vmem:[%s20937_s0 + $0x31b] sm:$0x1]   ;;  %v1653_v22 = vsel %vm29_vm6, %v9336_v0, %v1649_v17  ;;  %v9356_v0 = vld [vmem:[%s20937_s0 + $0x139] sm:$0x2]  }
  0xb6   :  { %v9321_v4 = vld [vmem:[%s20937_s0 + $0x33a] sm:$0x2]   ;;  %1654 = vrot.lane.b32.xlu1 %v1653_v22, %s11219_s29  ;;  %v9359_v6 = vld [vmem:[%s20937_s0 + $0x196] sm:$0x10]  }
  0xb7   :  { %v9322_v5 = vld [vmem:[%s20937_s0 + $0x359] sm:$0x4]   ;;  %v1594_v8 = vsel %vm5_vm0, %v9321_v4, %v9320_v3  ;;  %v1780_v3 = vsel %vm17_vm3, %v9368_v54, %v1776_v62  ;;  %v1733_v4 = vsel %vm5_vm0, %v9356_v0, %v9355_v63  ;;  %v9360_v7 = vld [vmem:[%s20937_s0 + $0x1b5] sm:$0x20]   ;;  %v12743_v54 = vpop.permute.xlu0 %294  }
  0xb8   :  { %v9323_v9 = vld [vmem:[%s20937_s0 + $0x378] sm:$0x8]   ;;  %v1598_v14 = vsel %vm9_vm1, %v9322_v5, %v1594_v8  ;;  %v9358_v5 = vld [vmem:[%s20937_s0 + $0x177] sm:$0x8]   ;;  %v1688_v8 = vsel %vm29_vm6, %v9345_v46, %v1684_v2 }
  0xb9   :  { %v9324_v10 = vld [vmem:[%s20937_s0 + $0x397] sm:$0x10]   ;;  %v1602_v18 = vsel %vm13_vm2, %v9323_v9, %v1598_v14  ;;  %v1784_v9 = vsel %vm21_vm4, %v9369_v58, %v1780_v3  ;;  %v9362_v12 = vld [vmem:[%s20937_s0 + $0x1f3] sm:$0x80]  }
  0xba   :  { %v9325_v11 = vld [vmem:[%s20937_s0 + $0x3b6] sm:$0x20]   ;;  %v1606_v23 = vsel %vm17_vm3, %v9324_v10, %v1602_v18  ;;  %1723 = vrot.lane.b32.xlu1 %v1722_v55, %s11220_s18  ;;  %v1737_v10 = vsel %vm9_vm1, %v9357_v1, %v1733_v4  ;;  %v9382_v13 = vld [vmem:[%s20937_s0 + $0x61a] sm:$0x1]   ;;  %v1788_v14 = vsel %vm25_vm5, %v9370_v59, %v1784_v9 }
  0xbb   :  { %v9326_v15 = vld [vmem:[%s20937_s0 + $0x3d5] sm:$0x40]   ;;  %v1610_v28 = vsel %vm21_vm4, %v9325_v11, %v1606_v23  ;;  %v9361_v11 = vld [vmem:[%s20937_s0 + $0x1d4] sm:$0x40]   ;;  %v1792_v19 = vsel %vm29_vm6, %v9371_v60, %v1788_v14 }
  0xbc   :  { %v9327_v16 = vld [vmem:[%s20937_s0 + $0x3f4] sm:$0x80]   ;;  %v1614_v33 = vsel %vm25_vm5, %v9326_v15, %v1610_v28  ;;  %v1741_v15 = vsel %vm13_vm2, %v9358_v5, %v1737_v10  ;;  %v9384_v17 = vld [vmem:[%s20937_s0 + $0x658] sm:$0x4]  }
  0xbd   :  { %v1618_v38 = vsel %vm29_vm6, %v9327_v16, %v1614_v33  ;;  %v9383_v16 = vld [vmem:[%s20937_s0 + $0x639] sm:$0x2]   ;;  %v1745_v20 = vsel %vm17_vm3, %v9359_v6, %v1741_v15 }
  0xbe   :  { %1619 = vrot.lane.b32.xlu0 %v1618_v38, %s11219_s29  ;;  %v9385_v18 = vld [vmem:[%s20937_s0 + $0x677] sm:$0x8]   ;;  %v1838_v21 = vsel %vm5_vm0, %v9383_v16, %v9382_v13  ;;  %1793 = vrot.lane.b32.xlu1 %v1792_v19, %s11220_s18  ;;  %v1749_v25 = vsel %vm21_vm4, %v9360_v7, %v1745_v20  ;;  %v9418_v13 = vld [vmem:[%s20937_s0 + $0x438] sm:$0x2]   ;;  %s11238_s29 = smov 32  }
  0xbf   :  { %v9386_v22 = vld [vmem:[%s20937_s0 + $0x696] sm:$0x10]   ;;  %v1842_v26 = vsel %vm9_vm1, %v9384_v17, %v1838_v21  ;;  %v1753_v30 = vsel %vm25_vm5, %v9361_v11, %v1749_v25  ;;  %v9419_v17 = vld [vmem:[%s20937_s0 + $0x457] sm:$0x4]  }
  0xc0   :  { %v9387_v23 = vld [vmem:[%s20937_s0 + $0x6b5] sm:$0x20]   ;;  %v1846_v31 = vsel %vm13_vm2, %v9385_v18, %v1842_v26  ;;  %v1757_v36 = vsel %vm29_vm6, %v9362_v12, %v1753_v30  ;;  %v9417_v12 = vld [vmem:[%s20937_s0 + $0x419] sm:$0x1]   ;;  %v12819_v26 = vpop.permute.xlu0 %328  }
  0xc1   :  { %v9388_v24 = vld [vmem:[%s20937_s0 + $0x6d4] sm:$0x40]   ;;  %v1850_v37 = vsel %vm17_vm3, %v9386_v22, %v1846_v31  ;;  %v1977_v16 = vsel %vm5_vm0, %v9418_v13, %v9417_v12  ;;  %v9420_v18 = vld [vmem:[%s20937_s0 + $0x476] sm:$0x8]  }
  0xc2   :  { %1689 = vrot.lane.b32.xlu0 %v1688_v8, %s11220_s18  ;;  %v9389_v27 = vld [vmem:[%s20937_s0 + $0x6f3] sm:$0x80]   ;;  %v1854_v43 = vsel %vm21_vm4, %v9387_v23, %v1850_v37  ;;  %v12781_v8 = vpop.permute.xlu1 %398   ;;  %v9421_v19 = vld [vmem:[%s20937_s0 + $0x495] sm:$0x10]   ;;  %v1981_v22 = vsel %vm9_vm1, %v9419_v17, %v1977_v16 }
  0xc3   :  { %v9373_v28 = vld [vmem:[%s20937_s0 + $0x21a] sm:$0x1]   ;;  %v1858_v48 = vsel %vm25_vm5, %v9388_v24, %v1854_v43  ;;  %v9422_v23 = vld [vmem:[%s20937_s0 + $0x4b4] sm:$0x20]  }
  0xc4   :  { %v9374_v29 = vld [vmem:[%s20937_s0 + $0x239] sm:$0x2]   ;;  %v1862_v55 = vsel %vm29_vm6, %v9389_v27, %v1858_v48  ;;  %v9423_v24 = vld [vmem:[%s20937_s0 + $0x4d3] sm:$0x40]  }
  0xc5   :  { %v1803_v32 = vsel %vm5_vm0, %v9374_v29, %v9373_v28  ;;  %v9375_v33 = vld [vmem:[%s20937_s0 + $0x258] sm:$0x4]   ;;  %1863 = vrot.lane.b32.xlu1 %v1862_v55, %s11220_s18  ;;  %v9424_v25 = vld [vmem:[%s20937_s0 + $0x4f2] sm:$0x80]   ;;  %v1985_v28 = vsel %vm13_vm2, %v9420_v18, %v1981_v22 }
  0xc6   :  { %v9376_v34 = vld [vmem:[%s20937_s0 + $0x277] sm:$0x8]   ;;  %v1807_v38 = vsel %vm9_vm1, %v9375_v33, %v1803_v32  ;;  %1758 = vrot.lane.b32.xlu0 %v1757_v36, %s11220_s18  ;;  %v9409_v29 = vld [vmem:[%s20937_s0 + $0x19] sm:$0x1]   ;;  %v1989_v33 = vsel %vm17_vm3, %v9421_v19, %v1985_v28 }
  0xc7   :  { %v9377_v35 = vld [vmem:[%s20937_s0 + $0x296] sm:$0x10]   ;;  %v1811_v44 = vsel %vm13_vm2, %v9376_v34, %v1807_v38  ;;  %v9410_v30 = vld [vmem:[%s20937_s0 + $0x38] sm:$0x2]   ;;  %v12845_v38 = vpop.permute.xlu1 %468  }
  0xc8   :  { %v9378_v39 = vld [vmem:[%s20937_s0 + $0x2b5] sm:$0x20]   ;;  %v1815_v49 = vsel %vm17_vm3, %v9377_v35, %v1811_v44  ;;  %v9411_v31 = vld [vmem:[%s20937_s0 + $0x57] sm:$0x4]   ;;  %v1943_v34 = vsel %vm5_vm0, %v9410_v30, %v9409_v29 }
  0xc9   :  { %v9379_v40 = vld [vmem:[%s20937_s0 + $0x2d4] sm:$0x40]   ;;  %v1819_v56 = vsel %vm21_vm4, %v9378_v39, %v1815_v49  ;;  %v9412_v35 = vld [vmem:[%s20937_s0 + $0x76] sm:$0x8]  }
  0xca   :  { %v9380_v41 = vld [vmem:[%s20937_s0 + $0x2f3] sm:$0x80]   ;;  %v1823_v61 = vsel %vm25_vm5, %v9379_v40, %v1819_v56  ;;  %v9413_v36 = vld [vmem:[%s20937_s0 + $0x95] sm:$0x10]   ;;  %v1993_v40 = vsel %vm21_vm4, %v9422_v23, %v1989_v33 }
  0xcb   :  { %v9400_v45 = vld [vmem:[%s20937_s0 + $0x71a] sm:$0x1]   ;;  %v1827_v2 = vsel %vm29_vm6, %v9380_v41, %v1823_v61  ;;  %v9414_v37 = vld [vmem:[%s20937_s0 + $0xb4] sm:$0x20]   ;;  %v1947_v41 = vsel %vm9_vm1, %v9411_v31, %v1943_v34  ;;  %v12921_v13 = vpop.permute.xlu1 %538  }
  0xcc   :  { %v9401_v46 = vld [vmem:[%s20937_s0 + $0x739] sm:$0x2]   ;;  %1828 = vrot.lane.b32.xlu0 %v1827_v2, %s11220_s18  ;;  %v9415_v43 = vld [vmem:[%s20937_s0 + $0xd3] sm:$0x40]  }
  0xcd   :  { %v9402_v47 = vld [vmem:[%s20937_s0 + $0x758] sm:$0x4]   ;;  %v1908_v50 = vsel %vm5_vm0, %v9401_v46, %v9400_v45  ;;  %v9416_v44 = vld [vmem:[%s20937_s0 + $0xf2] sm:$0x80]   ;;  %v1997_v46 = vsel %vm25_vm5, %v9423_v24, %v1993_v40 }
  0xce   :  { %v9403_v51 = vld [vmem:[%s20937_s0 + $0x777] sm:$0x8]   ;;  %v1912_v57 = vsel %vm9_vm1, %v9402_v47, %v1908_v50  ;;  %v9435_v45 = vld [vmem:[%s20937_s0 + $0x519] sm:$0x1]   ;;  %v1951_v47 = vsel %vm13_vm2, %v9412_v35, %v1947_v41 }
  0xcf   :  { %v9404_v52 = vld [vmem:[%s20937_s0 + $0x796] sm:$0x10]   ;;  %v1916_v62 = vsel %vm13_vm2, %v9403_v51, %v1912_v57  ;;  %v9436_v48 = vld [vmem:[%s20937_s0 + $0x538] sm:$0x2]   ;;  %v2001_v51 = vsel %vm29_vm6, %v9424_v25, %v1997_v46  ;;  %v12985_v46 = vpop.permute.xlu1 %607  }
  0xd0   :  { %v9405_v53 = vld [vmem:[%s20937_s0 + $0x7b5] sm:$0x20]   ;;  %v1920_v3 = vsel %vm17_vm3, %v9404_v52, %v1916_v62  ;;  %v9437_v49 = vld [vmem:[%s20937_s0 + $0x557] sm:$0x4]   ;;  %v1955_v52 = vsel %vm17_vm3, %v9413_v36, %v1951_v47 }
  0xd1   :  { %v9406_v58 = vld [vmem:[%s20937_s0 + $0x7d4] sm:$0x40]   ;;  %v1924_v9 = vsel %vm21_vm4, %v9405_v53, %v1920_v3  ;;  %v9438_v50 = vld [vmem:[%s20937_s0 + $0x576] sm:$0x8]   ;;  %v2047_v53 = vsel %vm5_vm0, %v9436_v48, %v9435_v45 }
  0xd2   :  { %v9407_v59 = vld [vmem:[%s20937_s0 + $0x7f3] sm:$0x80]   ;;  %v1928_v14 = vsel %vm25_vm5, %v9406_v58, %v1924_v9  ;;  %v9439_v55 = vld [vmem:[%s20937_s0 + $0x595] sm:$0x10]   ;;  %v12883_v58 = vpop.permute.xlu0 %433  }
  0xd3   :  { %v9391_v60 = vld [vmem:[%s20937_s0 + $0x31a] sm:$0x1]   ;;  %v1932_v20 = vsel %vm29_vm6, %v9407_v59, %v1928_v14  ;;  %v9440_v56 = vld [vmem:[%s20937_s0 + $0x5b4] sm:$0x20]   ;;  %v1959_v59 = vsel %vm21_vm4, %v9414_v37, %v1955_v52 }
  0xd4   :  { %v9392_v63 = vld [vmem:[%s20937_s0 + $0x339] sm:$0x2]   ;;  %1933 = vrot.lane.b32.xlu1 %v1932_v20, %s11220_s18  ;;  %v9441_v57 = vld [vmem:[%s20937_s0 + $0x5d3] sm:$0x40]  }
  0xd5   :  { %v9393_v0 = vld [vmem:[%s20937_s0 + $0x358] sm:$0x4]   ;;  %v1873_v4 = vsel %vm5_vm0, %v9392_v63, %v9391_v60  ;;  %v2051_v60 = vsel %vm9_vm1, %v9437_v49, %v2047_v53  ;;  %v9442_v61 = vld [vmem:[%s20937_s0 + $0x5f2] sm:$0x80]  }
  0xd6   :  { %v9394_v1 = vld [vmem:[%s20937_s0 + $0x377] sm:$0x8]   ;;  %v1877_v10 = vsel %vm9_vm1, %v9393_v0, %v1873_v4  ;;  %v9426_v62 = vld [vmem:[%s20937_s0 + $0x119] sm:$0x1]   ;;  %v1963_v0 = vsel %vm25_vm5, %v9415_v43, %v1959_v59  ;;  %v12947_v25 = vpop.permute.xlu0 %503  }
  0xd7   :  { %v9395_v5 = vld [vmem:[%s20937_s0 + $0x396] sm:$0x10]   ;;  %v1881_v15 = vsel %vm13_vm2, %v9394_v1, %v1877_v10  ;;  %v9427_v63 = vld [vmem:[%s20937_s0 + $0x138] sm:$0x2]   ;;  %v2055_v1 = vsel %vm13_vm2, %v9438_v50, %v2051_v60 }
  0xd8   :  { %v9396_v6 = vld [vmem:[%s20937_s0 + $0x3b5] sm:$0x20]   ;;  %v1885_v21 = vsel %vm17_vm3, %v9395_v5, %v1881_v15  ;;  %2002 = vrot.lane.b32.xlu1 %v2001_v51, %s11221_s3  ;;  %v2012_v2 = vsel %vm5_vm0, %v9427_v63, %v9426_v62  ;;  %v9428_v3 = vld [vmem:[%s20937_s0 + $0x157] sm:$0x4]  }
  0xd9   :  { %v9397_v7 = vld [vmem:[%s20937_s0 + $0x3d4] sm:$0x40]   ;;  %v1889_v27 = vsel %vm21_vm4, %v9396_v6, %v1885_v21  ;;  %v9429_v4 = vld [vmem:[%s20937_s0 + $0x176] sm:$0x8]   ;;  %v1967_v6 = vsel %vm29_vm6, %v9416_v44, %v1963_v0  ;;  %v2016_v9 = vsel %vm9_vm1, %v9428_v3, %v2012_v2 }
  0xda   :  { %v9398_v11 = vld [vmem:[%s20937_s0 + $0x3f3] sm:$0x80]   ;;  %v1893_v32 = vsel %vm25_vm5, %v9397_v7, %v1889_v27  ;;  %v9430_v5 = vld [vmem:[%s20937_s0 + $0x195] sm:$0x10]   ;;  %v2059_v7 = vsel %vm17_vm3, %v9439_v55, %v2055_v1  ;;  %v2020_v15 = vsel %vm13_vm2, %v9429_v4, %v2016_v9  ;;  %v13023_v2 = vpop.permute.xlu0 %573  }
  0xdb   :  { %v1897_v39 = vsel %vm29_vm6, %v9398_v11, %v1893_v32  ;;  %v9431_v10 = vld [vmem:[%s20937_s0 + $0x1b4] sm:$0x20]   ;;  %v2063_v14 = vsel %vm21_vm4, %v9440_v56, %v2059_v7  ;;  %v2024_v20 = vsel %vm17_vm3, %v9430_v5, %v2020_v15 }
  0xdc   :  { %1898 = vrot.lane.b32.xlu0 %v1897_v39, %s11220_s18  ;;  %v9432_v11 = vld [vmem:[%s20937_s0 + $0x1d3] sm:$0x40]   ;;  %v2067_v19 = vsel %vm25_vm5, %v9441_v57, %v2063_v14  ;;  %v2028_v28 = vsel %vm21_vm4, %v9431_v10, %v2024_v20  ;;  %s11235_s18 = smov 44  }
  0xdd   :  { %v9433_v12 = vld [vmem:[%s20937_s0 + $0x1f2] sm:$0x80]   ;;  %v2071_v27 = vsel %vm29_vm6, %v9442_v61, %v2067_v19  ;;  %v2032_v33 = vsel %vm25_vm5, %v9432_v11, %v2028_v28  ;;  %v9490_v28 = vld [vmem:[%s20937_s0 + $0x456] sm:$0x4]  }
  0xde   :  { %v9453_v16 = vld [vmem:[%s20937_s0 + $0x619] sm:$0x1]   ;;  %2072 = vrot.lane.b32.xlu1 %v2071_v27, %s11221_s3  ;;  %v2036_v39 = vsel %vm29_vm6, %v9433_v12, %v2032_v33  ;;  %v9489_v27 = vld [vmem:[%s20937_s0 + $0x437] sm:$0x2]  }
  0xdf   :  { %v9454_v17 = vld [vmem:[%s20937_s0 + $0x638] sm:$0x2]   ;;  %v9492_v33 = vld [vmem:[%s20937_s0 + $0x494] sm:$0x10]  }
  0xe0   :  { %1968 = vrot.lane.b32.xlu0 %v1967_v6, %s11221_s3  ;;  %v9455_v18 = vld [vmem:[%s20937_s0 + $0x657] sm:$0x4]   ;;  %v2117_v21 = vsel %vm5_vm0, %v9454_v17, %v9453_v16  ;;  %v13049_v16 = vpop.permute.xlu1 %677  }
  0xe1   :  { %v9456_v22 = vld [vmem:[%s20937_s0 + $0x676] sm:$0x8]   ;;  %v2121_v29 = vsel %vm9_vm1, %v9455_v18, %v2117_v21 }
  0xe2   :  { %v9457_v23 = vld [vmem:[%s20937_s0 + $0x695] sm:$0x10]   ;;  %v2125_v34 = vsel %vm13_vm2, %v9456_v22, %v2121_v29 }
  0xe3   :  { %v9458_v24 = vld [vmem:[%s20937_s0 + $0x6b4] sm:$0x20]   ;;  %v2129_v40 = vsel %vm17_vm3, %v9457_v23, %v2125_v34  ;;  %v9493_v34 = vld [vmem:[%s20937_s0 + $0x4b3] sm:$0x20]  }
  0xe4   :  { %v9459_v30 = vld [vmem:[%s20937_s0 + $0x6d3] sm:$0x40]   ;;  %2037 = vrot.lane.b32.xlu0 %v2036_v39, %s11221_s3  ;;  %v2133_v47 = vsel %vm21_vm4, %v9458_v24, %v2129_v40  ;;  %v9488_v24 = vld [vmem:[%s20937_s0 + $0x418] sm:$0x1]  }
  0xe5   :  { %v9460_v31 = vld [vmem:[%s20937_s0 + $0x6f2] sm:$0x80]   ;;  %v2137_v52 = vsel %vm25_vm5, %v9459_v30, %v2133_v47  ;;  %v9494_v39 = vld [vmem:[%s20937_s0 + $0x4d2] sm:$0x40]  }
  0xe6   :  { %v9444_v32 = vld [vmem:[%s20937_s0 + $0x219] sm:$0x1]   ;;  %v2141_v60 = vsel %vm29_vm6, %v9460_v31, %v2137_v52  ;;  %v2256_v31 = vsel %vm5_vm0, %v9489_v27, %v9488_v24  ;;  %v9495_v40 = vld [vmem:[%s20937_s0 + $0x4f1] sm:$0x80]   ;;  %v8916_v24 = vld [vmem:[%s20937_s0 + $0x7c] sm:$0x10]  }
  0xe7   :  { %v9445_v35 = vld [vmem:[%s20937_s0 + $0x238] sm:$0x2]   ;;  %2142 = vrot.lane.b32.xlu1 %v2141_v60, %s11221_s3  ;;  %v9482_v47 = vld [vmem:[%s20937_s0 + $0x56] sm:$0x4]  }
  0xe8   :  { %v9446_v36 = vld [vmem:[%s20937_s0 + $0x257] sm:$0x4]   ;;  %v2082_v41 = vsel %vm5_vm0, %v9445_v35, %v9444_v32  ;;  %v9491_v32 = vld [vmem:[%s20937_s0 + $0x475] sm:$0x8]   ;;  %v13084_v35 = vpop.permute.xlu0 %642  }
  0xe9   :  { %v9447_v37 = vld [vmem:[%s20937_s0 + $0x276] sm:$0x8]   ;;  %v2086_v48 = vsel %vm9_vm1, %v9446_v36, %v2082_v41  ;;  %v9480_v41 = vld [vmem:[%s20937_s0 + $0x18] sm:$0x1]  }
  0xea   :  { %v9448_v43 = vld [vmem:[%s20937_s0 + $0x295] sm:$0x10]   ;;  %v2090_v53 = vsel %vm13_vm2, %v9447_v37, %v2086_v48  ;;  %v2260_v37 = vsel %vm9_vm1, %v9490_v28, %v2256_v31  ;;  %v9483_v48 = vld [vmem:[%s20937_s0 + $0x75] sm:$0x8]   ;;  %v8917_v31 = vld [vmem:[%s20937_s0 + $0x9b] sm:$0x20]  }
  0xeb   :  { %v9449_v44 = vld [vmem:[%s20937_s0 + $0x2b4] sm:$0x20]   ;;  %v2094_v61 = vsel %vm17_vm3, %v9448_v43, %v2090_v53  ;;  %v9484_v52 = vld [vmem:[%s20937_s0 + $0x94] sm:$0x10]  }
  0xec   :  { %v9450_v45 = vld [vmem:[%s20937_s0 + $0x2d3] sm:$0x40]   ;;  %v2098_v3 = vsel %vm21_vm4, %v9449_v44, %v2094_v61  ;;  %v2264_v44 = vsel %vm13_vm2, %v9491_v32, %v2260_v37  ;;  %v9485_v53 = vld [vmem:[%s20937_s0 + $0xb3] sm:$0x20]   ;;  %v8920_v61 = vld [vmem:[%s20937_s0 + $0x100] sm:$0x1]  }
  0xed   :  { %v9451_v49 = vld [vmem:[%s20937_s0 + $0x2f2] sm:$0x80]   ;;  %v2102_v9 = vsel %vm25_vm5, %v9450_v45, %v2098_v3  ;;  %v9481_v45 = vld [vmem:[%s20937_s0 + $0x37] sm:$0x2]   ;;  %v8923_v3 = vld [vmem:[%s20937_s0 + $0x15d] sm:$0x8]  }
  0xee   :  { %v9471_v50 = vld [vmem:[%s20937_s0 + $0x719] sm:$0x1]   ;;  %v2106_v17 = vsel %vm29_vm6, %v9451_v49, %v2102_v9  ;;  %v9487_v60 = vld [vmem:[%s20937_s0 + $0xf1] sm:$0x80]   ;;  %v8924_v9 = vld [vmem:[%s20937_s0 + $0x17c] sm:$0x10]  }
  0xef   :  { %v9472_v51 = vld [vmem:[%s20937_s0 + $0x738] sm:$0x2]   ;;  %2107 = vrot.lane.b32.xlu0 %v2106_v17, %s11221_s3  ;;  %v2_v17 = vld [vmem:[%s20937_s0] sm:$0x1]   ;;  %v9506_v37 = vld [vmem:[%s20937_s0 + $0x518] sm:$0x1]  }
  0xf0   :  { %v2187_v55 = vsel %vm5_vm0, %v9472_v51, %v9471_v50  ;;  %v9473_v56 = vld [vmem:[%s20937_s0 + $0x757] sm:$0x4]   ;;  %v2268_v50 = vsel %vm17_vm3, %v9492_v33, %v2264_v44  ;;  %v2222_v51 = vsel %vm5_vm0, %v9481_v45, %v9480_v41  ;;  %v8918_v32 = vld [vmem:[%s20937_s0 + $0xba] sm:$0x40]   ;;  %v9509_v45 = vld [vmem:[%s20937_s0 + $0x575] sm:$0x8]  }
  0xf1   :  { %v9474_v57 = vld [vmem:[%s20937_s0 + $0x776] sm:$0x8]   ;;  %v2191_v62 = vsel %vm9_vm1, %v9473_v56, %v2187_v55  ;;  %v9486_v55 = vld [vmem:[%s20937_s0 + $0xd2] sm:$0x40]   ;;  %v13121_v56 = vpop.permute.xlu1 %747   ;;  %v8919_v33 = vld [vmem:[%s20937_s0 + $0xd9] sm:$0x80]  }
  0xf2   :  { %v9475_v59 = vld [vmem:[%s20937_s0 + $0x795] sm:$0x10]   ;;  %v2195_v4 = vsel %vm13_vm2, %v9474_v57, %v2191_v62  ;;  %v2272_v57 = vsel %vm21_vm4, %v9493_v34, %v2268_v50 }
  0xf3   :  { %v9476_v63 = vld [vmem:[%s20937_s0 + $0x7b4] sm:$0x20]   ;;  %v2199_v10 = vsel %vm17_vm3, %v9475_v59, %v2195_v4  ;;  %v2226_v59 = vsel %vm9_vm1, %v9482_v47, %v2222_v51  ;;  %v2276_v62 = vsel %vm25_vm5, %v9494_v39, %v2272_v57  ;;  %v13143_v4 = vpop.permute.xlu0 %712   ;;  %v9507_v39 = vld [vmem:[%s20937_s0 + $0x537] sm:$0x2]  }
  0xf4   :  { %v9477_v0 = vld [vmem:[%s20937_s0 + $0x7d3] sm:$0x40]   ;;  %v2203_v18 = vsel %vm21_vm4, %v9476_v63, %v2199_v10  ;;  %v2230_v63 = vsel %vm13_vm2, %v9483_v48, %v2226_v59  ;;  %v8925_v10 = vld [vmem:[%s20937_s0 + $0x19b] sm:$0x20]   ;;  %v2326_v44 = vsel %vm5_vm0, %v9507_v39, %v9506_v37  ;;  %v9510_v47 = vld [vmem:[%s20937_s0 + $0x594] sm:$0x10]  }
  0xf5   :  { %v9478_v1 = vld [vmem:[%s20937_s0 + $0x7f2] sm:$0x80]   ;;  %v2207_v22 = vsel %vm25_vm5, %v9477_v0, %v2203_v18  ;;  %v8921_v0 = vld [vmem:[%s20937_s0 + $0x11f] sm:$0x2]   ;;  %v13181_v27 = vpop.permute.xlu1 %817   ;;  %v9511_v48 = vld [vmem:[%s20937_s0 + $0x5b3] sm:$0x20]  }
  0xf6   :  { %v9462_v5 = vld [vmem:[%s20937_s0 + $0x319] sm:$0x1]   ;;  %v2211_v29 = vsel %vm29_vm6, %v9478_v1, %v2207_v22  ;;  %v8922_v1 = vld [vmem:[%s20937_s0 + $0x13e] sm:$0x4]   ;;  %v9497_v57 = vld [vmem:[%s20937_s0 + $0x118] sm:$0x1]  }
  0xf7   :  { %v9463_v6 = vld [vmem:[%s20937_s0 + $0x338] sm:$0x2]   ;;  %2212 = vrot.lane.b32.xlu1 %v2211_v29, %s11221_s3  ;;  %v8913_v18 = vld [vmem:[%s20937_s0 + $0x1f] sm:$0x2]  }
  0xf8   :  { %v9464_v7 = vld [vmem:[%s20937_s0 + $0x357] sm:$0x4]   ;;  %v2152_v11 = vsel %vm5_vm0, %v9463_v6, %v9462_v5  ;;  %v2280_v5 = vsel %vm29_vm6, %v9495_v40, %v2276_v62  ;;  %v2234_v6 = vsel %vm17_vm3, %v9484_v52, %v2230_v63  ;;  %v8914_v22 = vld [vmem:[%s20937_s0 + $0x3e] sm:$0x4]   ;;  %v9508_v40 = vld [vmem:[%s20937_s0 + $0x556] sm:$0x4]  }
  0xf9   :  { %v9465_v12 = vld [vmem:[%s20937_s0 + $0x376] sm:$0x8]   ;;  %v2156_v19 = vsel %vm9_vm1, %v9464_v7, %v2152_v11  ;;  %v38_v7 = vsel %vm5_vm0, %v8921_v0, %v8920_v61  ;;  %v8926_v11 = vld [vmem:[%s20937_s0 + $0x1ba] sm:$0x40]   ;;  %v2330_v52 = vsel %vm9_vm1, %v9508_v40, %v2326_v44  ;;  %v9498_v61 = vld [vmem:[%s20937_s0 + $0x137] sm:$0x2]   ;;  %v13248_v0 = vpop.permute.xlu1 %886  }
  0xfa   :  { %v9466_v14 = vld [vmem:[%s20937_s0 + $0x395] sm:$0x10]   ;;  %v2160_v23 = vsel %vm13_vm2, %v9465_v12, %v2156_v19  ;;  %v2238_v12 = vsel %vm21_vm4, %v9485_v53, %v2234_v6  ;;  %v9512_v53 = vld [vmem:[%s20937_s0 + $0x5d2] sm:$0x40]   ;;  %v8952_v44 = vld [vmem:[%s20937_s0 + $0x49b] sm:$0x20]  }
  0xfb   :  { %v9467_v15 = vld [vmem:[%s20937_s0 + $0x3b4] sm:$0x20]   ;;  %v2164_v30 = vsel %vm17_vm3, %v9466_v14, %v2160_v23  ;;  %2281 = vrot.lane.b32.xlu1 %v2280_v5, %s11222_s20  ;;  %v42_v14 = vsel %vm9_vm1, %v8922_v1, %v38_v7  ;;  %v2242_v19 = vsel %vm25_vm5, %v9486_v55, %v2238_v12  ;;  %v8915_v23 = vld [vmem:[%s20937_s0 + $0x5d] sm:$0x8]   ;;  %v9513_v55 = vld [vmem:[%s20937_s0 + $0x5f1] sm:$0x80]  }
  0xfc   :  { %v9468_v20 = vld [vmem:[%s20937_s0 + $0x3d3] sm:$0x40]   ;;  %v2168_v36 = vsel %vm21_vm4, %v9467_v15, %v2164_v30  ;;  %v8927_v15 = vld [vmem:[%s20937_s0 + $0x1d9] sm:$0x80]   ;;  %v2246_v28 = vsel %vm29_vm6, %v9487_v60, %v2242_v19  ;;  %v2334_v60 = vsel %vm13_vm2, %v9509_v45, %v2330_v52  ;;  %v9499_v62 = vld [vmem:[%s20937_s0 + $0x156] sm:$0x4]  }
  0xfd   :  { %v9469_v21 = vld [vmem:[%s20937_s0 + $0x3f2] sm:$0x80]   ;;  %v2172_v43 = vsel %vm25_vm5, %v9468_v20, %v2168_v36  ;;  %v46_v20 = vsel %vm13_vm2, %v8923_v3, %v42_v14  ;;  %v9500_v63 = vld [vmem:[%s20937_s0 + $0x175] sm:$0x8]   ;;  %v2338_v1 = vsel %vm17_vm3, %v9510_v47, %v2334_v60  ;;  %v2291_v3 = vsel %vm5_vm0, %v9498_v61, %v9497_v57  ;;  %v8956_v12 = vld [vmem:[%s20937_s0 + $0x500] sm:$0x1]   ;;  %v13337_v45 = vpop.permute.xlu1 %956  }
  0xfe   :  { %v2176_v49 = vsel %vm29_vm6, %v9469_v21, %v2172_v43  ;;  %v6_v21 = vsel %vm5_vm0, %v8913_v18, %v2_v17  ;;  %v50_v29 = vsel %vm17_vm3, %v8924_v9, %v46_v20  ;;  %v9501_v5 = vld [vmem:[%s20937_s0 + $0x194] sm:$0x10]   ;;  %v2342_v9 = vsel %vm21_vm4, %v9511_v48, %v2338_v1  ;;  %v8957_v14 = vld [vmem:[%s20937_s0 + $0x51f] sm:$0x2]  }
  0xff   :  { %2177 = vrot.lane.b32.xlu0 %v2176_v49, %s11221_s3  ;;  %v10_v30 = vsel %vm9_vm1, %v8914_v22, %v6_v21  ;;  %v54_v34 = vsel %vm21_vm4, %v8925_v10, %v50_v29  ;;  %v13219_v49 = vpop.permute.xlu0 %782   ;;  %v9502_v6 = vld [vmem:[%s20937_s0 + $0x1b3] sm:$0x20]   ;;  %v2295_v10 = vsel %vm9_vm1, %v9499_v62, %v2291_v3  ;;  %v170_v17 = vsel %vm5_vm0, %v8957_v14, %v8956_v12  ;;  %v8958_v18 = vld [vmem:[%s20937_s0 + $0x53e] sm:$0x4]  }
 0x100   :  { %v14_v36 = vsel %vm13_vm2, %v8915_v23, %v10_v30  ;;  %v58_v41 = vsel %vm25_vm5, %v8926_v11, %v54_v34  ;;  %v9503_v7 = vld [vmem:[%s20937_s0 + $0x1d2] sm:$0x40]   ;;  %v8959_v19 = vld [vmem:[%s20937_s0 + $0x55d] sm:$0x8]  }
 0x101   :  { %v18_v43 = vsel %vm17_vm3, %v8916_v24, %v14_v36  ;;  %v62_v50 = vsel %vm29_vm6, %v8927_v15, %v58_v41  ;;  %v9504_v11 = vld [vmem:[%s20937_s0 + $0x1f1] sm:$0x80]   ;;  %v2299_v15 = vsel %vm13_vm2, %v9500_v63, %v2295_v10  ;;  %v8960_v20 = vld [vmem:[%s20937_s0 + $0x57c] sm:$0x10]   ;;  %v174_v24 = vsel %vm9_vm1, %v8958_v18, %v170_v17 }
 0x102   :  { %v22_v51 = vsel %vm21_vm4, %v8917_v31, %v18_v43  ;;  %8928 = vst.msk [vmem:[%s20938_s1 + $0x8] sm:$0xff] %vm31_vm7, %v62_v50   ;;  %v2303_v23 = vsel %vm17_vm3, %v9501_v5, %v2299_v15  ;;  %v8962_v29 = vld [vmem:[%s20937_s0 + $0x5ba] sm:$0x40]   ;;  %v9526_v60 = vld [vmem:[%s20937_s0 + $0x656] sm:$0x4]  }
 0x103   :  { %2247 = vrot.lane.b32.xlu0 %v2246_v28, %s11222_s20  ;;  %v26_v59 = vsel %vm25_vm5, %v8918_v32, %v22_v51  ;;  %9008 = vst.msk [vmem:[%s20938_s1 + $0x8] sm:$0xff] %vm296_vm8, %v12717_v42   ;;  %v13299_v21 = vpop.permute.xlu0 %852   ;;  %v8961_v28 = vld [vmem:[%s20937_s0 + $0x59b] sm:$0x20]   ;;  %v2307_v31 = vsel %vm21_vm4, %v9502_v6, %v2303_v23  ;;  %v178_v32 = vsel %vm13_vm2, %v8959_v19, %v174_v24  ;;  %v9527_v61 = vld [vmem:[%s20937_s0 + $0x675] sm:$0x8]   ;;  %v13409_v19 = vpop.permute.xlu1 %1026  }
 0x104   :  { %v30_v42 = vsel %vm29_vm6, %v8919_v33, %v26_v59  ;;  %v8963_v30 = vld [vmem:[%s20937_s0 + $0x5d9] sm:$0x80]   ;;  %v2311_v37 = vsel %vm25_vm5, %v9503_v7, %v2307_v31  ;;  %v182_v39 = vsel %vm17_vm3, %v8960_v20, %v178_v32  ;;  %v9525_v59 = vld [vmem:[%s20937_s0 + $0x637] sm:$0x2]   ;;  %9079 = vst.msk [vmem:[%s20938_s1 + $0x8] sm:$0xff] %vm575_vm9, %v13084_v35  }
 0x105   :  { %32 = vst.msk [vmem:[%s20938_s1] sm:$0xff] %vm31_vm7, %v30_v42   ;;  %v8947_v33 = vld [vmem:[%s20937_s0 + $0x400] sm:$0x1]   ;;  %v2315_v47 = vsel %vm29_vm6, %v9504_v11, %v2311_v37  ;;  %v186_v48 = vsel %vm21_vm4, %v8961_v28, %v182_v39  ;;  %v9528_v3 = vld [vmem:[%s20937_s0 + $0x694] sm:$0x10]  }
 0x106   :  { %297 = vst.msk [vmem:[%s20938_s1] sm:$0xff] %vm296_vm8, %v12743_v54   ;;  %v2346_v54 = vsel %vm25_vm5, %v9512_v53, %v2342_v9  ;;  %v8948_v34 = vld [vmem:[%s20937_s0 + $0x41f] sm:$0x2]   ;;  %v9524_v53 = vld [vmem:[%s20937_s0 + $0x618] sm:$0x1]  }
 0x107   :  { %v2350_v22 = vsel %vm29_vm6, %v9513_v55, %v2346_v54  ;;  %v8949_v36 = vld [vmem:[%s20937_s0 + $0x43e] sm:$0x4]   ;;  %v137_v40 = vsel %vm5_vm0, %v8948_v34, %v8947_v33  ;;  %2316 = vrot.lane.b32.xlu0 %v2315_v47, %s11222_s20  ;;  %v190_v55 = vsel %vm25_vm5, %v8962_v29, %v186_v48  ;;  %v13363_v62 = vpop.permute.xlu0 %921   ;;  %v2396_v1 = vsel %vm5_vm0, %v9525_v59, %v9524_v53  ;;  %v9529_v5 = vld [vmem:[%s20937_s0 + $0x6b3] sm:$0x20]  }
 0x108   :  { %2351 = vrot.lane.b32.xlu1 %v2350_v22, %s11222_s20  ;;  %v8950_v41 = vld [vmem:[%s20937_s0 + $0x45d] sm:$0x8]   ;;  %v141_v50 = vsel %vm9_vm1, %v8949_v36, %v137_v40  ;;  %v194_v63 = vsel %vm29_vm6, %v8963_v30, %v190_v55  ;;  %v9530_v6 = vld [vmem:[%s20937_s0 + $0x6d2] sm:$0x40]   ;;  %v2400_v9 = vsel %vm9_vm1, %v9526_v60, %v2396_v1  ;;  %576 = vst.msk [vmem:[%s20938_s1] sm:$0xff] %vm575_vm9, %v13023_v2  }
 0x109   :  { %v8951_v43 = vld [vmem:[%s20937_s0 + $0x47c] sm:$0x10]   ;;  %v145_v57 = vsel %vm13_vm2, %v8950_v41, %v141_v50  ;;  %8964 = vst.msk [vmem:[%s20938_s1 + $0x28] sm:$0xff] %vm31_vm7, %v194_v63   ;;  %v9531_v10 = vld [vmem:[%s20937_s0 + $0x6f1] sm:$0x80]   ;;  %v2404_v14 = vsel %vm13_vm2, %v9527_v61, %v2400_v9  ;;  %v13481_v61 = vpop.permute.xlu1 %1096  }
 0x10a   :  { %v8953_v51 = vld [vmem:[%s20937_s0 + $0x4ba] sm:$0x40]   ;;  %v149_v42 = vsel %vm17_vm3, %v8951_v43, %v145_v57  ;;  %v9515_v11 = vld [vmem:[%s20937_s0 + $0x218] sm:$0x1]   ;;  %9017 = vst.msk [vmem:[%s20938_s1 + $0x28] sm:$0xff] %vm296_vm8, %v12781_v8   ;;  %v2408_v22 = vsel %vm17_vm3, %v9528_v3, %v2404_v14 }
 0x10b   :  { %v8954_v52 = vld [vmem:[%s20937_s0 + $0x4d9] sm:$0x80]   ;;  %v153_v7 = vsel %vm21_vm4, %v8952_v44, %v149_v42  ;;  %v9516_v12 = vld [vmem:[%s20937_s0 + $0x237] sm:$0x2]   ;;  %v2412_v30 = vsel %vm21_vm4, %v9529_v5, %v2408_v22  ;;  %v13455_v43 = vpop.permute.xlu0 %991   ;;  %v9579_v2 = vld [vmem:[%s20937_s0 + $0x555] sm:$0x4]  }
 0x10c   :  { %v157_v8 = vsel %vm25_vm5, %v8953_v51, %v153_v7  ;;  %v2361_v54 = vsel %vm5_vm0, %v9516_v12, %v9515_v11  ;;  %v9517_v15 = vld [vmem:[%s20937_s0 + $0x256] sm:$0x4]   ;;  %v8965_v32 = vld [vmem:[%s20937_s0 + $0x600] sm:$0x1]   ;;  %9088 = vst.msk [vmem:[%s20938_s1 + $0x28] sm:$0xff] %vm575_vm9, %v13049_v16  }
 0x10d   :  { %v9518_v17 = vld [vmem:[%s20937_s0 + $0x275] sm:$0x8]   ;;  %v161_v20 = vsel %vm29_vm6, %v8954_v52, %v157_v8  ;;  %v2365_v23 = vsel %vm9_vm1, %v9517_v15, %v2361_v54  ;;  %v8966_v33 = vld [vmem:[%s20937_s0 + $0x61f] sm:$0x2]   ;;  %855 = vst.msk [vmem:[%s20938_s1] sm:$0xff] %vm854_vm10, %v13299_v21   ;;  %9159 = vst.msk [vmem:[%s20938_s1 + $0x28] sm:$0xff] %vm854_vm10, %v13337_v45  }
 0x10e   :  { %v9519_v18 = vld [vmem:[%s20937_s0 + $0x294] sm:$0x10]   ;;  %8955 = vst.msk [vmem:[%s20938_s1 + $0x20] sm:$0xff] %vm31_vm7, %v161_v20   ;;  %v2369_v31 = vsel %vm13_vm2, %v9518_v17, %v2365_v23  ;;  %v8967_v34 = vld [vmem:[%s20937_s0 + $0x63e] sm:$0x4]   ;;  %v203_v37 = vsel %vm5_vm0, %v8966_v33, %v8965_v32 }
 0x10f   :  { %v9520_v24 = vld [vmem:[%s20937_s0 + $0x2b3] sm:$0x20]   ;;  %8999 = vst.msk [vmem:[%s20938_s1 + $0x20] sm:$0xff] %vm296_vm8, %v12819_v26   ;;  %v2416_v26 = vsel %vm25_vm5, %v9530_v6, %v2412_v30  ;;  %v2373_v36 = vsel %vm17_vm3, %v9519_v18, %v2369_v31  ;;  %v8968_v39 = vld [vmem:[%s20937_s0 + $0x65d] sm:$0x8]   ;;  %v207_v48 = vsel %vm9_vm1, %v8967_v34, %v203_v37  ;;  %v13519_v20 = vpop.permute.xlu0 %1061  }
 0x110   :  { %v9521_v28 = vld [vmem:[%s20937_s0 + $0x2d2] sm:$0x40]   ;;  %v8969_v40 = vld [vmem:[%s20937_s0 + $0x67c] sm:$0x10]   ;;  %v2420_v44 = vsel %vm29_vm6, %v9531_v10, %v2416_v26  ;;  %v2377_v47 = vsel %vm21_vm4, %v9520_v24, %v2373_v36  ;;  %v211_v55 = vsel %vm13_vm2, %v8968_v39, %v207_v48  ;;  %9070 = vst.msk [vmem:[%s20938_s1 + $0x20] sm:$0xff] %vm575_vm9, %v12985_v46  }
 0x111   :  { %v9522_v29 = vld [vmem:[%s20937_s0 + $0x2f1] sm:$0x80]   ;;  %v8970_v41 = vld [vmem:[%s20937_s0 + $0x69b] sm:$0x20]   ;;  %2421 = vrot.lane.b32.xlu1 %v2420_v44, %s11222_s20  ;;  %v2381_v53 = vsel %vm25_vm5, %v9521_v28, %v2377_v47  ;;  %v215_v42 = vsel %vm17_vm3, %v8969_v40, %v211_v55  ;;  %v13565_v44 = vpop.permute.xlu1 %1165   ;;  %v9578_v46 = vld [vmem:[%s20937_s0 + $0x536] sm:$0x2]  }
 0x112   :  { %v8971_v50 = vld [vmem:[%s20937_s0 + $0x6ba] sm:$0x40]   ;;  %v2385_v63 = vsel %vm29_vm6, %v9522_v29, %v2381_v53  ;;  %v219_v7 = vsel %vm21_vm4, %v8970_v41, %v215_v42  ;;  %v9542_v11 = vld [vmem:[%s20937_s0 + $0x718] sm:$0x1]   ;;  %9141 = vst.msk [vmem:[%s20938_s1 + $0x20] sm:$0xff] %vm854_vm10, %v13248_v0   ;;  %9150 = vst.msk [vmem:[%s20938_s1 + $0x8] sm:$0xff] %vm854_vm10, %v13363_v62  }
 0x113   :  { %v8972_v51 = vld [vmem:[%s20937_s0 + $0x6d9] sm:$0x80]   ;;  %2386 = vrot.lane.b32.xlu0 %v2385_v63, %s11222_s20  ;;  %v9543_v12 = vld [vmem:[%s20937_s0 + $0x737] sm:$0x2]   ;;  %v223_v8 = vsel %vm25_vm5, %v8971_v50, %v219_v7  ;;  %v13611_v7 = vpop.permute.xlu0 %1131   ;;  %v9650_v21 = vld [vmem:[%s20937_s0 + $0x554] sm:$0x4]  }
 0x114   :  { %v8929_v52 = vld [vmem:[%s20937_s0 + $0x200] sm:$0x1]   ;;  %v2466_v54 = vsel %vm5_vm0, %v9543_v12, %v9542_v11  ;;  %v9544_v15 = vld [vmem:[%s20937_s0 + $0x756] sm:$0x4]   ;;  %v227_v22 = vsel %vm29_vm6, %v8972_v51, %v223_v8  ;;  %9212 = vst.msk [vmem:[%s20938_s1 + $0x20] sm:$0xff] %vm1133_vm11, %v13565_v44   ;;  %1134 = vst.msk [vmem:[%s20938_s1] sm:$0xff] %vm1133_vm11, %v13611_v7  }
 0x115   :  { %v8930_v57 = vld [vmem:[%s20937_s0 + $0x21f] sm:$0x2]   ;;  %v9545_v17 = vld [vmem:[%s20937_s0 + $0x775] sm:$0x8]   ;;  %v2470_v24 = vsel %vm9_vm1, %v9544_v15, %v2466_v54  ;;  %8973 = vst.msk [vmem:[%s20938_s1 + $0x30] sm:$0xff] %vm31_vm7, %v227_v22  }
 0x116   :  { %v8931_v59 = vld [vmem:[%s20937_s0 + $0x23e] sm:$0x4]   ;;  %v71_v1 = vsel %vm5_vm0, %v8930_v57, %v8929_v52  ;;  %v9546_v18 = vld [vmem:[%s20937_s0 + $0x794] sm:$0x10]   ;;  %v2474_v32 = vsel %vm13_vm2, %v9545_v17, %v2470_v24  ;;  %9035 = vst.msk [vmem:[%s20938_s1 + $0x30] sm:$0xff] %vm296_vm8, %v12845_v38  }
 0x117   :  { %v8932_v60 = vld [vmem:[%s20937_s0 + $0x25d] sm:$0x8]   ;;  %v75_v9 = vsel %vm9_vm1, %v8931_v59, %v71_v1  ;;  %v9547_v28 = vld [vmem:[%s20937_s0 + $0x7b3] sm:$0x20]   ;;  %v2478_v36 = vsel %vm17_vm3, %v9546_v18, %v2474_v32  ;;  %9106 = vst.msk [vmem:[%s20938_s1 + $0x30] sm:$0xff] %vm575_vm9, %v13121_v56  }
 0x118   :  { %v8933_v3 = vld [vmem:[%s20937_s0 + $0x27c] sm:$0x10]   ;;  %v79_v14 = vsel %vm13_vm2, %v8932_v60, %v75_v9  ;;  %v9548_v29 = vld [vmem:[%s20937_s0 + $0x7d2] sm:$0x40]   ;;  %v2482_v48 = vsel %vm21_vm4, %v9547_v28, %v2478_v36  ;;  %v9561_v36 = vld [vmem:[%s20937_s0 + $0x455] sm:$0x4]  }
 0x119   :  { %v8934_v5 = vld [vmem:[%s20937_s0 + $0x29b] sm:$0x20]   ;;  %v83_v23 = vsel %vm17_vm3, %v8933_v3, %v79_v14  ;;  %v9549_v30 = vld [vmem:[%s20937_s0 + $0x7f1] sm:$0x80]   ;;  %v2486_v55 = vsel %vm25_vm5, %v9548_v29, %v2482_v48  ;;  %v9564_v48 = vld [vmem:[%s20937_s0 + $0x4b2] sm:$0x20]  }
 0x11a   :  { %v8935_v6 = vld [vmem:[%s20937_s0 + $0x2ba] sm:$0x40]   ;;  %v87_v31 = vsel %vm21_vm4, %v8934_v5, %v83_v23  ;;  %v9533_v33 = vld [vmem:[%s20937_s0 + $0x318] sm:$0x1]   ;;  %v13637_v23 = vpop.permute.xlu1 %1235   ;;  %9177 = vst.msk [vmem:[%s20938_s1 + $0x30] sm:$0xff] %vm854_vm10, %v13409_v19  }
 0x11b   :  { %v8936_v10 = vld [vmem:[%s20937_s0 + $0x2d9] sm:$0x80]   ;;  %v9534_v34 = vld [vmem:[%s20937_s0 + $0x337] sm:$0x2]   ;;  %v91_v38 = vsel %vm25_vm5, %v8935_v6, %v87_v31  ;;  %v9719_v44 = vld [vmem:[%s20937_s0 + $0x515] sm:$0x1]  }
 0x11c   :  { %v9535_v26 = vld [vmem:[%s20937_s0 + $0x356] sm:$0x4]   ;;  %v2431_v37 = vsel %vm5_vm0, %v9534_v34, %v9533_v33  ;;  %v95_v47 = vsel %vm29_vm6, %v8936_v10, %v91_v38  ;;  %v8974_v53 = vld [vmem:[%s20937_s0 + $0x700] sm:$0x1]   ;;  %v9560_v38 = vld [vmem:[%s20937_s0 + $0x436] sm:$0x2]  }
 0x11d   :  { %v9536_v39 = vld [vmem:[%s20937_s0 + $0x375] sm:$0x8]   ;;  %v2435_v50 = vsel %vm9_vm1, %v9535_v26, %v2431_v37  ;;  %8937 = vst.msk [vmem:[%s20938_s1 + $0x10] sm:$0xff] %vm31_vm7, %v95_v47   ;;  %v8975_v59 = vld [vmem:[%s20937_s0 + $0x71f] sm:$0x2]  }
 0x11e   :  { %v9537_v40 = vld [vmem:[%s20937_s0 + $0x394] sm:$0x10]   ;;  %v2439_v57 = vsel %vm13_vm2, %v9536_v39, %v2435_v50  ;;  %v8976_v60 = vld [vmem:[%s20937_s0 + $0x73e] sm:$0x4]   ;;  %9026 = vst.msk [vmem:[%s20938_s1 + $0x10] sm:$0xff] %vm296_vm8, %v12883_v58   ;;  %v2490_v58 = vsel %vm29_vm6, %v9549_v30, %v2486_v55  ;;  %v236_v1 = vsel %vm5_vm0, %v8975_v59, %v8974_v53  ;;  %v13675_v50 = vpop.permute.xlu0 %1200  }
 0x11f   :  { %v9538_v41 = vld [vmem:[%s20937_s0 + $0x3b3] sm:$0x20]   ;;  %v8977_v63 = vld [vmem:[%s20937_s0 + $0x75d] sm:$0x8]   ;;  %v2443_v42 = vsel %vm17_vm3, %v9537_v40, %v2439_v57  ;;  %2491 = vrot.lane.b32.xlu1 %v2490_v58, %s11222_s20  ;;  %v240_v10 = vsel %vm9_vm1, %v8976_v60, %v236_v1  ;;  %v9559_v26 = vld [vmem:[%s20937_s0 + $0x417] sm:$0x1]  }
 0x120   :  { %v9539_v51 = vld [vmem:[%s20937_s0 + $0x3d2] sm:$0x40]   ;;  %v8978_v3 = vld [vmem:[%s20937_s0 + $0x77c] sm:$0x10]   ;;  %v2447_v9 = vsel %vm21_vm4, %v9538_v41, %v2443_v42  ;;  %v244_v54 = vsel %vm13_vm2, %v8977_v63, %v240_v10  ;;  %v2535_v40 = vsel %vm5_vm0, %v9560_v38, %v9559_v26  ;;  %v9562_v41 = vld [vmem:[%s20937_s0 + $0x474] sm:$0x8]  }
 0x121   :  { %v9540_v52 = vld [vmem:[%s20937_s0 + $0x3f1] sm:$0x80]   ;;  %v8979_v5 = vld [vmem:[%s20937_s0 + $0x79b] sm:$0x20]   ;;  %v2451_v14 = vsel %vm25_vm5, %v9539_v51, %v2447_v9  ;;  %v248_v28 = vsel %vm17_vm3, %v8978_v3, %v244_v54  ;;  %v9563_v47 = vld [vmem:[%s20937_s0 + $0x493] sm:$0x10]   ;;  %v2539_v53 = vsel %vm9_vm1, %v9561_v36, %v2535_v40 }
 0x122   :  { %v8980_v6 = vld [vmem:[%s20937_s0 + $0x7ba] sm:$0x40]   ;;  %v2455_v24 = vsel %vm29_vm6, %v9540_v52, %v2451_v14  ;;  %v252_v33 = vsel %vm21_vm4, %v8979_v5, %v248_v28  ;;  %v9565_v55 = vld [vmem:[%s20937_s0 + $0x4d1] sm:$0x40]   ;;  %v2543_v63 = vsel %vm13_vm2, %v9562_v41, %v2539_v53  ;;  %9097 = vst.msk [vmem:[%s20938_s1 + $0x10] sm:$0xff] %vm575_vm9, %v13143_v4   ;;  %v13786_v16 = vpop.permute.xlu0 %1270  }
 0x123   :  { %v8981_v11 = vld [vmem:[%s20937_s0 + $0x7d9] sm:$0x80]   ;;  %2456 = vrot.lane.b32.xlu0 %v2455_v24, %s11222_s20  ;;  %v256_v37 = vsel %vm25_vm5, %v8980_v6, %v252_v33  ;;  %v9566_v57 = vld [vmem:[%s20937_s0 + $0x4f0] sm:$0x80]   ;;  %v2547_v3 = vsel %vm17_vm3, %v9563_v47, %v2543_v63  ;;  %9168 = vst.msk [vmem:[%s20938_s1 + $0x10] sm:$0xff] %vm854_vm10, %v13455_v43  }
 0x124   :  { %v8938_v12 = vld [vmem:[%s20937_s0 + $0x300] sm:$0x1]   ;;  %v260_v51 = vsel %vm29_vm6, %v8981_v11, %v256_v37  ;;  %v9551_v59 = vld [vmem:[%s20937_s0 + $0x17] sm:$0x1]   ;;  %v13721_v11 = vpop.permute.xlu1 %1305   ;;  %v9720_v7 = vld [vmem:[%s20937_s0 + $0x534] sm:$0x2]  }
 0x125   :  { %v8939_v8 = vld [vmem:[%s20937_s0 + $0x31f] sm:$0x2]   ;;  %8982 = vst.msk [vmem:[%s20938_s1 + $0x38] sm:$0xff] %vm31_vm7, %v260_v51   ;;  %v9552_v58 = vld [vmem:[%s20937_s0 + $0x36] sm:$0x2]  }
 0x126   :  { %v104_v15 = vsel %vm5_vm0, %v8939_v8, %v8938_v12  ;;  %v8940_v17 = vld [vmem:[%s20937_s0 + $0x33e] sm:$0x4]   ;;  %v9553_v42 = vld [vmem:[%s20937_s0 + $0x55] sm:$0x4]   ;;  %9053 = vst.msk [vmem:[%s20938_s1 + $0x38] sm:$0xff] %vm296_vm8, %v12921_v13   ;;  %v2501_v5 = vsel %vm5_vm0, %v9552_v58, %v9551_v59  ;;  %v2551_v12 = vsel %vm21_vm4, %v9564_v48, %v2547_v3 }
 0x127   :  { %v8941_v18 = vld [vmem:[%s20937_s0 + $0x35d] sm:$0x8]   ;;  %v108_v29 = vsel %vm9_vm1, %v8940_v17, %v104_v15  ;;  %v9554_v1 = vld [vmem:[%s20937_s0 + $0x74] sm:$0x8]   ;;  %v2505_v8 = vsel %vm9_vm1, %v9553_v42, %v2501_v5  ;;  %9124 = vst.msk [vmem:[%s20938_s1 + $0x38] sm:$0xff] %vm575_vm9, %v13181_v27  }
 0x128   :  { %v8942_v22 = vld [vmem:[%s20937_s0 + $0x37c] sm:$0x10]   ;;  %v112_v34 = vsel %vm13_vm2, %v8941_v18, %v108_v29  ;;  %v9555_v6 = vld [vmem:[%s20937_s0 + $0x93] sm:$0x10]   ;;  %v2509_v15 = vsel %vm13_vm2, %v9554_v1, %v2505_v8  ;;  %v13829_v36 = vpop.permute.xlu1 %1375   ;;  %9195 = vst.msk [vmem:[%s20938_s1 + $0x38] sm:$0xff] %vm854_vm10, %v13481_v61  }
 0x129   :  { %v8943_v30 = vld [vmem:[%s20937_s0 + $0x39b] sm:$0x20]   ;;  %v116_v39 = vsel %vm17_vm3, %v8942_v22, %v112_v34  ;;  %v9556_v9 = vld [vmem:[%s20937_s0 + $0xb2] sm:$0x20]   ;;  %v2513_v56 = vsel %vm17_vm3, %v9555_v6, %v2509_v15  ;;  %v9653_v61 = vld [vmem:[%s20937_s0 + $0x5b1] sm:$0x20]  }
 0x12a   :  { %v8944_v31 = vld [vmem:[%s20937_s0 + $0x3ba] sm:$0x40]   ;;  %v120_v52 = vsel %vm21_vm4, %v8943_v30, %v116_v39  ;;  %v9557_v10 = vld [vmem:[%s20937_s0 + $0xd1] sm:$0x40]   ;;  %9230 = vst.msk [vmem:[%s20938_s1 + $0x28] sm:$0xff] %vm1133_vm11, %v13637_v23   ;;  %9221 = vst.msk [vmem:[%s20938_s1 + $0x8] sm:$0xff] %vm1133_vm11, %v13675_v50  }
 0x12b   :  { %v8945_v32 = vld [vmem:[%s20937_s0 + $0x3d9] sm:$0x80]   ;;  %v124_v60 = vsel %vm25_vm5, %v8944_v31, %v120_v52  ;;  %v9558_v14 = vld [vmem:[%s20937_s0 + $0xf0] sm:$0x80]   ;;  %9248 = vst.msk [vmem:[%s20938_s1 + $0x30] sm:$0xff] %vm1133_vm11, %v13721_v11   ;;  %9239 = vst.msk [vmem:[%s20938_s1 + $0x10] sm:$0xff] %vm1133_vm11, %v13786_v16   ;;  %v3163_v16 = vsel %vm5_vm0, %v9720_v7, %v9719_v44 }
 0x12c   :  { %v128_v13 = vsel %vm29_vm6, %v8945_v32, %v124_v60  ;;  %v9577_v54 = vld [vmem:[%s20937_s0 + $0x517] sm:$0x1]   ;;  %9266 = vst.msk [vmem:[%s20938_s1 + $0x38] sm:$0xff] %vm1133_vm11, %v13829_v36   ;;  %v9722_v36 = vld [vmem:[%s20937_s0 + $0x572] sm:$0x8]  }
 0x12d   :  { %8946 = vst.msk [vmem:[%s20938_s1 + $0x18] sm:$0xff] %vm31_vm7, %v128_v13   ;;  %v9580_v17 = vld [vmem:[%s20937_s0 + $0x574] sm:$0x8]   ;;  %v2605_v4 = vsel %vm5_vm0, %v9578_v46, %v9577_v54  ;;  %v13867_v13 = vpop.permute.xlu0 %1340   ;;  %v13893_v46 = vpop.permute.xlu1 %1444   ;;  %vm2528_vm7 = vcmask 786144  }
 0x12e   :  { %9044 = vst.msk [vmem:[%s20938_s1 + $0x18] sm:$0xff] %vm296_vm8, %v12947_v25   ;;  %v2555_v25 = vsel %vm25_vm5, %v9565_v55, %v2551_v12  ;;  %v9581_v27 = vld [vmem:[%s20937_s0 + $0x593] sm:$0x10]   ;;  %v2609_v24 = vsel %vm9_vm1, %v9579_v2, %v2605_v4  ;;  %vm2807_vm8 = vcmask 753344  }
 0x12f   :  { %v2559_v35 = vsel %vm29_vm6, %v9566_v57, %v2555_v25  ;;  %v9582_v18 = vld [vmem:[%s20937_s0 + $0x5b2] sm:$0x20]   ;;  %9115 = vst.msk [vmem:[%s20938_s1 + $0x18] sm:$0xff] %vm575_vm9, %v13219_v49   ;;  %v2517_v49 = vsel %vm21_vm4, %v9556_v9, %v2513_v56  ;;  %v2613_v32 = vsel %vm13_vm2, %v9580_v17, %v2609_v24  ;;  %vm3086_vm9 = vcmask 720544  }
 0x130   :  { %v9583_v22 = vld [vmem:[%s20937_s0 + $0x5d1] sm:$0x40]   ;;  %2560 = vrot.lane.b32.xlu1 %v2559_v35, %s11223_s13  ;;  %v2521_v31 = vsel %vm25_vm5, %v9557_v10, %v2517_v49  ;;  %v2617_v39 = vsel %vm17_vm3, %v9581_v27, %v2613_v32  ;;  %9186 = vst.msk [vmem:[%s20938_s1 + $0x18] sm:$0xff] %vm854_vm10, %v13519_v20   ;;  %v9654_v20 = vld [vmem:[%s20937_s0 + $0x5d0] sm:$0x40]   ;;  %vm3365_vm10 = vcmask 687744  }
 0x131   :  { %v9584_v28 = vld [vmem:[%s20937_s0 + $0x5f0] sm:$0x80]   ;;  %v2525_v37 = vsel %vm29_vm6, %v9558_v14, %v2521_v31  ;;  %v2621_v51 = vsel %vm21_vm4, %v9582_v18, %v2617_v39  ;;  %9257 = vst.msk [vmem:[%s20938_s1 + $0x18] sm:$0xff] %vm1133_vm11, %v13867_v13   ;;  %v9723_v13 = vld [vmem:[%s20937_s0 + $0x591] sm:$0x10]   ;;  %vm3644_vm11 = vcmask 654944  }
 0x132   :  { %v9568_v29 = vld [vmem:[%s20937_s0 + $0x117] sm:$0x1]   ;;  %2526 = vrot.lane.b32.xlu0 %v2525_v37, %s11223_s13  ;;  %v2625_v59 = vsel %vm25_vm5, %v9583_v22, %v2621_v51  ;;  %9283 = vst.msk [vmem:[%s20938_s1 + $0x20] sm:$0xff] %vm1412_vm12, %v13893_v46   ;;  %v9791_v46 = vld [vmem:[%s20937_s0 + $0x533] sm:$0x2]  }
 0x133   :  { %v9569_v30 = vld [vmem:[%s20937_s0 + $0x136] sm:$0x2]   ;;  %v2629_v3 = vsel %vm29_vm6, %v9584_v28, %v2625_v59 }
 0x134   :  { %v2570_v33 = vsel %vm5_vm0, %v9569_v30, %v9568_v29  ;;  %v9570_v34 = vld [vmem:[%s20937_s0 + $0x155] sm:$0x4]   ;;  %2630 = vrot.lane.b32.xlu1 %v2629_v3, %s11223_s13 }
 0x135   :  { %v9571_v26 = vld [vmem:[%s20937_s0 + $0x174] sm:$0x8]   ;;  %v2574_v40 = vsel %vm9_vm1, %v9570_v34, %v2570_v33 }
 0x136   :  { %v9572_v38 = vld [vmem:[%s20937_s0 + $0x193] sm:$0x10]   ;;  %v2578_v52 = vsel %vm13_vm2, %v9571_v26, %v2574_v40  ;;  %v13931_v26 = vpop.permute.xlu0 %1410  }
 0x137   :  { %v9573_v41 = vld [vmem:[%s20937_s0 + $0x1b2] sm:$0x20]   ;;  %v2582_v60 = vsel %vm17_vm3, %v9572_v38, %v2578_v52  ;;  %1413 = vst.msk [vmem:[%s20938_s1] sm:$0xff] %vm1412_vm12, %v13931_v26   ;;  %v9792_v26 = vld [vmem:[%s20937_s0 + $0x552] sm:$0x4]  }
 0x138   :  { %v9574_v47 = vld [vmem:[%s20937_s0 + $0x1d1] sm:$0x40]   ;;  %v2586_v5 = vsel %vm21_vm4, %v9573_v41, %v2582_v60 }
 0x139   :  { %v9575_v48 = vld [vmem:[%s20937_s0 + $0x1f0] sm:$0x80]   ;;  %v2590_v8 = vsel %vm25_vm5, %v9574_v47, %v2586_v5 }
 0x13a   :  { %v9595_v53 = vld [vmem:[%s20937_s0 + $0x617] sm:$0x1]   ;;  %v2594_v2 = vsel %vm29_vm6, %v9575_v48, %v2590_v8 }
 0x13b   :  { %v9596_v55 = vld [vmem:[%s20937_s0 + $0x636] sm:$0x2]   ;;  %2595 = vrot.lane.b32.xlu0 %v2594_v2, %s11223_s13  ;;  %v13995_v2 = vpop.permute.xlu0 %1479  }
 0x13c   :  { %v9597_v57 = vld [vmem:[%s20937_s0 + $0x655] sm:$0x4]   ;;  %v2675_v63 = vsel %vm5_vm0, %v9596_v55, %v9595_v53  ;;  %9292 = vst.msk [vmem:[%s20938_s1 + $0x8] sm:$0xff] %vm1412_vm12, %v13995_v2  }
 0x13d   :  { %v9598_v58 = vld [vmem:[%s20937_s0 + $0x674] sm:$0x8]   ;;  %v2679_v6 = vsel %vm9_vm1, %v9597_v57, %v2675_v63 }
 0x13e   :  { %v9599_v42 = vld [vmem:[%s20937_s0 + $0x693] sm:$0x10]   ;;  %v2683_v14 = vsel %vm13_vm2, %v9598_v58, %v2679_v6 }
 0x13f   :  { %v9600_v1 = vld [vmem:[%s20937_s0 + $0x6b2] sm:$0x20]   ;;  %v2687_v17 = vsel %vm17_vm3, %v9599_v42, %v2683_v14  ;;  %v14108_v45 = vpop.permute.xlu0 %1549  }
 0x140   :  { %v9601_v9 = vld [vmem:[%s20937_s0 + $0x6d1] sm:$0x40]   ;;  %v2691_v18 = vsel %vm21_vm4, %v9600_v1, %v2687_v17  ;;  %v13969_v1 = vpop.permute.xlu1 %1514   ;;  %9310 = vst.msk [vmem:[%s20938_s1 + $0x10] sm:$0xff] %vm1412_vm12, %v14108_v45  }
 0x141   :  { %v9602_v10 = vld [vmem:[%s20937_s0 + $0x6f0] sm:$0x80]   ;;  %v2695_v29 = vsel %vm25_vm5, %v9601_v9, %v2691_v18  ;;  %v9636_v18 = vld [vmem:[%s20937_s0 + $0x4d0] sm:$0x40]   ;;  %9301 = vst.msk [vmem:[%s20938_s1 + $0x28] sm:$0xff] %vm1412_vm12, %v13969_v1  }
 0x142   :  { %v9586_v12 = vld [vmem:[%s20937_s0 + $0x217] sm:$0x1]   ;;  %v2699_v38 = vsel %vm29_vm6, %v9602_v10, %v2695_v29  ;;  %v9623_v29 = vld [vmem:[%s20937_s0 + $0x35] sm:$0x2]  }
 0x143   :  { %v9587_v54 = vld [vmem:[%s20937_s0 + $0x236] sm:$0x2]   ;;  %2700 = vrot.lane.b32.xlu1 %v2699_v38, %s11223_s13  ;;  %v9626_v38 = vld [vmem:[%s20937_s0 + $0x92] sm:$0x10]  }
 0x144   :  { %v9588_v25 = vld [vmem:[%s20937_s0 + $0x255] sm:$0x4]   ;;  %v2640_v35 = vsel %vm5_vm0, %v9587_v54, %v9586_v12  ;;  %v9630_v12 = vld [vmem:[%s20937_s0 + $0x416] sm:$0x1]  }
 0x145   :  { %v9589_v15 = vld [vmem:[%s20937_s0 + $0x274] sm:$0x8]   ;;  %v2644_v22 = vsel %vm9_vm1, %v9588_v25, %v2640_v35  ;;  %v9631_v54 = vld [vmem:[%s20937_s0 + $0x435] sm:$0x2]  }
 0x146   :  { %v9590_v56 = vld [vmem:[%s20937_s0 + $0x293] sm:$0x10]   ;;  %v2648_v30 = vsel %vm13_vm2, %v9589_v15, %v2644_v22  ;;  %v9632_v25 = vld [vmem:[%s20937_s0 + $0x454] sm:$0x4]  }
 0x147   :  { %v9591_v4 = vld [vmem:[%s20937_s0 + $0x2b2] sm:$0x20]   ;;  %v2652_v37 = vsel %vm17_vm3, %v9590_v56, %v2648_v30  ;;  %v9633_v15 = vld [vmem:[%s20937_s0 + $0x473] sm:$0x8]   ;;  %v2814_v56 = vsel %vm5_vm0, %v9631_v54, %v9630_v12 }
 0x148   :  { %v9592_v27 = vld [vmem:[%s20937_s0 + $0x2d1] sm:$0x40]   ;;  %v2656_v48 = vsel %vm21_vm4, %v9591_v4, %v2652_v37  ;;  %v9634_v4 = vld [vmem:[%s20937_s0 + $0x492] sm:$0x10]   ;;  %v14033_v37 = vpop.permute.xlu1 %1584  }
 0x149   :  { %v9593_v49 = vld [vmem:[%s20937_s0 + $0x2f0] sm:$0x80]   ;;  %v2660_v57 = vsel %vm25_vm5, %v9592_v27, %v2656_v48  ;;  %v9635_v27 = vld [vmem:[%s20937_s0 + $0x4b1] sm:$0x20]   ;;  %9319 = vst.msk [vmem:[%s20938_s1 + $0x30] sm:$0xff] %vm1412_vm12, %v14033_v37  }
 0x14a   :  { %v9613_v24 = vld [vmem:[%s20937_s0 + $0x717] sm:$0x1]   ;;  %v2664_v3 = vsel %vm29_vm6, %v9593_v49, %v2660_v57  ;;  %v2818_v49 = vsel %vm9_vm1, %v9632_v25, %v2814_v56  ;;  %v9628_v48 = vld [vmem:[%s20937_s0 + $0xd0] sm:$0x40]  }
 0x14b   :  { %v9614_v28 = vld [vmem:[%s20937_s0 + $0x736] sm:$0x2]   ;;  %2665 = vrot.lane.b32.xlu0 %v2664_v3, %s11223_s13  ;;  %v9649_v57 = vld [vmem:[%s20937_s0 + $0x535] sm:$0x2]  }
 0x14c   :  { %v2745_v31 = vsel %vm5_vm0, %v9614_v28, %v9613_v24  ;;  %v9615_v32 = vld [vmem:[%s20937_s0 + $0x755] sm:$0x4]   ;;  %v9637_v24 = vld [vmem:[%s20937_s0 + $0x4ef] sm:$0x80]   ;;  %v14134_v12 = vpop.permute.xlu1 %1654  }
 0x14d   :  { %v9616_v33 = vld [vmem:[%s20937_s0 + $0x774] sm:$0x8]   ;;  %v2749_v39 = vsel %vm9_vm1, %v9615_v32, %v2745_v31  ;;  %v9622_v28 = vld [vmem:[%s20937_s0 + $0x16] sm:$0x1]   ;;  %v2822_v31 = vsel %vm13_vm2, %v9633_v15, %v2818_v49  ;;  %9337 = vst.msk [vmem:[%s20938_s1 + $0x38] sm:$0xff] %vm1412_vm12, %v14134_v12  }
 0x14e   :  { %v9617_v34 = vld [vmem:[%s20937_s0 + $0x793] sm:$0x10]   ;;  %v2753_v51 = vsel %vm13_vm2, %v9616_v33, %v2749_v39  ;;  %v2780_v32 = vsel %vm5_vm0, %v9623_v29, %v9622_v28  ;;  %v9624_v33 = vld [vmem:[%s20937_s0 + $0x54] sm:$0x4]   ;;  %v9794_v12 = vld [vmem:[%s20937_s0 + $0x590] sm:$0x10]  }
 0x14f   :  { %v9618_v40 = vld [vmem:[%s20937_s0 + $0x7b2] sm:$0x20]   ;;  %v2757_v59 = vsel %vm17_vm3, %v9617_v34, %v2753_v51  ;;  %v9625_v34 = vld [vmem:[%s20937_s0 + $0x73] sm:$0x8]  }
 0x150   :  { %v9619_v41 = vld [vmem:[%s20937_s0 + $0x7d1] sm:$0x40]   ;;  %v2761_v5 = vsel %vm21_vm4, %v9618_v40, %v2757_v59  ;;  %v2826_v40 = vsel %vm17_vm3, %v9634_v4, %v2822_v31  ;;  %v9629_v51 = vld [vmem:[%s20937_s0 + $0xef] sm:$0x80]  }
 0x151   :  { %v9620_v47 = vld [vmem:[%s20937_s0 + $0x7f0] sm:$0x80]   ;;  %v2765_v8 = vsel %vm25_vm5, %v9619_v41, %v2761_v5  ;;  %v2784_v41 = vsel %vm9_vm1, %v9624_v33, %v2780_v32  ;;  %v9642_v25 = vld [vmem:[%s20937_s0 + $0x173] sm:$0x8]  }
 0x152   :  { %v9604_v52 = vld [vmem:[%s20937_s0 + $0x317] sm:$0x1]   ;;  %v2769_v17 = vsel %vm29_vm6, %v9620_v47, %v2765_v8  ;;  %v9627_v47 = vld [vmem:[%s20937_s0 + $0xb1] sm:$0x20]  }
 0x153   :  { %v9605_v53 = vld [vmem:[%s20937_s0 + $0x336] sm:$0x2]   ;;  %2770 = vrot.lane.b32.xlu1 %v2769_v17, %s11223_s13  ;;  %v9643_v15 = vld [vmem:[%s20937_s0 + $0x192] sm:$0x10]  }
 0x154   :  { %v9606_v55 = vld [vmem:[%s20937_s0 + $0x355] sm:$0x4]   ;;  %v2710_v60 = vsel %vm5_vm0, %v9605_v53, %v9604_v52  ;;  %v2830_v52 = vsel %vm21_vm4, %v9635_v27, %v2826_v40  ;;  %v2788_v53 = vsel %vm13_vm2, %v9625_v34, %v2784_v41  ;;  %v9644_v17 = vld [vmem:[%s20937_s0 + $0x1b1] sm:$0x20]  }
 0x155   :  { %v9607_v63 = vld [vmem:[%s20937_s0 + $0x374] sm:$0x8]   ;;  %v2714_v6 = vsel %vm9_vm1, %v9606_v55, %v2710_v60  ;;  %v9648_v55 = vld [vmem:[%s20937_s0 + $0x516] sm:$0x1]   ;;  %v2834_v59 = vsel %vm25_vm5, %v9636_v18, %v2830_v52  ;;  %v2792_v60 = vsel %vm17_vm3, %v9626_v38, %v2788_v53 }
 0x156   :  { %v9608_v58 = vld [vmem:[%s20937_s0 + $0x393] sm:$0x10]   ;;  %v2718_v14 = vsel %vm13_vm2, %v9607_v63, %v2714_v6  ;;  %v2884_v0 = vsel %vm5_vm0, %v9649_v57, %v9648_v55  ;;  %v9651_v63 = vld [vmem:[%s20937_s0 + $0x573] sm:$0x8]   ;;  %v2838_v62 = vsel %vm29_vm6, %v9637_v24, %v2834_v59  ;;  %v2796_v19 = vsel %vm21_vm4, %v9627_v47, %v2792_v60 }
 0x157   :  { %v9609_v42 = vld [vmem:[%s20937_s0 + $0x3b2] sm:$0x20]   ;;  %v2722_v35 = vsel %vm17_vm3, %v9608_v58, %v2718_v14  ;;  %v9652_v58 = vld [vmem:[%s20937_s0 + $0x592] sm:$0x10]   ;;  %v2888_v43 = vsel %vm9_vm1, %v9650_v21, %v2884_v0  ;;  %2839 = vrot.lane.b32.xlu1 %v2838_v62, %s11224_s15  ;;  %v2800_v3 = vsel %vm25_vm5, %v9628_v48, %v2796_v19  ;;  %v14209_v0 = vpop.permute.xlu1 %1723  }
 0x158   :  { %v9610_v9 = vld [vmem:[%s20937_s0 + $0x3d1] sm:$0x40]   ;;  %v2726_v22 = vsel %vm21_vm4, %v9609_v42, %v2722_v35  ;;  %v9655_v42 = vld [vmem:[%s20937_s0 + $0x5ef] sm:$0x80]   ;;  %v2892_v5 = vsel %vm13_vm2, %v9651_v63, %v2888_v43  ;;  %v2804_v8 = vsel %vm29_vm6, %v9629_v51, %v2800_v3  ;;  %9354 = vst.msk [vmem:[%s20938_s1 + $0x20] sm:$0xff] %vm1691_vm13, %v14209_v0  }
 0x159   :  { %v9611_v10 = vld [vmem:[%s20937_s0 + $0x3f0] sm:$0x80]   ;;  %v2730_v30 = vsel %vm25_vm5, %v9610_v9, %v2726_v22  ;;  %v9639_v6 = vld [vmem:[%s20937_s0 + $0x116] sm:$0x1]   ;;  %v2896_v14 = vsel %vm17_vm3, %v9652_v58, %v2892_v5 }
 0x15a   :  { %v2734_v39 = vsel %vm29_vm6, %v9611_v10, %v2730_v30  ;;  %v9640_v9 = vld [vmem:[%s20937_s0 + $0x135] sm:$0x2]   ;;  %v2900_v35 = vsel %vm21_vm4, %v9653_v61, %v2896_v14  ;;  %v14171_v30 = vpop.permute.xlu0 %1619  }
 0x15b   :  { %2735 = vrot.lane.b32.xlu0 %v2734_v39, %s11223_s13  ;;  %v9641_v10 = vld [vmem:[%s20937_s0 + $0x154] sm:$0x4]   ;;  %v2849_v54 = vsel %vm5_vm0, %v9640_v9, %v9639_v6  ;;  %v2904_v22 = vsel %vm25_vm5, %v9654_v20, %v2900_v35  ;;  %9328 = vst.msk [vmem:[%s20938_s1 + $0x18] sm:$0xff] %vm1412_vm12, %v14171_v30   ;;  %v9795_v30 = vld [vmem:[%s20937_s0 + $0x5af] sm:$0x20]   ;;  %s11234_s13 = smov 48  }
 0x15c   :  { %v2853_v56 = vsel %vm9_vm1, %v9641_v10, %v2849_v54  ;;  %v9645_v4 = vld [vmem:[%s20937_s0 + $0x1d0] sm:$0x40]   ;;  %v2908_v31 = vsel %vm29_vm6, %v9655_v42, %v2904_v22  ;;  %vm3923_vm12 = vcmask 622144  }
 0x15d   :  { %v9646_v27 = vld [vmem:[%s20937_s0 + $0x1ef] sm:$0x80]   ;;  %v2857_v49 = vsel %vm13_vm2, %v9642_v25, %v2853_v56  ;;  %2909 = vrot.lane.b32.xlu1 %v2908_v31, %s11224_s15 }
 0x15e   :  { %v9666_v18 = vld [vmem:[%s20937_s0 + $0x616] sm:$0x1]   ;;  %v2861_v32 = vsel %vm17_vm3, %v9643_v15, %v2857_v49  ;;  %v14247_v25 = vpop.permute.xlu0 %1689  }
 0x15f   :  { %2805 = vrot.lane.b32.xlu0 %v2804_v8, %s11224_s15  ;;  %v9667_v24 = vld [vmem:[%s20937_s0 + $0x635] sm:$0x2]   ;;  %v2865_v40 = vsel %vm21_vm4, %v9644_v17, %v2861_v32  ;;  %1692 = vst.msk [vmem:[%s20938_s1] sm:$0xff] %vm1691_vm13, %v14247_v25   ;;  %v9863_v25 = vld [vmem:[%s20937_s0 + $0x551] sm:$0x4]  }
 0x160   :  { %v9668_v28 = vld [vmem:[%s20937_s0 + $0x654] sm:$0x4]   ;;  %v2954_v33 = vsel %vm5_vm0, %v9667_v24, %v9666_v18  ;;  %v2869_v52 = vsel %vm25_vm5, %v9645_v4, %v2865_v40 }
 0x161   :  { %v9669_v29 = vld [vmem:[%s20937_s0 + $0x673] sm:$0x8]   ;;  %v2958_v41 = vsel %vm9_vm1, %v9668_v28, %v2954_v33  ;;  %v2873_v21 = vsel %vm29_vm6, %v9646_v27, %v2869_v52 }
 0x162   :  { %v9670_v34 = vld [vmem:[%s20937_s0 + $0x692] sm:$0x10]   ;;  %v2962_v53 = vsel %vm13_vm2, %v9669_v29, %v2958_v41  ;;  %v14273_v29 = vpop.permute.xlu1 %1793  }
 0x163   :  { %v9671_v38 = vld [vmem:[%s20937_s0 + $0x6b1] sm:$0x20]   ;;  %v2966_v63 = vsel %vm17_vm3, %v9670_v34, %v2962_v53  ;;  %2874 = vrot.lane.b32.xlu0 %v2873_v21, %s11224_s15  ;;  %v14311_v21 = vpop.permute.xlu0 %1758   ;;  %9372 = vst.msk [vmem:[%s20938_s1 + $0x28] sm:$0xff] %vm1691_vm13, %v14273_v29  }
 0x164   :  { %v9672_v39 = vld [vmem:[%s20937_s0 + $0x6d0] sm:$0x40]   ;;  %v2970_v61 = vsel %vm21_vm4, %v9671_v38, %v2966_v63  ;;  %9363 = vst.msk [vmem:[%s20938_s1 + $0x8] sm:$0xff] %vm1691_vm13, %v14311_v21  }
 0x165   :  { %v9673_v47 = vld [vmem:[%s20937_s0 + $0x6ef] sm:$0x80]   ;;  %v2974_v6 = vsel %vm25_vm5, %v9672_v39, %v2970_v61  ;;  %v9708_v61 = vld [vmem:[%s20937_s0 + $0x4ee] sm:$0x80]  }
 0x166   :  { %v9657_v48 = vld [vmem:[%s20937_s0 + $0x216] sm:$0x1]   ;;  %v2978_v15 = vsel %vm29_vm6, %v9673_v47, %v2974_v6  ;;  %v9695_v6 = vld [vmem:[%s20937_s0 + $0x53] sm:$0x4]  }
 0x167   :  { %v9658_v51 = vld [vmem:[%s20937_s0 + $0x235] sm:$0x2]   ;;  %2979 = vrot.lane.b32.xlu1 %v2978_v15, %s11224_s15  ;;  %v9698_v15 = vld [vmem:[%s20937_s0 + $0xb0] sm:$0x20]   ;;  %v14404_v23 = vpop.permute.xlu0 %1828  }
 0x168   :  { %v2919_v55 = vsel %vm5_vm0, %v9658_v51, %v9657_v48  ;;  %v9659_v57 = vld [vmem:[%s20937_s0 + $0x254] sm:$0x4]   ;;  %v9701_v48 = vld [vmem:[%s20937_s0 + $0x415] sm:$0x1]   ;;  %9381 = vst.msk [vmem:[%s20938_s1 + $0x10] sm:$0xff] %vm1691_vm13, %v14404_v23  }
 0x169   :  { %v9660_v59 = vld [vmem:[%s20937_s0 + $0x273] sm:$0x8]   ;;  %v2923_v58 = vsel %vm9_vm1, %v9659_v57, %v2919_v55  ;;  %v9702_v51 = vld [vmem:[%s20937_s0 + $0x434] sm:$0x2]  }
 0x16a   :  { %v9661_v60 = vld [vmem:[%s20937_s0 + $0x292] sm:$0x10]   ;;  %v2927_v20 = vsel %vm13_vm2, %v9660_v59, %v2923_v58  ;;  %v3093_v55 = vsel %vm5_vm0, %v9702_v51, %v9701_v48  ;;  %v9703_v57 = vld [vmem:[%s20937_s0 + $0x453] sm:$0x4]  }
 0x16b   :  { %v9662_v62 = vld [vmem:[%s20937_s0 + $0x2b1] sm:$0x20]   ;;  %v2931_v9 = vsel %vm17_vm3, %v9661_v60, %v2927_v20  ;;  %v9704_v59 = vld [vmem:[%s20937_s0 + $0x472] sm:$0x8]  }
 0x16c   :  { %v9663_v19 = vld [vmem:[%s20937_s0 + $0x2d0] sm:$0x40]   ;;  %v2935_v17 = vsel %vm21_vm4, %v9662_v62, %v2931_v9  ;;  %v9705_v60 = vld [vmem:[%s20937_s0 + $0x491] sm:$0x10]   ;;  %v3097_v62 = vsel %vm9_vm1, %v9703_v57, %v3093_v55 }
 0x16d   :  { %v9664_v43 = vld [vmem:[%s20937_s0 + $0x2ef] sm:$0x80]   ;;  %v2939_v18 = vsel %vm25_vm5, %v9663_v19, %v2935_v17  ;;  %v9706_v19 = vld [vmem:[%s20937_s0 + $0x4b0] sm:$0x20]   ;;  %v14349_v17 = vpop.permute.xlu1 %1863  }
 0x16e   :  { %v9684_v42 = vld [vmem:[%s20937_s0 + $0x716] sm:$0x1]   ;;  %v2943_v31 = vsel %vm29_vm6, %v9664_v43, %v2939_v18  ;;  %v9707_v43 = vld [vmem:[%s20937_s0 + $0x4cf] sm:$0x40]   ;;  %9390 = vst.msk [vmem:[%s20938_s1 + $0x30] sm:$0xff] %vm1691_vm13, %v14349_v17  }
 0x16f   :  { %v9685_v3 = vld [vmem:[%s20937_s0 + $0x735] sm:$0x2]   ;;  %2944 = vrot.lane.b32.xlu0 %v2943_v31, %s11224_s15  ;;  %v9700_v18 = vld [vmem:[%s20937_s0 + $0xee] sm:$0x80]  }
 0x170   :  { %v9686_v5 = vld [vmem:[%s20937_s0 + $0x754] sm:$0x4]   ;;  %v3024_v10 = vsel %vm5_vm0, %v9685_v3, %v9684_v42  ;;  %v3101_v42 = vsel %vm13_vm2, %v9704_v59, %v3097_v62  ;;  %v9693_v3 = vld [vmem:[%s20937_s0 + $0x15] sm:$0x1]  }
 0x171   :  { %v9687_v8 = vld [vmem:[%s20937_s0 + $0x773] sm:$0x8]   ;;  %v3028_v35 = vsel %vm9_vm1, %v9686_v5, %v3024_v10  ;;  %v9694_v5 = vld [vmem:[%s20937_s0 + $0x34] sm:$0x2]   ;;  %v3105_v10 = vsel %vm17_vm3, %v9705_v60, %v3101_v42  ;;  %v14441_v51 = vpop.permute.xlu1 %1933  }
 0x172   :  { %v9688_v14 = vld [vmem:[%s20937_s0 + $0x792] sm:$0x10]   ;;  %v3032_v22 = vsel %vm13_vm2, %v9687_v8, %v3028_v35  ;;  %v3059_v8 = vsel %vm5_vm0, %v9694_v5, %v9693_v3  ;;  %v9713_v48 = vld [vmem:[%s20937_s0 + $0x172] sm:$0x8]   ;;  %9408 = vst.msk [vmem:[%s20938_s1 + $0x38] sm:$0xff] %vm1691_vm13, %v14441_v51  }
 0x173   :  { %v9689_v54 = vld [vmem:[%s20937_s0 + $0x7b1] sm:$0x20]   ;;  %v3036_v32 = vsel %vm17_vm3, %v9688_v14, %v3032_v22  ;;  %v9696_v14 = vld [vmem:[%s20937_s0 + $0x72] sm:$0x8]   ;;  %v9866_v51 = vld [vmem:[%s20937_s0 + $0x5ae] sm:$0x20]  }
 0x174   :  { %v9690_v56 = vld [vmem:[%s20937_s0 + $0x7d0] sm:$0x40]   ;;  %v3040_v40 = vsel %vm21_vm4, %v9689_v54, %v3036_v32  ;;  %v9697_v54 = vld [vmem:[%s20937_s0 + $0x91] sm:$0x10]  }
 0x175   :  { %v9691_v4 = vld [vmem:[%s20937_s0 + $0x7ef] sm:$0x80]   ;;  %v3044_v52 = vsel %vm25_vm5, %v9690_v56, %v3040_v40  ;;  %v3109_v56 = vsel %vm21_vm4, %v9706_v19, %v3105_v10  ;;  %v9714_v57 = vld [vmem:[%s20937_s0 + $0x191] sm:$0x10]  }
 0x176   :  { %v9675_v27 = vld [vmem:[%s20937_s0 + $0x316] sm:$0x1]   ;;  %v3048_v63 = vsel %vm29_vm6, %v9691_v4, %v3044_v52  ;;  %v3063_v4 = vsel %vm9_vm1, %v9695_v6, %v3059_v8  ;;  %v3113_v22 = vsel %vm25_vm5, %v9707_v43, %v3109_v56  ;;  %v9715_v59 = vld [vmem:[%s20937_s0 + $0x1b0] sm:$0x20]  }
 0x177   :  { %v9676_v49 = vld [vmem:[%s20937_s0 + $0x335] sm:$0x2]   ;;  %3049 = vrot.lane.b32.xlu1 %v3048_v63, %s11224_s15  ;;  %v3117_v50 = vsel %vm29_vm6, %v9708_v61, %v3113_v22  ;;  %v9716_v60 = vld [vmem:[%s20937_s0 + $0x1cf] sm:$0x40]  }
 0x178   :  { %v9677_v24 = vld [vmem:[%s20937_s0 + $0x354] sm:$0x4]   ;;  %v2989_v33 = vsel %vm5_vm0, %v9676_v49, %v9675_v27  ;;  %v9699_v27 = vld [vmem:[%s20937_s0 + $0xcf] sm:$0x40]   ;;  %v3067_v49 = vsel %vm13_vm2, %v9696_v14, %v3063_v4 }
 0x179   :  { %v9678_v28 = vld [vmem:[%s20937_s0 + $0x373] sm:$0x8]   ;;  %v2993_v41 = vsel %vm9_vm1, %v9677_v24, %v2989_v33  ;;  %v9721_v24 = vld [vmem:[%s20937_s0 + $0x553] sm:$0x4]   ;;  %v3071_v11 = vsel %vm17_vm3, %v9697_v54, %v3067_v49  ;;  %v14505_v49 = vpop.permute.xlu1 %2002  }
 0x17a   :  { %v9679_v34 = vld [vmem:[%s20937_s0 + $0x392] sm:$0x10]   ;;  %v2997_v53 = vsel %vm13_vm2, %v9678_v28, %v2993_v41  ;;  %v9724_v28 = vld [vmem:[%s20937_s0 + $0x5b0] sm:$0x20]   ;;  %v3075_v31 = vsel %vm21_vm4, %v9698_v15, %v3071_v11  ;;  %v3167_v32 = vsel %vm9_vm1, %v9721_v24, %v3163_v16  ;;  %9425 = vst.msk [vmem:[%s20938_s1 + $0x20] sm:$0xff] %vm1970_vm14, %v14505_v49  }
 0x17b   :  { %v9680_v38 = vld [vmem:[%s20937_s0 + $0x3b1] sm:$0x20]   ;;  %v3001_v58 = vsel %vm17_vm3, %v9679_v34, %v2997_v53  ;;  %3118 = vrot.lane.b32.xlu1 %v3117_v50, %s11225_s17  ;;  %v9725_v33 = vld [vmem:[%s20937_s0 + $0x5cf] sm:$0x40]   ;;  %v3171_v40 = vsel %vm13_vm2, %v9722_v36, %v3167_v32  ;;  %v9932_v49 = vld [vmem:[%s20937_s0 + $0x512] sm:$0x1]  }
 0x17c   :  { %v9681_v39 = vld [vmem:[%s20937_s0 + $0x3d0] sm:$0x40]   ;;  %v3005_v20 = vsel %vm21_vm4, %v9680_v38, %v3001_v58  ;;  %v9726_v34 = vld [vmem:[%s20937_s0 + $0x5ee] sm:$0x80]   ;;  %v3175_v53 = vsel %vm17_vm3, %v9723_v13, %v3171_v40 }
 0x17d   :  { %v9682_v47 = vld [vmem:[%s20937_s0 + $0x3ef] sm:$0x80]   ;;  %v3009_v9 = vsel %vm25_vm5, %v9681_v39, %v3005_v20  ;;  %v9710_v38 = vld [vmem:[%s20937_s0 + $0x115] sm:$0x1]   ;;  %v3079_v39 = vsel %vm25_vm5, %v9699_v27, %v3075_v31  ;;  %v3179_v63 = vsel %vm21_vm4, %v9724_v28, %v3175_v53 }
 0x17e   :  { %v3013_v35 = vsel %vm29_vm6, %v9682_v47, %v3009_v9  ;;  %v9711_v41 = vld [vmem:[%s20937_s0 + $0x134] sm:$0x2]   ;;  %v3083_v52 = vsel %vm29_vm6, %v9700_v18, %v3079_v39  ;;  %v3183_v61 = vsel %vm25_vm5, %v9725_v33, %v3179_v63  ;;  %v14479_v9 = vpop.permute.xlu0 %1898  }
 0x17f   :  { %3014 = vrot.lane.b32.xlu0 %v3013_v35, %s11224_s15  ;;  %v9712_v47 = vld [vmem:[%s20937_s0 + $0x153] sm:$0x4]   ;;  %v3128_v55 = vsel %vm5_vm0, %v9711_v41, %v9710_v38  ;;  %v3187_v10 = vsel %vm29_vm6, %v9726_v34, %v3183_v61  ;;  %9399 = vst.msk [vmem:[%s20938_s1 + $0x18] sm:$0xff] %vm1691_vm13, %v14479_v9   ;;  %v9867_v9 = vld [vmem:[%s20937_s0 + $0x5cd] sm:$0x40]   ;;  %vm4202_vm13 = vcmask 589344  }
 0x180   :  { %v3132_v58 = vsel %vm9_vm1, %v9712_v47, %v3128_v55  ;;  %v9717_v62 = vld [vmem:[%s20937_s0 + $0x1ee] sm:$0x80]   ;;  %3188 = vrot.lane.b32.xlu1 %v3187_v10, %s11225_s17 }
 0x181   :  { %v9737_v19 = vld [vmem:[%s20937_s0 + $0x615] sm:$0x1]   ;;  %v3136_v20 = vsel %vm13_vm2, %v9713_v48, %v3132_v58 }
 0x182   :  { %v9738_v43 = vld [vmem:[%s20937_s0 + $0x634] sm:$0x2]   ;;  %v3140_v8 = vsel %vm17_vm3, %v9714_v57, %v3136_v20  ;;  %v14543_v47 = vpop.permute.xlu0 %1968  }
 0x183   :  { %3084 = vrot.lane.b32.xlu0 %v3083_v52, %s11225_s17  ;;  %v3233_v42 = vsel %vm5_vm0, %v9738_v43, %v9737_v19  ;;  %v9739_v3 = vld [vmem:[%s20937_s0 + $0x653] sm:$0x4]   ;;  %v3144_v56 = vsel %vm21_vm4, %v9715_v59, %v3140_v8  ;;  %1971 = vst.msk [vmem:[%s20938_s1] sm:$0xff] %vm1970_vm14, %v14543_v47   ;;  %v9933_v47 = vld [vmem:[%s20937_s0 + $0x531] sm:$0x2]  }
 0x184   :  { %v9740_v5 = vld [vmem:[%s20937_s0 + $0x672] sm:$0x8]   ;;  %v3237_v14 = vsel %vm9_vm1, %v9739_v3, %v3233_v42  ;;  %v3148_v44 = vsel %vm25_vm5, %v9716_v60, %v3144_v56 }
 0x185   :  { %v9741_v6 = vld [vmem:[%s20937_s0 + $0x691] sm:$0x10]   ;;  %v3241_v4 = vsel %vm13_vm2, %v9740_v5, %v3237_v14  ;;  %v3152_v36 = vsel %vm29_vm6, %v9717_v62, %v3148_v44 }
 0x186   :  { %v9742_v54 = vld [vmem:[%s20937_s0 + $0x6b0] sm:$0x20]   ;;  %v3245_v7 = vsel %vm17_vm3, %v9741_v6, %v3241_v4  ;;  %v14581_v6 = vpop.permute.xlu1 %2072   ;;  %v14607_v44 = vpop.permute.xlu0 %2037  }
 0x187   :  { %v9743_v15 = vld [vmem:[%s20937_s0 + $0x6cf] sm:$0x40]   ;;  %v3249_v13 = vsel %vm21_vm4, %v9742_v54, %v3245_v7  ;;  %3153 = vrot.lane.b32.xlu0 %v3152_v36, %s11225_s17  ;;  %v9777_v36 = vld [vmem:[%s20937_s0 + $0x4af] sm:$0x20]   ;;  %9443 = vst.msk [vmem:[%s20938_s1 + $0x28] sm:$0xff] %vm1970_vm14, %v14581_v6  }
 0x188   :  { %v9744_v35 = vld [vmem:[%s20937_s0 + $0x6ee] sm:$0x80]   ;;  %v3253_v34 = vsel %vm25_vm5, %v9743_v15, %v3249_v13  ;;  %9434 = vst.msk [vmem:[%s20938_s1 + $0x8] sm:$0xff] %vm1970_vm14, %v14607_v44  }
 0x189   :  { %v9728_v27 = vld [vmem:[%s20937_s0 + $0x215] sm:$0x1]   ;;  %v3257_v48 = vsel %vm29_vm6, %v9744_v35, %v3253_v34  ;;  %v9764_v34 = vld [vmem:[%s20937_s0 + $0x14] sm:$0x1]  }
 0x18a   :  { %v9729_v18 = vld [vmem:[%s20937_s0 + $0x234] sm:$0x2]   ;;  %3258 = vrot.lane.b32.xlu1 %v3257_v48, %s11225_s17  ;;  %v9767_v48 = vld [vmem:[%s20937_s0 + $0x71] sm:$0x8]   ;;  %v14711_v1 = vpop.permute.xlu0 %2107  }
 0x18b   :  { %v9730_v22 = vld [vmem:[%s20937_s0 + $0x253] sm:$0x4]   ;;  %v3198_v24 = vsel %vm5_vm0, %v9729_v18, %v9728_v27  ;;  %v9772_v27 = vld [vmem:[%s20937_s0 + $0x414] sm:$0x1]   ;;  %9452 = vst.msk [vmem:[%s20938_s1 + $0x10] sm:$0xff] %vm1970_vm14, %v14711_v1   ;;  %v4000_v1 = vsel %vm5_vm0, %v9933_v47, %v9932_v49 }
 0x18c   :  { %v9731_v50 = vld [vmem:[%s20937_s0 + $0x272] sm:$0x8]   ;;  %v3202_v28 = vsel %vm9_vm1, %v9730_v22, %v3198_v24  ;;  %v9773_v18 = vld [vmem:[%s20937_s0 + $0x433] sm:$0x2]   ;;  %v9947_v47 = vld [vmem:[%s20937_s0 + $0x2cc] sm:$0x40]  }
 0x18d   :  { %v9732_v11 = vld [vmem:[%s20937_s0 + $0x291] sm:$0x10]   ;;  %v3206_v38 = vsel %vm13_vm2, %v9731_v50, %v3202_v28  ;;  %v9774_v22 = vld [vmem:[%s20937_s0 + $0x452] sm:$0x4]   ;;  %v3372_v50 = vsel %vm5_vm0, %v9773_v18, %v9772_v27 }
 0x18e   :  { %v9733_v16 = vld [vmem:[%s20937_s0 + $0x2b0] sm:$0x20]   ;;  %v3210_v52 = vsel %vm17_vm3, %v9732_v11, %v3206_v38  ;;  %v9775_v11 = vld [vmem:[%s20937_s0 + $0x471] sm:$0x8]  }
 0x18f   :  { %v9734_v31 = vld [vmem:[%s20937_s0 + $0x2cf] sm:$0x40]   ;;  %v3214_v60 = vsel %vm21_vm4, %v9733_v16, %v3210_v52  ;;  %v9776_v16 = vld [vmem:[%s20937_s0 + $0x490] sm:$0x10]   ;;  %v14645_v52 = vpop.permute.xlu1 %2142  }
 0x190   :  { %v9735_v32 = vld [vmem:[%s20937_s0 + $0x2ee] sm:$0x80]   ;;  %v3218_v43 = vsel %vm25_vm5, %v9734_v31, %v3214_v60  ;;  %v3376_v31 = vsel %vm9_vm1, %v9774_v22, %v3372_v50  ;;  %v9769_v60 = vld [vmem:[%s20937_s0 + $0xaf] sm:$0x20]   ;;  %9461 = vst.msk [vmem:[%s20938_s1 + $0x30] sm:$0xff] %vm1970_vm14, %v14645_v52  }
 0x191   :  { %v9755_v33 = vld [vmem:[%s20937_s0 + $0x715] sm:$0x1]   ;;  %v3222_v10 = vsel %vm29_vm6, %v9735_v32, %v3218_v43  ;;  %v9778_v32 = vld [vmem:[%s20937_s0 + $0x4ce] sm:$0x40]  }
 0x192   :  { %v9756_v39 = vld [vmem:[%s20937_s0 + $0x734] sm:$0x2]   ;;  %3223 = vrot.lane.b32.xlu0 %v3222_v10, %s11225_s17  ;;  %v9790_v43 = vld [vmem:[%s20937_s0 + $0x514] sm:$0x1]  }
 0x193   :  { %v9757_v40 = vld [vmem:[%s20937_s0 + $0x753] sm:$0x4]   ;;  %v3303_v53 = vsel %vm5_vm0, %v9756_v39, %v9755_v33  ;;  %v9779_v33 = vld [vmem:[%s20937_s0 + $0x4ed] sm:$0x80]   ;;  %v3380_v39 = vsel %vm13_vm2, %v9775_v11, %v3376_v31  ;;  %v3442_v45 = vsel %vm5_vm0, %v9791_v46, %v9790_v43 }
 0x194   :  { %v9758_v41 = vld [vmem:[%s20937_s0 + $0x772] sm:$0x8]   ;;  %v3307_v63 = vsel %vm9_vm1, %v9757_v40, %v3303_v53  ;;  %v9765_v40 = vld [vmem:[%s20937_s0 + $0x33] sm:$0x2]   ;;  %v3446_v10 = vsel %vm9_vm1, %v9792_v26, %v3442_v45 }
 0x195   :  { %v9759_v55 = vld [vmem:[%s20937_s0 + $0x791] sm:$0x10]   ;;  %v3311_v61 = vsel %vm13_vm2, %v9758_v41, %v3307_v63  ;;  %v9766_v41 = vld [vmem:[%s20937_s0 + $0x52] sm:$0x4]  }
 0x196   :  { %v9760_v57 = vld [vmem:[%s20937_s0 + $0x7b0] sm:$0x20]   ;;  %v3315_v8 = vsel %vm17_vm3, %v9759_v55, %v3311_v61  ;;  %v3384_v55 = vsel %vm17_vm3, %v9776_v16, %v3380_v39  ;;  %v9770_v63 = vld [vmem:[%s20937_s0 + $0xce] sm:$0x40]  }
 0x197   :  { %v9761_v59 = vld [vmem:[%s20937_s0 + $0x7cf] sm:$0x40]   ;;  %v3319_v56 = vsel %vm21_vm4, %v9760_v57, %v3315_v8  ;;  %v3338_v57 = vsel %vm5_vm0, %v9765_v40, %v9764_v34  ;;  %v9797_v8 = vld [vmem:[%s20937_s0 + $0x5ed] sm:$0x80]   ;;  %v14775_v34 = vpop.permute.xlu0 %2177  }
 0x198   :  { %v9762_v58 = vld [vmem:[%s20937_s0 + $0x7ee] sm:$0x80]   ;;  %v3323_v7 = vsel %vm25_vm5, %v9761_v59, %v3319_v56  ;;  %v9768_v59 = vld [vmem:[%s20937_s0 + $0x90] sm:$0x10]   ;;  %9470 = vst.msk [vmem:[%s20938_s1 + $0x18] sm:$0xff] %vm1970_vm14, %v14775_v34  }
 0x199   :  { %v9746_v62 = vld [vmem:[%s20937_s0 + $0x315] sm:$0x1]   ;;  %v3327_v13 = vsel %vm29_vm6, %v9762_v58, %v3323_v7  ;;  %v3388_v58 = vsel %vm21_vm4, %v9777_v36, %v3384_v55  ;;  %v9783_v27 = vld [vmem:[%s20937_s0 + $0x152] sm:$0x4]   ;;  %v9936_v34 = vld [vmem:[%s20937_s0 + $0x58e] sm:$0x10]  }
 0x19a   :  { %v9747_v19 = vld [vmem:[%s20937_s0 + $0x334] sm:$0x2]   ;;  %3328 = vrot.lane.b32.xlu1 %v3327_v13, %s11225_s17  ;;  %v3392_v61 = vsel %vm25_vm5, %v9778_v32, %v3388_v58  ;;  %v9784_v18 = vld [vmem:[%s20937_s0 + $0x171] sm:$0x8]  }
 0x19b   :  { %v3268_v20 = vsel %vm5_vm0, %v9747_v19, %v9746_v62  ;;  %v9748_v42 = vld [vmem:[%s20937_s0 + $0x353] sm:$0x4]   ;;  %v3342_v62 = vsel %vm9_vm1, %v9766_v41, %v3338_v57  ;;  %v9771_v19 = vld [vmem:[%s20937_s0 + $0xed] sm:$0x80]   ;;  %v3396_v2 = vsel %vm29_vm6, %v9779_v33, %v3392_v61 }
 0x19c   :  { %v9749_v3 = vld [vmem:[%s20937_s0 + $0x372] sm:$0x8]   ;;  %v3272_v14 = vsel %vm9_vm1, %v9748_v42, %v3268_v20  ;;  %v3346_v20 = vsel %vm13_vm2, %v9767_v48, %v3342_v62  ;;  %v9793_v42 = vld [vmem:[%s20937_s0 + $0x571] sm:$0x8]  }
 0x19d   :  { %v9750_v5 = vld [vmem:[%s20937_s0 + $0x391] sm:$0x10]   ;;  %v3276_v4 = vsel %vm13_vm2, %v9749_v3, %v3272_v14  ;;  %v3350_v37 = vsel %vm17_vm3, %v9768_v59, %v3346_v20  ;;  %v9796_v3 = vld [vmem:[%s20937_s0 + $0x5ce] sm:$0x40]   ;;  %v3450_v56 = vsel %vm13_vm2, %v9793_v42, %v3446_v10 }
 0x19e   :  { %v9751_v54 = vld [vmem:[%s20937_s0 + $0x3b0] sm:$0x20]   ;;  %v3280_v24 = vsel %vm17_vm3, %v9750_v5, %v3276_v4  ;;  %3397 = vrot.lane.b32.xlu1 %v3396_v2, %s11226_s22  ;;  %v3354_v5 = vsel %vm21_vm4, %v9769_v60, %v3350_v37  ;;  %v9781_v14 = vld [vmem:[%s20937_s0 + $0x114] sm:$0x1]  }
 0x19f   :  { %v9752_v15 = vld [vmem:[%s20937_s0 + $0x3cf] sm:$0x40]   ;;  %v3284_v28 = vsel %vm21_vm4, %v9751_v54, %v3280_v24  ;;  %v9782_v54 = vld [vmem:[%s20937_s0 + $0x133] sm:$0x2]   ;;  %v3454_v24 = vsel %vm17_vm3, %v9794_v12, %v3450_v56 }
 0x1a0   :  { %v9753_v35 = vld [vmem:[%s20937_s0 + $0x3ee] sm:$0x80]   ;;  %v3288_v38 = vsel %vm25_vm5, %v9752_v15, %v3284_v28  ;;  %v14737_v15 = vpop.permute.xlu1 %2212   ;;  %v3407_v4 = vsel %vm5_vm0, %v9782_v54, %v9781_v14  ;;  %v9785_v22 = vld [vmem:[%s20937_s0 + $0x190] sm:$0x10]   ;;  %v3458_v13 = vsel %vm21_vm4, %v9795_v30, %v3454_v24 }
 0x1a1   :  { %v3292_v53 = vsel %vm29_vm6, %v9753_v35, %v3288_v38  ;;  %v3358_v35 = vsel %vm25_vm5, %v9770_v63, %v3354_v5  ;;  %v3411_v50 = vsel %vm9_vm1, %v9783_v27, %v3407_v4  ;;  %v9786_v11 = vld [vmem:[%s20937_s0 + $0x1af] sm:$0x20]   ;;  %v3462_v38 = vsel %vm25_vm5, %v9796_v3, %v3458_v13  ;;  %9479 = vst.msk [vmem:[%s20938_s1 + $0x38] sm:$0xff] %vm1970_vm14, %v14737_v15   ;;  %v9935_v15 = vld [vmem:[%s20937_s0 + $0x56f] sm:$0x8]  }
 0x1a2   :  { %3293 = vrot.lane.b32.xlu0 %v3292_v53, %s11225_s17  ;;  %v3362_v7 = vsel %vm29_vm6, %v9771_v19, %v3358_v35  ;;  %v9787_v16 = vld [vmem:[%s20937_s0 + $0x1ce] sm:$0x40]   ;;  %v3415_v28 = vsel %vm13_vm2, %v9784_v18, %v3411_v50  ;;  %v3466_v55 = vsel %vm29_vm6, %v9797_v8, %v3462_v38  ;;  %v14851_v18 = vpop.permute.xlu0 %2247   ;;  %vm4481_vm14 = vcmask 556544  }
 0x1a3   :  { %v9788_v36 = vld [vmem:[%s20937_s0 + $0x1ed] sm:$0x80]   ;;  %v3419_v39 = vsel %vm17_vm3, %v9785_v22, %v3415_v28  ;;  %3467 = vrot.lane.b32.xlu1 %v3466_v55, %s11226_s22  ;;  %2250 = vst.msk [vmem:[%s20938_s1] sm:$0xff] %vm2249_vm15, %v14851_v18   ;;  %v10005_v18 = vld [vmem:[%s20937_s0 + $0x54f] sm:$0x4]  }
 0x1a4   :  { %v9808_v31 = vld [vmem:[%s20937_s0 + $0x614] sm:$0x1]   ;;  %v3423_v57 = vsel %vm21_vm4, %v9786_v11, %v3419_v39  ;;  %v14813_v46 = vpop.permute.xlu1 %2281  }
 0x1a5   :  { %v9809_v32 = vld [vmem:[%s20937_s0 + $0x633] sm:$0x2]   ;;  %v3427_v62 = vsel %vm25_vm5, %v9787_v16, %v3423_v57  ;;  %9496 = vst.msk [vmem:[%s20938_s1 + $0x20] sm:$0xff] %vm2249_vm15, %v14813_v46   ;;  %v10004_v46 = vld [vmem:[%s20937_s0 + $0x530] sm:$0x2]  }
 0x1a6   :  { %3363 = vrot.lane.b32.xlu0 %v3362_v7, %s11226_s22  ;;  %v9810_v33 = vld [vmem:[%s20937_s0 + $0x652] sm:$0x4]   ;;  %v3512_v40 = vsel %vm5_vm0, %v9809_v32, %v9808_v31  ;;  %v3431_v26 = vsel %vm29_vm6, %v9788_v36, %v3427_v62  ;;  %v15024_v29 = vpop.permute.xlu0 %2316  }
 0x1a7   :  { %v9811_v41 = vld [vmem:[%s20937_s0 + $0x671] sm:$0x8]   ;;  %v3516_v59 = vsel %vm9_vm1, %v9810_v33, %v3512_v40  ;;  %9505 = vst.msk [vmem:[%s20938_s1 + $0x8] sm:$0xff] %vm2249_vm15, %v15024_v29  }
 0x1a8   :  { %v9812_v48 = vld [vmem:[%s20937_s0 + $0x690] sm:$0x10]   ;;  %v3520_v19 = vsel %vm13_vm2, %v9811_v41, %v3516_v59 }
 0x1a9   :  { %v9813_v53 = vld [vmem:[%s20937_s0 + $0x6af] sm:$0x20]   ;;  %v3524_v42 = vsel %vm17_vm3, %v9812_v48, %v3520_v19  ;;  %v9844_v19 = vld [vmem:[%s20937_s0 + $0x432] sm:$0x2]  }
 0x1aa   :  { %v9814_v60 = vld [vmem:[%s20937_s0 + $0x6ce] sm:$0x40]   ;;  %3432 = vrot.lane.b32.xlu0 %v3431_v26, %s11226_s22  ;;  %v3528_v30 = vsel %vm21_vm4, %v9813_v53, %v3524_v42 }
 0x1ab   :  { %v9815_v63 = vld [vmem:[%s20937_s0 + $0x6ed] sm:$0x80]   ;;  %v3532_v14 = vsel %vm25_vm5, %v9814_v60, %v3528_v30 }
 0x1ac   :  { %v9799_v58 = vld [vmem:[%s20937_s0 + $0x214] sm:$0x1]   ;;  %v3536_v22 = vsel %vm29_vm6, %v9815_v63, %v3532_v14  ;;  %v9843_v63 = vld [vmem:[%s20937_s0 + $0x413] sm:$0x1]  }
 0x1ad   :  { %v9800_v43 = vld [vmem:[%s20937_s0 + $0x233] sm:$0x2]   ;;  %3537 = vrot.lane.b32.xlu1 %v3536_v22, %s11226_s22  ;;  %v3651_v42 = vsel %vm5_vm0, %v9844_v19, %v9843_v63  ;;  %v9857_v19 = vld [vmem:[%s20937_s0 + $0x1ae] sm:$0x20]  }
 0x1ae   :  { %v9801_v61 = vld [vmem:[%s20937_s0 + $0x252] sm:$0x4]   ;;  %v3477_v2 = vsel %vm5_vm0, %v9800_v43, %v9799_v58  ;;  %v9845_v43 = vld [vmem:[%s20937_s0 + $0x451] sm:$0x4]  }
 0x1af   :  { %v9802_v20 = vld [vmem:[%s20937_s0 + $0x271] sm:$0x8]   ;;  %v3481_v3 = vsel %vm9_vm1, %v9801_v61, %v3477_v2  ;;  %v9846_v61 = vld [vmem:[%s20937_s0 + $0x470] sm:$0x8]   ;;  %v3655_v30 = vsel %vm9_vm1, %v9845_v43, %v3651_v42 }
 0x1b0   :  { %v9803_v37 = vld [vmem:[%s20937_s0 + $0x290] sm:$0x10]   ;;  %v3485_v54 = vsel %vm13_vm2, %v9802_v20, %v3481_v3  ;;  %v9847_v2 = vld [vmem:[%s20937_s0 + $0x48f] sm:$0x10]   ;;  %v3659_v14 = vsel %vm13_vm2, %v9846_v61, %v3655_v30 }
 0x1b1   :  { %v9804_v45 = vld [vmem:[%s20937_s0 + $0x2af] sm:$0x20]   ;;  %v3489_v7 = vsel %vm17_vm3, %v9803_v37, %v3485_v54  ;;  %v9848_v37 = vld [vmem:[%s20937_s0 + $0x4ae] sm:$0x20]  }
 0x1b2   :  { %v9805_v12 = vld [vmem:[%s20937_s0 + $0x2ce] sm:$0x40]   ;;  %v3493_v36 = vsel %vm21_vm4, %v9804_v45, %v3489_v7  ;;  %v9849_v45 = vld [vmem:[%s20937_s0 + $0x4cd] sm:$0x40]   ;;  %v3663_v7 = vsel %vm17_vm3, %v9847_v2, %v3659_v14 }
 0x1b3   :  { %v9806_v5 = vld [vmem:[%s20937_s0 + $0x2ed] sm:$0x80]   ;;  %v3497_v33 = vsel %vm25_vm5, %v9805_v12, %v3493_v36  ;;  %v9850_v3 = vld [vmem:[%s20937_s0 + $0x4ec] sm:$0x80]   ;;  %v3667_v36 = vsel %vm21_vm4, %v9848_v37, %v3663_v7 }
 0x1b4   :  { %v9826_v10 = vld [vmem:[%s20937_s0 + $0x714] sm:$0x1]   ;;  %v3501_v53 = vsel %vm29_vm6, %v9806_v5, %v3497_v33  ;;  %v9835_v5 = vld [vmem:[%s20937_s0 + $0x13] sm:$0x1]  }
 0x1b5   :  { %v9827_v8 = vld [vmem:[%s20937_s0 + $0x733] sm:$0x2]   ;;  %3502 = vrot.lane.b32.xlu0 %v3501_v53, %s11226_s22  ;;  %v9852_v53 = vld [vmem:[%s20937_s0 + $0x113] sm:$0x1]  }
 0x1b6   :  { %v3582_v35 = vsel %vm5_vm0, %v9827_v8, %v9826_v10  ;;  %v9828_v56 = vld [vmem:[%s20937_s0 + $0x752] sm:$0x4]   ;;  %v9836_v10 = vld [vmem:[%s20937_s0 + $0x32] sm:$0x2]  }
 0x1b7   :  { %v9829_v4 = vld [vmem:[%s20937_s0 + $0x771] sm:$0x8]   ;;  %v3586_v24 = vsel %vm9_vm1, %v9828_v56, %v3582_v35  ;;  %v3617_v54 = vsel %vm5_vm0, %v9836_v10, %v9835_v5  ;;  %v9837_v35 = vld [vmem:[%s20937_s0 + $0x51] sm:$0x4]  }
 0x1b8   :  { %v9830_v27 = vld [vmem:[%s20937_s0 + $0x790] sm:$0x10]   ;;  %v3590_v13 = vsel %vm13_vm2, %v9829_v4, %v3586_v24  ;;  %v9838_v56 = vld [vmem:[%s20937_s0 + $0x70] sm:$0x8]   ;;  %v3621_v24 = vsel %vm9_vm1, %v9837_v35, %v3617_v54 }
 0x1b9   :  { %v9831_v50 = vld [vmem:[%s20937_s0 + $0x7af] sm:$0x20]   ;;  %v3594_v38 = vsel %vm17_vm3, %v9830_v27, %v3590_v13  ;;  %v9839_v4 = vld [vmem:[%s20937_s0 + $0x8f] sm:$0x10]   ;;  %v14949_v27 = vpop.permute.xlu1 %2351   ;;  %v3625_v13 = vsel %vm13_vm2, %v9838_v56, %v3621_v24 }
 0x1ba   :  { %v9832_v11 = vld [vmem:[%s20937_s0 + $0x7ce] sm:$0x40]   ;;  %v3598_v55 = vsel %vm21_vm4, %v9831_v50, %v3594_v38  ;;  %v9840_v50 = vld [vmem:[%s20937_s0 + $0xae] sm:$0x20]   ;;  %v3629_v33 = vsel %vm17_vm3, %v9839_v4, %v3625_v13  ;;  %9514 = vst.msk [vmem:[%s20938_s1 + $0x28] sm:$0xff] %vm2249_vm15, %v14949_v27  }
 0x1bb   :  { %v9833_v16 = vld [vmem:[%s20937_s0 + $0x7ed] sm:$0x80]   ;;  %v3602_v58 = vsel %vm25_vm5, %v9832_v11, %v3598_v55  ;;  %v9841_v11 = vld [vmem:[%s20937_s0 + $0xcd] sm:$0x40]   ;;  %v3633_v17 = vsel %vm21_vm4, %v9840_v50, %v3629_v33 }
 0x1bc   :  { %v9817_v28 = vld [vmem:[%s20937_s0 + $0x314] sm:$0x1]   ;;  %v3606_v20 = vsel %vm29_vm6, %v9833_v16, %v3602_v58  ;;  %v9842_v16 = vld [vmem:[%s20937_s0 + $0xec] sm:$0x80]  }
 0x1bd   :  { %v9818_v31 = vld [vmem:[%s20937_s0 + $0x333] sm:$0x2]   ;;  %3607 = vrot.lane.b32.xlu1 %v3606_v20, %s11226_s22  ;;  %v9864_v38 = vld [vmem:[%s20937_s0 + $0x570] sm:$0x8]  }
 0x1be   :  { %v9819_v32 = vld [vmem:[%s20937_s0 + $0x352] sm:$0x4]   ;;  %v3547_v39 = vsel %vm5_vm0, %v9818_v31, %v9817_v28  ;;  %v9861_v28 = vld [vmem:[%s20937_s0 + $0x513] sm:$0x1]  }
 0x1bf   :  { %v9820_v40 = vld [vmem:[%s20937_s0 + $0x371] sm:$0x8]   ;;  %v3551_v57 = vsel %vm9_vm1, %v9819_v32, %v3547_v39  ;;  %v9862_v31 = vld [vmem:[%s20937_s0 + $0x532] sm:$0x2]   ;;  %v3671_v32 = vsel %vm25_vm5, %v9849_v45, %v3667_v36 }
 0x1c0   :  { %v9821_v41 = vld [vmem:[%s20937_s0 + $0x390] sm:$0x10]   ;;  %v3555_v62 = vsel %vm13_vm2, %v9820_v40, %v3551_v57  ;;  %v3721_v0 = vsel %vm5_vm0, %v9862_v31, %v9861_v28  ;;  %v9865_v39 = vld [vmem:[%s20937_s0 + $0x58f] sm:$0x10]   ;;  %v3675_v21 = vsel %vm29_vm6, %v9850_v3, %v3671_v32  ;;  %v15121_v28 = vpop.permute.xlu1 %2421  }
 0x1c1   :  { %v9822_v48 = vld [vmem:[%s20937_s0 + $0x3af] sm:$0x20]   ;;  %v3559_v26 = vsel %vm17_vm3, %v9821_v41, %v3555_v62  ;;  %v3725_v23 = vsel %vm9_vm1, %v9863_v25, %v3721_v0  ;;  %v9868_v40 = vld [vmem:[%s20937_s0 + $0x5ec] sm:$0x80]   ;;  %3676 = vrot.lane.b32.xlu1 %v3675_v21, %s11227_s26  ;;  %v3637_v41 = vsel %vm25_vm5, %v9841_v11, %v3633_v17  ;;  %9532 = vst.msk [vmem:[%s20938_s1 + $0x30] sm:$0xff] %vm2249_vm15, %v15121_v28  }
 0x1c2   :  { %v9823_v59 = vld [vmem:[%s20937_s0 + $0x3ce] sm:$0x40]   ;;  %v3563_v12 = vsel %vm21_vm4, %v9822_v48, %v3559_v26  ;;  %v3729_v48 = vsel %vm13_vm2, %v9864_v38, %v3725_v23  ;;  %v9853_v55 = vld [vmem:[%s20937_s0 + $0x132] sm:$0x2]  }
 0x1c3   :  { %v9824_v60 = vld [vmem:[%s20937_s0 + $0x3ed] sm:$0x80]   ;;  %v3567_v8 = vsel %vm25_vm5, %v9823_v59, %v3563_v12  ;;  %v9854_v57 = vld [vmem:[%s20937_s0 + $0x151] sm:$0x4]   ;;  %v3641_v59 = vsel %vm29_vm6, %v9842_v16, %v3637_v41  ;;  %v3686_v63 = vsel %vm5_vm0, %v9853_v55, %v9852_v53 }
 0x1c4   :  { %v3571_v22 = vsel %vm29_vm6, %v9824_v60, %v3567_v8  ;;  %v3733_v60 = vsel %vm17_vm3, %v9865_v39, %v3729_v48  ;;  %v9855_v58 = vld [vmem:[%s20937_s0 + $0x170] sm:$0x8]   ;;  %v3690_v61 = vsel %vm9_vm1, %v9854_v57, %v3686_v63 }
 0x1c5   :  { %3572 = vrot.lane.b32.xlu0 %v3571_v22, %s11226_s22  ;;  %v9856_v62 = vld [vmem:[%s20937_s0 + $0x18f] sm:$0x10]   ;;  %v3737_v43 = vsel %vm21_vm4, %v9866_v51, %v3733_v60  ;;  %v3694_v37 = vsel %vm13_vm2, %v9855_v58, %v3690_v61  ;;  %s11237_s22 = smov 36  }
 0x1c6   :  { %v9858_v20 = vld [vmem:[%s20937_s0 + $0x1cd] sm:$0x40]   ;;  %v3741_v2 = vsel %vm25_vm5, %v9867_v9, %v3737_v43  ;;  %v3698_v5 = vsel %vm17_vm3, %v9856_v62, %v3694_v37  ;;  %v15147_v9 = vpop.permute.xlu0 %2386  }
 0x1c7   :  { %v9859_v26 = vld [vmem:[%s20937_s0 + $0x1ec] sm:$0x80]   ;;  %v3745_v3 = vsel %vm29_vm6, %v9868_v40, %v3741_v2  ;;  %v3702_v35 = vsel %vm21_vm4, %v9857_v19, %v3698_v5  ;;  %9523 = vst.msk [vmem:[%s20938_s1 + $0x10] sm:$0xff] %vm2249_vm15, %v15147_v9  }
 0x1c8   :  { %v9879_v42 = vld [vmem:[%s20937_s0 + $0x613] sm:$0x1]   ;;  %3746 = vrot.lane.b32.xlu1 %v3745_v3, %s11227_s26  ;;  %v3706_v24 = vsel %vm25_vm5, %v9858_v20, %v3702_v35 }
 0x1c9   :  { %3642 = vrot.lane.b32.xlu0 %v3641_v59, %s11227_s26  ;;  %v9880_v45 = vld [vmem:[%s20937_s0 + $0x632] sm:$0x2]   ;;  %v3710_v31 = vsel %vm29_vm6, %v9859_v26, %v3706_v24  ;;  %v9918_v24 = vld [vmem:[%s20937_s0 + $0x48e] sm:$0x10]  }
 0x1ca   :  { %v9881_v12 = vld [vmem:[%s20937_s0 + $0x651] sm:$0x4]   ;;  %v3791_v10 = vsel %vm5_vm0, %v9880_v45, %v9879_v42  ;;  %v15312_v6 = vpop.permute.xlu0 %2456  }
 0x1cb   :  { %v9882_v30 = vld [vmem:[%s20937_s0 + $0x670] sm:$0x8]   ;;  %v3795_v56 = vsel %vm9_vm1, %v9881_v12, %v3791_v10  ;;  %9541 = vst.msk [vmem:[%s20938_s1 + $0x18] sm:$0xff] %vm2249_vm15, %v15312_v6   ;;  %v10008_v6 = vld [vmem:[%s20937_s0 + $0x5ac] sm:$0x20]  }
 0x1cc   :  { %v9883_v8 = vld [vmem:[%s20937_s0 + $0x68f] sm:$0x10]   ;;  %v3799_v50 = vsel %vm13_vm2, %v9882_v30, %v3795_v56 }
 0x1cd   :  { %v9884_v14 = vld [vmem:[%s20937_s0 + $0x6ae] sm:$0x20]   ;;  %v3803_v32 = vsel %vm17_vm3, %v9883_v8, %v3799_v50  ;;  %3711 = vrot.lane.b32.xlu0 %v3710_v31, %s11227_s26  ;;  %v9921_v31 = vld [vmem:[%s20937_s0 + $0x4eb] sm:$0x80]  }
 0x1ce   :  { %v9885_v54 = vld [vmem:[%s20937_s0 + $0x6cd] sm:$0x40]   ;;  %v3807_v39 = vsel %vm21_vm4, %v9884_v14, %v3803_v32  ;;  %v9914_v14 = vld [vmem:[%s20937_s0 + $0x412] sm:$0x1]  }
 0x1cf   :  { %v9886_v4 = vld [vmem:[%s20937_s0 + $0x6ec] sm:$0x80]   ;;  %v3811_v40 = vsel %vm25_vm5, %v9885_v54, %v3807_v39  ;;  %v9915_v54 = vld [vmem:[%s20937_s0 + $0x431] sm:$0x2]   ;;  %v15245_v39 = vpop.permute.xlu1 %2491  }
 0x1d0   :  { %v9870_v22 = vld [vmem:[%s20937_s0 + $0x213] sm:$0x1]   ;;  %v3815_v59 = vsel %vm29_vm6, %v9886_v4, %v3811_v40  ;;  %v3930_v4 = vsel %vm5_vm0, %v9915_v54, %v9914_v14  ;;  %v9910_v40 = vld [vmem:[%s20937_s0 + $0x8e] sm:$0x10]   ;;  %9550 = vst.msk [vmem:[%s20938_s1 + $0x38] sm:$0xff] %vm2249_vm15, %v15245_v39   ;;  %vm4760_vm15 = vcmask 523744  }
 0x1d1   :  { %v9871_v7 = vld [vmem:[%s20937_s0 + $0x232] sm:$0x2]   ;;  %3816 = vrot.lane.b32.xlu1 %v3815_v59, %s11227_s26  ;;  %v9913_v59 = vld [vmem:[%s20937_s0 + $0xeb] sm:$0x80]   ;;  %v10007_v39 = vld [vmem:[%s20937_s0 + $0x58d] sm:$0x10]  }
 0x1d2   :  { %v3756_v11 = vsel %vm5_vm0, %v9871_v7, %v9870_v22  ;;  %v9872_v16 = vld [vmem:[%s20937_s0 + $0x251] sm:$0x4]   ;;  %v9916_v22 = vld [vmem:[%s20937_s0 + $0x450] sm:$0x4]  }
 0x1d3   :  { %v9873_v36 = vld [vmem:[%s20937_s0 + $0x270] sm:$0x8]   ;;  %v3760_v33 = vsel %vm9_vm1, %v9872_v16, %v3756_v11  ;;  %v9917_v7 = vld [vmem:[%s20937_s0 + $0x46f] sm:$0x8]   ;;  %v3934_v16 = vsel %vm9_vm1, %v9916_v22, %v3930_v4 }
 0x1d4   :  { %v9874_v13 = vld [vmem:[%s20937_s0 + $0x28f] sm:$0x10]   ;;  %v3764_v21 = vsel %vm13_vm2, %v9873_v36, %v3760_v33  ;;  %v9919_v36 = vld [vmem:[%s20937_s0 + $0x4ad] sm:$0x20]   ;;  %v3938_v33 = vsel %vm13_vm2, %v9917_v7, %v3934_v16 }
 0x1d5   :  { %v9875_v0 = vld [vmem:[%s20937_s0 + $0x2ae] sm:$0x20]   ;;  %v3768_v41 = vsel %vm17_vm3, %v9874_v13, %v3764_v21  ;;  %v9920_v13 = vld [vmem:[%s20937_s0 + $0x4cc] sm:$0x40]  }
 0x1d6   :  { %v9876_v25 = vld [vmem:[%s20937_s0 + $0x2cd] sm:$0x40]   ;;  %v3772_v60 = vsel %vm21_vm4, %v9875_v0, %v3768_v41  ;;  %v9906_v0 = vld [vmem:[%s20937_s0 + $0x12] sm:$0x1]  }
 0x1d7   :  { %v9877_v38 = vld [vmem:[%s20937_s0 + $0x2ec] sm:$0x80]   ;;  %v3776_v43 = vsel %vm25_vm5, %v9876_v25, %v3772_v60  ;;  %v9907_v25 = vld [vmem:[%s20937_s0 + $0x31] sm:$0x2]  }
 0x1d8   :  { %v9897_v17 = vld [vmem:[%s20937_s0 + $0x713] sm:$0x1]   ;;  %v3780_v2 = vsel %vm29_vm6, %v9877_v38, %v3776_v43  ;;  %v9908_v38 = vld [vmem:[%s20937_s0 + $0x50] sm:$0x4]  }
 0x1d9   :  { %v9898_v23 = vld [vmem:[%s20937_s0 + $0x732] sm:$0x2]   ;;  %3781 = vrot.lane.b32.xlu0 %v3780_v2, %s11227_s26  ;;  %v9911_v41 = vld [vmem:[%s20937_s0 + $0xad] sm:$0x20]  }
 0x1da   :  { %v9899_v51 = vld [vmem:[%s20937_s0 + $0x751] sm:$0x4]   ;;  %v3861_v48 = vsel %vm5_vm0, %v9898_v23, %v9897_v17  ;;  %v3942_v17 = vsel %vm17_vm3, %v9918_v24, %v3938_v33  ;;  %v3896_v23 = vsel %vm5_vm0, %v9907_v25, %v9906_v0  ;;  %v9929_v14 = vld [vmem:[%s20937_s0 + $0x1cc] sm:$0x40]  }
 0x1db   :  { %v9900_v53 = vld [vmem:[%s20937_s0 + $0x770] sm:$0x8]   ;;  %v3865_v63 = vsel %vm9_vm1, %v9899_v51, %v3861_v48  ;;  %v9909_v51 = vld [vmem:[%s20937_s0 + $0x6f] sm:$0x8]  }
 0x1dc   :  { %v9901_v55 = vld [vmem:[%s20937_s0 + $0x78f] sm:$0x10]   ;;  %v3869_v61 = vsel %vm13_vm2, %v9900_v53, %v3865_v63  ;;  %v3946_v53 = vsel %vm21_vm4, %v9919_v36, %v3942_v17  ;;  %v9950_v4 = vld [vmem:[%s20937_s0 + $0x612] sm:$0x1]  }
 0x1dd   :  { %v9902_v57 = vld [vmem:[%s20937_s0 + $0x7ae] sm:$0x20]   ;;  %v3873_v37 = vsel %vm17_vm3, %v9901_v55, %v3869_v61  ;;  %v3900_v55 = vsel %vm9_vm1, %v9908_v38, %v3896_v23  ;;  %v3950_v60 = vsel %vm25_vm5, %v9920_v13, %v3946_v53  ;;  %v9938_v61 = vld [vmem:[%s20937_s0 + $0x5cc] sm:$0x40]  }
 0x1de   :  { %v9903_v58 = vld [vmem:[%s20937_s0 + $0x7cd] sm:$0x40]   ;;  %v3877_v5 = vsel %vm21_vm4, %v9902_v57, %v3873_v37  ;;  %v9912_v57 = vld [vmem:[%s20937_s0 + $0xcc] sm:$0x40]   ;;  %v3904_v63 = vsel %vm13_vm2, %v9909_v51, %v3900_v55  ;;  %v3954_v44 = vsel %vm29_vm6, %v9921_v31, %v3950_v60 }
 0x1df   :  { %v9904_v62 = vld [vmem:[%s20937_s0 + $0x7ec] sm:$0x80]   ;;  %v3881_v35 = vsel %vm25_vm5, %v9903_v58, %v3877_v5  ;;  %v9934_v58 = vld [vmem:[%s20937_s0 + $0x550] sm:$0x4]   ;;  %v3908_v52 = vsel %vm17_vm3, %v9910_v40, %v3904_v63  ;;  %v15409_v40 = vpop.permute.xlu1 %2560  }
 0x1e0   :  { %v9888_v19 = vld [vmem:[%s20937_s0 + $0x313] sm:$0x1]   ;;  %v3885_v50 = vsel %vm29_vm6, %v9904_v62, %v3881_v35  ;;  %v9937_v62 = vld [vmem:[%s20937_s0 + $0x5ad] sm:$0x20]   ;;  %v4004_v43 = vsel %vm9_vm1, %v9934_v58, %v4000_v1  ;;  %9567 = vst.msk [vmem:[%s20938_s1 + $0x20] sm:$0xff] %vm2528_vm7, %v15409_v40  }
 0x1e1   :  { %v9889_v20 = vld [vmem:[%s20937_s0 + $0x332] sm:$0x2]   ;;  %3886 = vrot.lane.b32.xlu1 %v3885_v50, %s11227_s26  ;;  %v4008_v2 = vsel %vm13_vm2, %v9935_v15, %v4004_v43  ;;  %v9924_v37 = vld [vmem:[%s20937_s0 + $0x131] sm:$0x2]  }
 0x1e2   :  { %v9890_v26 = vld [vmem:[%s20937_s0 + $0x351] sm:$0x4]   ;;  %v3826_v45 = vsel %vm5_vm0, %v9889_v20, %v9888_v19  ;;  %v3912_v19 = vsel %vm21_vm4, %v9911_v41, %v3908_v52  ;;  %v9939_v20 = vld [vmem:[%s20937_s0 + $0x5eb] sm:$0x80]  }
 0x1e3   :  { %v9891_v42 = vld [vmem:[%s20937_s0 + $0x370] sm:$0x8]   ;;  %v3830_v10 = vsel %vm9_vm1, %v9890_v26, %v3826_v45  ;;  %v9923_v26 = vld [vmem:[%s20937_s0 + $0x112] sm:$0x1]  }
 0x1e4   :  { %v9892_v12 = vld [vmem:[%s20937_s0 + $0x38f] sm:$0x10]   ;;  %v3834_v56 = vsel %vm13_vm2, %v9891_v42, %v3830_v10  ;;  %v3916_v42 = vsel %vm25_vm5, %v9912_v57, %v3912_v19  ;;  %v9925_v45 = vld [vmem:[%s20937_s0 + $0x150] sm:$0x4]   ;;  %v3965_v5 = vsel %vm5_vm0, %v9924_v37, %v9923_v26  ;;  %v15447_v19 = vpop.permute.xlu0 %2526  }
 0x1e5   :  { %v9893_v30 = vld [vmem:[%s20937_s0 + $0x3ae] sm:$0x20]   ;;  %v3838_v11 = vsel %vm17_vm3, %v9892_v12, %v3834_v56  ;;  %3955 = vrot.lane.b32.xlu1 %v3954_v44, %s11228_s25  ;;  %v9926_v12 = vld [vmem:[%s20937_s0 + $0x16f] sm:$0x8]   ;;  %v3969_v35 = vsel %vm9_vm1, %v9925_v45, %v3965_v5  ;;  %2529 = vst.msk [vmem:[%s20938_s1] sm:$0xff] %vm2528_vm7, %v15447_v19  }
 0x1e6   :  { %v9894_v3 = vld [vmem:[%s20937_s0 + $0x3cd] sm:$0x40]   ;;  %v3842_v32 = vsel %vm21_vm4, %v9893_v30, %v3838_v11  ;;  %v3920_v30 = vsel %vm29_vm6, %v9913_v59, %v3916_v42  ;;  %v9927_v10 = vld [vmem:[%s20937_s0 + $0x18e] sm:$0x10]   ;;  %v3973_v24 = vsel %vm13_vm2, %v9926_v12, %v3969_v35  ;;  %v10076_v19 = vld [vmem:[%s20937_s0 + $0x54e] sm:$0x4]  }
 0x1e7   :  { %v9895_v8 = vld [vmem:[%s20937_s0 + $0x3ec] sm:$0x80]   ;;  %v3846_v21 = vsel %vm25_vm5, %v9894_v3, %v3842_v32  ;;  %v4012_v3 = vsel %vm17_vm3, %v9936_v34, %v4008_v2  ;;  %v9930_v56 = vld [vmem:[%s20937_s0 + $0x1eb] sm:$0x80]   ;;  %v3977_v31 = vsel %vm17_vm3, %v9927_v10, %v3973_v24 }
 0x1e8   :  { %v3850_v48 = vsel %vm29_vm6, %v9895_v8, %v3846_v21  ;;  %v9928_v8 = vld [vmem:[%s20937_s0 + $0x1ad] sm:$0x20]   ;;  %v4016_v54 = vsel %vm21_vm4, %v9937_v62, %v4012_v3 }
 0x1e9   :  { %3851 = vrot.lane.b32.xlu0 %v3850_v48, %s11227_s26  ;;  %v9951_v22 = vld [vmem:[%s20937_s0 + $0x631] sm:$0x2]   ;;  %v4020_v7 = vsel %vm25_vm5, %v9938_v61, %v4016_v54  ;;  %v3981_v38 = vsel %vm21_vm4, %v9928_v8, %v3977_v31  ;;  %v9986_v31 = vld [vmem:[%s20937_s0 + $0x430] sm:$0x2]  }
 0x1ea   :  { %v4070_v50 = vsel %vm5_vm0, %v9951_v22, %v9950_v4  ;;  %v9952_v11 = vld [vmem:[%s20937_s0 + $0x650] sm:$0x4]   ;;  %v4024_v13 = vsel %vm29_vm6, %v9939_v20, %v4020_v7  ;;  %v3985_v41 = vsel %vm25_vm5, %v9929_v14, %v3981_v38 }
 0x1eb   :  { %v9953_v16 = vld [vmem:[%s20937_s0 + $0x66f] sm:$0x8]   ;;  %v4074_v32 = vsel %vm9_vm1, %v9952_v11, %v4070_v50  ;;  %4025 = vrot.lane.b32.xlu1 %v4024_v13, %s11228_s25  ;;  %v3989_v60 = vsel %vm29_vm6, %v9930_v56, %v3985_v41  ;;  %v15485_v56 = vpop.permute.xlu1 %2630   ;;  %v9985_v13 = vld [vmem:[%s20937_s0 + $0x411] sm:$0x1]  }
 0x1ec   :  { %v9954_v36 = vld [vmem:[%s20937_s0 + $0x68e] sm:$0x10]   ;;  %v4078_v21 = vsel %vm13_vm2, %v9953_v16, %v4074_v32  ;;  %v9987_v32 = vld [vmem:[%s20937_s0 + $0x44f] sm:$0x4]   ;;  %v4209_v38 = vsel %vm5_vm0, %v9986_v31, %v9985_v13  ;;  %9585 = vst.msk [vmem:[%s20938_s1 + $0x28] sm:$0xff] %vm2528_vm7, %v15485_v56  }
 0x1ed   :  { %3921 = vrot.lane.b32.xlu0 %v3920_v30, %s11228_s25  ;;  %v9955_v33 = vld [vmem:[%s20937_s0 + $0x6ad] sm:$0x20]   ;;  %v4082_v48 = vsel %vm17_vm3, %v9954_v36, %v4078_v21  ;;  %v9988_v21 = vld [vmem:[%s20937_s0 + $0x46e] sm:$0x8]  }
 0x1ee   :  { %v9956_v0 = vld [vmem:[%s20937_s0 + $0x6cc] sm:$0x40]   ;;  %v4086_v63 = vsel %vm21_vm4, %v9955_v33, %v4082_v48  ;;  %v15511_v33 = vpop.permute.xlu0 %2595   ;;  %v4213_v48 = vsel %vm9_vm1, %v9987_v32, %v4209_v38  ;;  %v10001_v13 = vld [vmem:[%s20937_s0 + $0x1ea] sm:$0x80]  }
 0x1ef   :  { %v9957_v25 = vld [vmem:[%s20937_s0 + $0x6eb] sm:$0x80]   ;;  %v4090_v52 = vsel %vm25_vm5, %v9956_v0, %v4086_v63  ;;  %v9978_v63 = vld [vmem:[%s20937_s0 + $0x30] sm:$0x2]   ;;  %9576 = vst.msk [vmem:[%s20938_s1 + $0x8] sm:$0xff] %vm2528_vm7, %v15511_v33  }
 0x1f0   :  { %v9941_v17 = vld [vmem:[%s20937_s0 + $0x212] sm:$0x1]   ;;  %v4094_v43 = vsel %vm29_vm6, %v9957_v25, %v4090_v52  ;;  %v10023_v38 = vld [vmem:[%s20937_s0 + $0x64f] sm:$0x4]  }
 0x1f1   :  { %v9942_v23 = vld [vmem:[%s20937_s0 + $0x231] sm:$0x2]   ;;  %3990 = vrot.lane.b32.xlu0 %v3989_v60, %s11228_s25  ;;  %4095 = vrot.lane.b32.xlu1 %v4094_v43, %s11228_s25  ;;  %v4217_v60 = vsel %vm13_vm2, %v9988_v21, %v4213_v48  ;;  %v10025_v48 = vld [vmem:[%s20937_s0 + $0x68d] sm:$0x10]  }
 0x1f2   :  { %v9943_v51 = vld [vmem:[%s20937_s0 + $0x250] sm:$0x4]   ;;  %v4035_v53 = vsel %vm5_vm0, %v9942_v23, %v9941_v17  ;;  %v9989_v17 = vld [vmem:[%s20937_s0 + $0x48d] sm:$0x10]   ;;  %v15615_v27 = vpop.permute.xlu0 %2665  }
 0x1f3   :  { %v9944_v55 = vld [vmem:[%s20937_s0 + $0x26f] sm:$0x8]   ;;  %v4039_v49 = vsel %vm9_vm1, %v9943_v51, %v4035_v53  ;;  %v9990_v23 = vld [vmem:[%s20937_s0 + $0x4ac] sm:$0x20]   ;;  %v4221_v52 = vsel %vm17_vm3, %v9989_v17, %v4217_v60  ;;  %9594 = vst.msk [vmem:[%s20938_s1 + $0x10] sm:$0xff] %vm2528_vm7, %v15615_v27  }
 0x1f4   :  { %v9945_v57 = vld [vmem:[%s20937_s0 + $0x28e] sm:$0x10]   ;;  %v4043_v1 = vsel %vm13_vm2, %v9944_v55, %v4039_v49  ;;  %v9991_v53 = vld [vmem:[%s20937_s0 + $0x4cb] sm:$0x40]   ;;  %v4225_v43 = vsel %vm21_vm4, %v9990_v23, %v4221_v52  ;;  %v10079_v27 = vld [vmem:[%s20937_s0 + $0x5ab] sm:$0x20]  }
 0x1f5   :  { %v9946_v59 = vld [vmem:[%s20937_s0 + $0x2ad] sm:$0x20]   ;;  %v4047_v61 = vsel %vm17_vm3, %v9945_v57, %v4043_v1  ;;  %v9992_v55 = vld [vmem:[%s20937_s0 + $0x4ea] sm:$0x80]  }
 0x1f6   :  { %v9948_v58 = vld [vmem:[%s20937_s0 + $0x2eb] sm:$0x80]   ;;  %v4051_v37 = vsel %vm21_vm4, %v9946_v59, %v4047_v61  ;;  %v9977_v57 = vld [vmem:[%s20937_s0 + $0x11] sm:$0x1]   ;;  %v15679_v21 = vpop.permute.xlu0 %2735  }
 0x1f7   :  { %v9968_v44 = vld [vmem:[%s20937_s0 + $0x712] sm:$0x1]   ;;  %v4055_v5 = vsel %vm25_vm5, %v9947_v47, %v4051_v37  ;;  %v9979_v49 = vld [vmem:[%s20937_s0 + $0x4f] sm:$0x4]   ;;  %v4175_v1 = vsel %vm5_vm0, %v9978_v63, %v9977_v57  ;;  %9612 = vst.msk [vmem:[%s20938_s1 + $0x18] sm:$0xff] %vm2528_vm7, %v15679_v21  }
 0x1f8   :  { %v9969_v15 = vld [vmem:[%s20937_s0 + $0x731] sm:$0x2]   ;;  %v4059_v4 = vsel %vm29_vm6, %v9948_v58, %v4055_v5  ;;  %v9980_v47 = vld [vmem:[%s20937_s0 + $0x6e] sm:$0x8]   ;;  %v15549_v58 = vpop.permute.xlu1 %2700   ;;  %v4179_v61 = vsel %vm9_vm1, %v9979_v49, %v4175_v1  ;;  %v10081_v21 = vld [vmem:[%s20937_s0 + $0x5e9] sm:$0x80]  }
 0x1f9   :  { %v9970_v34 = vld [vmem:[%s20937_s0 + $0x750] sm:$0x4]   ;;  %v4140_v20 = vsel %vm5_vm0, %v9969_v15, %v9968_v44  ;;  %4060 = vrot.lane.b32.xlu0 %v4059_v4, %s11228_s25  ;;  %v9981_v15 = vld [vmem:[%s20937_s0 + $0x8d] sm:$0x10]   ;;  %9603 = vst.msk [vmem:[%s20938_s1 + $0x30] sm:$0xff] %vm2528_vm7, %v15549_v58  }
 0x1fa   :  { %v9971_v62 = vld [vmem:[%s20937_s0 + $0x76f] sm:$0x8]   ;;  %v4144_v45 = vsel %vm9_vm1, %v9970_v34, %v4140_v20  ;;  %v9982_v34 = vld [vmem:[%s20937_s0 + $0xac] sm:$0x20]  }
 0x1fb   :  { %v9972_v26 = vld [vmem:[%s20937_s0 + $0x78e] sm:$0x10]   ;;  %v4148_v10 = vsel %vm13_vm2, %v9971_v62, %v4144_v45  ;;  %v9983_v62 = vld [vmem:[%s20937_s0 + $0xcb] sm:$0x40]  }
 0x1fc   :  { %v9973_v42 = vld [vmem:[%s20937_s0 + $0x7ad] sm:$0x20]   ;;  %v4152_v22 = vsel %vm17_vm3, %v9972_v26, %v4148_v10  ;;  %v9984_v20 = vld [vmem:[%s20937_s0 + $0xea] sm:$0x80]  }
 0x1fd   :  { %v9974_v2 = vld [vmem:[%s20937_s0 + $0x7cc] sm:$0x40]   ;;  %v4156_v16 = vsel %vm21_vm4, %v9973_v42, %v4152_v22  ;;  %v10003_v26 = vld [vmem:[%s20937_s0 + $0x511] sm:$0x1]   ;;  %v4229_v42 = vsel %vm25_vm5, %v9991_v53, %v4225_v43 }
 0x1fe   :  { %v9975_v12 = vld [vmem:[%s20937_s0 + $0x7eb] sm:$0x80]   ;;  %v4160_v0 = vsel %vm25_vm5, %v9974_v2, %v4156_v16  ;;  %v4183_v2 = vsel %vm13_vm2, %v9980_v47, %v4179_v61  ;;  %v10006_v37 = vld [vmem:[%s20937_s0 + $0x56e] sm:$0x8]   ;;  %v4233_v29 = vsel %vm29_vm6, %v9992_v55, %v4229_v42  ;;  %v4279_v9 = vsel %vm5_vm0, %v10004_v46, %v10003_v26 }
 0x1ff   :  { %v9959_v30 = vld [vmem:[%s20937_s0 + $0x312] sm:$0x1]   ;;  %v4164_v51 = vsel %vm29_vm6, %v9975_v12, %v4160_v0  ;;  %v4187_v28 = vsel %vm17_vm3, %v9981_v15, %v4183_v2  ;;  %v10009_v45 = vld [vmem:[%s20937_s0 + $0x5cb] sm:$0x40]  }
 0x200   :  { %v9960_v3 = vld [vmem:[%s20937_s0 + $0x331] sm:$0x2]   ;;  %4165 = vrot.lane.b32.xlu1 %v4164_v51, %s11228_s25  ;;  %v4191_v12 = vsel %vm21_vm4, %v9982_v34, %v4187_v28  ;;  %v9994_v5 = vld [vmem:[%s20937_s0 + $0x111] sm:$0x1]   ;;  %v15743_v28 = vpop.permute.xlu0 %2805  }
 0x201   :  { %v4105_v8 = vsel %vm5_vm0, %v9960_v3, %v9959_v30  ;;  %v9961_v14 = vld [vmem:[%s20937_s0 + $0x350] sm:$0x4]   ;;  %v4283_v30 = vsel %vm9_vm1, %v10005_v18, %v4279_v9  ;;  %v10010_v3 = vld [vmem:[%s20937_s0 + $0x5ea] sm:$0x80]   ;;  %2808 = vst.msk [vmem:[%s20938_s1] sm:$0xff] %vm2807_vm8, %v15743_v28  }
 0x202   :  { %v9962_v54 = vld [vmem:[%s20937_s0 + $0x36f] sm:$0x8]   ;;  %v4109_v7 = vsel %vm9_vm1, %v9961_v14, %v4105_v8  ;;  %v9995_v10 = vld [vmem:[%s20937_s0 + $0x130] sm:$0x2]   ;;  %v15641_v8 = vpop.permute.xlu1 %2770   ;;  %v4195_v14 = vsel %vm25_vm5, %v9983_v62, %v4191_v12  ;;  %v10146_v28 = vld [vmem:[%s20937_s0 + $0x52e] sm:$0x2]  }
 0x203   :  { %v9963_v35 = vld [vmem:[%s20937_s0 + $0x38e] sm:$0x10]   ;;  %v4113_v36 = vsel %vm13_vm2, %v9962_v54, %v4109_v7  ;;  %v4287_v54 = vsel %vm13_vm2, %v10006_v37, %v4283_v30  ;;  %v9996_v4 = vld [vmem:[%s20937_s0 + $0x14f] sm:$0x4]   ;;  %9621 = vst.msk [vmem:[%s20938_s1 + $0x38] sm:$0xff] %vm2528_vm7, %v15641_v8   ;;  %vm5039_vm7 = vcmask 490944  }
 0x204   :  { %v9964_v24 = vld [vmem:[%s20937_s0 + $0x3ad] sm:$0x20]   ;;  %v4117_v25 = vsel %vm17_vm3, %v9963_v35, %v4113_v36  ;;  %4234 = vrot.lane.b32.xlu1 %v4233_v29, %s11229_s30  ;;  %v4244_v35 = vsel %vm5_vm0, %v9995_v10, %v9994_v5  ;;  %v9997_v22 = vld [vmem:[%s20937_s0 + $0x16e] sm:$0x8]   ;;  %v10080_v8 = vld [vmem:[%s20937_s0 + $0x5ca] sm:$0x40]  }
 0x205   :  { %v9965_v50 = vld [vmem:[%s20937_s0 + $0x3cc] sm:$0x40]   ;;  %v4121_v41 = vsel %vm21_vm4, %v9964_v24, %v4117_v25  ;;  %v9998_v7 = vld [vmem:[%s20937_s0 + $0x18d] sm:$0x10]   ;;  %v4199_v24 = vsel %vm29_vm6, %v9984_v20, %v4195_v14 }
 0x206   :  { %v9966_v11 = vld [vmem:[%s20937_s0 + $0x3eb] sm:$0x80]   ;;  %v4125_v59 = vsel %vm25_vm5, %v9965_v50, %v4121_v41  ;;  %v4291_v50 = vsel %vm17_vm3, %v10007_v39, %v4287_v54  ;;  %v9999_v16 = vld [vmem:[%s20937_s0 + $0x1ac] sm:$0x20]   ;;  %v15717_v34 = vpop.permute.xlu1 %2839  }
 0x207   :  { %v4129_v44 = vsel %vm29_vm6, %v9966_v11, %v4125_v59  ;;  %v4248_v11 = vsel %vm9_vm1, %v9996_v4, %v4244_v35  ;;  %v10000_v36 = vld [vmem:[%s20937_s0 + $0x1cb] sm:$0x40]   ;;  %v4295_v31 = vsel %vm21_vm4, %v10008_v6, %v4291_v50  ;;  %9638 = vst.msk [vmem:[%s20938_s1 + $0x20] sm:$0xff] %vm2807_vm8, %v15717_v34   ;;  %v10145_v34 = vld [vmem:[%s20937_s0 + $0x50f] sm:$0x1]  }
 0x208   :  { %4130 = vrot.lane.b32.xlu0 %v4129_v44, %s11228_s25  ;;  %v4252_v32 = vsel %vm13_vm2, %v9997_v22, %v4248_v11  ;;  %v10021_v0 = vld [vmem:[%s20937_s0 + $0x611] sm:$0x1]   ;;  %v4299_v17 = vsel %vm25_vm5, %v10009_v45, %v4295_v31 }
 0x209   :  { %v10022_v25 = vld [vmem:[%s20937_s0 + $0x630] sm:$0x2]   ;;  %v4256_v23 = vsel %vm17_vm3, %v9998_v7, %v4252_v32  ;;  %v4303_v55 = vsel %vm29_vm6, %v10010_v3, %v4299_v17 }
 0x20a   :  { %v4349_v51 = vsel %vm5_vm0, %v10022_v25, %v10021_v0  ;;  %v10024_v41 = vld [vmem:[%s20937_s0 + $0x66e] sm:$0x8]   ;;  %v4260_v57 = vsel %vm21_vm4, %v9999_v16, %v4256_v23  ;;  %4304 = vrot.lane.b32.xlu1 %v4303_v55, %s11229_s30  ;;  %v15781_v11 = vpop.permute.xlu1 %2909   ;;  %v10057_v55 = vld [vmem:[%s20937_s0 + $0x42f] sm:$0x2]  }
 0x20b   :  { %v10026_v53 = vld [vmem:[%s20937_s0 + $0x6ac] sm:$0x20]   ;;  %v4353_v59 = vsel %vm9_vm1, %v10023_v38, %v4349_v51  ;;  %v4264_v47 = vsel %vm25_vm5, %v10000_v36, %v4260_v57  ;;  %v10058_v57 = vld [vmem:[%s20937_s0 + $0x44e] sm:$0x4]   ;;  %9656 = vst.msk [vmem:[%s20938_s1 + $0x28] sm:$0xff] %vm2807_vm8, %v15781_v11  }
 0x20c   :  { %4200 = vrot.lane.b32.xlu0 %v4199_v24, %s11229_s30  ;;  %v10027_v60 = vld [vmem:[%s20937_s0 + $0x6cb] sm:$0x40]   ;;  %v4357_v44 = vsel %vm13_vm2, %v10024_v41, %v4353_v59  ;;  %v4268_v62 = vsel %vm29_vm6, %v10001_v13, %v4264_v47  ;;  %v10056_v41 = vld [vmem:[%s20937_s0 + $0x410] sm:$0x1]  }
 0x20d   :  { %v10028_v63 = vld [vmem:[%s20937_s0 + $0x6ea] sm:$0x80]   ;;  %v4361_v43 = vsel %vm17_vm3, %v10025_v48, %v4357_v44  ;;  %v10059_v59 = vld [vmem:[%s20937_s0 + $0x46d] sm:$0x8]   ;;  %v4488_v47 = vsel %vm5_vm0, %v10057_v55, %v10056_v41 }
 0x20e   :  { %v10012_v49 = vld [vmem:[%s20937_s0 + $0x211] sm:$0x1]   ;;  %v4365_v2 = vsel %vm21_vm4, %v10026_v53, %v4361_v43  ;;  %v10060_v44 = vld [vmem:[%s20937_s0 + $0x48c] sm:$0x10]  }
 0x20f   :  { %v10013_v52 = vld [vmem:[%s20937_s0 + $0x230] sm:$0x2]   ;;  %v4369_v9 = vsel %vm25_vm5, %v10027_v60, %v4365_v2  ;;  %v15819_v60 = vpop.permute.xlu0 %2874   ;;  %v10063_v43 = vld [vmem:[%s20937_s0 + $0x4e9] sm:$0x80]  }
 0x210   :  { %v10014_v1 = vld [vmem:[%s20937_s0 + $0x24f] sm:$0x4]   ;;  %v4314_v61 = vsel %vm5_vm0, %v10013_v52, %v10012_v49  ;;  %4269 = vrot.lane.b32.xlu0 %v4268_v62, %s11229_s30  ;;  %v4373_v3 = vsel %vm29_vm6, %v10028_v63, %v4369_v9  ;;  %v10061_v52 = vld [vmem:[%s20937_s0 + $0x4ab] sm:$0x20]   ;;  %v4492_v62 = vsel %vm9_vm1, %v10058_v57, %v4488_v47  ;;  %9647 = vst.msk [vmem:[%s20938_s1 + $0x8] sm:$0xff] %vm2807_vm8, %v15819_v60  }
 0x211   :  { %v10015_v15 = vld [vmem:[%s20937_s0 + $0x26e] sm:$0x8]   ;;  %v4318_v46 = vsel %vm9_vm1, %v10014_v1, %v4314_v61  ;;  %4374 = vrot.lane.b32.xlu1 %v4373_v3, %s11229_s30  ;;  %v10062_v1 = vld [vmem:[%s20937_s0 + $0x4ca] sm:$0x40]  }
 0x212   :  { %v10016_v20 = vld [vmem:[%s20937_s0 + $0x28d] sm:$0x10]   ;;  %v4322_v39 = vsel %vm13_vm2, %v10015_v15, %v4318_v46  ;;  %v10048_v61 = vld [vmem:[%s20937_s0 + $0x10] sm:$0x1]  }
 0x213   :  { %v10017_v26 = vld [vmem:[%s20937_s0 + $0x2ac] sm:$0x20]   ;;  %v4326_v5 = vsel %vm17_vm3, %v10016_v20, %v4322_v39  ;;  %v10049_v20 = vld [vmem:[%s20937_s0 + $0x2f] sm:$0x2]  }
 0x214   :  { %v10018_v42 = vld [vmem:[%s20937_s0 + $0x2cb] sm:$0x40]   ;;  %v4330_v4 = vsel %vm21_vm4, %v10017_v26, %v4326_v5  ;;  %v4454_v2 = vsel %vm5_vm0, %v10049_v20, %v10048_v61  ;;  %v10050_v46 = vld [vmem:[%s20937_s0 + $0x4e] sm:$0x4]  }
 0x215   :  { %v10019_v18 = vld [vmem:[%s20937_s0 + $0x2ea] sm:$0x80]   ;;  %v4334_v16 = vsel %vm25_vm5, %v10018_v42, %v4330_v4  ;;  %v4496_v42 = vsel %vm13_vm2, %v10059_v59, %v4492_v62  ;;  %v10092_v55 = vld [vmem:[%s20937_s0 + $0x610] sm:$0x1]  }
 0x216   :  { %v10039_v37 = vld [vmem:[%s20937_s0 + $0x711] sm:$0x1]   ;;  %v4338_v25 = vsel %vm29_vm6, %v10019_v18, %v4334_v16  ;;  %v10051_v18 = vld [vmem:[%s20937_s0 + $0x6d] sm:$0x8]   ;;  %v4500_v39 = vsel %vm17_vm3, %v10060_v44, %v4496_v42 }
 0x217   :  { %v10040_v29 = vld [vmem:[%s20937_s0 + $0x730] sm:$0x2]   ;;  %4339 = vrot.lane.b32.xlu0 %v4338_v25, %s11229_s30  ;;  %v4504_v3 = vsel %vm21_vm4, %v10061_v52, %v4500_v39  ;;  %v10065_v16 = vld [vmem:[%s20937_s0 + $0x110] sm:$0x1]  }
 0x218   :  { %v4419_v6 = vsel %vm5_vm0, %v10040_v29, %v10039_v37  ;;  %v10041_v45 = vld [vmem:[%s20937_s0 + $0x74f] sm:$0x4]   ;;  %v10052_v37 = vld [vmem:[%s20937_s0 + $0x8c] sm:$0x10]   ;;  %v15857_v29 = vpop.permute.xlu1 %2979  }
 0x219   :  { %v10042_v12 = vld [vmem:[%s20937_s0 + $0x76e] sm:$0x8]   ;;  %v4423_v10 = vsel %vm9_vm1, %v10041_v45, %v4419_v6  ;;  %v4458_v6 = vsel %vm9_vm1, %v10050_v46, %v4454_v2  ;;  %v10053_v45 = vld [vmem:[%s20937_s0 + $0xab] sm:$0x20]   ;;  %9674 = vst.msk [vmem:[%s20938_s1 + $0x30] sm:$0xff] %vm2807_vm8, %v15857_v29  }
 0x21a   :  { %v10043_v30 = vld [vmem:[%s20937_s0 + $0x78d] sm:$0x10]   ;;  %v4427_v22 = vsel %vm13_vm2, %v10042_v12, %v4423_v10  ;;  %v10054_v12 = vld [vmem:[%s20937_s0 + $0xca] sm:$0x40]   ;;  %v4462_v5 = vsel %vm13_vm2, %v10051_v18, %v4458_v6 }
 0x21b   :  { %v10044_v14 = vld [vmem:[%s20937_s0 + $0x7ac] sm:$0x20]   ;;  %v4431_v36 = vsel %vm17_vm3, %v10043_v30, %v4427_v22  ;;  %v10055_v30 = vld [vmem:[%s20937_s0 + $0xe9] sm:$0x80]   ;;  %v4466_v4 = vsel %vm17_vm3, %v10052_v37, %v4462_v5 }
 0x21c   :  { %v10045_v54 = vld [vmem:[%s20937_s0 + $0x7cb] sm:$0x40]   ;;  %v4435_v38 = vsel %vm21_vm4, %v10044_v14, %v4431_v36  ;;  %v10074_v10 = vld [vmem:[%s20937_s0 + $0x510] sm:$0x1]   ;;  %v4470_v33 = vsel %vm21_vm4, %v10053_v45, %v4466_v4 }
 0x21d   :  { %v10046_v35 = vld [vmem:[%s20937_s0 + $0x7ea] sm:$0x80]   ;;  %v4439_v48 = vsel %vm25_vm5, %v10045_v54, %v4435_v38  ;;  %v10075_v14 = vld [vmem:[%s20937_s0 + $0x52f] sm:$0x2]   ;;  %v15880_v54 = vpop.permute.xlu0 %2944  }
 0x21e   :  { %v10030_v7 = vld [vmem:[%s20937_s0 + $0x311] sm:$0x1]   ;;  %v4443_v63 = vsel %vm29_vm6, %v10046_v35, %v4439_v48  ;;  %v4508_v35 = vsel %vm25_vm5, %v10062_v1, %v4504_v3  ;;  %v4558_v40 = vsel %vm5_vm0, %v10075_v14, %v10074_v10  ;;  %v10077_v22 = vld [vmem:[%s20937_s0 + $0x56d] sm:$0x8]   ;;  %9665 = vst.msk [vmem:[%s20938_s1 + $0x10] sm:$0xff] %vm2807_vm8, %v15880_v54   ;;  %v4837_v54 = vsel %vm5_vm0, %v10146_v28, %v10145_v34 }
 0x21f   :  { %v10031_v24 = vld [vmem:[%s20937_s0 + $0x330] sm:$0x2]   ;;  %4444 = vrot.lane.b32.xlu1 %v4443_v63, %s11229_s30  ;;  %v4512_v56 = vsel %vm29_vm6, %v10063_v43, %v4508_v35  ;;  %v4562_v58 = vsel %vm9_vm1, %v10076_v19, %v4558_v40  ;;  %v10066_v36 = vld [vmem:[%s20937_s0 + $0x12f] sm:$0x2]   ;;  %v10160_v28 = vld [vmem:[%s20937_s0 + $0x2c9] sm:$0x40]  }
 0x220   :  { %v10032_v50 = vld [vmem:[%s20937_s0 + $0x34f] sm:$0x4]   ;;  %v4384_v13 = vsel %vm5_vm0, %v10031_v24, %v10030_v7  ;;  %v10078_v7 = vld [vmem:[%s20937_s0 + $0x58c] sm:$0x10]   ;;  %v4474_v24 = vsel %vm25_vm5, %v10054_v12, %v4470_v33  ;;  %v4523_v25 = vsel %vm5_vm0, %v10066_v36, %v10065_v16 }
 0x221   :  { %v10033_v31 = vld [vmem:[%s20937_s0 + $0x36e] sm:$0x8]   ;;  %v4388_v17 = vsel %vm9_vm1, %v10032_v50, %v4384_v13  ;;  %v4566_v50 = vsel %vm13_vm2, %v10077_v22, %v4562_v58  ;;  %v10067_v13 = vld [vmem:[%s20937_s0 + $0x14e] sm:$0x4]   ;;  %v15995_v44 = vpop.permute.xlu0 %3014  }
 0x222   :  { %v10034_v32 = vld [vmem:[%s20937_s0 + $0x38d] sm:$0x10]   ;;  %v4392_v53 = vsel %vm13_vm2, %v10033_v31, %v4388_v17  ;;  %v15958_v31 = vpop.permute.xlu1 %3049   ;;  %v10068_v38 = vld [vmem:[%s20937_s0 + $0x16d] sm:$0x8]   ;;  %v4527_v41 = vsel %vm9_vm1, %v10067_v13, %v4523_v25  ;;  %9683 = vst.msk [vmem:[%s20938_s1 + $0x18] sm:$0xff] %vm2807_vm8, %v15995_v44  }
 0x223   :  { %v10035_v0 = vld [vmem:[%s20937_s0 + $0x3ac] sm:$0x20]   ;;  %v4396_v49 = vsel %vm17_vm3, %v10034_v32, %v4392_v53  ;;  %4513 = vrot.lane.b32.xlu1 %v4512_v56, %s11230_s6  ;;  %v4478_v32 = vsel %vm29_vm6, %v10055_v30, %v4474_v24  ;;  %v10069_v17 = vld [vmem:[%s20937_s0 + $0x18c] sm:$0x10]   ;;  %v4531_v59 = vsel %vm13_vm2, %v10068_v38, %v4527_v41  ;;  %9692 = vst.msk [vmem:[%s20938_s1 + $0x38] sm:$0xff] %vm2807_vm8, %v15958_v31   ;;  %vm5318_vm8 = vcmask 458144  }
 0x224   :  { %v10036_v23 = vld [vmem:[%s20937_s0 + $0x3cb] sm:$0x40]   ;;  %v4400_v15 = vsel %vm21_vm4, %v10035_v0, %v4396_v49  ;;  %v4570_v0 = vsel %vm17_vm3, %v10078_v7, %v4566_v50  ;;  %v10071_v48 = vld [vmem:[%s20937_s0 + $0x1ca] sm:$0x40]   ;;  %v4535_v1 = vsel %vm17_vm3, %v10069_v17, %v4531_v59  ;;  %v10148_v31 = vld [vmem:[%s20937_s0 + $0x56c] sm:$0x8]  }
 0x225   :  { %v10037_v51 = vld [vmem:[%s20937_s0 + $0x3ea] sm:$0x80]   ;;  %v4404_v26 = vsel %vm25_vm5, %v10036_v23, %v4400_v15  ;;  %v10070_v23 = vld [vmem:[%s20937_s0 + $0x1ab] sm:$0x20]   ;;  %v16059_v56 = vpop.permute.xlu0 %3084   ;;  %v10149_v44 = vld [vmem:[%s20937_s0 + $0x58b] sm:$0x10]  }
 0x226   :  { %v4408_v9 = vsel %vm29_vm6, %v10037_v51, %v4404_v26  ;;  %v4574_v51 = vsel %vm21_vm4, %v10079_v27, %v4570_v0  ;;  %v10072_v53 = vld [vmem:[%s20937_s0 + $0x1e9] sm:$0x80]   ;;  %v4539_v20 = vsel %vm21_vm4, %v10070_v23, %v4535_v1  ;;  %v16021_v18 = vpop.permute.xlu1 %3118   ;;  %v10127_v1 = vld [vmem:[%s20937_s0 + $0x40f] sm:$0x1]   ;;  %3087 = vst.msk [vmem:[%s20938_s1] sm:$0xff] %vm3086_vm9, %v16059_v56  }
 0x227   :  { %4409 = vrot.lane.b32.xlu0 %v4408_v9, %s11229_s30  ;;  %v4578_v57 = vsel %vm25_vm5, %v10080_v8, %v4574_v51  ;;  %v10093_v63 = vld [vmem:[%s20937_s0 + $0x62f] sm:$0x2]   ;;  %v4543_v37 = vsel %vm25_vm5, %v10071_v48, %v4539_v20  ;;  %v10129_v20 = vld [vmem:[%s20937_s0 + $0x44d] sm:$0x4]   ;;  %9709 = vst.msk [vmem:[%s20938_s1 + $0x20] sm:$0xff] %vm3086_vm9, %v16021_v18   ;;  %s11240_s30 = smov 24  }
 0x228   :  { %v10094_v49 = vld [vmem:[%s20937_s0 + $0x64e] sm:$0x4]   ;;  %v4582_v52 = vsel %vm29_vm6, %v10081_v21, %v4578_v57  ;;  %v4628_v15 = vsel %vm5_vm0, %v10093_v63, %v10092_v55  ;;  %v4547_v30 = vsel %vm29_vm6, %v10072_v53, %v4543_v37  ;;  %v10217_v18 = vld [vmem:[%s20937_s0 + $0x52d] sm:$0x2]  }
 0x229   :  { %v10095_v47 = vld [vmem:[%s20937_s0 + $0x66d] sm:$0x8]   ;;  %4583 = vrot.lane.b32.xlu1 %v4582_v52, %s11230_s6  ;;  %v4632_v26 = vsel %vm9_vm1, %v10094_v49, %v4628_v15  ;;  %v10128_v15 = vld [vmem:[%s20937_s0 + $0x42e] sm:$0x2]   ;;  %v10218_v56 = vld [vmem:[%s20937_s0 + $0x54c] sm:$0x4]  }
 0x22a   :  { %v10096_v62 = vld [vmem:[%s20937_s0 + $0x68c] sm:$0x10]   ;;  %v4636_v9 = vsel %vm13_vm2, %v10095_v47, %v4632_v26  ;;  %v16097_v41 = vpop.permute.xlu1 %3188   ;;  %v10130_v26 = vld [vmem:[%s20937_s0 + $0x46c] sm:$0x8]  }
 0x22b   :  { %4479 = vrot.lane.b32.xlu0 %v4478_v32, %s11230_s6  ;;  %v10097_v43 = vld [vmem:[%s20937_s0 + $0x6ab] sm:$0x20]   ;;  %v4640_v3 = vsel %vm17_vm3, %v10096_v62, %v4636_v9  ;;  %9727 = vst.msk [vmem:[%s20938_s1 + $0x28] sm:$0xff] %vm3086_vm9, %v16097_v41  }
 0x22c   :  { %v10098_v61 = vld [vmem:[%s20937_s0 + $0x6ca] sm:$0x40]   ;;  %v4644_v4 = vsel %vm21_vm4, %v10097_v43, %v4640_v3  ;;  %v10119_v3 = vld [vmem:[%s20937_s0 + $0xf] sm:$0x1]  }
 0x22d   :  { %v10099_v42 = vld [vmem:[%s20937_s0 + $0x6e9] sm:$0x80]   ;;  %v4648_v33 = vsel %vm25_vm5, %v10098_v61, %v4644_v4  ;;  %v4767_v61 = vsel %vm5_vm0, %v10128_v15, %v10127_v1 }
 0x22e   :  { %v10083_v2 = vld [vmem:[%s20937_s0 + $0x210] sm:$0x1]   ;;  %v4652_v50 = vsel %vm29_vm6, %v10099_v42, %v4648_v33  ;;  %v10131_v42 = vld [vmem:[%s20937_s0 + $0x48b] sm:$0x10]   ;;  %v4771_v9 = vsel %vm9_vm1, %v10129_v20, %v4767_v61 }
 0x22f   :  { %v10084_v46 = vld [vmem:[%s20937_s0 + $0x22f] sm:$0x2]   ;;  %4548 = vrot.lane.b32.xlu0 %v4547_v30, %s11230_s6  ;;  %4653 = vrot.lane.b32.xlu1 %v4652_v50, %s11230_s6  ;;  %v4775_v30 = vsel %vm13_vm2, %v10130_v26, %v4771_v9  ;;  %v10164_v61 = vld [vmem:[%s20937_s0 + $0x62e] sm:$0x2]  }
 0x230   :  { %v4593_v39 = vsel %vm5_vm0, %v10084_v46, %v10083_v2  ;;  %v10085_v6 = vld [vmem:[%s20937_s0 + $0x24e] sm:$0x4]   ;;  %v16135_v2 = vpop.permute.xlu0 %3153   ;;  %v4779_v4 = vsel %vm17_vm3, %v10131_v42, %v4775_v30  ;;  %v10166_v9 = vld [vmem:[%s20937_s0 + $0x66c] sm:$0x8]  }
 0x231   :  { %v10086_v45 = vld [vmem:[%s20937_s0 + $0x26d] sm:$0x8]   ;;  %v4597_v5 = vsel %vm9_vm1, %v10085_v6, %v4593_v39  ;;  %v10132_v39 = vld [vmem:[%s20937_s0 + $0x4aa] sm:$0x20]   ;;  %9718 = vst.msk [vmem:[%s20938_s1 + $0x8] sm:$0xff] %vm3086_vm9, %v16135_v2  }
 0x232   :  { %v10087_v12 = vld [vmem:[%s20937_s0 + $0x28c] sm:$0x10]   ;;  %v4601_v40 = vsel %vm13_vm2, %v10086_v45, %v4597_v5  ;;  %v10133_v6 = vld [vmem:[%s20937_s0 + $0x4c9] sm:$0x40]  }
 0x233   :  { %v10088_v10 = vld [vmem:[%s20937_s0 + $0x2ab] sm:$0x20]   ;;  %v4605_v58 = vsel %vm17_vm3, %v10087_v12, %v4601_v40  ;;  %v10134_v45 = vld [vmem:[%s20937_s0 + $0x4e8] sm:$0x80]  }
 0x234   :  { %v10089_v14 = vld [vmem:[%s20937_s0 + $0x2ca] sm:$0x40]   ;;  %v4609_v16 = vsel %vm21_vm4, %v10088_v10, %v4605_v58  ;;  %v10120_v5 = vld [vmem:[%s20937_s0 + $0x2e] sm:$0x2]   ;;  %v4783_v58 = vsel %vm21_vm4, %v10132_v39, %v4779_v4  ;;  %v16228_v11 = vpop.permute.xlu0 %3223  }
 0x235   :  { %v10090_v35 = vld [vmem:[%s20937_s0 + $0x2e9] sm:$0x80]   ;;  %v4613_v25 = vsel %vm25_vm5, %v10089_v14, %v4609_v16  ;;  %v10121_v10 = vld [vmem:[%s20937_s0 + $0x4d] sm:$0x4]   ;;  %v16161_v14 = vpop.permute.xlu1 %3258   ;;  %v4733_v40 = vsel %vm5_vm0, %v10120_v5, %v10119_v3  ;;  %9736 = vst.msk [vmem:[%s20938_s1 + $0x10] sm:$0xff] %vm3086_vm9, %v16228_v11  }
 0x236   :  { %v10110_v19 = vld [vmem:[%s20937_s0 + $0x710] sm:$0x1]   ;;  %v4617_v48 = vsel %vm29_vm6, %v10090_v35, %v4613_v25  ;;  %v10147_v16 = vld [vmem:[%s20937_s0 + $0x54d] sm:$0x4]   ;;  %9745 = vst.msk [vmem:[%s20938_s1 + $0x30] sm:$0xff] %vm3086_vm9, %v16161_v14  }
 0x237   :  { %v10111_v22 = vld [vmem:[%s20937_s0 + $0x72f] sm:$0x2]   ;;  %4618 = vrot.lane.b32.xlu0 %v4617_v48, %s11230_s6  ;;  %v10152_v25 = vld [vmem:[%s20937_s0 + $0x5e8] sm:$0x80]  }
 0x238   :  { %v10112_v7 = vld [vmem:[%s20937_s0 + $0x74e] sm:$0x4]   ;;  %v4698_v27 = vsel %vm5_vm0, %v10111_v22, %v10110_v19  ;;  %v10122_v19 = vld [vmem:[%s20937_s0 + $0x6c] sm:$0x8]   ;;  %v16291_v20 = vpop.permute.xlu0 %3293  }
 0x239   :  { %v10113_v8 = vld [vmem:[%s20937_s0 + $0x76d] sm:$0x8]   ;;  %v4702_v36 = vsel %vm9_vm1, %v10112_v7, %v4698_v27  ;;  %v10123_v22 = vld [vmem:[%s20937_s0 + $0x8b] sm:$0x10]   ;;  %v4737_v27 = vsel %vm9_vm1, %v10121_v10, %v4733_v40  ;;  %9754 = vst.msk [vmem:[%s20938_s1 + $0x18] sm:$0xff] %vm3086_vm9, %v16291_v20  }
 0x23a   :  { %v10114_v21 = vld [vmem:[%s20937_s0 + $0x78c] sm:$0x10]   ;;  %v4706_v38 = vsel %vm13_vm2, %v10113_v8, %v4702_v36  ;;  %v10124_v7 = vld [vmem:[%s20937_s0 + $0xaa] sm:$0x20]   ;;  %v4741_v50 = vsel %vm13_vm2, %v10122_v19, %v4737_v27  ;;  %v10221_v20 = vld [vmem:[%s20937_s0 + $0x5a9] sm:$0x20]  }
 0x23b   :  { %v10115_v24 = vld [vmem:[%s20937_s0 + $0x7ab] sm:$0x20]   ;;  %v4710_v53 = vsel %vm17_vm3, %v10114_v21, %v4706_v38  ;;  %v10125_v8 = vld [vmem:[%s20937_s0 + $0xc9] sm:$0x40]   ;;  %v4745_v29 = vsel %vm17_vm3, %v10123_v22, %v4741_v50 }
 0x23c   :  { %v10116_v13 = vld [vmem:[%s20937_s0 + $0x7ca] sm:$0x40]   ;;  %v4714_v49 = vsel %vm21_vm4, %v10115_v24, %v4710_v53  ;;  %v10126_v21 = vld [vmem:[%s20937_s0 + $0xe8] sm:$0x80]   ;;  %v4787_v24 = vsel %vm25_vm5, %v10133_v6, %v4783_v58 }
 0x23d   :  { %v10117_v32 = vld [vmem:[%s20937_s0 + $0x7e9] sm:$0x80]   ;;  %v4718_v62 = vsel %vm25_vm5, %v10116_v13, %v4714_v49  ;;  %v4791_v60 = vsel %vm29_vm6, %v10134_v45, %v4787_v24  ;;  %v10150_v36 = vld [vmem:[%s20937_s0 + $0x5aa] sm:$0x20]   ;;  %v4749_v13 = vsel %vm21_vm4, %v10124_v7, %v4745_v29 }
 0x23e   :  { %v10101_v0 = vld [vmem:[%s20937_s0 + $0x310] sm:$0x1]   ;;  %v4722_v46 = vsel %vm29_vm6, %v10117_v32, %v4718_v62  ;;  %v4841_v32 = vsel %vm9_vm1, %v10147_v16, %v4837_v54  ;;  %v10136_v38 = vld [vmem:[%s20937_s0 + $0x10f] sm:$0x1]  }
 0x23f   :  { %v10102_v17 = vld [vmem:[%s20937_s0 + $0x32f] sm:$0x2]   ;;  %4723 = vrot.lane.b32.xlu1 %v4722_v46, %s11230_s6  ;;  %v10138_v48 = vld [vmem:[%s20937_s0 + $0x14d] sm:$0x4]  }
 0x240   :  { %v10103_v23 = vld [vmem:[%s20937_s0 + $0x34e] sm:$0x4]   ;;  %v4663_v55 = vsel %vm5_vm0, %v10102_v17, %v10101_v0  ;;  %v10151_v0 = vld [vmem:[%s20937_s0 + $0x5c9] sm:$0x40]   ;;  %v4753_v17 = vsel %vm25_vm5, %v10125_v8, %v4749_v13  ;;  %v16367_v13 = vpop.permute.xlu0 %3363  }
 0x241   :  { %v10104_v51 = vld [vmem:[%s20937_s0 + $0x36d] sm:$0x8]   ;;  %v4667_v47 = vsel %vm9_vm1, %v10103_v23, %v4663_v55  ;;  %v4845_v23 = vsel %vm13_vm2, %v10148_v31, %v4841_v32  ;;  %v10139_v53 = vld [vmem:[%s20937_s0 + $0x16c] sm:$0x8]   ;;  %v16265_v55 = vpop.permute.xlu1 %3328   ;;  %3366 = vst.msk [vmem:[%s20938_s1] sm:$0xff] %vm3365_vm10, %v16367_v13  }
 0x242   :  { %v10105_v57 = vld [vmem:[%s20937_s0 + $0x38c] sm:$0x10]   ;;  %v4671_v43 = vsel %vm13_vm2, %v10104_v51, %v4667_v47  ;;  %v10137_v51 = vld [vmem:[%s20937_s0 + $0x12e] sm:$0x2]   ;;  %9763 = vst.msk [vmem:[%s20938_s1 + $0x38] sm:$0xff] %vm3086_vm9, %v16265_v55   ;;  %vm5597_vm9 = vcmask 425344  }
 0x243   :  { %v10106_v59 = vld [vmem:[%s20937_s0 + $0x3ab] sm:$0x20]   ;;  %v4675_v37 = vsel %vm17_vm3, %v10105_v57, %v4671_v43  ;;  %4792 = vrot.lane.b32.xlu1 %v4791_v60, %s11231_s5  ;;  %v4757_v57 = vsel %vm29_vm6, %v10126_v21, %v4753_v17  ;;  %v10140_v49 = vld [vmem:[%s20937_s0 + $0x18b] sm:$0x10]   ;;  %v10220_v55 = vld [vmem:[%s20937_s0 + $0x58a] sm:$0x10]  }
 0x244   :  { %v10107_v63 = vld [vmem:[%s20937_s0 + $0x3ca] sm:$0x40]   ;;  %v4679_v12 = vsel %vm21_vm4, %v10106_v59, %v4675_v37  ;;  %v4849_v59 = vsel %vm17_vm3, %v10149_v44, %v4845_v23  ;;  %v10141_v47 = vld [vmem:[%s20937_s0 + $0x1aa] sm:$0x20]   ;;  %v10289_v13 = vld [vmem:[%s20937_s0 + $0x54b] sm:$0x4]  }
 0x245   :  { %v10108_v52 = vld [vmem:[%s20937_s0 + $0x3e9] sm:$0x80]   ;;  %v4683_v35 = vsel %vm25_vm5, %v10107_v63, %v4679_v12  ;;  %v4802_v63 = vsel %vm5_vm0, %v10137_v51, %v10136_v38  ;;  %v4853_v1 = vsel %vm21_vm4, %v10150_v36, %v4849_v59  ;;  %v10143_v62 = vld [vmem:[%s20937_s0 + $0x1e8] sm:$0x80]   ;;  %v16329_v22 = vpop.permute.xlu1 %3397  }
 0x246   :  { %v4687_v33 = vsel %vm29_vm6, %v10108_v52, %v4683_v35  ;;  %v10142_v52 = vld [vmem:[%s20937_s0 + $0x1c9] sm:$0x40]   ;;  %v4806_v15 = vsel %vm9_vm1, %v10138_v48, %v4802_v63  ;;  %v4857_v26 = vsel %vm25_vm5, %v10151_v0, %v4853_v1  ;;  %9780 = vst.msk [vmem:[%s20938_s1 + $0x20] sm:$0xff] %vm3365_vm10, %v16329_v22  }
 0x247   :  { %4688 = vrot.lane.b32.xlu0 %v4687_v33, %s11230_s6  ;;  %v10163_v43 = vld [vmem:[%s20937_s0 + $0x60f] sm:$0x1]   ;;  %v4810_v42 = vsel %vm13_vm2, %v10139_v53, %v4806_v15  ;;  %v4861_v6 = vsel %vm29_vm6, %v10152_v25, %v4857_v26 }
 0x248   :  { %v4907_v46 = vsel %vm5_vm0, %v10164_v61, %v10163_v43  ;;  %v10165_v37 = vld [vmem:[%s20937_s0 + $0x64d] sm:$0x4]   ;;  %v4814_v45 = vsel %vm17_vm3, %v10140_v49, %v4810_v42  ;;  %4862 = vrot.lane.b32.xlu1 %v4861_v6, %s11231_s5  ;;  %v10198_v6 = vld [vmem:[%s20937_s0 + $0x40e] sm:$0x1]  }
 0x249   :  { %v10167_v39 = vld [vmem:[%s20937_s0 + $0x68b] sm:$0x10]   ;;  %v4911_v12 = vsel %vm9_vm1, %v10165_v37, %v4907_v46  ;;  %v4818_v10 = vsel %vm21_vm4, %v10141_v47, %v4814_v45  ;;  %v10199_v45 = vld [vmem:[%s20937_s0 + $0x42d] sm:$0x2]  }
 0x24a   :  { %v10168_v30 = vld [vmem:[%s20937_s0 + $0x6aa] sm:$0x20]   ;;  %v4915_v35 = vsel %vm13_vm2, %v10166_v9, %v4911_v12  ;;  %v4822_v7 = vsel %vm25_vm5, %v10142_v52, %v4818_v10  ;;  %v10200_v12 = vld [vmem:[%s20937_s0 + $0x44c] sm:$0x4]   ;;  %v5046_v10 = vsel %vm5_vm0, %v10199_v45, %v10198_v6 }
 0x24b   :  { %4758 = vrot.lane.b32.xlu0 %v4757_v57, %s11231_s5  ;;  %v10169_v3 = vld [vmem:[%s20937_s0 + $0x6c9] sm:$0x40]   ;;  %v4919_v33 = vsel %vm17_vm3, %v10167_v39, %v4915_v35  ;;  %v4826_v24 = vsel %vm29_vm6, %v10143_v62, %v4822_v7  ;;  %v16405_v62 = vpop.permute.xlu1 %3467   ;;  %v10201_v35 = vld [vmem:[%s20937_s0 + $0x46b] sm:$0x8]  }
 0x24c   :  { %v10170_v5 = vld [vmem:[%s20937_s0 + $0x6e8] sm:$0x80]   ;;  %v4923_v50 = vsel %vm21_vm4, %v10168_v30, %v4919_v33  ;;  %v16431_v30 = vpop.permute.xlu0 %3432   ;;  %v5050_v33 = vsel %vm9_vm1, %v10200_v12, %v5046_v10  ;;  %v10214_v6 = vld [vmem:[%s20937_s0 + $0x1e7] sm:$0x80]   ;;  %9798 = vst.msk [vmem:[%s20938_s1 + $0x28] sm:$0xff] %vm3365_vm10, %v16405_v62  }
 0x24d   :  { %v10154_v4 = vld [vmem:[%s20937_s0 + $0x20f] sm:$0x1]   ;;  %v4927_v29 = vsel %vm25_vm5, %v10169_v3, %v4923_v50  ;;  %v10191_v50 = vld [vmem:[%s20937_s0 + $0x2d] sm:$0x2]   ;;  %9789 = vst.msk [vmem:[%s20938_s1 + $0x8] sm:$0xff] %vm3365_vm10, %v16431_v30  }
 0x24e   :  { %v10155_v40 = vld [vmem:[%s20937_s0 + $0x22e] sm:$0x2]   ;;  %v4931_v32 = vsel %vm29_vm6, %v10170_v5, %v4927_v29  ;;  %v10236_v10 = vld [vmem:[%s20937_s0 + $0x64c] sm:$0x4]  }
 0x24f   :  { %v10156_v19 = vld [vmem:[%s20937_s0 + $0x24d] sm:$0x4]   ;;  %v4872_v58 = vsel %vm5_vm0, %v10155_v40, %v10154_v4  ;;  %4827 = vrot.lane.b32.xlu0 %v4826_v24, %s11231_s5  ;;  %4932 = vrot.lane.b32.xlu1 %v4931_v32, %s11231_s5  ;;  %v10202_v4 = vld [vmem:[%s20937_s0 + $0x48a] sm:$0x10]   ;;  %v5054_v24 = vsel %vm13_vm2, %v10201_v35, %v5050_v33 }
 0x250   :  { %v10157_v27 = vld [vmem:[%s20937_s0 + $0x26c] sm:$0x8]   ;;  %v4876_v34 = vsel %vm9_vm1, %v10156_v19, %v4872_v58  ;;  %v10203_v40 = vld [vmem:[%s20937_s0 + $0x4a9] sm:$0x20]   ;;  %v5058_v29 = vsel %vm17_vm3, %v10202_v4, %v5054_v24  ;;  %v16535_v41 = vpop.permute.xlu0 %3502  }
 0x251   :  { %v10158_v8 = vld [vmem:[%s20937_s0 + $0x28b] sm:$0x10]   ;;  %v4880_v54 = vsel %vm13_vm2, %v10157_v27, %v4876_v34  ;;  %v10204_v58 = vld [vmem:[%s20937_s0 + $0x4c8] sm:$0x40]   ;;  %v5062_v32 = vsel %vm21_vm4, %v10203_v40, %v5058_v29  ;;  %9807 = vst.msk [vmem:[%s20938_s1 + $0x10] sm:$0xff] %vm3365_vm10, %v16535_v41  }
 0x252   :  { %v10159_v21 = vld [vmem:[%s20937_s0 + $0x2aa] sm:$0x20]   ;;  %v4884_v0 = vsel %vm17_vm3, %v10158_v8, %v4880_v54  ;;  %v10205_v27 = vld [vmem:[%s20937_s0 + $0x4e7] sm:$0x80]   ;;  %v10292_v41 = vld [vmem:[%s20937_s0 + $0x5a8] sm:$0x20]  }
 0x253   :  { %v10161_v16 = vld [vmem:[%s20937_s0 + $0x2e8] sm:$0x80]   ;;  %v4888_v51 = vsel %vm21_vm4, %v10159_v21, %v4884_v0  ;;  %v10190_v8 = vld [vmem:[%s20937_s0 + $0xe] sm:$0x1]  }
 0x254   :  { %v10181_v60 = vld [vmem:[%s20937_s0 + $0x70f] sm:$0x1]   ;;  %v4892_v63 = vsel %vm25_vm5, %v10160_v28, %v4888_v51  ;;  %v10192_v34 = vld [vmem:[%s20937_s0 + $0x4c] sm:$0x4]   ;;  %v5012_v54 = vsel %vm5_vm0, %v10191_v50, %v10190_v8  ;;  %v16599_v35 = vpop.permute.xlu0 %3572  }
 0x255   :  { %v10182_v31 = vld [vmem:[%s20937_s0 + $0x72e] sm:$0x2]   ;;  %v4896_v43 = vsel %vm29_vm6, %v10161_v16, %v4892_v63  ;;  %v10193_v28 = vld [vmem:[%s20937_s0 + $0x6b] sm:$0x8]   ;;  %v16469_v16 = vpop.permute.xlu1 %3537   ;;  %v5016_v0 = vsel %vm9_vm1, %v10192_v34, %v5012_v54  ;;  %9825 = vst.msk [vmem:[%s20938_s1 + $0x18] sm:$0xff] %vm3365_vm10, %v16599_v35  }
 0x256   :  { %v10183_v44 = vld [vmem:[%s20937_s0 + $0x74d] sm:$0x4]   ;;  %v4977_v25 = vsel %vm5_vm0, %v10182_v31, %v10181_v60  ;;  %4897 = vrot.lane.b32.xlu0 %v4896_v43, %s11231_s5  ;;  %v10194_v31 = vld [vmem:[%s20937_s0 + $0x8a] sm:$0x10]   ;;  %9816 = vst.msk [vmem:[%s20938_s1 + $0x30] sm:$0xff] %vm3365_vm10, %v16469_v16  }
 0x257   :  { %v10184_v36 = vld [vmem:[%s20937_s0 + $0x76c] sm:$0x8]   ;;  %v4981_v48 = vsel %vm9_vm1, %v10183_v44, %v4977_v25  ;;  %v10195_v44 = vld [vmem:[%s20937_s0 + $0xa9] sm:$0x20]   ;;  %v10294_v35 = vld [vmem:[%s20937_s0 + $0x5e6] sm:$0x80]  }
 0x258   :  { %v10185_v38 = vld [vmem:[%s20937_s0 + $0x78b] sm:$0x10]   ;;  %v4985_v49 = vsel %vm13_vm2, %v10184_v36, %v4981_v48  ;;  %v10196_v36 = vld [vmem:[%s20937_s0 + $0xc8] sm:$0x40]  }
 0x259   :  { %v10186_v17 = vld [vmem:[%s20937_s0 + $0x7aa] sm:$0x20]   ;;  %v4989_v61 = vsel %vm17_vm3, %v10185_v38, %v4985_v49  ;;  %v10197_v25 = vld [vmem:[%s20937_s0 + $0xe7] sm:$0x80]  }
 0x25a   :  { %v10187_v23 = vld [vmem:[%s20937_s0 + $0x7c9] sm:$0x40]   ;;  %v4993_v9 = vsel %vm21_vm4, %v10186_v17, %v4989_v61  ;;  %v10216_v38 = vld [vmem:[%s20937_s0 + $0x50e] sm:$0x1]   ;;  %v5066_v17 = vsel %vm25_vm5, %v10204_v58, %v5062_v32 }
 0x25b   :  { %v10188_v53 = vld [vmem:[%s20937_s0 + $0x7e8] sm:$0x80]   ;;  %v4997_v3 = vsel %vm25_vm5, %v10187_v23, %v4993_v9  ;;  %v5020_v23 = vsel %vm13_vm2, %v10193_v28, %v5016_v0  ;;  %v10219_v51 = vld [vmem:[%s20937_s0 + $0x56b] sm:$0x8]   ;;  %v5070_v2 = vsel %vm29_vm6, %v10205_v27, %v5066_v17  ;;  %v5116_v11 = vsel %vm5_vm0, %v10217_v18, %v10216_v38 }
 0x25c   :  { %v10172_v57 = vld [vmem:[%s20937_s0 + $0x30f] sm:$0x1]   ;;  %v5001_v19 = vsel %vm29_vm6, %v10188_v53, %v4997_v3  ;;  %v5024_v14 = vsel %vm17_vm3, %v10194_v31, %v5020_v23  ;;  %v10222_v48 = vld [vmem:[%s20937_s0 + $0x5c8] sm:$0x40]  }
 0x25d   :  { %v10173_v59 = vld [vmem:[%s20937_s0 + $0x32e] sm:$0x2]   ;;  %5002 = vrot.lane.b32.xlu1 %v5001_v19, %s11231_s5  ;;  %v5028_v53 = vsel %vm21_vm4, %v10195_v44, %v5024_v14  ;;  %v10207_v63 = vld [vmem:[%s20937_s0 + $0x10e] sm:$0x1]   ;;  %v16663_v14 = vpop.permute.xlu0 %3642  }
 0x25e   :  { %v4942_v47 = vsel %vm5_vm0, %v10173_v59, %v10172_v57  ;;  %v10174_v52 = vld [vmem:[%s20937_s0 + $0x34d] sm:$0x4]   ;;  %v5120_v57 = vsel %vm9_vm1, %v10218_v56, %v5116_v11  ;;  %v10223_v59 = vld [vmem:[%s20937_s0 + $0x5e7] sm:$0x80]   ;;  %3645 = vst.msk [vmem:[%s20938_s1] sm:$0xff] %vm3644_vm11, %v16663_v14  }
 0x25f   :  { %v10175_v1 = vld [vmem:[%s20937_s0 + $0x36c] sm:$0x8]   ;;  %v4946_v26 = vsel %vm9_vm1, %v10174_v52, %v4942_v47  ;;  %v10208_v49 = vld [vmem:[%s20937_s0 + $0x12d] sm:$0x2]   ;;  %v16561_v47 = vpop.permute.xlu1 %3607   ;;  %v5032_v52 = vsel %vm25_vm5, %v10196_v36, %v5028_v53  ;;  %v10359_v14 = vld [vmem:[%s20937_s0 + $0x52b] sm:$0x2]  }
 0x260   :  { %v10176_v15 = vld [vmem:[%s20937_s0 + $0x38b] sm:$0x10]   ;;  %v4950_v39 = vsel %vm13_vm2, %v10175_v1, %v4946_v26  ;;  %v5124_v1 = vsel %vm13_vm2, %v10219_v51, %v5120_v57  ;;  %v10209_v43 = vld [vmem:[%s20937_s0 + $0x14c] sm:$0x4]   ;;  %9834 = vst.msk [vmem:[%s20938_s1 + $0x38] sm:$0xff] %vm3365_vm10, %v16561_v47   ;;  %vm5876_vm10 = vcmask 392544  }
 0x261   :  { %v10177_v42 = vld [vmem:[%s20937_s0 + $0x3aa] sm:$0x20]   ;;  %v4954_v5 = vsel %vm17_vm3, %v10176_v15, %v4950_v39  ;;  %5071 = vrot.lane.b32.xlu1 %v5070_v2, %s11232_s10  ;;  %v5081_v15 = vsel %vm5_vm0, %v10208_v49, %v10207_v63  ;;  %v10210_v61 = vld [vmem:[%s20937_s0 + $0x16b] sm:$0x8]   ;;  %v10293_v47 = vld [vmem:[%s20937_s0 + $0x5c7] sm:$0x40]  }
 0x262   :  { %v10178_v46 = vld [vmem:[%s20937_s0 + $0x3c9] sm:$0x40]   ;;  %v4958_v7 = vsel %vm21_vm4, %v10177_v42, %v4954_v5  ;;  %v10211_v26 = vld [vmem:[%s20937_s0 + $0x18a] sm:$0x10]   ;;  %v5036_v42 = vsel %vm29_vm6, %v10197_v25, %v5032_v52 }
 0x263   :  { %v10179_v37 = vld [vmem:[%s20937_s0 + $0x3e8] sm:$0x80]   ;;  %v4962_v21 = vsel %vm25_vm5, %v10178_v46, %v4958_v7  ;;  %v5128_v46 = vsel %vm17_vm3, %v10220_v55, %v5124_v1  ;;  %v10212_v9 = vld [vmem:[%s20937_s0 + $0x1a9] sm:$0x20]   ;;  %v16637_v44 = vpop.permute.xlu1 %3676  }
 0x264   :  { %v4966_v60 = vsel %vm29_vm6, %v10179_v37, %v4962_v21  ;;  %v5085_v37 = vsel %vm9_vm1, %v10209_v43, %v5081_v15  ;;  %v10213_v39 = vld [vmem:[%s20937_s0 + $0x1c8] sm:$0x40]   ;;  %v5132_v45 = vsel %vm21_vm4, %v10221_v20, %v5128_v46  ;;  %9851 = vst.msk [vmem:[%s20938_s1 + $0x20] sm:$0xff] %vm3644_vm11, %v16637_v44   ;;  %v10358_v44 = vld [vmem:[%s20937_s0 + $0x50c] sm:$0x1]  }
 0x265   :  { %4967 = vrot.lane.b32.xlu0 %v4966_v60, %s11231_s5  ;;  %v5089_v12 = vsel %vm13_vm2, %v10210_v61, %v5085_v37  ;;  %v10234_v3 = vld [vmem:[%s20937_s0 + $0x60e] sm:$0x1]   ;;  %v5136_v4 = vsel %vm25_vm5, %v10222_v48, %v5132_v45 }
 0x266   :  { %v10235_v5 = vld [vmem:[%s20937_s0 + $0x62d] sm:$0x2]   ;;  %v5093_v40 = vsel %vm17_vm3, %v10211_v26, %v5089_v12  ;;  %v5140_v27 = vsel %vm29_vm6, %v10223_v59, %v5136_v4 }
 0x267   :  { %v5186_v19 = vsel %vm5_vm0, %v10235_v5, %v10234_v3  ;;  %v10237_v7 = vld [vmem:[%s20937_s0 + $0x66b] sm:$0x8]   ;;  %v5097_v8 = vsel %vm21_vm4, %v10212_v9, %v5093_v40  ;;  %5141 = vrot.lane.b32.xlu1 %v5140_v27, %s11232_s10  ;;  %v16701_v37 = vpop.permute.xlu1 %3746   ;;  %v10270_v27 = vld [vmem:[%s20937_s0 + $0x42c] sm:$0x2]  }
 0x268   :  { %v10238_v33 = vld [vmem:[%s20937_s0 + $0x68a] sm:$0x10]   ;;  %v5190_v21 = vsel %vm9_vm1, %v10236_v10, %v5186_v19  ;;  %v5101_v28 = vsel %vm25_vm5, %v10213_v39, %v5097_v8  ;;  %v10271_v8 = vld [vmem:[%s20937_s0 + $0x44b] sm:$0x4]   ;;  %9869 = vst.msk [vmem:[%s20938_s1 + $0x28] sm:$0xff] %vm3644_vm11, %v16701_v37  }
 0x269   :  { %5037 = vrot.lane.b32.xlu0 %v5036_v42, %s11232_s10  ;;  %v10239_v58 = vld [vmem:[%s20937_s0 + $0x6a9] sm:$0x20]   ;;  %v5194_v60 = vsel %vm13_vm2, %v10237_v7, %v5190_v21  ;;  %v5105_v36 = vsel %vm29_vm6, %v10214_v6, %v5101_v28  ;;  %v10269_v7 = vld [vmem:[%s20937_s0 + $0x40d] sm:$0x1]  }
 0x26a   :  { %v10240_v24 = vld [vmem:[%s20937_s0 + $0x6c8] sm:$0x40]   ;;  %v5198_v32 = vsel %vm17_vm3, %v10238_v33, %v5194_v60  ;;  %v10272_v21 = vld [vmem:[%s20937_s0 + $0x46a] sm:$0x8]   ;;  %v5325_v28 = vsel %vm5_vm0, %v10270_v27, %v10269_v7 }
 0x26b   :  { %v10241_v50 = vld [vmem:[%s20937_s0 + $0x6e7] sm:$0x80]   ;;  %v5202_v23 = vsel %vm21_vm4, %v10239_v58, %v5198_v32  ;;  %v10273_v60 = vld [vmem:[%s20937_s0 + $0x489] sm:$0x10]  }
 0x26c   :  { %v10225_v34 = vld [vmem:[%s20937_s0 + $0x20e] sm:$0x1]   ;;  %v5206_v11 = vsel %vm25_vm5, %v10240_v24, %v5202_v23  ;;  %v16739_v24 = vpop.permute.xlu0 %3711   ;;  %v10276_v32 = vld [vmem:[%s20937_s0 + $0x4e6] sm:$0x80]  }
 0x26d   :  { %v10226_v29 = vld [vmem:[%s20937_s0 + $0x22d] sm:$0x2]   ;;  %5106 = vrot.lane.b32.xlu0 %v5105_v36, %s11232_s10  ;;  %v5210_v59 = vsel %vm29_vm6, %v10241_v50, %v5206_v11  ;;  %v5329_v36 = vsel %vm9_vm1, %v10271_v8, %v5325_v28  ;;  %v10305_v27 = vld [vmem:[%s20937_s0 + $0x60d] sm:$0x1]   ;;  %9860 = vst.msk [vmem:[%s20938_s1 + $0x8] sm:$0xff] %vm3644_vm11, %v16739_v24  }
 0x26e   :  { %v10227_v54 = vld [vmem:[%s20937_s0 + $0x24c] sm:$0x4]   ;;  %v5151_v0 = vsel %vm5_vm0, %v10226_v29, %v10225_v34  ;;  %5211 = vrot.lane.b32.xlu1 %v5210_v59, %s11232_s10  ;;  %v10274_v29 = vld [vmem:[%s20937_s0 + $0x4a8] sm:$0x20]  }
 0x26f   :  { %v10228_v31 = vld [vmem:[%s20937_s0 + $0x26b] sm:$0x8]   ;;  %v5155_v18 = vsel %vm9_vm1, %v10227_v54, %v5151_v0  ;;  %v10275_v54 = vld [vmem:[%s20937_s0 + $0x4c7] sm:$0x40]  }
 0x270   :  { %v10229_v25 = vld [vmem:[%s20937_s0 + $0x28a] sm:$0x10]   ;;  %v5159_v55 = vsel %vm13_vm2, %v10228_v31, %v5155_v18  ;;  %v10261_v0 = vld [vmem:[%s20937_s0 + $0xd] sm:$0x1]  }
 0x271   :  { %v10230_v38 = vld [vmem:[%s20937_s0 + $0x2a9] sm:$0x20]   ;;  %v5163_v63 = vsel %vm17_vm3, %v10229_v25, %v5159_v55  ;;  %v10262_v25 = vld [vmem:[%s20937_s0 + $0x2c] sm:$0x2]  }
 0x272   :  { %v10231_v17 = vld [vmem:[%s20937_s0 + $0x2c8] sm:$0x40]   ;;  %v5167_v43 = vsel %vm21_vm4, %v10230_v38, %v5163_v63  ;;  %v5291_v23 = vsel %vm5_vm0, %v10262_v25, %v10261_v0  ;;  %v10263_v18 = vld [vmem:[%s20937_s0 + $0x4b] sm:$0x4]  }
 0x273   :  { %v10232_v56 = vld [vmem:[%s20937_s0 + $0x2e7] sm:$0x80]   ;;  %v5171_v9 = vsel %vm25_vm5, %v10231_v17, %v5167_v43  ;;  %v5333_v17 = vsel %vm13_vm2, %v10272_v21, %v5329_v36  ;;  %v10308_v28 = vld [vmem:[%s20937_s0 + $0x66a] sm:$0x8]  }
 0x274   :  { %v10252_v51 = vld [vmem:[%s20937_s0 + $0x70e] sm:$0x1]   ;;  %v5175_v5 = vsel %vm29_vm6, %v10232_v56, %v5171_v9  ;;  %v10264_v56 = vld [vmem:[%s20937_s0 + $0x6a] sm:$0x8]   ;;  %v5337_v55 = vsel %vm17_vm3, %v10273_v60, %v5333_v17 }
 0x275   :  { %v10253_v2 = vld [vmem:[%s20937_s0 + $0x72d] sm:$0x2]   ;;  %5176 = vrot.lane.b32.xlu0 %v5175_v5, %s11232_s10  ;;  %v5341_v59 = vsel %vm21_vm4, %v10274_v29, %v5337_v55  ;;  %v10278_v9 = vld [vmem:[%s20937_s0 + $0x10d] sm:$0x1]  }
 0x276   :  { %v5256_v20 = vsel %vm5_vm0, %v10253_v2, %v10252_v51  ;;  %v10254_v48 = vld [vmem:[%s20937_s0 + $0x74c] sm:$0x4]   ;;  %v10265_v51 = vld [vmem:[%s20937_s0 + $0x89] sm:$0x10]   ;;  %v16777_v2 = vpop.permute.xlu1 %3816  }
 0x277   :  { %v10255_v53 = vld [vmem:[%s20937_s0 + $0x76b] sm:$0x8]   ;;  %v5260_v49 = vsel %vm9_vm1, %v10254_v48, %v5256_v20  ;;  %v5295_v20 = vsel %vm9_vm1, %v10263_v18, %v5291_v23  ;;  %v10266_v48 = vld [vmem:[%s20937_s0 + $0xa8] sm:$0x20]   ;;  %9887 = vst.msk [vmem:[%s20938_s1 + $0x30] sm:$0xff] %vm3644_vm11, %v16777_v2  }
 0x278   :  { %v10256_v57 = vld [vmem:[%s20937_s0 + $0x78a] sm:$0x10]   ;;  %v5264_v61 = vsel %vm13_vm2, %v10255_v53, %v5260_v49  ;;  %v10267_v53 = vld [vmem:[%s20937_s0 + $0xc7] sm:$0x40]   ;;  %v5299_v63 = vsel %vm13_vm2, %v10264_v56, %v5295_v20 }
 0x279   :  { %v10257_v52 = vld [vmem:[%s20937_s0 + $0x7a9] sm:$0x20]   ;;  %v5268_v39 = vsel %vm17_vm3, %v10256_v57, %v5264_v61  ;;  %v10268_v57 = vld [vmem:[%s20937_s0 + $0xe6] sm:$0x80]   ;;  %v5303_v43 = vsel %vm17_vm3, %v10265_v51, %v5299_v63 }
 0x27a   :  { %v10258_v1 = vld [vmem:[%s20937_s0 + $0x7c8] sm:$0x40]   ;;  %v5272_v10 = vsel %vm21_vm4, %v10257_v52, %v5268_v39  ;;  %v10287_v49 = vld [vmem:[%s20937_s0 + $0x50d] sm:$0x1]   ;;  %v5307_v30 = vsel %vm21_vm4, %v10266_v48, %v5303_v43 }
 0x27b   :  { %v10259_v15 = vld [vmem:[%s20937_s0 + $0x7e7] sm:$0x80]   ;;  %v5276_v33 = vsel %vm25_vm5, %v10258_v1, %v5272_v10  ;;  %v10288_v52 = vld [vmem:[%s20937_s0 + $0x52c] sm:$0x2]   ;;  %v16800_v1 = vpop.permute.xlu0 %3781  }
 0x27c   :  { %v10243_v26 = vld [vmem:[%s20937_s0 + $0x30e] sm:$0x1]   ;;  %v5280_v50 = vsel %vm29_vm6, %v10259_v15, %v5276_v33  ;;  %v5345_v15 = vsel %vm25_vm5, %v10275_v54, %v5341_v59  ;;  %v5395_v22 = vsel %vm5_vm0, %v10288_v52, %v10287_v49  ;;  %v10290_v61 = vld [vmem:[%s20937_s0 + $0x56a] sm:$0x8]   ;;  %9878 = vst.msk [vmem:[%s20938_s1 + $0x10] sm:$0xff] %vm3644_vm11, %v16800_v1   ;;  %v5674_v1 = vsel %vm5_vm0, %v10359_v14, %v10358_v44 }
 0x27d   :  { %v10244_v42 = vld [vmem:[%s20937_s0 + $0x32d] sm:$0x2]   ;;  %5281 = vrot.lane.b32.xlu1 %v5280_v50, %s11232_s10  ;;  %v5349_v62 = vsel %vm29_vm6, %v10276_v32, %v5345_v15  ;;  %v5399_v16 = vsel %vm9_vm1, %v10289_v13, %v5395_v22  ;;  %v10279_v39 = vld [vmem:[%s20937_s0 + $0x12c] sm:$0x2]   ;;  %v10373_v14 = vld [vmem:[%s20937_s0 + $0x2c6] sm:$0x40]  }
 0x27e   :  { %v10245_v46 = vld [vmem:[%s20937_s0 + $0x34c] sm:$0x4]   ;;  %v5221_v6 = vsel %vm5_vm0, %v10244_v42, %v10243_v26  ;;  %v10291_v26 = vld [vmem:[%s20937_s0 + $0x589] sm:$0x10]   ;;  %v5311_v42 = vsel %vm25_vm5, %v10267_v53, %v5307_v30  ;;  %v5360_v5 = vsel %vm5_vm0, %v10279_v39, %v10278_v9 }
 0x27f   :  { %v10246_v45 = vld [vmem:[%s20937_s0 + $0x36b] sm:$0x8]   ;;  %v5225_v4 = vsel %vm9_vm1, %v10245_v46, %v5221_v6  ;;  %v5403_v46 = vsel %vm13_vm2, %v10290_v61, %v5399_v16  ;;  %v10280_v6 = vld [vmem:[%s20937_s0 + $0x14b] sm:$0x4]   ;;  %v16915_v60 = vpop.permute.xlu0 %3851  }
 0x280   :  { %v10247_v12 = vld [vmem:[%s20937_s0 + $0x38a] sm:$0x10]   ;;  %v5229_v58 = vsel %vm13_vm2, %v10246_v45, %v5225_v4  ;;  %v16878_v45 = vpop.permute.xlu1 %3886   ;;  %v10281_v10 = vld [vmem:[%s20937_s0 + $0x16a] sm:$0x8]   ;;  %v5364_v7 = vsel %vm9_vm1, %v10280_v6, %v5360_v5  ;;  %9896 = vst.msk [vmem:[%s20938_s1 + $0x18] sm:$0xff] %vm3644_vm11, %v16915_v60  }
 0x281   :  { %v10248_v3 = vld [vmem:[%s20937_s0 + $0x3a9] sm:$0x20]   ;;  %v5233_v34 = vsel %vm17_vm3, %v10247_v12, %v5229_v58  ;;  %5350 = vrot.lane.b32.xlu1 %v5349_v62, %s11233_s16  ;;  %v5315_v12 = vsel %vm29_vm6, %v10268_v57, %v5311_v42  ;;  %v10282_v4 = vld [vmem:[%s20937_s0 + $0x189] sm:$0x10]   ;;  %v5368_v21 = vsel %vm13_vm2, %v10281_v10, %v5364_v7  ;;  %9905 = vst.msk [vmem:[%s20938_s1 + $0x38] sm:$0xff] %vm3644_vm11, %v16878_v45   ;;  %vm6155_vm11 = vcmask 359744  }
 0x282   :  { %v10249_v40 = vld [vmem:[%s20937_s0 + $0x3c8] sm:$0x40]   ;;  %v5237_v31 = vsel %vm21_vm4, %v10248_v3, %v5233_v34  ;;  %v5407_v3 = vsel %vm17_vm3, %v10291_v26, %v5403_v46  ;;  %v10284_v33 = vld [vmem:[%s20937_s0 + $0x1c7] sm:$0x40]   ;;  %v5372_v54 = vsel %vm17_vm3, %v10282_v4, %v5368_v21  ;;  %v10361_v45 = vld [vmem:[%s20937_s0 + $0x569] sm:$0x8]  }
 0x283   :  { %v10250_v19 = vld [vmem:[%s20937_s0 + $0x3e7] sm:$0x80]   ;;  %v5241_v38 = vsel %vm25_vm5, %v10249_v40, %v5237_v31  ;;  %v10283_v40 = vld [vmem:[%s20937_s0 + $0x1a8] sm:$0x20]   ;;  %v16979_v62 = vpop.permute.xlu0 %3921   ;;  %v10362_v60 = vld [vmem:[%s20937_s0 + $0x588] sm:$0x10]  }
 0x284   :  { %v5245_v11 = vsel %vm29_vm6, %v10250_v19, %v5241_v38  ;;  %v5411_v19 = vsel %vm21_vm4, %v10292_v41, %v5407_v3  ;;  %v10285_v58 = vld [vmem:[%s20937_s0 + $0x1e6] sm:$0x80]   ;;  %v5376_v25 = vsel %vm21_vm4, %v10283_v40, %v5372_v54  ;;  %v16941_v56 = vpop.permute.xlu1 %3955   ;;  %v10340_v54 = vld [vmem:[%s20937_s0 + $0x40c] sm:$0x1]   ;;  %3924 = vst.msk [vmem:[%s20938_s1] sm:$0xff] %vm3923_vm12, %v16979_v62  }
 0x285   :  { %5246 = vrot.lane.b32.xlu0 %v5245_v11, %s11232_s10  ;;  %v5415_v8 = vsel %vm25_vm5, %v10293_v47, %v5411_v19  ;;  %v10306_v50 = vld [vmem:[%s20937_s0 + $0x62c] sm:$0x2]   ;;  %v5380_v51 = vsel %vm25_vm5, %v10284_v33, %v5376_v25  ;;  %v10342_v25 = vld [vmem:[%s20937_s0 + $0x44a] sm:$0x4]   ;;  %9922 = vst.msk [vmem:[%s20938_s1 + $0x20] sm:$0xff] %vm3923_vm12, %v16941_v56   ;;  %s11243_s10 = smov 12  }
 0x286   :  { %v10307_v34 = vld [vmem:[%s20937_s0 + $0x64b] sm:$0x4]   ;;  %v5419_v29 = vsel %vm29_vm6, %v10294_v35, %v5415_v8  ;;  %v5465_v31 = vsel %vm5_vm0, %v10306_v50, %v10305_v27  ;;  %v5384_v57 = vsel %vm29_vm6, %v10285_v58, %v5380_v51  ;;  %v10430_v56 = vld [vmem:[%s20937_s0 + $0x52a] sm:$0x2]  }
 0x287   :  { %v10309_v36 = vld [vmem:[%s20937_s0 + $0x689] sm:$0x10]   ;;  %5420 = vrot.lane.b32.xlu1 %v5419_v29, %s11233_s16  ;;  %v5469_v38 = vsel %vm9_vm1, %v10307_v34, %v5465_v31  ;;  %v10341_v31 = vld [vmem:[%s20937_s0 + $0x42b] sm:$0x2]   ;;  %v10431_v62 = vld [vmem:[%s20937_s0 + $0x549] sm:$0x4]  }
 0x288   :  { %v10310_v32 = vld [vmem:[%s20937_s0 + $0x6a8] sm:$0x20]   ;;  %v5473_v11 = vsel %vm13_vm2, %v10308_v28, %v5469_v38  ;;  %v17017_v7 = vpop.permute.xlu1 %4025   ;;  %v10343_v38 = vld [vmem:[%s20937_s0 + $0x469] sm:$0x8]  }
 0x289   :  { %5316 = vrot.lane.b32.xlu0 %v5315_v12, %s11233_s16  ;;  %v10311_v0 = vld [vmem:[%s20937_s0 + $0x6c7] sm:$0x40]   ;;  %v5477_v59 = vsel %vm17_vm3, %v10309_v36, %v5473_v11  ;;  %9940 = vst.msk [vmem:[%s20938_s1 + $0x28] sm:$0xff] %vm3923_vm12, %v17017_v7  }
 0x28a   :  { %v10312_v17 = vld [vmem:[%s20937_s0 + $0x6e6] sm:$0x80]   ;;  %v5481_v43 = vsel %vm21_vm4, %v10310_v32, %v5477_v59  ;;  %v10332_v59 = vld [vmem:[%s20937_s0 + $0xc] sm:$0x1]  }
 0x28b   :  { %v10296_v23 = vld [vmem:[%s20937_s0 + $0x20d] sm:$0x1]   ;;  %v5485_v30 = vsel %vm25_vm5, %v10311_v0, %v5481_v43  ;;  %v5604_v0 = vsel %vm5_vm0, %v10341_v31, %v10340_v54 }
 0x28c   :  { %v10297_v18 = vld [vmem:[%s20937_s0 + $0x22c] sm:$0x2]   ;;  %v5489_v46 = vsel %vm29_vm6, %v10312_v17, %v5485_v30  ;;  %v10344_v17 = vld [vmem:[%s20937_s0 + $0x488] sm:$0x10]   ;;  %v5608_v11 = vsel %vm9_vm1, %v10342_v25, %v5604_v0 }
 0x28d   :  { %v5430_v55 = vsel %vm5_vm0, %v10297_v18, %v10296_v23  ;;  %v10298_v20 = vld [vmem:[%s20937_s0 + $0x24b] sm:$0x4]   ;;  %5385 = vrot.lane.b32.xlu0 %v5384_v57, %s11233_s16  ;;  %5490 = vrot.lane.b32.xlu1 %v5489_v46, %s11233_s16  ;;  %v17055_v23 = vpop.permute.xlu0 %3990   ;;  %v5612_v57 = vsel %vm13_vm2, %v10343_v38, %v5608_v11  ;;  %v10377_v0 = vld [vmem:[%s20937_s0 + $0x62b] sm:$0x2]  }
 0x28e   :  { %v10299_v48 = vld [vmem:[%s20937_s0 + $0x26a] sm:$0x8]   ;;  %v5434_v63 = vsel %vm9_vm1, %v10298_v20, %v5430_v55  ;;  %v10345_v55 = vld [vmem:[%s20937_s0 + $0x4a7] sm:$0x20]   ;;  %v5616_v43 = vsel %vm17_vm3, %v10344_v17, %v5612_v57  ;;  %9931 = vst.msk [vmem:[%s20938_s1 + $0x8] sm:$0xff] %vm3923_vm12, %v17055_v23  }
 0x28f   :  { %v10300_v53 = vld [vmem:[%s20937_s0 + $0x289] sm:$0x10]   ;;  %v5438_v22 = vsel %vm13_vm2, %v10299_v48, %v5434_v63  ;;  %v10346_v20 = vld [vmem:[%s20937_s0 + $0x4c6] sm:$0x40]  }
 0x290   :  { %v10301_v49 = vld [vmem:[%s20937_s0 + $0x2a8] sm:$0x20]   ;;  %v5442_v16 = vsel %vm17_vm3, %v10300_v53, %v5438_v22  ;;  %v10347_v48 = vld [vmem:[%s20937_s0 + $0x4e5] sm:$0x80]  }
 0x291   :  { %v10302_v52 = vld [vmem:[%s20937_s0 + $0x2c7] sm:$0x40]   ;;  %v5446_v9 = vsel %vm21_vm4, %v10301_v49, %v5442_v16  ;;  %v10333_v63 = vld [vmem:[%s20937_s0 + $0x2b] sm:$0x2]   ;;  %v5620_v16 = vsel %vm21_vm4, %v10345_v55, %v5616_v43  ;;  %v17148_v37 = vpop.permute.xlu0 %4060  }
 0x292   :  { %v10303_v15 = vld [vmem:[%s20937_s0 + $0x2e6] sm:$0x80]   ;;  %v5450_v5 = vsel %vm25_vm5, %v10302_v52, %v5446_v9  ;;  %v10334_v49 = vld [vmem:[%s20937_s0 + $0x4a] sm:$0x4]   ;;  %v17081_v52 = vpop.permute.xlu1 %4095   ;;  %v5570_v22 = vsel %vm5_vm0, %v10333_v63, %v10332_v59  ;;  %9949 = vst.msk [vmem:[%s20938_s1 + $0x10] sm:$0xff] %vm3923_vm12, %v17148_v37  }
 0x293   :  { %v10323_v13 = vld [vmem:[%s20937_s0 + $0x70d] sm:$0x1]   ;;  %v5454_v33 = vsel %vm29_vm6, %v10303_v15, %v5450_v5  ;;  %v10360_v9 = vld [vmem:[%s20937_s0 + $0x54a] sm:$0x4]   ;;  %9958 = vst.msk [vmem:[%s20938_s1 + $0x30] sm:$0xff] %vm3923_vm12, %v17081_v52  }
 0x294   :  { %v10324_v61 = vld [vmem:[%s20937_s0 + $0x72c] sm:$0x2]   ;;  %5455 = vrot.lane.b32.xlu0 %v5454_v33, %s11233_s16  ;;  %v10365_v5 = vld [vmem:[%s20937_s0 + $0x5e5] sm:$0x80]  }
 0x295   :  { %v10325_v26 = vld [vmem:[%s20937_s0 + $0x74b] sm:$0x4]   ;;  %v5535_v41 = vsel %vm5_vm0, %v10324_v61, %v10323_v13  ;;  %v10335_v13 = vld [vmem:[%s20937_s0 + $0x69] sm:$0x8]   ;;  %v17211_v25 = vpop.permute.xlu0 %4130  }
 0x296   :  { %v10326_v47 = vld [vmem:[%s20937_s0 + $0x76a] sm:$0x8]   ;;  %v5539_v39 = vsel %vm9_vm1, %v10325_v26, %v5535_v41  ;;  %v10336_v61 = vld [vmem:[%s20937_s0 + $0x88] sm:$0x10]   ;;  %v5574_v41 = vsel %vm9_vm1, %v10334_v49, %v5570_v22  ;;  %9967 = vst.msk [vmem:[%s20938_s1 + $0x18] sm:$0xff] %vm3923_vm12, %v17211_v25  }
 0x297   :  { %v10327_v35 = vld [vmem:[%s20937_s0 + $0x789] sm:$0x10]   ;;  %v5543_v10 = vsel %vm13_vm2, %v10326_v47, %v5539_v39  ;;  %v10337_v26 = vld [vmem:[%s20937_s0 + $0xa7] sm:$0x20]   ;;  %v5578_v46 = vsel %vm13_vm2, %v10335_v13, %v5574_v41  ;;  %v10434_v25 = vld [vmem:[%s20937_s0 + $0x5a6] sm:$0x20]  }
 0x298   :  { %v10328_v42 = vld [vmem:[%s20937_s0 + $0x7a8] sm:$0x20]   ;;  %v5547_v58 = vsel %vm17_vm3, %v10327_v35, %v5543_v10  ;;  %v10338_v47 = vld [vmem:[%s20937_s0 + $0xc6] sm:$0x40]   ;;  %v5582_v2 = vsel %vm17_vm3, %v10336_v61, %v5578_v46 }
 0x299   :  { %v10329_v6 = vld [vmem:[%s20937_s0 + $0x7c7] sm:$0x40]   ;;  %v5551_v34 = vsel %vm21_vm4, %v10328_v42, %v5547_v58  ;;  %v10339_v35 = vld [vmem:[%s20937_s0 + $0xe5] sm:$0x80]   ;;  %v5624_v42 = vsel %vm25_vm5, %v10346_v20, %v5620_v16 }
 0x29a   :  { %v10330_v12 = vld [vmem:[%s20937_s0 + $0x7e6] sm:$0x80]   ;;  %v5555_v36 = vsel %vm25_vm5, %v10329_v6, %v5551_v34  ;;  %v5628_v24 = vsel %vm29_vm6, %v10347_v48, %v5624_v42  ;;  %v10363_v39 = vld [vmem:[%s20937_s0 + $0x5a7] sm:$0x20]   ;;  %v5586_v6 = vsel %vm21_vm4, %v10337_v26, %v5582_v2 }
 0x29b   :  { %v10314_v3 = vld [vmem:[%s20937_s0 + $0x30d] sm:$0x1]   ;;  %v5559_v18 = vsel %vm29_vm6, %v10330_v12, %v5555_v36  ;;  %v5678_v12 = vsel %vm9_vm1, %v10360_v9, %v5674_v1  ;;  %v10349_v10 = vld [vmem:[%s20937_s0 + $0x10c] sm:$0x1]  }
 0x29c   :  { %v10315_v4 = vld [vmem:[%s20937_s0 + $0x32c] sm:$0x2]   ;;  %5560 = vrot.lane.b32.xlu1 %v5559_v18, %s11233_s16  ;;  %v10351_v33 = vld [vmem:[%s20937_s0 + $0x14a] sm:$0x4]  }
 0x29d   :  { %v10316_v40 = vld [vmem:[%s20937_s0 + $0x34b] sm:$0x4]   ;;  %v5500_v27 = vsel %vm5_vm0, %v10315_v4, %v10314_v3  ;;  %v10364_v3 = vld [vmem:[%s20937_s0 + $0x5c6] sm:$0x40]   ;;  %v5590_v4 = vsel %vm25_vm5, %v10338_v47, %v5586_v6  ;;  %v17287_v6 = vpop.permute.xlu0 %4200  }
 0x29e   :  { %v10317_v19 = vld [vmem:[%s20937_s0 + $0x36a] sm:$0x8]   ;;  %v5504_v28 = vsel %vm9_vm1, %v10316_v40, %v5500_v27  ;;  %v5682_v40 = vsel %vm13_vm2, %v10361_v45, %v5678_v12  ;;  %v10352_v58 = vld [vmem:[%s20937_s0 + $0x169] sm:$0x8]   ;;  %v17185_v27 = vpop.permute.xlu1 %4165   ;;  %4203 = vst.msk [vmem:[%s20938_s1] sm:$0xff] %vm4202_vm13, %v17287_v6  }
 0x29f   :  { %v10318_v8 = vld [vmem:[%s20937_s0 + $0x389] sm:$0x10]   ;;  %v5508_v32 = vsel %vm13_vm2, %v10317_v19, %v5504_v28  ;;  %v10350_v19 = vld [vmem:[%s20937_s0 + $0x12b] sm:$0x2]   ;;  %9976 = vst.msk [vmem:[%s20938_s1 + $0x38] sm:$0xff] %vm3923_vm12, %v17185_v27   ;;  %vm6434_vm12 = vcmask 326944  }
 0x2a0   :  { %v10319_v21 = vld [vmem:[%s20937_s0 + $0x3a8] sm:$0x20]   ;;  %v5512_v51 = vsel %vm17_vm3, %v10318_v8, %v5508_v32  ;;  %5629 = vrot.lane.b32.xlu1 %v5628_v24, %s11234_s13  ;;  %v5594_v8 = vsel %vm29_vm6, %v10339_v35, %v5590_v4  ;;  %v10353_v34 = vld [vmem:[%s20937_s0 + $0x188] sm:$0x10]   ;;  %v10433_v27 = vld [vmem:[%s20937_s0 + $0x587] sm:$0x10]  }
 0x2a1   :  { %v10320_v50 = vld [vmem:[%s20937_s0 + $0x3c7] sm:$0x40]   ;;  %v5516_v53 = vsel %vm21_vm4, %v10319_v21, %v5512_v51  ;;  %v5686_v21 = vsel %vm17_vm3, %v10362_v60, %v5682_v40  ;;  %v10354_v28 = vld [vmem:[%s20937_s0 + $0x1a7] sm:$0x20]   ;;  %v10502_v6 = vld [vmem:[%s20937_s0 + $0x548] sm:$0x4]  }
 0x2a2   :  { %v10321_v29 = vld [vmem:[%s20937_s0 + $0x3e6] sm:$0x80]   ;;  %v5520_v15 = vsel %vm25_vm5, %v10320_v50, %v5516_v53  ;;  %v5639_v50 = vsel %vm5_vm0, %v10350_v19, %v10349_v10  ;;  %v5690_v54 = vsel %vm21_vm4, %v10363_v39, %v5686_v21  ;;  %v10356_v36 = vld [vmem:[%s20937_s0 + $0x1e5] sm:$0x80]   ;;  %v17249_v61 = vpop.permute.xlu1 %4234  }
 0x2a3   :  { %v5524_v30 = vsel %vm29_vm6, %v10321_v29, %v5520_v15  ;;  %v10355_v29 = vld [vmem:[%s20937_s0 + $0x1c6] sm:$0x40]   ;;  %v5643_v31 = vsel %vm9_vm1, %v10351_v33, %v5639_v50  ;;  %v5694_v38 = vsel %vm25_vm5, %v10364_v3, %v5690_v54  ;;  %9993 = vst.msk [vmem:[%s20938_s1 + $0x20] sm:$0xff] %vm4202_vm13, %v17249_v61  }
 0x2a4   :  { %5525 = vrot.lane.b32.xlu0 %v5524_v30, %s11233_s16  ;;  %v10376_v32 = vld [vmem:[%s20937_s0 + $0x60c] sm:$0x1]   ;;  %v5647_v17 = vsel %vm13_vm2, %v10352_v58, %v5643_v31  ;;  %v5698_v20 = vsel %vm29_vm6, %v10365_v5, %v5694_v38 }
 0x2a5   :  { %v5744_v18 = vsel %vm5_vm0, %v10377_v0, %v10376_v32  ;;  %v10378_v51 = vld [vmem:[%s20937_s0 + $0x64a] sm:$0x4]   ;;  %v5651_v48 = vsel %vm17_vm3, %v10353_v34, %v5647_v17  ;;  %5699 = vrot.lane.b32.xlu1 %v5698_v20, %s11234_s13  ;;  %v10411_v20 = vld [vmem:[%s20937_s0 + $0x40b] sm:$0x1]  }
 0x2a6   :  { %v10379_v11 = vld [vmem:[%s20937_s0 + $0x669] sm:$0x8]   ;;  %v5748_v53 = vsel %vm9_vm1, %v10378_v51, %v5744_v18  ;;  %v5655_v49 = vsel %vm21_vm4, %v10354_v28, %v5651_v48  ;;  %v10412_v48 = vld [vmem:[%s20937_s0 + $0x42a] sm:$0x2]  }
 0x2a7   :  { %v10380_v55 = vld [vmem:[%s20937_s0 + $0x688] sm:$0x10]   ;;  %v5752_v15 = vsel %vm13_vm2, %v10379_v11, %v5748_v53  ;;  %v5659_v26 = vsel %vm25_vm5, %v10355_v29, %v5655_v49  ;;  %v10413_v53 = vld [vmem:[%s20937_s0 + $0x449] sm:$0x4]   ;;  %v5883_v49 = vsel %vm5_vm0, %v10412_v48, %v10411_v20 }
 0x2a8   :  { %5595 = vrot.lane.b32.xlu0 %v5594_v8, %s11234_s13  ;;  %v10381_v57 = vld [vmem:[%s20937_s0 + $0x6a7] sm:$0x20]   ;;  %v5756_v30 = vsel %vm17_vm3, %v10380_v55, %v5752_v15  ;;  %v5663_v42 = vsel %vm29_vm6, %v10356_v36, %v5659_v26  ;;  %v17325_v36 = vpop.permute.xlu1 %4304   ;;  %v10414_v15 = vld [vmem:[%s20937_s0 + $0x468] sm:$0x8]  }
 0x2a9   :  { %v10382_v59 = vld [vmem:[%s20937_s0 + $0x6c6] sm:$0x40]   ;;  %v5760_v46 = vsel %vm21_vm4, %v10381_v57, %v5756_v30  ;;  %v17351_v57 = vpop.permute.xlu0 %4269   ;;  %v5887_v30 = vsel %vm9_vm1, %v10413_v53, %v5883_v49  ;;  %v10427_v20 = vld [vmem:[%s20937_s0 + $0x1e4] sm:$0x80]   ;;  %10011 = vst.msk [vmem:[%s20938_s1 + $0x28] sm:$0xff] %vm4202_vm13, %v17325_v36  }
 0x2aa   :  { %v10383_v63 = vld [vmem:[%s20937_s0 + $0x6e5] sm:$0x80]   ;;  %v5764_v2 = vsel %vm25_vm5, %v10382_v59, %v5760_v46  ;;  %v10404_v46 = vld [vmem:[%s20937_s0 + $0x2a] sm:$0x2]   ;;  %10002 = vst.msk [vmem:[%s20938_s1 + $0x8] sm:$0xff] %vm4202_vm13, %v17351_v57  }
 0x2ab   :  { %v10367_v43 = vld [vmem:[%s20937_s0 + $0x20c] sm:$0x1]   ;;  %v5768_v12 = vsel %vm29_vm6, %v10383_v63, %v5764_v2  ;;  %v10449_v49 = vld [vmem:[%s20937_s0 + $0x649] sm:$0x4]  }
 0x2ac   :  { %v10368_v22 = vld [vmem:[%s20937_s0 + $0x22b] sm:$0x2]   ;;  %5664 = vrot.lane.b32.xlu0 %v5663_v42, %s11234_s13  ;;  %5769 = vrot.lane.b32.xlu1 %v5768_v12, %s11234_s13  ;;  %v5891_v42 = vsel %vm13_vm2, %v10414_v15, %v5887_v30  ;;  %v10451_v30 = vld [vmem:[%s20937_s0 + $0x687] sm:$0x10]  }
 0x2ad   :  { %v10369_v13 = vld [vmem:[%s20937_s0 + $0x24a] sm:$0x4]   ;;  %v5709_v16 = vsel %vm5_vm0, %v10368_v22, %v10367_v43  ;;  %v10415_v43 = vld [vmem:[%s20937_s0 + $0x487] sm:$0x10]   ;;  %v17455_v7 = vpop.permute.xlu0 %4339  }
 0x2ae   :  { %v10370_v41 = vld [vmem:[%s20937_s0 + $0x269] sm:$0x8]   ;;  %v5713_v44 = vsel %vm9_vm1, %v10369_v13, %v5709_v16  ;;  %v10416_v22 = vld [vmem:[%s20937_s0 + $0x4a6] sm:$0x20]   ;;  %v5895_v2 = vsel %vm17_vm3, %v10415_v43, %v5891_v42  ;;  %10020 = vst.msk [vmem:[%s20938_s1 + $0x10] sm:$0xff] %vm4202_vm13, %v17455_v7  }
 0x2af   :  { %v10371_v47 = vld [vmem:[%s20937_s0 + $0x288] sm:$0x10]   ;;  %v5717_v1 = vsel %vm13_vm2, %v10370_v41, %v5713_v44  ;;  %v10417_v16 = vld [vmem:[%s20937_s0 + $0x4c5] sm:$0x40]   ;;  %v5899_v12 = vsel %vm21_vm4, %v10416_v22, %v5895_v2  ;;  %v10505_v7 = vld [vmem:[%s20937_s0 + $0x5a5] sm:$0x20]  }
 0x2b0   :  { %v10372_v35 = vld [vmem:[%s20937_s0 + $0x2a7] sm:$0x20]   ;;  %v5721_v3 = vsel %vm17_vm3, %v10371_v47, %v5717_v1  ;;  %v10418_v41 = vld [vmem:[%s20937_s0 + $0x4e4] sm:$0x80]  }
 0x2b1   :  { %v10374_v9 = vld [vmem:[%s20937_s0 + $0x2e5] sm:$0x80]   ;;  %v5725_v19 = vsel %vm21_vm4, %v10372_v35, %v5721_v3  ;;  %v10403_v47 = vld [vmem:[%s20937_s0 + $0xb] sm:$0x1]   ;;  %v17519_v15 = vpop.permute.xlu0 %4409  }
 0x2b2   :  { %v10394_v24 = vld [vmem:[%s20937_s0 + $0x70c] sm:$0x1]   ;;  %v5729_v50 = vsel %vm25_vm5, %v10373_v14, %v5725_v19  ;;  %v10405_v44 = vld [vmem:[%s20937_s0 + $0x49] sm:$0x4]   ;;  %v5849_v1 = vsel %vm5_vm0, %v10404_v46, %v10403_v47  ;;  %10038 = vst.msk [vmem:[%s20938_s1 + $0x18] sm:$0xff] %vm4202_vm13, %v17519_v15  }
 0x2b3   :  { %v10395_v45 = vld [vmem:[%s20937_s0 + $0x72b] sm:$0x2]   ;;  %v5733_v32 = vsel %vm29_vm6, %v10374_v9, %v5729_v50  ;;  %v10406_v14 = vld [vmem:[%s20937_s0 + $0x68] sm:$0x8]   ;;  %v17389_v9 = vpop.permute.xlu1 %4374   ;;  %v5853_v3 = vsel %vm9_vm1, %v10405_v44, %v5849_v1  ;;  %v10507_v15 = vld [vmem:[%s20937_s0 + $0x5e3] sm:$0x80]  }
 0x2b4   :  { %v10396_v60 = vld [vmem:[%s20937_s0 + $0x74a] sm:$0x4]   ;;  %v5814_v5 = vsel %vm5_vm0, %v10395_v45, %v10394_v24  ;;  %5734 = vrot.lane.b32.xlu0 %v5733_v32, %s11234_s13  ;;  %v10407_v45 = vld [vmem:[%s20937_s0 + $0x87] sm:$0x10]   ;;  %10029 = vst.msk [vmem:[%s20938_s1 + $0x30] sm:$0xff] %vm4202_vm13, %v17389_v9  }
 0x2b5   :  { %v10397_v39 = vld [vmem:[%s20937_s0 + $0x769] sm:$0x8]   ;;  %v5818_v33 = vsel %vm9_vm1, %v10396_v60, %v5814_v5  ;;  %v10408_v60 = vld [vmem:[%s20937_s0 + $0xa6] sm:$0x20]  }
 0x2b6   :  { %v10398_v10 = vld [vmem:[%s20937_s0 + $0x788] sm:$0x10]   ;;  %v5822_v34 = vsel %vm13_vm2, %v10397_v39, %v5818_v33  ;;  %v10409_v39 = vld [vmem:[%s20937_s0 + $0xc5] sm:$0x40]  }
 0x2b7   :  { %v10399_v4 = vld [vmem:[%s20937_s0 + $0x7a7] sm:$0x20]   ;;  %v5826_v0 = vsel %vm17_vm3, %v10398_v10, %v5822_v34  ;;  %v10410_v5 = vld [vmem:[%s20937_s0 + $0xe4] sm:$0x80]  }
 0x2b8   :  { %v10400_v40 = vld [vmem:[%s20937_s0 + $0x7c6] sm:$0x40]   ;;  %v5830_v11 = vsel %vm21_vm4, %v10399_v4, %v5826_v0  ;;  %v10429_v10 = vld [vmem:[%s20937_s0 + $0x50b] sm:$0x1]   ;;  %v5903_v4 = vsel %vm25_vm5, %v10417_v16, %v5899_v12 }
 0x2b9   :  { %v10401_v58 = vld [vmem:[%s20937_s0 + $0x7e5] sm:$0x80]   ;;  %v5834_v59 = vsel %vm25_vm5, %v10400_v40, %v5830_v11  ;;  %v5857_v40 = vsel %vm13_vm2, %v10406_v14, %v5853_v3  ;;  %v10432_v19 = vld [vmem:[%s20937_s0 + $0x568] sm:$0x8]   ;;  %v5907_v23 = vsel %vm29_vm6, %v10418_v41, %v5903_v4  ;;  %v5953_v37 = vsel %vm5_vm0, %v10430_v56, %v10429_v10 }
 0x2ba   :  { %v10385_v8 = vld [vmem:[%s20937_s0 + $0x30c] sm:$0x1]   ;;  %v5838_v13 = vsel %vm29_vm6, %v10401_v58, %v5834_v59  ;;  %v5861_v52 = vsel %vm17_vm3, %v10407_v45, %v5857_v40  ;;  %v10435_v33 = vld [vmem:[%s20937_s0 + $0x5c5] sm:$0x40]  }
 0x2bb   :  { %v10386_v21 = vld [vmem:[%s20937_s0 + $0x32b] sm:$0x2]   ;;  %5839 = vrot.lane.b32.xlu1 %v5838_v13, %s11234_s13  ;;  %v5865_v58 = vsel %vm21_vm4, %v10408_v60, %v5861_v52  ;;  %v10420_v50 = vld [vmem:[%s20937_s0 + $0x10b] sm:$0x1]   ;;  %v17583_v52 = vpop.permute.xlu0 %4479  }
 0x2bc   :  { %v5779_v28 = vsel %vm5_vm0, %v10386_v21, %v10385_v8  ;;  %v10387_v29 = vld [vmem:[%s20937_s0 + $0x34a] sm:$0x4]   ;;  %v5957_v8 = vsel %vm9_vm1, %v10431_v62, %v5953_v37  ;;  %v10436_v21 = vld [vmem:[%s20937_s0 + $0x5e4] sm:$0x80]   ;;  %4482 = vst.msk [vmem:[%s20938_s1] sm:$0xff] %vm4481_vm14, %v17583_v52  }
 0x2bd   :  { %v10388_v54 = vld [vmem:[%s20937_s0 + $0x369] sm:$0x8]   ;;  %v5783_v38 = vsel %vm9_vm1, %v10387_v29, %v5779_v28  ;;  %v10421_v34 = vld [vmem:[%s20937_s0 + $0x12a] sm:$0x2]   ;;  %v17481_v28 = vpop.permute.xlu1 %4444   ;;  %v5869_v29 = vsel %vm25_vm5, %v10409_v39, %v5865_v58  ;;  %v10572_v52 = vld [vmem:[%s20937_s0 + $0x528] sm:$0x2]  }
 0x2be   :  { %v10389_v31 = vld [vmem:[%s20937_s0 + $0x388] sm:$0x10]   ;;  %v5787_v55 = vsel %vm13_vm2, %v10388_v54, %v5783_v38  ;;  %v5961_v54 = vsel %vm13_vm2, %v10432_v19, %v5957_v8  ;;  %v10422_v32 = vld [vmem:[%s20937_s0 + $0x149] sm:$0x4]   ;;  %10047 = vst.msk [vmem:[%s20938_s1 + $0x38] sm:$0xff] %vm4202_vm13, %v17481_v28   ;;  %vm6713_vm13 = vcmask 294144  }
 0x2bf   :  { %v10390_v17 = vld [vmem:[%s20937_s0 + $0x3a7] sm:$0x20]   ;;  %v5791_v63 = vsel %vm17_vm3, %v10389_v31, %v5787_v55  ;;  %5908 = vrot.lane.b32.xlu1 %v5907_v23, %s11235_s18  ;;  %v5918_v31 = vsel %vm5_vm0, %v10421_v34, %v10420_v50  ;;  %v10423_v0 = vld [vmem:[%s20937_s0 + $0x168] sm:$0x8]   ;;  %v10506_v28 = vld [vmem:[%s20937_s0 + $0x5c4] sm:$0x40]  }
 0x2c0   :  { %v10391_v18 = vld [vmem:[%s20937_s0 + $0x3c6] sm:$0x40]   ;;  %v5795_v26 = vsel %vm21_vm4, %v10390_v17, %v5791_v63  ;;  %v10424_v38 = vld [vmem:[%s20937_s0 + $0x187] sm:$0x10]   ;;  %v5873_v17 = vsel %vm29_vm6, %v10410_v5, %v5869_v29 }
 0x2c1   :  { %v10392_v51 = vld [vmem:[%s20937_s0 + $0x3e5] sm:$0x80]   ;;  %v5799_v35 = vsel %vm25_vm5, %v10391_v18, %v5795_v26  ;;  %v5965_v18 = vsel %vm17_vm3, %v10433_v27, %v5961_v54  ;;  %v10425_v11 = vld [vmem:[%s20937_s0 + $0x1a6] sm:$0x20]   ;;  %v17557_v60 = vpop.permute.xlu1 %4513  }
 0x2c2   :  { %v5803_v24 = vsel %vm29_vm6, %v10392_v51, %v5799_v35  ;;  %v5922_v51 = vsel %vm9_vm1, %v10422_v32, %v5918_v31  ;;  %v10426_v55 = vld [vmem:[%s20937_s0 + $0x1c5] sm:$0x40]   ;;  %v5969_v48 = vsel %vm21_vm4, %v10434_v25, %v5965_v18  ;;  %10064 = vst.msk [vmem:[%s20938_s1 + $0x20] sm:$0xff] %vm4481_vm14, %v17557_v60   ;;  %v10571_v60 = vld [vmem:[%s20937_s0 + $0x509] sm:$0x1]  }
 0x2c3   :  { %5804 = vrot.lane.b32.xlu0 %v5803_v24, %s11234_s13  ;;  %v5926_v53 = vsel %vm13_vm2, %v10423_v0, %v5922_v51  ;;  %v10447_v59 = vld [vmem:[%s20937_s0 + $0x60b] sm:$0x1]   ;;  %v5973_v43 = vsel %vm25_vm5, %v10435_v33, %v5969_v48 }
 0x2c4   :  { %v10448_v63 = vld [vmem:[%s20937_s0 + $0x62a] sm:$0x2]   ;;  %v5930_v22 = vsel %vm17_vm3, %v10424_v38, %v5926_v53  ;;  %v5977_v41 = vsel %vm29_vm6, %v10436_v21, %v5973_v43 }
 0x2c5   :  { %v6023_v13 = vsel %vm5_vm0, %v10448_v63, %v10447_v59  ;;  %v10450_v26 = vld [vmem:[%s20937_s0 + $0x668] sm:$0x8]   ;;  %v5934_v47 = vsel %vm21_vm4, %v10425_v11, %v5930_v22  ;;  %5978 = vrot.lane.b32.xlu1 %v5977_v41, %s11235_s18  ;;  %v17621_v51 = vpop.permute.xlu1 %4583   ;;  %v10483_v41 = vld [vmem:[%s20937_s0 + $0x429] sm:$0x2]  }
 0x2c6   :  { %v10452_v16 = vld [vmem:[%s20937_s0 + $0x6a6] sm:$0x20]   ;;  %v6027_v35 = vsel %vm9_vm1, %v10449_v49, %v6023_v13  ;;  %v5938_v14 = vsel %vm25_vm5, %v10426_v55, %v5934_v47  ;;  %v10484_v47 = vld [vmem:[%s20937_s0 + $0x448] sm:$0x4]   ;;  %10082 = vst.msk [vmem:[%s20938_s1 + $0x28] sm:$0xff] %vm4481_vm14, %v17621_v51  }
 0x2c7   :  { %5874 = vrot.lane.b32.xlu0 %v5873_v17, %s11235_s18  ;;  %v10453_v42 = vld [vmem:[%s20937_s0 + $0x6c5] sm:$0x40]   ;;  %v6031_v24 = vsel %vm13_vm2, %v10450_v26, %v6027_v35  ;;  %v5942_v39 = vsel %vm29_vm6, %v10427_v20, %v5938_v14  ;;  %v10482_v26 = vld [vmem:[%s20937_s0 + $0x40a] sm:$0x1]  }
 0x2c8   :  { %v10454_v46 = vld [vmem:[%s20937_s0 + $0x6e4] sm:$0x80]   ;;  %v6035_v12 = vsel %vm17_vm3, %v10451_v30, %v6031_v24  ;;  %v10485_v35 = vld [vmem:[%s20937_s0 + $0x467] sm:$0x8]   ;;  %v6162_v14 = vsel %vm5_vm0, %v10483_v41, %v10482_v26 }
 0x2c9   :  { %v10438_v44 = vld [vmem:[%s20937_s0 + $0x20b] sm:$0x1]   ;;  %v6039_v40 = vsel %vm21_vm4, %v10452_v16, %v6035_v12  ;;  %v10486_v24 = vld [vmem:[%s20937_s0 + $0x486] sm:$0x10]  }
 0x2ca   :  { %v10439_v2 = vld [vmem:[%s20937_s0 + $0x22a] sm:$0x2]   ;;  %v6043_v37 = vsel %vm25_vm5, %v10453_v42, %v6039_v40  ;;  %v17659_v42 = vpop.permute.xlu0 %4548   ;;  %v10489_v12 = vld [vmem:[%s20937_s0 + $0x4e3] sm:$0x80]  }
 0x2cb   :  { %v10440_v1 = vld [vmem:[%s20937_s0 + $0x249] sm:$0x4]   ;;  %v5988_v3 = vsel %vm5_vm0, %v10439_v2, %v10438_v44  ;;  %5943 = vrot.lane.b32.xlu0 %v5942_v39, %s11235_s18  ;;  %v6047_v21 = vsel %vm29_vm6, %v10454_v46, %v6043_v37  ;;  %v10487_v2 = vld [vmem:[%s20937_s0 + $0x4a5] sm:$0x20]   ;;  %v6166_v39 = vsel %vm9_vm1, %v10484_v47, %v6162_v14  ;;  %10073 = vst.msk [vmem:[%s20938_s1 + $0x8] sm:$0xff] %vm4481_vm14, %v17659_v42  }
 0x2cc   :  { %v10441_v45 = vld [vmem:[%s20937_s0 + $0x268] sm:$0x8]   ;;  %v5992_v56 = vsel %vm9_vm1, %v10440_v1, %v5988_v3  ;;  %6048 = vrot.lane.b32.xlu1 %v6047_v21, %s11235_s18  ;;  %v10488_v1 = vld [vmem:[%s20937_s0 + $0x4c4] sm:$0x40]  }
 0x2cd   :  { %v10442_v5 = vld [vmem:[%s20937_s0 + $0x287] sm:$0x10]   ;;  %v5996_v27 = vsel %vm13_vm2, %v10441_v45, %v5992_v56  ;;  %v10474_v3 = vld [vmem:[%s20937_s0 + $0xa] sm:$0x1]  }
 0x2ce   :  { %v10443_v10 = vld [vmem:[%s20937_s0 + $0x2a6] sm:$0x20]   ;;  %v6000_v50 = vsel %vm17_vm3, %v10442_v5, %v5996_v27  ;;  %v10475_v5 = vld [vmem:[%s20937_s0 + $0x29] sm:$0x2]  }
 0x2cf   :  { %v10444_v4 = vld [vmem:[%s20937_s0 + $0x2c5] sm:$0x40]   ;;  %v6004_v32 = vsel %vm21_vm4, %v10443_v10, %v6000_v50  ;;  %v6128_v40 = vsel %vm5_vm0, %v10475_v5, %v10474_v3  ;;  %v10476_v56 = vld [vmem:[%s20937_s0 + $0x48] sm:$0x4]  }
 0x2d0   :  { %v10445_v62 = vld [vmem:[%s20937_s0 + $0x2e4] sm:$0x80]   ;;  %v6008_v11 = vsel %vm25_vm5, %v10444_v4, %v6004_v32  ;;  %v6170_v4 = vsel %vm13_vm2, %v10485_v35, %v6166_v39  ;;  %v10518_v41 = vld [vmem:[%s20937_s0 + $0x60a] sm:$0x1]  }
 0x2d1   :  { %v10465_v19 = vld [vmem:[%s20937_s0 + $0x70b] sm:$0x1]   ;;  %v6012_v63 = vsel %vm29_vm6, %v10445_v62, %v6008_v11  ;;  %v10477_v62 = vld [vmem:[%s20937_s0 + $0x67] sm:$0x8]   ;;  %v6174_v27 = vsel %vm17_vm3, %v10486_v24, %v6170_v4 }
 0x2d2   :  { %v10466_v23 = vld [vmem:[%s20937_s0 + $0x72a] sm:$0x2]   ;;  %6013 = vrot.lane.b32.xlu0 %v6012_v63, %s11235_s18  ;;  %v6178_v21 = vsel %vm21_vm4, %v10487_v2, %v6174_v27  ;;  %v10491_v11 = vld [vmem:[%s20937_s0 + $0x10a] sm:$0x1]  }
 0x2d3   :  { %v6093_v25 = vsel %vm5_vm0, %v10466_v23, %v10465_v19  ;;  %v10467_v33 = vld [vmem:[%s20937_s0 + $0x749] sm:$0x4]   ;;  %v10478_v19 = vld [vmem:[%s20937_s0 + $0x86] sm:$0x10]   ;;  %v17697_v23 = vpop.permute.xlu1 %4653  }
 0x2d4   :  { %v10468_v58 = vld [vmem:[%s20937_s0 + $0x768] sm:$0x8]   ;;  %v6097_v34 = vsel %vm9_vm1, %v10467_v33, %v6093_v25  ;;  %v6132_v25 = vsel %vm9_vm1, %v10476_v56, %v6128_v40  ;;  %v10479_v33 = vld [vmem:[%s20937_s0 + $0xa5] sm:$0x20]   ;;  %10100 = vst.msk [vmem:[%s20938_s1 + $0x30] sm:$0xff] %vm4481_vm14, %v17697_v23  }
 0x2d5   :  { %v10469_v8 = vld [vmem:[%s20937_s0 + $0x787] sm:$0x10]   ;;  %v6101_v0 = vsel %vm13_vm2, %v10468_v58, %v6097_v34  ;;  %v10480_v58 = vld [vmem:[%s20937_s0 + $0xc4] sm:$0x40]   ;;  %v6136_v50 = vsel %vm13_vm2, %v10477_v62, %v6132_v25 }
 0x2d6   :  { %v10470_v29 = vld [vmem:[%s20937_s0 + $0x7a6] sm:$0x20]   ;;  %v6105_v55 = vsel %vm17_vm3, %v10469_v8, %v6101_v0  ;;  %v10481_v8 = vld [vmem:[%s20937_s0 + $0xe3] sm:$0x80]   ;;  %v6140_v32 = vsel %vm17_vm3, %v10478_v19, %v6136_v50 }
 0x2d7   :  { %v10471_v54 = vld [vmem:[%s20937_s0 + $0x7c5] sm:$0x40]   ;;  %v6109_v49 = vsel %vm21_vm4, %v10470_v29, %v6105_v55  ;;  %v10500_v34 = vld [vmem:[%s20937_s0 + $0x50a] sm:$0x1]   ;;  %v6144_v57 = vsel %vm21_vm4, %v10479_v33, %v6140_v32 }
 0x2d8   :  { %v10472_v31 = vld [vmem:[%s20937_s0 + $0x7e4] sm:$0x80]   ;;  %v6113_v30 = vsel %vm25_vm5, %v10471_v54, %v6109_v49  ;;  %v10501_v29 = vld [vmem:[%s20937_s0 + $0x529] sm:$0x2]   ;;  %v17720_v54 = vpop.permute.xlu0 %4618  }
 0x2d9   :  { %v10456_v38 = vld [vmem:[%s20937_s0 + $0x30b] sm:$0x1]   ;;  %v6117_v46 = vsel %vm29_vm6, %v10472_v31, %v6113_v30  ;;  %v6182_v31 = vsel %vm25_vm5, %v10488_v1, %v6178_v21  ;;  %v6232_v61 = vsel %vm5_vm0, %v10501_v29, %v10500_v34  ;;  %v10503_v0 = vld [vmem:[%s20937_s0 + $0x567] sm:$0x8]   ;;  %10091 = vst.msk [vmem:[%s20938_s1 + $0x10] sm:$0xff] %vm4481_vm14, %v17720_v54   ;;  %v6511_v54 = vsel %vm5_vm0, %v10572_v52, %v10571_v60 }
 0x2da   :  { %v10457_v17 = vld [vmem:[%s20937_s0 + $0x32a] sm:$0x2]   ;;  %6118 = vrot.lane.b32.xlu1 %v6117_v46, %s11235_s18  ;;  %v6186_v36 = vsel %vm29_vm6, %v10489_v12, %v6182_v31  ;;  %v6236_v9 = vsel %vm9_vm1, %v10502_v6, %v6232_v61  ;;  %v10492_v55 = vld [vmem:[%s20937_s0 + $0x129] sm:$0x2]   ;;  %v10586_v52 = vld [vmem:[%s20937_s0 + $0x2c3] sm:$0x40]  }
 0x2db   :  { %v10458_v18 = vld [vmem:[%s20937_s0 + $0x349] sm:$0x4]   ;;  %v6058_v20 = vsel %vm5_vm0, %v10457_v17, %v10456_v38  ;;  %v10504_v38 = vld [vmem:[%s20937_s0 + $0x586] sm:$0x10]   ;;  %v6148_v17 = vsel %vm25_vm5, %v10480_v58, %v6144_v57  ;;  %v6197_v63 = vsel %vm5_vm0, %v10492_v55, %v10491_v11 }
 0x2dc   :  { %v10459_v48 = vld [vmem:[%s20937_s0 + $0x368] sm:$0x8]   ;;  %v6062_v43 = vsel %vm9_vm1, %v10458_v18, %v6058_v20  ;;  %v6240_v18 = vsel %vm13_vm2, %v10503_v0, %v6236_v9  ;;  %v10493_v20 = vld [vmem:[%s20937_s0 + $0x148] sm:$0x4]   ;;  %v17835_v24 = vpop.permute.xlu0 %4688  }
 0x2dd   :  { %v10460_v53 = vld [vmem:[%s20937_s0 + $0x387] sm:$0x10]   ;;  %v6066_v16 = vsel %vm13_vm2, %v10459_v48, %v6062_v43  ;;  %v17798_v48 = vpop.permute.xlu1 %4723   ;;  %v10494_v49 = vld [vmem:[%s20937_s0 + $0x167] sm:$0x8]   ;;  %v6201_v26 = vsel %vm9_vm1, %v10493_v20, %v6197_v63  ;;  %10109 = vst.msk [vmem:[%s20938_s1 + $0x18] sm:$0xff] %vm4481_vm14, %v17835_v24  }
 0x2de   :  { %v10461_v59 = vld [vmem:[%s20937_s0 + $0x3a6] sm:$0x20]   ;;  %v6070_v44 = vsel %vm17_vm3, %v10460_v53, %v6066_v16  ;;  %6187 = vrot.lane.b32.xlu1 %v6186_v36, %s11236_s24  ;;  %v6152_v53 = vsel %vm29_vm6, %v10481_v8, %v6148_v17  ;;  %v10495_v43 = vld [vmem:[%s20937_s0 + $0x186] sm:$0x10]   ;;  %v6205_v35 = vsel %vm13_vm2, %v10494_v49, %v6201_v26  ;;  %10118 = vst.msk [vmem:[%s20938_s1 + $0x38] sm:$0xff] %vm4481_vm14, %v17798_v48   ;;  %vm6992_vm14 = vcmask 261344  }
 0x2df   :  { %v10462_v22 = vld [vmem:[%s20937_s0 + $0x3c5] sm:$0x40]   ;;  %v6074_v45 = vsel %vm21_vm4, %v10461_v59, %v6070_v44  ;;  %v6244_v59 = vsel %vm17_vm3, %v10504_v38, %v6240_v18  ;;  %v10497_v30 = vld [vmem:[%s20937_s0 + $0x1c4] sm:$0x40]   ;;  %v6209_v1 = vsel %vm17_vm3, %v10495_v43, %v6205_v35  ;;  %v10574_v48 = vld [vmem:[%s20937_s0 + $0x566] sm:$0x8]  }
 0x2e0   :  { %v10463_v13 = vld [vmem:[%s20937_s0 + $0x3e4] sm:$0x80]   ;;  %v6078_v10 = vsel %vm25_vm5, %v10462_v22, %v6074_v45  ;;  %v10496_v22 = vld [vmem:[%s20937_s0 + $0x1a5] sm:$0x20]   ;;  %v17899_v36 = vpop.permute.xlu0 %4758   ;;  %v10575_v24 = vld [vmem:[%s20937_s0 + $0x585] sm:$0x10]  }
 0x2e1   :  { %v6082_v37 = vsel %vm29_vm6, %v10463_v13, %v6078_v10  ;;  %v6248_v13 = vsel %vm21_vm4, %v10505_v7, %v6244_v59  ;;  %v10498_v16 = vld [vmem:[%s20937_s0 + $0x1e3] sm:$0x80]   ;;  %v6213_v5 = vsel %vm21_vm4, %v10496_v22, %v6209_v1  ;;  %v17861_v62 = vpop.permute.xlu1 %4792   ;;  %v10553_v1 = vld [vmem:[%s20937_s0 + $0x409] sm:$0x1]   ;;  %4761 = vst.msk [vmem:[%s20938_s1] sm:$0xff] %vm4760_vm15, %v17899_v36  }
 0x2e2   :  { %6083 = vrot.lane.b32.xlu0 %v6082_v37, %s11235_s18  ;;  %v6252_v47 = vsel %vm25_vm5, %v10506_v28, %v6248_v13  ;;  %v10519_v46 = vld [vmem:[%s20937_s0 + $0x629] sm:$0x2]   ;;  %v6217_v19 = vsel %vm25_vm5, %v10497_v30, %v6213_v5  ;;  %v10555_v5 = vld [vmem:[%s20937_s0 + $0x447] sm:$0x4]   ;;  %10135 = vst.msk [vmem:[%s20938_s1 + $0x20] sm:$0xff] %vm4760_vm15, %v17861_v62  }
 0x2e3   :  { %v10520_v44 = vld [vmem:[%s20937_s0 + $0x648] sm:$0x4]   ;;  %v6256_v2 = vsel %vm29_vm6, %v10507_v15, %v6252_v47  ;;  %v6302_v45 = vsel %vm5_vm0, %v10519_v46, %v10518_v41  ;;  %v6221_v8 = vsel %vm29_vm6, %v10498_v16, %v6217_v19  ;;  %v10643_v62 = vld [vmem:[%s20937_s0 + $0x527] sm:$0x2]  }
 0x2e4   :  { %v10521_v14 = vld [vmem:[%s20937_s0 + $0x667] sm:$0x8]   ;;  %6257 = vrot.lane.b32.xlu1 %v6256_v2, %s11236_s24  ;;  %v6306_v10 = vsel %vm9_vm1, %v10520_v44, %v6302_v45  ;;  %v10554_v45 = vld [vmem:[%s20937_s0 + $0x428] sm:$0x2]   ;;  %v10644_v36 = vld [vmem:[%s20937_s0 + $0x546] sm:$0x4]  }
 0x2e5   :  { %v10522_v39 = vld [vmem:[%s20937_s0 + $0x686] sm:$0x10]   ;;  %v6310_v37 = vsel %vm13_vm2, %v10521_v14, %v6306_v10  ;;  %v17937_v26 = vpop.permute.xlu1 %4862   ;;  %v10556_v10 = vld [vmem:[%s20937_s0 + $0x466] sm:$0x8]  }
 0x2e6   :  { %6153 = vrot.lane.b32.xlu0 %v6152_v53, %s11236_s24  ;;  %v10523_v12 = vld [vmem:[%s20937_s0 + $0x6a5] sm:$0x20]   ;;  %v6314_v21 = vsel %vm17_vm3, %v10522_v39, %v6310_v37  ;;  %10153 = vst.msk [vmem:[%s20938_s1 + $0x28] sm:$0xff] %vm4760_vm15, %v17937_v26  }
 0x2e7   :  { %v10524_v3 = vld [vmem:[%s20937_s0 + $0x6c4] sm:$0x40]   ;;  %v6318_v32 = vsel %vm21_vm4, %v10523_v12, %v6314_v21  ;;  %v10545_v21 = vld [vmem:[%s20937_s0 + $0x9] sm:$0x1]  }
 0x2e8   :  { %v10525_v4 = vld [vmem:[%s20937_s0 + $0x6e3] sm:$0x80]   ;;  %v6322_v57 = vsel %vm25_vm5, %v10524_v3, %v6318_v32  ;;  %v6441_v3 = vsel %vm5_vm0, %v10554_v45, %v10553_v1 }
 0x2e9   :  { %v10509_v40 = vld [vmem:[%s20937_s0 + $0x20a] sm:$0x1]   ;;  %v6326_v18 = vsel %vm29_vm6, %v10525_v4, %v6322_v57  ;;  %v10557_v4 = vld [vmem:[%s20937_s0 + $0x485] sm:$0x10]   ;;  %v6445_v37 = vsel %vm9_vm1, %v10555_v5, %v6441_v3 }
 0x2ea   :  { %v10510_v56 = vld [vmem:[%s20937_s0 + $0x229] sm:$0x2]   ;;  %6222 = vrot.lane.b32.xlu0 %v6221_v8, %s11236_s24  ;;  %6327 = vrot.lane.b32.xlu1 %v6326_v18, %s11236_s24  ;;  %v6449_v8 = vsel %vm13_vm2, %v10556_v10, %v6445_v37  ;;  %v10590_v3 = vld [vmem:[%s20937_s0 + $0x628] sm:$0x2]  }
 0x2eb   :  { %v6267_v27 = vsel %vm5_vm0, %v10510_v56, %v10509_v40  ;;  %v10511_v25 = vld [vmem:[%s20937_s0 + $0x248] sm:$0x4]   ;;  %v17975_v40 = vpop.permute.xlu0 %4827   ;;  %v6453_v32 = vsel %vm17_vm3, %v10557_v4, %v6449_v8  ;;  %v10592_v37 = vld [vmem:[%s20937_s0 + $0x666] sm:$0x8]  }
 0x2ec   :  { %v10512_v33 = vld [vmem:[%s20937_s0 + $0x267] sm:$0x8]   ;;  %v6271_v50 = vsel %vm9_vm1, %v10511_v25, %v6267_v27  ;;  %v10558_v27 = vld [vmem:[%s20937_s0 + $0x4a4] sm:$0x20]   ;;  %10144 = vst.msk [vmem:[%s20938_s1 + $0x8] sm:$0xff] %vm4760_vm15, %v17975_v40  }
 0x2ed   :  { %v10513_v58 = vld [vmem:[%s20937_s0 + $0x286] sm:$0x10]   ;;  %v6275_v61 = vsel %vm13_vm2, %v10512_v33, %v6271_v50  ;;  %v10559_v25 = vld [vmem:[%s20937_s0 + $0x4c3] sm:$0x40]  }
 0x2ee   :  { %v10514_v34 = vld [vmem:[%s20937_s0 + $0x2a5] sm:$0x20]   ;;  %v6279_v9 = vsel %vm17_vm3, %v10513_v58, %v6275_v61  ;;  %v10560_v33 = vld [vmem:[%s20937_s0 + $0x4e2] sm:$0x80]  }
 0x2ef   :  { %v10515_v29 = vld [vmem:[%s20937_s0 + $0x2c4] sm:$0x40]   ;;  %v6283_v11 = vsel %vm21_vm4, %v10514_v34, %v6279_v9  ;;  %v10546_v50 = vld [vmem:[%s20937_s0 + $0x28] sm:$0x2]   ;;  %v6457_v9 = vsel %vm21_vm4, %v10558_v27, %v6453_v32  ;;  %v18068_v51 = vpop.permute.xlu0 %4897  }
 0x2f0   :  { %v10516_v31 = vld [vmem:[%s20937_s0 + $0x2e3] sm:$0x80]   ;;  %v6287_v63 = vsel %vm25_vm5, %v10515_v29, %v6283_v11  ;;  %v10547_v34 = vld [vmem:[%s20937_s0 + $0x47] sm:$0x4]   ;;  %v18001_v29 = vpop.permute.xlu1 %4932   ;;  %v6407_v61 = vsel %vm5_vm0, %v10546_v50, %v10545_v21  ;;  %10162 = vst.msk [vmem:[%s20938_s1 + $0x10] sm:$0xff] %vm4760_vm15, %v18068_v51  }
 0x2f1   :  { %v10536_v6 = vld [vmem:[%s20937_s0 + $0x70a] sm:$0x1]   ;;  %v6291_v30 = vsel %vm29_vm6, %v10516_v31, %v6287_v63  ;;  %v10573_v11 = vld [vmem:[%s20937_s0 + $0x547] sm:$0x4]   ;;  %10171 = vst.msk [vmem:[%s20938_s1 + $0x30] sm:$0xff] %vm4760_vm15, %v18001_v29  }
 0x2f2   :  { %v10537_v0 = vld [vmem:[%s20937_s0 + $0x729] sm:$0x2]   ;;  %6292 = vrot.lane.b32.xlu0 %v6291_v30, %s11236_s24  ;;  %v10578_v63 = vld [vmem:[%s20937_s0 + $0x5e2] sm:$0x80]  }
 0x2f3   :  { %v10538_v38 = vld [vmem:[%s20937_s0 + $0x748] sm:$0x4]   ;;  %v6372_v7 = vsel %vm5_vm0, %v10537_v0, %v10536_v6  ;;  %v10548_v6 = vld [vmem:[%s20937_s0 + $0x66] sm:$0x8]   ;;  %v18131_v5 = vpop.permute.xlu0 %4967  }
 0x2f4   :  { %v10539_v28 = vld [vmem:[%s20937_s0 + $0x767] sm:$0x8]   ;;  %v6376_v55 = vsel %vm9_vm1, %v10538_v38, %v6372_v7  ;;  %v10549_v0 = vld [vmem:[%s20937_s0 + $0x85] sm:$0x10]   ;;  %v6411_v7 = vsel %vm9_vm1, %v10547_v34, %v6407_v61  ;;  %10180 = vst.msk [vmem:[%s20938_s1 + $0x18] sm:$0xff] %vm4760_vm15, %v18131_v5  }
 0x2f5   :  { %v10540_v15 = vld [vmem:[%s20937_s0 + $0x786] sm:$0x10]   ;;  %v6380_v49 = vsel %vm13_vm2, %v10539_v28, %v6376_v55  ;;  %v10550_v38 = vld [vmem:[%s20937_s0 + $0xa4] sm:$0x20]   ;;  %v6415_v18 = vsel %vm13_vm2, %v10548_v6, %v6411_v7  ;;  %v10647_v5 = vld [vmem:[%s20937_s0 + $0x5a3] sm:$0x20]  }
 0x2f6   :  { %v10541_v17 = vld [vmem:[%s20937_s0 + $0x7a5] sm:$0x20]   ;;  %v6384_v16 = vsel %vm17_vm3, %v10540_v15, %v6380_v49  ;;  %v10551_v28 = vld [vmem:[%s20937_s0 + $0xc3] sm:$0x40]   ;;  %v6419_v23 = vsel %vm17_vm3, %v10549_v0, %v6415_v18 }
 0x2f7   :  { %v10542_v20 = vld [vmem:[%s20937_s0 + $0x7c4] sm:$0x40]   ;;  %v6388_v44 = vsel %vm21_vm4, %v10541_v17, %v6384_v16  ;;  %v10552_v15 = vld [vmem:[%s20937_s0 + $0xe2] sm:$0x80]   ;;  %v6461_v17 = vsel %vm25_vm5, %v10559_v25, %v6457_v9 }
 0x2f8   :  { %v10543_v53 = vld [vmem:[%s20937_s0 + $0x7e3] sm:$0x80]   ;;  %v6392_v39 = vsel %vm25_vm5, %v10542_v20, %v6388_v44  ;;  %v6465_v42 = vsel %vm29_vm6, %v10560_v33, %v6461_v17  ;;  %v10576_v55 = vld [vmem:[%s20937_s0 + $0x5a4] sm:$0x20]   ;;  %v6423_v20 = vsel %vm21_vm4, %v10550_v38, %v6419_v23 }
 0x2f9   :  { %v10527_v59 = vld [vmem:[%s20937_s0 + $0x30a] sm:$0x1]   ;;  %v6396_v56 = vsel %vm29_vm6, %v10543_v53, %v6392_v39  ;;  %v6515_v53 = vsel %vm9_vm1, %v10573_v11, %v6511_v54  ;;  %v10562_v49 = vld [vmem:[%s20937_s0 + $0x109] sm:$0x1]  }
 0x2fa   :  { %v10528_v43 = vld [vmem:[%s20937_s0 + $0x329] sm:$0x2]   ;;  %6397 = vrot.lane.b32.xlu1 %v6396_v56, %s11236_s24  ;;  %v10564_v30 = vld [vmem:[%s20937_s0 + $0x147] sm:$0x4]  }
 0x2fb   :  { %v10529_v22 = vld [vmem:[%s20937_s0 + $0x348] sm:$0x4]   ;;  %v6337_v41 = vsel %vm5_vm0, %v10528_v43, %v10527_v59  ;;  %v10577_v59 = vld [vmem:[%s20937_s0 + $0x5c3] sm:$0x40]   ;;  %v6427_v43 = vsel %vm25_vm5, %v10551_v28, %v6423_v20  ;;  %v18207_v20 = vpop.permute.xlu0 %5037  }
 0x2fc   :  { %v10530_v13 = vld [vmem:[%s20937_s0 + $0x367] sm:$0x8]   ;;  %v6341_v14 = vsel %vm9_vm1, %v10529_v22, %v6337_v41  ;;  %v6519_v22 = vsel %vm13_vm2, %v10574_v48, %v6515_v53  ;;  %v10565_v16 = vld [vmem:[%s20937_s0 + $0x166] sm:$0x8]   ;;  %v18105_v41 = vpop.permute.xlu1 %5002   ;;  %5040 = vst.msk [vmem:[%s20938_s1] sm:$0xff] %vm5039_vm7, %v18207_v20  }
 0x2fd   :  { %v10531_v47 = vld [vmem:[%s20937_s0 + $0x386] sm:$0x10]   ;;  %v6345_v12 = vsel %vm13_vm2, %v10530_v13, %v6341_v14  ;;  %v10563_v13 = vld [vmem:[%s20937_s0 + $0x128] sm:$0x2]   ;;  %10189 = vst.msk [vmem:[%s20938_s1 + $0x38] sm:$0xff] %vm4760_vm15, %v18105_v41  }
 0x2fe   :  { %v10532_v35 = vld [vmem:[%s20937_s0 + $0x3a5] sm:$0x20]   ;;  %v6349_v19 = vsel %vm17_vm3, %v10531_v47, %v6345_v12  ;;  %6466 = vrot.lane.b32.xlu1 %v6465_v42, %s11237_s22  ;;  %v6431_v47 = vsel %vm29_vm6, %v10552_v15, %v6427_v43  ;;  %v10566_v44 = vld [vmem:[%s20937_s0 + $0x185] sm:$0x10]   ;;  %v10646_v41 = vld [vmem:[%s20937_s0 + $0x584] sm:$0x10]  }
 0x2ff   :  { %v10533_v46 = vld [vmem:[%s20937_s0 + $0x3c4] sm:$0x40]   ;;  %v6353_v58 = vsel %vm21_vm4, %v10532_v35, %v6349_v19  ;;  %v6523_v35 = vsel %vm17_vm3, %v10575_v24, %v6519_v22  ;;  %v10567_v14 = vld [vmem:[%s20937_s0 + $0x1a4] sm:$0x20]   ;;  %v10715_v20 = vld [vmem:[%s20937_s0 + $0x545] sm:$0x4]  }
 0x300   :  { %v10534_v2 = vld [vmem:[%s20937_s0 + $0x3e3] sm:$0x80]   ;;  %v6357_v31 = vsel %vm25_vm5, %v10533_v46, %v6353_v58  ;;  %v6476_v46 = vsel %vm5_vm0, %v10563_v13, %v10562_v49  ;;  %v6527_v1 = vsel %vm21_vm4, %v10576_v55, %v6523_v35  ;;  %v10569_v39 = vld [vmem:[%s20937_s0 + $0x1e2] sm:$0x80]   ;;  %v18169_v0 = vpop.permute.xlu1 %5071  }
 0x301   :  { %v6361_v57 = vsel %vm29_vm6, %v10534_v2, %v6357_v31  ;;  %v10568_v2 = vld [vmem:[%s20937_s0 + $0x1c3] sm:$0x40]   ;;  %v6480_v45 = vsel %vm9_vm1, %v10564_v30, %v6476_v46  ;;  %v6531_v10 = vsel %vm25_vm5, %v10577_v59, %v6527_v1  ;;  %10206 = vst.msk [vmem:[%s20938_s1 + $0x20] sm:$0xff] %vm5039_vm7, %v18169_v0  }
 0x302   :  { %6362 = vrot.lane.b32.xlu0 %v6361_v57, %s11236_s24  ;;  %v10589_v12 = vld [vmem:[%s20937_s0 + $0x609] sm:$0x1]   ;;  %v6484_v4 = vsel %vm13_vm2, %v10565_v16, %v6480_v45  ;;  %v6535_v25 = vsel %vm29_vm6, %v10578_v63, %v6531_v10 }
 0x303   :  { %v6581_v56 = vsel %vm5_vm0, %v10590_v3, %v10589_v12  ;;  %v10591_v19 = vld [vmem:[%s20937_s0 + $0x647] sm:$0x4]   ;;  %v6488_v33 = vsel %vm17_vm3, %v10566_v44, %v6484_v4  ;;  %6536 = vrot.lane.b32.xlu1 %v6535_v25, %s11237_s22  ;;  %v10624_v25 = vld [vmem:[%s20937_s0 + $0x408] sm:$0x1]  }
 0x304   :  { %v10593_v27 = vld [vmem:[%s20937_s0 + $0x685] sm:$0x10]   ;;  %v6585_v58 = vsel %vm9_vm1, %v10591_v19, %v6581_v56  ;;  %v6492_v34 = vsel %vm21_vm4, %v10567_v14, %v6488_v33  ;;  %v10625_v33 = vld [vmem:[%s20937_s0 + $0x427] sm:$0x2]  }
 0x305   :  { %v10594_v8 = vld [vmem:[%s20937_s0 + $0x6a4] sm:$0x20]   ;;  %v6589_v31 = vsel %vm13_vm2, %v10592_v37, %v6585_v58  ;;  %v6496_v38 = vsel %vm25_vm5, %v10568_v2, %v6492_v34  ;;  %v10626_v58 = vld [vmem:[%s20937_s0 + $0x446] sm:$0x4]   ;;  %v6720_v34 = vsel %vm5_vm0, %v10625_v33, %v10624_v25 }
 0x306   :  { %6432 = vrot.lane.b32.xlu0 %v6431_v47, %s11237_s22  ;;  %v10595_v21 = vld [vmem:[%s20937_s0 + $0x6c3] sm:$0x40]   ;;  %v6593_v57 = vsel %vm17_vm3, %v10593_v27, %v6589_v31  ;;  %v6500_v17 = vsel %vm29_vm6, %v10569_v39, %v6496_v38  ;;  %v18245_v39 = vpop.permute.xlu1 %5141   ;;  %v10627_v31 = vld [vmem:[%s20937_s0 + $0x465] sm:$0x8]  }
 0x307   :  { %v10596_v50 = vld [vmem:[%s20937_s0 + $0x6e2] sm:$0x80]   ;;  %v6597_v18 = vsel %vm21_vm4, %v10594_v8, %v6593_v57  ;;  %v18271_v8 = vpop.permute.xlu0 %5106   ;;  %v6724_v57 = vsel %vm9_vm1, %v10626_v58, %v6720_v34  ;;  %v10640_v25 = vld [vmem:[%s20937_s0 + $0x1e1] sm:$0x80]   ;;  %10224 = vst.msk [vmem:[%s20938_s1 + $0x28] sm:$0xff] %vm5039_vm7, %v18245_v39  }
 0x308   :  { %v10580_v32 = vld [vmem:[%s20937_s0 + $0x209] sm:$0x1]   ;;  %v6601_v23 = vsel %vm25_vm5, %v10595_v21, %v6597_v18  ;;  %v10617_v18 = vld [vmem:[%s20937_s0 + $0x27] sm:$0x2]   ;;  %10215 = vst.msk [vmem:[%s20938_s1 + $0x8] sm:$0xff] %vm5039_vm7, %v18271_v8  }
 0x309   :  { %v10581_v61 = vld [vmem:[%s20937_s0 + $0x228] sm:$0x2]   ;;  %v6605_v53 = vsel %vm29_vm6, %v10596_v50, %v6601_v23  ;;  %v10662_v34 = vld [vmem:[%s20937_s0 + $0x646] sm:$0x4]  }
 0x30a   :  { %v10582_v6 = vld [vmem:[%s20937_s0 + $0x247] sm:$0x4]   ;;  %v6546_v9 = vsel %vm5_vm0, %v10581_v61, %v10580_v32  ;;  %6501 = vrot.lane.b32.xlu0 %v6500_v17, %s11237_s22  ;;  %6606 = vrot.lane.b32.xlu1 %v6605_v53, %s11237_s22  ;;  %v10628_v32 = vld [vmem:[%s20937_s0 + $0x484] sm:$0x10]   ;;  %v6728_v17 = vsel %vm13_vm2, %v10627_v31, %v6724_v57 }
 0x30b   :  { %v10583_v7 = vld [vmem:[%s20937_s0 + $0x266] sm:$0x8]   ;;  %v6550_v60 = vsel %vm9_vm1, %v10582_v6, %v6546_v9  ;;  %v10629_v61 = vld [vmem:[%s20937_s0 + $0x4a3] sm:$0x20]   ;;  %v6732_v23 = vsel %vm17_vm3, %v10628_v32, %v6728_v17  ;;  %v18375_v26 = vpop.permute.xlu0 %5176  }
 0x30c   :  { %v10584_v28 = vld [vmem:[%s20937_s0 + $0x285] sm:$0x10]   ;;  %v6554_v54 = vsel %vm13_vm2, %v10583_v7, %v6550_v60  ;;  %v10630_v9 = vld [vmem:[%s20937_s0 + $0x4c2] sm:$0x40]   ;;  %v6736_v53 = vsel %vm21_vm4, %v10629_v61, %v6732_v23  ;;  %10233 = vst.msk [vmem:[%s20938_s1 + $0x10] sm:$0xff] %vm5039_vm7, %v18375_v26  }
 0x30d   :  { %v10585_v15 = vld [vmem:[%s20937_s0 + $0x2a4] sm:$0x20]   ;;  %v6558_v59 = vsel %vm17_vm3, %v10584_v28, %v6554_v54  ;;  %v10631_v7 = vld [vmem:[%s20937_s0 + $0x4e1] sm:$0x80]   ;;  %v10718_v26 = vld [vmem:[%s20937_s0 + $0x5a2] sm:$0x20]  }
 0x30e   :  { %v10587_v11 = vld [vmem:[%s20937_s0 + $0x2e2] sm:$0x80]   ;;  %v6562_v13 = vsel %vm21_vm4, %v10585_v15, %v6558_v59  ;;  %v10616_v28 = vld [vmem:[%s20937_s0 + $0x8] sm:$0x1]  }
 0x30f   :  { %v10607_v42 = vld [vmem:[%s20937_s0 + $0x709] sm:$0x1]   ;;  %v6566_v46 = vsel %vm25_vm5, %v10586_v52, %v6562_v13  ;;  %v10618_v60 = vld [vmem:[%s20937_s0 + $0x46] sm:$0x4]   ;;  %v6686_v54 = vsel %vm5_vm0, %v10617_v18, %v10616_v28  ;;  %v18439_v31 = vpop.permute.xlu0 %5246  }
 0x310   :  { %v10608_v48 = vld [vmem:[%s20937_s0 + $0x728] sm:$0x2]   ;;  %v6570_v12 = vsel %vm29_vm6, %v10587_v11, %v6566_v46  ;;  %v10619_v52 = vld [vmem:[%s20937_s0 + $0x65] sm:$0x8]   ;;  %v18309_v11 = vpop.permute.xlu1 %5211   ;;  %v6690_v59 = vsel %vm9_vm1, %v10618_v60, %v6686_v54  ;;  %10251 = vst.msk [vmem:[%s20938_s1 + $0x18] sm:$0xff] %vm5039_vm7, %v18439_v31  }
 0x311   :  { %v10609_v24 = vld [vmem:[%s20937_s0 + $0x747] sm:$0x4]   ;;  %v6651_v63 = vsel %vm5_vm0, %v10608_v48, %v10607_v42  ;;  %6571 = vrot.lane.b32.xlu0 %v6570_v12, %s11237_s22  ;;  %v10620_v48 = vld [vmem:[%s20937_s0 + $0x84] sm:$0x10]   ;;  %10242 = vst.msk [vmem:[%s20938_s1 + $0x30] sm:$0xff] %vm5039_vm7, %v18309_v11  }
 0x312   :  { %v10610_v55 = vld [vmem:[%s20937_s0 + $0x766] sm:$0x8]   ;;  %v6655_v30 = vsel %vm9_vm1, %v10609_v24, %v6651_v63  ;;  %v10621_v24 = vld [vmem:[%s20937_s0 + $0xa3] sm:$0x20]   ;;  %v10720_v31 = vld [vmem:[%s20937_s0 + $0x5e0] sm:$0x80]  }
 0x313   :  { %v10611_v49 = vld [vmem:[%s20937_s0 + $0x785] sm:$0x10]   ;;  %v6659_v44 = vsel %vm13_vm2, %v10610_v55, %v6655_v30  ;;  %v10622_v55 = vld [vmem:[%s20937_s0 + $0xc2] sm:$0x40]  }
 0x314   :  { %v10612_v43 = vld [vmem:[%s20937_s0 + $0x7a4] sm:$0x20]   ;;  %v6663_v3 = vsel %vm17_vm3, %v10611_v49, %v6659_v44  ;;  %v10623_v63 = vld [vmem:[%s20937_s0 + $0xe1] sm:$0x80]  }
 0x315   :  { %v10613_v22 = vld [vmem:[%s20937_s0 + $0x7c3] sm:$0x40]   ;;  %v6667_v37 = vsel %vm21_vm4, %v10612_v43, %v6663_v3  ;;  %v10642_v49 = vld [vmem:[%s20937_s0 + $0x508] sm:$0x1]   ;;  %v6740_v43 = vsel %vm25_vm5, %v10630_v9, %v6736_v53 }
 0x316   :  { %v10614_v16 = vld [vmem:[%s20937_s0 + $0x7e2] sm:$0x80]   ;;  %v6671_v21 = vsel %vm25_vm5, %v10613_v22, %v6667_v37  ;;  %v6694_v22 = vsel %vm13_vm2, %v10619_v52, %v6690_v59  ;;  %v10645_v13 = vld [vmem:[%s20937_s0 + $0x565] sm:$0x8]   ;;  %v6744_v40 = vsel %vm29_vm6, %v10631_v7, %v6740_v43  ;;  %v6790_v51 = vsel %vm5_vm0, %v10643_v62, %v10642_v49 }
 0x317   :  { %v10598_v47 = vld [vmem:[%s20937_s0 + $0x309] sm:$0x1]   ;;  %v6675_v6 = vsel %vm29_vm6, %v10614_v16, %v6671_v21  ;;  %v6698_v29 = vsel %vm17_vm3, %v10620_v48, %v6694_v22  ;;  %v10648_v30 = vld [vmem:[%s20937_s0 + $0x5c2] sm:$0x40]  }
 0x318   :  { %v10599_v35 = vld [vmem:[%s20937_s0 + $0x328] sm:$0x2]   ;;  %6676 = vrot.lane.b32.xlu1 %v6675_v6, %s11237_s22  ;;  %v6702_v16 = vsel %vm21_vm4, %v10621_v24, %v6698_v29  ;;  %v10633_v46 = vld [vmem:[%s20937_s0 + $0x108] sm:$0x1]   ;;  %v18503_v29 = vpop.permute.xlu0 %5316  }
 0x319   :  { %v6616_v14 = vsel %vm5_vm0, %v10599_v35, %v10598_v47  ;;  %v10600_v2 = vld [vmem:[%s20937_s0 + $0x347] sm:$0x4]   ;;  %v6794_v47 = vsel %vm9_vm1, %v10644_v36, %v6790_v51  ;;  %v10649_v35 = vld [vmem:[%s20937_s0 + $0x5e1] sm:$0x80]   ;;  %5319 = vst.msk [vmem:[%s20938_s1] sm:$0xff] %vm5318_vm8, %v18503_v29  }
 0x31a   :  { %v10601_v1 = vld [vmem:[%s20937_s0 + $0x366] sm:$0x8]   ;;  %v6620_v10 = vsel %vm9_vm1, %v10600_v2, %v6616_v14  ;;  %v10634_v44 = vld [vmem:[%s20937_s0 + $0x127] sm:$0x2]   ;;  %v18401_v14 = vpop.permute.xlu1 %5281   ;;  %v6706_v2 = vsel %vm25_vm5, %v10622_v55, %v6702_v16  ;;  %v10785_v29 = vld [vmem:[%s20937_s0 + $0x525] sm:$0x2]  }
 0x31b   :  { %v10602_v45 = vld [vmem:[%s20937_s0 + $0x385] sm:$0x10]   ;;  %v6624_v27 = vsel %vm13_vm2, %v10601_v1, %v6620_v10  ;;  %v6798_v1 = vsel %vm13_vm2, %v10645_v13, %v6794_v47  ;;  %v10635_v12 = vld [vmem:[%s20937_s0 + $0x146] sm:$0x4]   ;;  %10260 = vst.msk [vmem:[%s20938_s1 + $0x38] sm:$0xff] %vm5039_vm7, %v18401_v14  }
 0x31c   :  { %v10603_v4 = vld [vmem:[%s20937_s0 + $0x3a4] sm:$0x20]   ;;  %v6628_v50 = vsel %vm17_vm3, %v10602_v45, %v6624_v27  ;;  %6745 = vrot.lane.b32.xlu1 %v6744_v40, %s11238_s29  ;;  %v6755_v45 = vsel %vm5_vm0, %v10634_v44, %v10633_v46  ;;  %v10636_v3 = vld [vmem:[%s20937_s0 + $0x165] sm:$0x8]   ;;  %v10719_v14 = vld [vmem:[%s20937_s0 + $0x5c1] sm:$0x40]  }
 0x31d   :  { %v10604_v56 = vld [vmem:[%s20937_s0 + $0x3c3] sm:$0x40]   ;;  %v6632_v38 = vsel %vm21_vm4, %v10603_v4, %v6628_v50  ;;  %v10637_v10 = vld [vmem:[%s20937_s0 + $0x184] sm:$0x10]   ;;  %v6710_v4 = vsel %vm29_vm6, %v10623_v63, %v6706_v2 }
 0x31e   :  { %v10605_v19 = vld [vmem:[%s20937_s0 + $0x3e2] sm:$0x80]   ;;  %v6636_v15 = vsel %vm25_vm5, %v10604_v56, %v6632_v38  ;;  %v6802_v56 = vsel %vm17_vm3, %v10646_v41, %v6798_v1  ;;  %v10638_v37 = vld [vmem:[%s20937_s0 + $0x1a3] sm:$0x20]   ;;  %v18477_v24 = vpop.permute.xlu1 %5350  }
 0x31f   :  { %v6640_v42 = vsel %vm29_vm6, %v10605_v19, %v6636_v15  ;;  %v6759_v19 = vsel %vm9_vm1, %v10635_v12, %v6755_v45  ;;  %v10639_v27 = vld [vmem:[%s20937_s0 + $0x1c2] sm:$0x40]   ;;  %v6806_v33 = vsel %vm21_vm4, %v10647_v5, %v6802_v56  ;;  %10277 = vst.msk [vmem:[%s20938_s1 + $0x20] sm:$0xff] %vm5318_vm8, %v18477_v24   ;;  %v10784_v24 = vld [vmem:[%s20937_s0 + $0x506] sm:$0x1]  }
 0x320   :  { %6641 = vrot.lane.b32.xlu0 %v6640_v42, %s11237_s22  ;;  %v6763_v58 = vsel %vm13_vm2, %v10636_v3, %v6759_v19  ;;  %v10660_v21 = vld [vmem:[%s20937_s0 + $0x608] sm:$0x1]   ;;  %v6810_v32 = vsel %vm25_vm5, %v10648_v30, %v6806_v33 }
 0x321   :  { %v10661_v50 = vld [vmem:[%s20937_s0 + $0x627] sm:$0x2]   ;;  %v6767_v61 = vsel %vm17_vm3, %v10637_v10, %v6763_v58  ;;  %v6814_v7 = vsel %vm29_vm6, %v10649_v35, %v6810_v32 }
 0x322   :  { %v6860_v6 = vsel %vm5_vm0, %v10661_v50, %v10660_v21  ;;  %v10663_v38 = vld [vmem:[%s20937_s0 + $0x665] sm:$0x8]   ;;  %v6771_v28 = vsel %vm21_vm4, %v10638_v37, %v6767_v61  ;;  %6815 = vrot.lane.b32.xlu1 %v6814_v7, %s11238_s29  ;;  %v18541_v19 = vpop.permute.xlu1 %5420   ;;  %v10696_v7 = vld [vmem:[%s20937_s0 + $0x426] sm:$0x2]  }
 0x323   :  { %v10664_v57 = vld [vmem:[%s20937_s0 + $0x684] sm:$0x10]   ;;  %v6864_v15 = vsel %vm9_vm1, %v10662_v34, %v6860_v6  ;;  %v6775_v52 = vsel %vm25_vm5, %v10639_v27, %v6771_v28  ;;  %v10697_v28 = vld [vmem:[%s20937_s0 + $0x445] sm:$0x4]   ;;  %10295 = vst.msk [vmem:[%s20938_s1 + $0x28] sm:$0xff] %vm5318_vm8, %v18541_v19  }
 0x324   :  { %6711 = vrot.lane.b32.xlu0 %v6710_v4, %s11238_s29  ;;  %v10665_v9 = vld [vmem:[%s20937_s0 + $0x6a3] sm:$0x20]   ;;  %v6868_v42 = vsel %vm13_vm2, %v10663_v38, %v6864_v15  ;;  %v6779_v55 = vsel %vm29_vm6, %v10640_v25, %v6775_v52  ;;  %v10695_v38 = vld [vmem:[%s20937_s0 + $0x407] sm:$0x1]  }
 0x325   :  { %v10666_v17 = vld [vmem:[%s20937_s0 + $0x6c2] sm:$0x40]   ;;  %v6872_v53 = vsel %vm17_vm3, %v10664_v57, %v6868_v42  ;;  %v10698_v15 = vld [vmem:[%s20937_s0 + $0x464] sm:$0x8]   ;;  %v6999_v52 = vsel %vm5_vm0, %v10696_v7, %v10695_v38 }
 0x326   :  { %v10667_v18 = vld [vmem:[%s20937_s0 + $0x6e1] sm:$0x80]   ;;  %v6876_v22 = vsel %vm21_vm4, %v10665_v9, %v6872_v53  ;;  %v10699_v42 = vld [vmem:[%s20937_s0 + $0x483] sm:$0x10]  }
 0x327   :  { %v10651_v60 = vld [vmem:[%s20937_s0 + $0x208] sm:$0x1]   ;;  %v6880_v51 = vsel %vm25_vm5, %v10666_v17, %v6876_v22  ;;  %v18579_v17 = vpop.permute.xlu0 %5385   ;;  %v10702_v53 = vld [vmem:[%s20937_s0 + $0x4e0] sm:$0x80]  }
 0x328   :  { %v10652_v23 = vld [vmem:[%s20937_s0 + $0x227] sm:$0x2]   ;;  %6780 = vrot.lane.b32.xlu0 %v6779_v55, %s11238_s29  ;;  %v6884_v35 = vsel %vm29_vm6, %v10667_v18, %v6880_v51  ;;  %v7003_v55 = vsel %vm9_vm1, %v10697_v28, %v6999_v52  ;;  %v10731_v7 = vld [vmem:[%s20937_s0 + $0x607] sm:$0x1]   ;;  %10286 = vst.msk [vmem:[%s20938_s1 + $0x8] sm:$0xff] %vm5318_vm8, %v18579_v17  }
 0x329   :  { %v10653_v54 = vld [vmem:[%s20937_s0 + $0x246] sm:$0x4]   ;;  %v6825_v59 = vsel %vm5_vm0, %v10652_v23, %v10651_v60  ;;  %6885 = vrot.lane.b32.xlu1 %v6884_v35, %s11238_s29  ;;  %v10700_v23 = vld [vmem:[%s20937_s0 + $0x4a2] sm:$0x20]  }
 0x32a   :  { %v10654_v48 = vld [vmem:[%s20937_s0 + $0x265] sm:$0x8]   ;;  %v6829_v62 = vsel %vm9_vm1, %v10653_v54, %v6825_v59  ;;  %v10701_v54 = vld [vmem:[%s20937_s0 + $0x4c1] sm:$0x40]  }
 0x32b   :  { %v10655_v63 = vld [vmem:[%s20937_s0 + $0x284] sm:$0x10]   ;;  %v6833_v41 = vsel %vm13_vm2, %v10654_v48, %v6829_v62  ;;  %v10687_v59 = vld [vmem:[%s20937_s0 + $0x7] sm:$0x1]  }
 0x32c   :  { %v10656_v49 = vld [vmem:[%s20937_s0 + $0x2a3] sm:$0x20]   ;;  %v6837_v46 = vsel %vm17_vm3, %v10655_v63, %v6833_v41  ;;  %v10688_v63 = vld [vmem:[%s20937_s0 + $0x26] sm:$0x2]  }
 0x32d   :  { %v10657_v43 = vld [vmem:[%s20937_s0 + $0x2c2] sm:$0x40]   ;;  %v6841_v12 = vsel %vm21_vm4, %v10656_v49, %v6837_v46  ;;  %v6965_v22 = vsel %vm5_vm0, %v10688_v63, %v10687_v59  ;;  %v10689_v62 = vld [vmem:[%s20937_s0 + $0x45] sm:$0x4]  }
 0x32e   :  { %v10658_v36 = vld [vmem:[%s20937_s0 + $0x2e1] sm:$0x80]   ;;  %v6845_v37 = vsel %vm25_vm5, %v10657_v43, %v6841_v12  ;;  %v7007_v43 = vsel %vm13_vm2, %v10698_v15, %v7003_v55  ;;  %v10734_v52 = vld [vmem:[%s20937_s0 + $0x664] sm:$0x8]  }
 0x32f   :  { %v10678_v13 = vld [vmem:[%s20937_s0 + $0x708] sm:$0x1]   ;;  %v6849_v50 = vsel %vm29_vm6, %v10658_v36, %v6845_v37  ;;  %v10690_v36 = vld [vmem:[%s20937_s0 + $0x64] sm:$0x8]   ;;  %v7011_v41 = vsel %vm17_vm3, %v10699_v42, %v7007_v43 }
 0x330   :  { %v10679_v40 = vld [vmem:[%s20937_s0 + $0x727] sm:$0x2]   ;;  %6850 = vrot.lane.b32.xlu0 %v6849_v50, %s11238_s29  ;;  %v7015_v35 = vsel %vm21_vm4, %v10700_v23, %v7011_v41  ;;  %v10704_v37 = vld [vmem:[%s20937_s0 + $0x107] sm:$0x1]  }
 0x331   :  { %v6930_v5 = vsel %vm5_vm0, %v10679_v40, %v10678_v13  ;;  %v10680_v30 = vld [vmem:[%s20937_s0 + $0x746] sm:$0x4]   ;;  %v10691_v13 = vld [vmem:[%s20937_s0 + $0x83] sm:$0x10]   ;;  %v18617_v40 = vpop.permute.xlu1 %5490  }
 0x332   :  { %v10681_v16 = vld [vmem:[%s20937_s0 + $0x765] sm:$0x8]   ;;  %v6934_v44 = vsel %vm9_vm1, %v10680_v30, %v6930_v5  ;;  %v6969_v5 = vsel %vm9_vm1, %v10689_v62, %v6965_v22  ;;  %v10692_v30 = vld [vmem:[%s20937_s0 + $0xa2] sm:$0x20]   ;;  %10313 = vst.msk [vmem:[%s20938_s1 + $0x30] sm:$0xff] %vm5318_vm8, %v18617_v40  }
 0x333   :  { %v10682_v47 = vld [vmem:[%s20937_s0 + $0x784] sm:$0x10]   ;;  %v6938_v3 = vsel %vm13_vm2, %v10681_v16, %v6934_v44  ;;  %v10693_v16 = vld [vmem:[%s20937_s0 + $0xc1] sm:$0x40]   ;;  %v6973_v46 = vsel %vm13_vm2, %v10690_v36, %v6969_v5 }
 0x334   :  { %v10683_v2 = vld [vmem:[%s20937_s0 + $0x7a3] sm:$0x20]   ;;  %v6942_v27 = vsel %vm17_vm3, %v10682_v47, %v6938_v3  ;;  %v10694_v47 = vld [vmem:[%s20937_s0 + $0xe0] sm:$0x80]   ;;  %v6977_v12 = vsel %vm17_vm3, %v10691_v13, %v6973_v46 }
 0x335   :  { %v10684_v1 = vld [vmem:[%s20937_s0 + $0x7c2] sm:$0x40]   ;;  %v6946_v34 = vsel %vm21_vm4, %v10683_v2, %v6942_v27  ;;  %v10713_v44 = vld [vmem:[%s20937_s0 + $0x507] sm:$0x1]   ;;  %v6981_v8 = vsel %vm21_vm4, %v10692_v30, %v6977_v12 }
 0x336   :  { %v10685_v45 = vld [vmem:[%s20937_s0 + $0x7e1] sm:$0x80]   ;;  %v6950_v57 = vsel %vm25_vm5, %v10684_v1, %v6946_v34  ;;  %v10714_v2 = vld [vmem:[%s20937_s0 + $0x526] sm:$0x2]   ;;  %v18640_v1 = vpop.permute.xlu0 %5455  }
 0x337   :  { %v10669_v10 = vld [vmem:[%s20937_s0 + $0x308] sm:$0x1]   ;;  %v6954_v18 = vsel %vm29_vm6, %v10685_v45, %v6950_v57  ;;  %v7019_v45 = vsel %vm25_vm5, %v10701_v54, %v7015_v35  ;;  %v7069_v0 = vsel %vm5_vm0, %v10714_v2, %v10713_v44  ;;  %v10716_v3 = vld [vmem:[%s20937_s0 + $0x564] sm:$0x8]   ;;  %10304 = vst.msk [vmem:[%s20938_s1 + $0x10] sm:$0xff] %vm5318_vm8, %v18640_v1   ;;  %v7348_v1 = vsel %vm5_vm0, %v10785_v29, %v10784_v24 }
 0x338   :  { %v10670_v4 = vld [vmem:[%s20937_s0 + $0x327] sm:$0x2]   ;;  %6955 = vrot.lane.b32.xlu1 %v6954_v18, %s11238_s29  ;;  %v7023_v39 = vsel %vm29_vm6, %v10702_v53, %v7019_v45  ;;  %v7073_v11 = vsel %vm9_vm1, %v10715_v20, %v7069_v0  ;;  %v10705_v27 = vld [vmem:[%s20937_s0 + $0x126] sm:$0x2]   ;;  %v10799_v29 = vld [vmem:[%s20937_s0 + $0x2c0] sm:$0x40]  }
 0x339   :  { %v10671_v56 = vld [vmem:[%s20937_s0 + $0x346] sm:$0x4]   ;;  %v6895_v25 = vsel %vm5_vm0, %v10670_v4, %v10669_v10  ;;  %v10717_v10 = vld [vmem:[%s20937_s0 + $0x583] sm:$0x10]   ;;  %v6985_v4 = vsel %vm25_vm5, %v10693_v16, %v6981_v8  ;;  %v7034_v50 = vsel %vm5_vm0, %v10705_v27, %v10704_v37 }
 0x33a   :  { %v10672_v33 = vld [vmem:[%s20937_s0 + $0x365] sm:$0x8]   ;;  %v6899_v32 = vsel %vm9_vm1, %v10671_v56, %v6895_v25  ;;  %v7077_v56 = vsel %vm13_vm2, %v10716_v3, %v7073_v11  ;;  %v10706_v25 = vld [vmem:[%s20937_s0 + $0x145] sm:$0x4]   ;;  %v18755_v42 = vpop.permute.xlu0 %5525  }
 0x33b   :  { %v10673_v58 = vld [vmem:[%s20937_s0 + $0x384] sm:$0x10]   ;;  %v6903_v9 = vsel %vm13_vm2, %v10672_v33, %v6899_v32  ;;  %v18718_v33 = vpop.permute.xlu1 %5560   ;;  %v10707_v34 = vld [vmem:[%s20937_s0 + $0x164] sm:$0x8]   ;;  %v7038_v38 = vsel %vm9_vm1, %v10706_v25, %v7034_v50  ;;  %10322 = vst.msk [vmem:[%s20938_s1 + $0x18] sm:$0xff] %vm5318_vm8, %v18755_v42  }
 0x33c   :  { %v10674_v21 = vld [vmem:[%s20937_s0 + $0x3a3] sm:$0x20]   ;;  %v6907_v60 = vsel %vm17_vm3, %v10673_v58, %v6903_v9  ;;  %7024 = vrot.lane.b32.xlu1 %v7023_v39, %s11239_s4  ;;  %v6989_v58 = vsel %vm29_vm6, %v10694_v47, %v6985_v4  ;;  %v10708_v32 = vld [vmem:[%s20937_s0 + $0x183] sm:$0x10]   ;;  %v7042_v15 = vsel %vm13_vm2, %v10707_v34, %v7038_v38  ;;  %10331 = vst.msk [vmem:[%s20938_s1 + $0x38] sm:$0xff] %vm5318_vm8, %v18718_v33  }
 0x33d   :  { %v10675_v61 = vld [vmem:[%s20937_s0 + $0x3c2] sm:$0x40]   ;;  %v6911_v48 = vsel %vm21_vm4, %v10674_v21, %v6907_v60  ;;  %v7081_v21 = vsel %vm17_vm3, %v10717_v10, %v7077_v56  ;;  %v10710_v57 = vld [vmem:[%s20937_s0 + $0x1c1] sm:$0x40]   ;;  %v7046_v54 = vsel %vm17_vm3, %v10708_v32, %v7042_v15  ;;  %v10787_v33 = vld [vmem:[%s20937_s0 + $0x563] sm:$0x8]  }
 0x33e   :  { %v10676_v6 = vld [vmem:[%s20937_s0 + $0x3e1] sm:$0x80]   ;;  %v6915_v49 = vsel %vm25_vm5, %v10675_v61, %v6911_v48  ;;  %v10709_v61 = vld [vmem:[%s20937_s0 + $0x1a2] sm:$0x20]   ;;  %v18819_v39 = vpop.permute.xlu0 %5595   ;;  %v10788_v42 = vld [vmem:[%s20937_s0 + $0x582] sm:$0x10]  }
 0x33f   :  { %v6919_v51 = vsel %vm29_vm6, %v10676_v6, %v6915_v49  ;;  %v7085_v6 = vsel %vm21_vm4, %v10718_v26, %v7081_v21  ;;  %v10711_v9 = vld [vmem:[%s20937_s0 + $0x1e0] sm:$0x80]   ;;  %v7050_v63 = vsel %vm21_vm4, %v10709_v61, %v7046_v54  ;;  %v18781_v36 = vpop.permute.xlu1 %5629   ;;  %v10766_v54 = vld [vmem:[%s20937_s0 + $0x406] sm:$0x1]   ;;  %5598 = vst.msk [vmem:[%s20938_s1] sm:$0xff] %vm5597_vm9, %v18819_v39  }
 0x340   :  { %6920 = vrot.lane.b32.xlu0 %v6919_v51, %s11238_s29  ;;  %v7089_v28 = vsel %vm25_vm5, %v10719_v14, %v7085_v6  ;;  %v10732_v18 = vld [vmem:[%s20937_s0 + $0x626] sm:$0x2]   ;;  %v7054_v13 = vsel %vm25_vm5, %v10710_v57, %v7050_v63  ;;  %v10768_v63 = vld [vmem:[%s20937_s0 + $0x444] sm:$0x4]   ;;  %10348 = vst.msk [vmem:[%s20938_s1 + $0x20] sm:$0xff] %vm5597_vm9, %v18781_v36  }
 0x341   :  { %v10733_v60 = vld [vmem:[%s20937_s0 + $0x645] sm:$0x4]   ;;  %v7093_v23 = vsel %vm29_vm6, %v10720_v31, %v7089_v28  ;;  %v7139_v48 = vsel %vm5_vm0, %v10732_v18, %v10731_v7  ;;  %v7058_v47 = vsel %vm29_vm6, %v10711_v9, %v7054_v13  ;;  %v10856_v36 = vld [vmem:[%s20937_s0 + $0x524] sm:$0x2]  }
 0x342   :  { %v10735_v55 = vld [vmem:[%s20937_s0 + $0x683] sm:$0x10]   ;;  %7094 = vrot.lane.b32.xlu1 %v7093_v23, %s11239_s4  ;;  %v7143_v49 = vsel %vm9_vm1, %v10733_v60, %v7139_v48  ;;  %v10767_v48 = vld [vmem:[%s20937_s0 + $0x425] sm:$0x2]   ;;  %v10857_v39 = vld [vmem:[%s20937_s0 + $0x543] sm:$0x4]  }
 0x343   :  { %v10736_v53 = vld [vmem:[%s20937_s0 + $0x6a2] sm:$0x20]   ;;  %v7147_v51 = vsel %vm13_vm2, %v10734_v52, %v7143_v49  ;;  %v18857_v38 = vpop.permute.xlu1 %5699   ;;  %v10769_v49 = vld [vmem:[%s20937_s0 + $0x463] sm:$0x8]  }
 0x344   :  { %6990 = vrot.lane.b32.xlu0 %v6989_v58, %s11239_s4  ;;  %v10737_v59 = vld [vmem:[%s20937_s0 + $0x6c1] sm:$0x40]   ;;  %v7151_v35 = vsel %vm17_vm3, %v10735_v55, %v7147_v51  ;;  %10366 = vst.msk [vmem:[%s20938_s1 + $0x28] sm:$0xff] %vm5597_vm9, %v18857_v38  }
 0x345   :  { %v10738_v43 = vld [vmem:[%s20937_s0 + $0x6e0] sm:$0x80]   ;;  %v7155_v12 = vsel %vm21_vm4, %v10736_v53, %v7151_v35  ;;  %v10758_v35 = vld [vmem:[%s20937_s0 + $0x6] sm:$0x1]  }
 0x346   :  { %v10722_v22 = vld [vmem:[%s20937_s0 + $0x207] sm:$0x1]   ;;  %v7159_v8 = vsel %vm25_vm5, %v10737_v59, %v7155_v12  ;;  %v7278_v59 = vsel %vm5_vm0, %v10767_v48, %v10766_v54 }
 0x347   :  { %v10723_v62 = vld [vmem:[%s20937_s0 + $0x226] sm:$0x2]   ;;  %v7163_v56 = vsel %vm29_vm6, %v10738_v43, %v7159_v8  ;;  %v10770_v43 = vld [vmem:[%s20937_s0 + $0x482] sm:$0x10]   ;;  %v7282_v51 = vsel %vm9_vm1, %v10768_v63, %v7278_v59 }
 0x348   :  { %v7104_v41 = vsel %vm5_vm0, %v10723_v62, %v10722_v22  ;;  %v10724_v5 = vld [vmem:[%s20937_s0 + $0x245] sm:$0x4]   ;;  %7059 = vrot.lane.b32.xlu0 %v7058_v47, %s11239_s4  ;;  %7164 = vrot.lane.b32.xlu1 %v7163_v56, %s11239_s4  ;;  %v18895_v22 = vpop.permute.xlu0 %5664   ;;  %v7286_v47 = vsel %vm13_vm2, %v10769_v49, %v7282_v51  ;;  %v10803_v59 = vld [vmem:[%s20937_s0 + $0x625] sm:$0x2]  }
 0x349   :  { %v10725_v30 = vld [vmem:[%s20937_s0 + $0x264] sm:$0x8]   ;;  %v7108_v46 = vsel %vm9_vm1, %v10724_v5, %v7104_v41  ;;  %v10771_v41 = vld [vmem:[%s20937_s0 + $0x4a1] sm:$0x20]   ;;  %v7290_v12 = vsel %vm17_vm3, %v10770_v43, %v7286_v47  ;;  %10357 = vst.msk [vmem:[%s20938_s1 + $0x8] sm:$0xff] %vm5597_vm9, %v18895_v22  }
 0x34a   :  { %v10726_v16 = vld [vmem:[%s20937_s0 + $0x283] sm:$0x10]   ;;  %v7112_v0 = vsel %vm13_vm2, %v10725_v30, %v7108_v46  ;;  %v10772_v5 = vld [vmem:[%s20937_s0 + $0x4c0] sm:$0x40]  }
 0x34b   :  { %v10727_v44 = vld [vmem:[%s20937_s0 + $0x2a2] sm:$0x20]   ;;  %v7116_v11 = vsel %vm17_vm3, %v10726_v16, %v7112_v0  ;;  %v10773_v30 = vld [vmem:[%s20937_s0 + $0x4df] sm:$0x80]  }
 0x34c   :  { %v10728_v2 = vld [vmem:[%s20937_s0 + $0x2c1] sm:$0x40]   ;;  %v7120_v37 = vsel %vm21_vm4, %v10727_v44, %v7116_v11  ;;  %v10759_v46 = vld [vmem:[%s20937_s0 + $0x25] sm:$0x2]   ;;  %v7294_v11 = vsel %vm21_vm4, %v10771_v41, %v7290_v12  ;;  %v18988_v19 = vpop.permute.xlu0 %5734  }
 0x34d   :  { %v10729_v45 = vld [vmem:[%s20937_s0 + $0x2e0] sm:$0x80]   ;;  %v7124_v50 = vsel %vm25_vm5, %v10728_v2, %v7120_v37  ;;  %v10760_v44 = vld [vmem:[%s20937_s0 + $0x44] sm:$0x4]   ;;  %v18921_v2 = vpop.permute.xlu1 %5769   ;;  %v7244_v0 = vsel %vm5_vm0, %v10759_v46, %v10758_v35  ;;  %10375 = vst.msk [vmem:[%s20938_s1 + $0x10] sm:$0xff] %vm5597_vm9, %v18988_v19  }
 0x34e   :  { %v10749_v20 = vld [vmem:[%s20937_s0 + $0x707] sm:$0x1]   ;;  %v7128_v57 = vsel %vm29_vm6, %v10729_v45, %v7124_v50  ;;  %v10786_v37 = vld [vmem:[%s20937_s0 + $0x544] sm:$0x4]   ;;  %10384 = vst.msk [vmem:[%s20938_s1 + $0x30] sm:$0xff] %vm5597_vm9, %v18921_v2  }
 0x34f   :  { %v10750_v3 = vld [vmem:[%s20937_s0 + $0x726] sm:$0x2]   ;;  %7129 = vrot.lane.b32.xlu0 %v7128_v57, %s11239_s4  ;;  %v10791_v50 = vld [vmem:[%s20937_s0 + $0x5df] sm:$0x80]  }
 0x350   :  { %v10751_v10 = vld [vmem:[%s20937_s0 + $0x745] sm:$0x4]   ;;  %v7209_v26 = vsel %vm5_vm0, %v10750_v3, %v10749_v20  ;;  %v10761_v20 = vld [vmem:[%s20937_s0 + $0x63] sm:$0x8]   ;;  %v19051_v63 = vpop.permute.xlu0 %5804  }
 0x351   :  { %v10752_v14 = vld [vmem:[%s20937_s0 + $0x764] sm:$0x8]   ;;  %v7213_v27 = vsel %vm9_vm1, %v10751_v10, %v7209_v26  ;;  %v10762_v3 = vld [vmem:[%s20937_s0 + $0x82] sm:$0x10]   ;;  %v7248_v26 = vsel %vm9_vm1, %v10760_v44, %v7244_v0  ;;  %10393 = vst.msk [vmem:[%s20938_s1 + $0x18] sm:$0xff] %vm5597_vm9, %v19051_v63  }
 0x352   :  { %v10753_v31 = vld [vmem:[%s20937_s0 + $0x783] sm:$0x10]   ;;  %v7217_v34 = vsel %vm13_vm2, %v10752_v14, %v7213_v27  ;;  %v10763_v10 = vld [vmem:[%s20937_s0 + $0xa1] sm:$0x20]   ;;  %v7252_v56 = vsel %vm13_vm2, %v10761_v20, %v7248_v26  ;;  %v10860_v63 = vld [vmem:[%s20937_s0 + $0x5a0] sm:$0x20]  }
 0x353   :  { %v10754_v4 = vld [vmem:[%s20937_s0 + $0x7a2] sm:$0x20]   ;;  %v7221_v9 = vsel %vm17_vm3, %v10753_v31, %v7217_v34  ;;  %v10764_v14 = vld [vmem:[%s20937_s0 + $0xc0] sm:$0x40]   ;;  %v7256_v40 = vsel %vm17_vm3, %v10762_v3, %v7252_v56 }
 0x354   :  { %v10755_v25 = vld [vmem:[%s20937_s0 + $0x7c1] sm:$0x40]   ;;  %v7225_v60 = vsel %vm21_vm4, %v10754_v4, %v7221_v9  ;;  %v10765_v31 = vld [vmem:[%s20937_s0 + $0xdf] sm:$0x80]   ;;  %v7298_v4 = vsel %vm25_vm5, %v10772_v5, %v7294_v11 }
 0x355   :  { %v10756_v58 = vld [vmem:[%s20937_s0 + $0x7e0] sm:$0x80]   ;;  %v7229_v55 = vsel %vm25_vm5, %v10755_v25, %v7225_v60  ;;  %v7302_v17 = vsel %vm29_vm6, %v10773_v30, %v7298_v4  ;;  %v10789_v27 = vld [vmem:[%s20937_s0 + $0x5a1] sm:$0x20]   ;;  %v7260_v25 = vsel %vm21_vm4, %v10763_v10, %v7256_v40 }
 0x356   :  { %v10740_v21 = vld [vmem:[%s20937_s0 + $0x307] sm:$0x1]   ;;  %v7233_v62 = vsel %vm29_vm6, %v10756_v58, %v7229_v55  ;;  %v7352_v58 = vsel %vm9_vm1, %v10786_v37, %v7348_v1  ;;  %v10775_v34 = vld [vmem:[%s20937_s0 + $0x106] sm:$0x1]  }
 0x357   :  { %v10741_v32 = vld [vmem:[%s20937_s0 + $0x326] sm:$0x2]   ;;  %7234 = vrot.lane.b32.xlu1 %v7233_v62, %s11239_s4  ;;  %v10777_v57 = vld [vmem:[%s20937_s0 + $0x144] sm:$0x4]  }
 0x358   :  { %v10742_v61 = vld [vmem:[%s20937_s0 + $0x345] sm:$0x4]   ;;  %v7174_v7 = vsel %vm5_vm0, %v10741_v32, %v10740_v21  ;;  %v10790_v21 = vld [vmem:[%s20937_s0 + $0x5c0] sm:$0x40]   ;;  %v7264_v32 = vsel %vm25_vm5, %v10764_v14, %v7260_v25  ;;  %v19127_v25 = vpop.permute.xlu0 %5874  }
 0x359   :  { %v10743_v6 = vld [vmem:[%s20937_s0 + $0x364] sm:$0x8]   ;;  %v7178_v52 = vsel %vm9_vm1, %v10742_v61, %v7174_v7  ;;  %v7356_v61 = vsel %vm13_vm2, %v10787_v33, %v7352_v58  ;;  %v10778_v9 = vld [vmem:[%s20937_s0 + $0x163] sm:$0x8]   ;;  %v19025_v7 = vpop.permute.xlu1 %5839   ;;  %5877 = vst.msk [vmem:[%s20938_s1] sm:$0xff] %vm5876_vm10, %v19127_v25  }
 0x35a   :  { %v10744_v28 = vld [vmem:[%s20937_s0 + $0x383] sm:$0x10]   ;;  %v7182_v53 = vsel %vm13_vm2, %v10743_v6, %v7178_v52  ;;  %v10776_v6 = vld [vmem:[%s20937_s0 + $0x125] sm:$0x2]   ;;  %10402 = vst.msk [vmem:[%s20938_s1 + $0x38] sm:$0xff] %vm5597_vm9, %v19025_v7  }
 0x35b   :  { %v10745_v15 = vld [vmem:[%s20937_s0 + $0x3a2] sm:$0x20]   ;;  %v7186_v13 = vsel %vm17_vm3, %v10744_v28, %v7182_v53  ;;  %7303 = vrot.lane.b32.xlu1 %v7302_v17, %s11240_s30  ;;  %v7268_v28 = vsel %vm29_vm6, %v10765_v31, %v7264_v32  ;;  %v10779_v60 = vld [vmem:[%s20937_s0 + $0x182] sm:$0x10]   ;;  %v10859_v7 = vld [vmem:[%s20937_s0 + $0x581] sm:$0x10]  }
 0x35c   :  { %v10746_v18 = vld [vmem:[%s20937_s0 + $0x3c1] sm:$0x40]   ;;  %v7190_v16 = vsel %vm21_vm4, %v10745_v15, %v7186_v13  ;;  %v7360_v15 = vsel %vm17_vm3, %v10788_v42, %v7356_v61  ;;  %v10780_v52 = vld [vmem:[%s20937_s0 + $0x1a1] sm:$0x20]   ;;  %v10928_v25 = vld [vmem:[%s20937_s0 + $0x542] sm:$0x4]  }
 0x35d   :  { %v10747_v23 = vld [vmem:[%s20937_s0 + $0x3e0] sm:$0x80]   ;;  %v7194_v45 = vsel %vm25_vm5, %v10746_v18, %v7190_v16  ;;  %v7313_v18 = vsel %vm5_vm0, %v10776_v6, %v10775_v34  ;;  %v7364_v54 = vsel %vm21_vm4, %v10789_v27, %v7360_v15  ;;  %v10782_v55 = vld [vmem:[%s20937_s0 + $0x1df] sm:$0x80]   ;;  %v19089_v3 = vpop.permute.xlu1 %5908  }
 0x35e   :  { %v7198_v8 = vsel %vm29_vm6, %v10747_v23, %v7194_v45  ;;  %v10781_v23 = vld [vmem:[%s20937_s0 + $0x1c0] sm:$0x40]   ;;  %v7317_v48 = vsel %vm9_vm1, %v10777_v57, %v7313_v18  ;;  %v7368_v49 = vsel %vm25_vm5, %v10790_v21, %v7364_v54  ;;  %10419 = vst.msk [vmem:[%s20938_s1 + $0x20] sm:$0xff] %vm5876_vm10, %v19089_v3  }
 0x35f   :  { %7199 = vrot.lane.b32.xlu0 %v7198_v8, %s11239_s4  ;;  %v10802_v53 = vld [vmem:[%s20937_s0 + $0x606] sm:$0x1]   ;;  %v7321_v43 = vsel %vm13_vm2, %v10778_v9, %v7317_v48  ;;  %v7372_v5 = vsel %vm29_vm6, %v10791_v50, %v7368_v49  ;;  %s11245_s4 = smov 4  }
 0x360   :  { %v7418_v62 = vsel %vm5_vm0, %v10803_v59, %v10802_v53  ;;  %v10804_v13 = vld [vmem:[%s20937_s0 + $0x644] sm:$0x4]   ;;  %v7325_v30 = vsel %vm17_vm3, %v10779_v60, %v7321_v43  ;;  %7373 = vrot.lane.b32.xlu1 %v7372_v5, %s11240_s30  ;;  %v10837_v5 = vld [vmem:[%s20937_s0 + $0x405] sm:$0x1]  }
 0x361   :  { %v10805_v51 = vld [vmem:[%s20937_s0 + $0x663] sm:$0x8]   ;;  %v7422_v16 = vsel %vm9_vm1, %v10804_v13, %v7418_v62  ;;  %v7329_v44 = vsel %vm21_vm4, %v10780_v52, %v7325_v30  ;;  %v10838_v30 = vld [vmem:[%s20937_s0 + $0x424] sm:$0x2]  }
 0x362   :  { %v10806_v41 = vld [vmem:[%s20937_s0 + $0x682] sm:$0x10]   ;;  %v7426_v45 = vsel %vm13_vm2, %v10805_v51, %v7422_v16  ;;  %v7333_v10 = vsel %vm25_vm5, %v10781_v23, %v7329_v44  ;;  %v10839_v16 = vld [vmem:[%s20937_s0 + $0x443] sm:$0x4]   ;;  %v7557_v44 = vsel %vm5_vm0, %v10838_v30, %v10837_v5 }
 0x363   :  { %7269 = vrot.lane.b32.xlu0 %v7268_v28, %s11240_s30  ;;  %v10807_v47 = vld [vmem:[%s20937_s0 + $0x6a1] sm:$0x20]   ;;  %v7430_v8 = vsel %vm17_vm3, %v10806_v41, %v7426_v45  ;;  %v7337_v4 = vsel %vm29_vm6, %v10782_v55, %v7333_v10  ;;  %v19165_v55 = vpop.permute.xlu1 %5978   ;;  %v10840_v45 = vld [vmem:[%s20937_s0 + $0x462] sm:$0x8]  }
 0x364   :  { %v10808_v35 = vld [vmem:[%s20937_s0 + $0x6c0] sm:$0x40]   ;;  %v7434_v56 = vsel %vm21_vm4, %v10807_v47, %v7430_v8  ;;  %v19191_v47 = vpop.permute.xlu0 %5943   ;;  %v7561_v8 = vsel %vm9_vm1, %v10839_v16, %v7557_v44  ;;  %v10853_v5 = vld [vmem:[%s20937_s0 + $0x1de] sm:$0x80]   ;;  %10437 = vst.msk [vmem:[%s20938_s1 + $0x28] sm:$0xff] %vm5876_vm10, %v19165_v55  }
 0x365   :  { %v10809_v46 = vld [vmem:[%s20937_s0 + $0x6df] sm:$0x80]   ;;  %v7438_v40 = vsel %vm25_vm5, %v10808_v35, %v7434_v56  ;;  %v10830_v56 = vld [vmem:[%s20937_s0 + $0x24] sm:$0x2]   ;;  %10428 = vst.msk [vmem:[%s20938_s1 + $0x8] sm:$0xff] %vm5876_vm10, %v19191_v47  }
 0x366   :  { %v10793_v12 = vld [vmem:[%s20937_s0 + $0x206] sm:$0x1]   ;;  %v7442_v58 = vsel %vm29_vm6, %v10809_v46, %v7438_v40  ;;  %v10875_v44 = vld [vmem:[%s20937_s0 + $0x643] sm:$0x4]  }
 0x367   :  { %v10794_v0 = vld [vmem:[%s20937_s0 + $0x225] sm:$0x2]   ;;  %7338 = vrot.lane.b32.xlu0 %v7337_v4, %s11240_s30  ;;  %7443 = vrot.lane.b32.xlu1 %v7442_v58, %s11240_s30  ;;  %v7565_v4 = vsel %vm13_vm2, %v10840_v45, %v7561_v8  ;;  %v10877_v8 = vld [vmem:[%s20937_s0 + $0x681] sm:$0x10]  }
 0x368   :  { %v10795_v20 = vld [vmem:[%s20937_s0 + $0x244] sm:$0x4]   ;;  %v7383_v11 = vsel %vm5_vm0, %v10794_v0, %v10793_v12  ;;  %v10841_v12 = vld [vmem:[%s20937_s0 + $0x481] sm:$0x10]   ;;  %v19295_v38 = vpop.permute.xlu0 %6013  }
 0x369   :  { %v10796_v26 = vld [vmem:[%s20937_s0 + $0x263] sm:$0x8]   ;;  %v7387_v24 = vsel %vm9_vm1, %v10795_v20, %v7383_v11  ;;  %v10842_v0 = vld [vmem:[%s20937_s0 + $0x4a0] sm:$0x20]   ;;  %v7569_v40 = vsel %vm17_vm3, %v10841_v12, %v7565_v4  ;;  %10446 = vst.msk [vmem:[%s20938_s1 + $0x10] sm:$0xff] %vm5876_vm10, %v19295_v38  }
 0x36a   :  { %v10797_v14 = vld [vmem:[%s20937_s0 + $0x282] sm:$0x10]   ;;  %v7391_v1 = vsel %vm13_vm2, %v10796_v26, %v7387_v24  ;;  %v10843_v11 = vld [vmem:[%s20937_s0 + $0x4bf] sm:$0x40]   ;;  %v7573_v58 = vsel %vm21_vm4, %v10842_v0, %v7569_v40  ;;  %v10931_v38 = vld [vmem:[%s20937_s0 + $0x59f] sm:$0x20]  }
 0x36b   :  { %v10798_v31 = vld [vmem:[%s20937_s0 + $0x2a1] sm:$0x20]   ;;  %v7395_v21 = vsel %vm17_vm3, %v10797_v14, %v7391_v1  ;;  %v10844_v26 = vld [vmem:[%s20937_s0 + $0x4de] sm:$0x80]  }
 0x36c   :  { %v10800_v37 = vld [vmem:[%s20937_s0 + $0x2df] sm:$0x80]   ;;  %v7399_v6 = vsel %vm21_vm4, %v10798_v31, %v7395_v21  ;;  %v10829_v14 = vld [vmem:[%s20937_s0 + $0x5] sm:$0x1]   ;;  %v19359_v45 = vpop.permute.xlu0 %6083  }
 0x36d   :  { %v10820_v17 = vld [vmem:[%s20937_s0 + $0x706] sm:$0x1]   ;;  %v7403_v18 = vsel %vm25_vm5, %v10799_v29, %v7399_v6  ;;  %v10831_v24 = vld [vmem:[%s20937_s0 + $0x43] sm:$0x4]   ;;  %v7523_v1 = vsel %vm5_vm0, %v10830_v56, %v10829_v14  ;;  %10464 = vst.msk [vmem:[%s20938_s1 + $0x18] sm:$0xff] %vm5876_vm10, %v19359_v45  }
 0x36e   :  { %v10821_v33 = vld [vmem:[%s20937_s0 + $0x725] sm:$0x2]   ;;  %v7407_v53 = vsel %vm29_vm6, %v10800_v37, %v7403_v18  ;;  %v10832_v29 = vld [vmem:[%s20937_s0 + $0x62] sm:$0x8]   ;;  %v19229_v37 = vpop.permute.xlu1 %6048   ;;  %v7527_v21 = vsel %vm9_vm1, %v10831_v24, %v7523_v1  ;;  %v10933_v45 = vld [vmem:[%s20937_s0 + $0x5dd] sm:$0x80]  }
 0x36f   :  { %v10822_v42 = vld [vmem:[%s20937_s0 + $0x744] sm:$0x4]   ;;  %v7488_v50 = vsel %vm5_vm0, %v10821_v33, %v10820_v17  ;;  %7408 = vrot.lane.b32.xlu0 %v7407_v53, %s11240_s30  ;;  %v10833_v33 = vld [vmem:[%s20937_s0 + $0x81] sm:$0x10]   ;;  %10455 = vst.msk [vmem:[%s20938_s1 + $0x30] sm:$0xff] %vm5876_vm10, %v19229_v37  }
 0x370   :  { %v10823_v27 = vld [vmem:[%s20937_s0 + $0x763] sm:$0x8]   ;;  %v7492_v57 = vsel %vm9_vm1, %v10822_v42, %v7488_v50  ;;  %v10834_v42 = vld [vmem:[%s20937_s0 + $0xa0] sm:$0x20]  }
 0x371   :  { %v10824_v34 = vld [vmem:[%s20937_s0 + $0x782] sm:$0x10]   ;;  %v7496_v60 = vsel %vm13_vm2, %v10823_v27, %v7492_v57  ;;  %v10835_v27 = vld [vmem:[%s20937_s0 + $0xbf] sm:$0x40]  }
 0x372   :  { %v10825_v32 = vld [vmem:[%s20937_s0 + $0x7a1] sm:$0x20]   ;;  %v7500_v59 = vsel %vm17_vm3, %v10824_v34, %v7496_v60  ;;  %v10836_v50 = vld [vmem:[%s20937_s0 + $0xde] sm:$0x80]  }
 0x373   :  { %v10826_v61 = vld [vmem:[%s20937_s0 + $0x7c0] sm:$0x40]   ;;  %v7504_v51 = vsel %vm21_vm4, %v10825_v32, %v7500_v59  ;;  %v10855_v34 = vld [vmem:[%s20937_s0 + $0x505] sm:$0x1]   ;;  %v7577_v32 = vsel %vm25_vm5, %v10843_v11, %v7573_v58 }
 0x374   :  { %v10827_v9 = vld [vmem:[%s20937_s0 + $0x7df] sm:$0x80]   ;;  %v7508_v35 = vsel %vm25_vm5, %v10826_v61, %v7504_v51  ;;  %v7531_v61 = vsel %vm13_vm2, %v10832_v29, %v7527_v21  ;;  %v10858_v6 = vld [vmem:[%s20937_s0 + $0x562] sm:$0x8]   ;;  %v7581_v22 = vsel %vm29_vm6, %v10844_v26, %v7577_v32  ;;  %v7627_v19 = vsel %vm5_vm0, %v10856_v36, %v10855_v34 }
 0x375   :  { %v10811_v28 = vld [vmem:[%s20937_s0 + $0x306] sm:$0x1]   ;;  %v7512_v20 = vsel %vm29_vm6, %v10827_v9, %v7508_v35  ;;  %v7535_v2 = vsel %vm17_vm3, %v10833_v33, %v7531_v61  ;;  %v10861_v57 = vld [vmem:[%s20937_s0 + $0x5bf] sm:$0x40]  }
 0x376   :  { %v10812_v15 = vld [vmem:[%s20937_s0 + $0x325] sm:$0x2]   ;;  %7513 = vrot.lane.b32.xlu1 %v7512_v20, %s11240_s30  ;;  %v7539_v9 = vsel %vm21_vm4, %v10834_v42, %v7535_v2  ;;  %v10846_v18 = vld [vmem:[%s20937_s0 + $0x105] sm:$0x1]   ;;  %v19423_v2 = vpop.permute.xlu0 %6153  }
 0x377   :  { %v7453_v52 = vsel %vm5_vm0, %v10812_v15, %v10811_v28  ;;  %v10813_v23 = vld [vmem:[%s20937_s0 + $0x344] sm:$0x4]   ;;  %v7631_v28 = vsel %vm9_vm1, %v10857_v39, %v7627_v19  ;;  %v10862_v15 = vld [vmem:[%s20937_s0 + $0x5de] sm:$0x80]   ;;  %6156 = vst.msk [vmem:[%s20938_s1] sm:$0xff] %vm6155_vm11, %v19423_v2  }
 0x378   :  { %v10814_v54 = vld [vmem:[%s20937_s0 + $0x363] sm:$0x8]   ;;  %v7457_v49 = vsel %vm9_vm1, %v10813_v23, %v7453_v52  ;;  %v10847_v60 = vld [vmem:[%s20937_s0 + $0x124] sm:$0x2]   ;;  %v19321_v52 = vpop.permute.xlu1 %6118   ;;  %v7543_v23 = vsel %vm25_vm5, %v10835_v27, %v7539_v9  ;;  %v10998_v2 = vld [vmem:[%s20937_s0 + $0x522] sm:$0x2]  }
 0x379   :  { %v10815_v48 = vld [vmem:[%s20937_s0 + $0x382] sm:$0x10]   ;;  %v7461_v41 = vsel %vm13_vm2, %v10814_v54, %v7457_v49  ;;  %v7635_v54 = vsel %vm13_vm2, %v10858_v6, %v7631_v28  ;;  %v10848_v53 = vld [vmem:[%s20937_s0 + $0x143] sm:$0x4]   ;;  %10473 = vst.msk [vmem:[%s20938_s1 + $0x38] sm:$0xff] %vm5876_vm10, %v19321_v52  }
 0x37a   :  { %v10816_v43 = vld [vmem:[%s20937_s0 + $0x3a1] sm:$0x20]   ;;  %v7465_v46 = vsel %vm17_vm3, %v10815_v48, %v7461_v41  ;;  %7582 = vrot.lane.b32.xlu1 %v7581_v22, %s11241_s8  ;;  %v7592_v48 = vsel %vm5_vm0, %v10847_v60, %v10846_v18  ;;  %v10849_v59 = vld [vmem:[%s20937_s0 + $0x162] sm:$0x8]   ;;  %v10932_v52 = vld [vmem:[%s20937_s0 + $0x5be] sm:$0x40]  }
 0x37b   :  { %v10817_v62 = vld [vmem:[%s20937_s0 + $0x3c0] sm:$0x40]   ;;  %v7469_v10 = vsel %vm21_vm4, %v10816_v43, %v7465_v46  ;;  %v10850_v49 = vld [vmem:[%s20937_s0 + $0x181] sm:$0x10]   ;;  %v7547_v43 = vsel %vm29_vm6, %v10836_v50, %v7543_v23 }
 0x37c   :  { %v10818_v13 = vld [vmem:[%s20937_s0 + $0x3df] sm:$0x80]   ;;  %v7473_v31 = vsel %vm25_vm5, %v10817_v62, %v7469_v10  ;;  %v7639_v62 = vsel %vm17_vm3, %v10859_v7, %v7635_v54  ;;  %v10851_v51 = vld [vmem:[%s20937_s0 + $0x1a0] sm:$0x20]   ;;  %v19397_v42 = vpop.permute.xlu1 %6187  }
 0x37d   :  { %v7477_v17 = vsel %vm29_vm6, %v10818_v13, %v7473_v31  ;;  %v7596_v13 = vsel %vm9_vm1, %v10848_v53, %v7592_v48  ;;  %v10852_v41 = vld [vmem:[%s20937_s0 + $0x1bf] sm:$0x40]   ;;  %v7643_v30 = vsel %vm21_vm4, %v10860_v63, %v7639_v62  ;;  %10490 = vst.msk [vmem:[%s20938_s1 + $0x20] sm:$0xff] %vm6155_vm11, %v19397_v42   ;;  %v10997_v42 = vld [vmem:[%s20937_s0 + $0x503] sm:$0x1]  }
 0x37e   :  { %7478 = vrot.lane.b32.xlu0 %v7477_v17, %s11240_s30  ;;  %v7600_v16 = vsel %vm13_vm2, %v10849_v59, %v7596_v13  ;;  %v10873_v35 = vld [vmem:[%s20937_s0 + $0x605] sm:$0x1]   ;;  %v7647_v12 = vsel %vm25_vm5, %v10861_v57, %v7643_v30 }
 0x37f   :  { %v10874_v46 = vld [vmem:[%s20937_s0 + $0x624] sm:$0x2]   ;;  %v7604_v0 = vsel %vm17_vm3, %v10850_v49, %v7600_v16  ;;  %v7651_v26 = vsel %vm29_vm6, %v10862_v15, %v7647_v12 }
 0x380   :  { %v7697_v20 = vsel %vm5_vm0, %v10874_v46, %v10873_v35  ;;  %v10876_v10 = vld [vmem:[%s20937_s0 + $0x662] sm:$0x8]   ;;  %v7608_v14 = vsel %vm21_vm4, %v10851_v51, %v7604_v0  ;;  %7652 = vrot.lane.b32.xlu1 %v7651_v26, %s11241_s8  ;;  %v19461_v13 = vpop.permute.xlu1 %6257   ;;  %v10909_v26 = vld [vmem:[%s20937_s0 + $0x423] sm:$0x2]  }
 0x381   :  { %v10878_v11 = vld [vmem:[%s20937_s0 + $0x6a0] sm:$0x20]   ;;  %v7701_v31 = vsel %vm9_vm1, %v10875_v44, %v7697_v20  ;;  %v7612_v29 = vsel %vm25_vm5, %v10852_v41, %v7608_v14  ;;  %v10910_v14 = vld [vmem:[%s20937_s0 + $0x442] sm:$0x4]   ;;  %10508 = vst.msk [vmem:[%s20938_s1 + $0x28] sm:$0xff] %vm6155_vm11, %v19461_v13  }
 0x382   :  { %7548 = vrot.lane.b32.xlu0 %v7547_v43, %s11241_s8  ;;  %v10879_v4 = vld [vmem:[%s20937_s0 + $0x6bf] sm:$0x40]   ;;  %v7705_v17 = vsel %vm13_vm2, %v10876_v10, %v7701_v31  ;;  %v7616_v27 = vsel %vm29_vm6, %v10853_v5, %v7612_v29  ;;  %v10908_v10 = vld [vmem:[%s20937_s0 + $0x404] sm:$0x1]  }
 0x383   :  { %v10880_v56 = vld [vmem:[%s20937_s0 + $0x6de] sm:$0x80]   ;;  %v7709_v58 = vsel %vm17_vm3, %v10877_v8, %v7705_v17  ;;  %v10911_v31 = vld [vmem:[%s20937_s0 + $0x461] sm:$0x8]   ;;  %v7836_v29 = vsel %vm5_vm0, %v10909_v26, %v10908_v10 }
 0x384   :  { %v10864_v24 = vld [vmem:[%s20937_s0 + $0x205] sm:$0x1]   ;;  %v7713_v61 = vsel %vm21_vm4, %v10878_v11, %v7709_v58  ;;  %v10912_v17 = vld [vmem:[%s20937_s0 + $0x480] sm:$0x10]  }
 0x385   :  { %v10865_v40 = vld [vmem:[%s20937_s0 + $0x224] sm:$0x2]   ;;  %v7717_v19 = vsel %vm25_vm5, %v10879_v4, %v7713_v61  ;;  %v19499_v4 = vpop.permute.xlu0 %6222   ;;  %v10915_v58 = vld [vmem:[%s20937_s0 + $0x4dd] sm:$0x80]  }
 0x386   :  { %v10866_v1 = vld [vmem:[%s20937_s0 + $0x243] sm:$0x4]   ;;  %v7662_v21 = vsel %vm5_vm0, %v10865_v40, %v10864_v24  ;;  %7617 = vrot.lane.b32.xlu0 %v7616_v27, %s11241_s8  ;;  %v7721_v15 = vsel %vm29_vm6, %v10880_v56, %v7717_v19  ;;  %v10913_v40 = vld [vmem:[%s20937_s0 + $0x49f] sm:$0x20]   ;;  %v7840_v27 = vsel %vm9_vm1, %v10910_v14, %v7836_v29  ;;  %10499 = vst.msk [vmem:[%s20938_s1 + $0x8] sm:$0xff] %vm6155_vm11, %v19499_v4  }
 0x387   :  { %v10867_v33 = vld [vmem:[%s20937_s0 + $0x262] sm:$0x8]   ;;  %v7666_v36 = vsel %vm9_vm1, %v10866_v1, %v7662_v21  ;;  %7722 = vrot.lane.b32.xlu1 %v7721_v15, %s11241_s8  ;;  %v10914_v1 = vld [vmem:[%s20937_s0 + $0x4be] sm:$0x40]  }
 0x388   :  { %v10868_v50 = vld [vmem:[%s20937_s0 + $0x281] sm:$0x10]   ;;  %v7670_v7 = vsel %vm13_vm2, %v10867_v33, %v7666_v36  ;;  %v10900_v21 = vld [vmem:[%s20937_s0 + $0x4] sm:$0x1]  }
 0x389   :  { %v10869_v34 = vld [vmem:[%s20937_s0 + $0x2a0] sm:$0x20]   ;;  %v7674_v18 = vsel %vm17_vm3, %v10868_v50, %v7670_v7  ;;  %v10901_v50 = vld [vmem:[%s20937_s0 + $0x23] sm:$0x2]  }
 0x38a   :  { %v10870_v32 = vld [vmem:[%s20937_s0 + $0x2bf] sm:$0x40]   ;;  %v7678_v53 = vsel %vm21_vm4, %v10869_v34, %v7674_v18  ;;  %v7802_v61 = vsel %vm5_vm0, %v10901_v50, %v10900_v21  ;;  %v10902_v36 = vld [vmem:[%s20937_s0 + $0x42] sm:$0x4]  }
 0x38b   :  { %v10871_v39 = vld [vmem:[%s20937_s0 + $0x2de] sm:$0x80]   ;;  %v7682_v51 = vsel %vm25_vm5, %v10870_v32, %v7678_v53  ;;  %v7844_v32 = vsel %vm13_vm2, %v10911_v31, %v7840_v27  ;;  %v10944_v26 = vld [vmem:[%s20937_s0 + $0x604] sm:$0x1]  }
 0x38c   :  { %v10891_v6 = vld [vmem:[%s20937_s0 + $0x705] sm:$0x1]   ;;  %v7686_v46 = vsel %vm29_vm6, %v10871_v39, %v7682_v51  ;;  %v10903_v39 = vld [vmem:[%s20937_s0 + $0x61] sm:$0x8]   ;;  %v7848_v7 = vsel %vm17_vm3, %v10912_v17, %v7844_v32 }
 0x38d   :  { %v10892_v22 = vld [vmem:[%s20937_s0 + $0x724] sm:$0x2]   ;;  %7687 = vrot.lane.b32.xlu0 %v7686_v46, %s11241_s8  ;;  %v7852_v15 = vsel %vm21_vm4, %v10913_v40, %v7848_v7  ;;  %v10917_v51 = vld [vmem:[%s20937_s0 + $0x104] sm:$0x1]  }
 0x38e   :  { %v7767_v63 = vsel %vm5_vm0, %v10892_v22, %v10891_v6  ;;  %v10893_v57 = vld [vmem:[%s20937_s0 + $0x743] sm:$0x4]   ;;  %v10904_v6 = vld [vmem:[%s20937_s0 + $0x80] sm:$0x10]   ;;  %v19537_v22 = vpop.permute.xlu1 %6327  }
 0x38f   :  { %v10894_v9 = vld [vmem:[%s20937_s0 + $0x762] sm:$0x8]   ;;  %v7771_v60 = vsel %vm9_vm1, %v10893_v57, %v7767_v63  ;;  %v7806_v63 = vsel %vm9_vm1, %v10902_v36, %v7802_v61  ;;  %v10905_v57 = vld [vmem:[%s20937_s0 + $0x9f] sm:$0x20]   ;;  %10526 = vst.msk [vmem:[%s20938_s1 + $0x30] sm:$0xff] %vm6155_vm11, %v19537_v22  }
 0x390   :  { %v10895_v28 = vld [vmem:[%s20937_s0 + $0x781] sm:$0x10]   ;;  %v7775_v59 = vsel %vm13_vm2, %v10894_v9, %v7771_v60  ;;  %v10906_v9 = vld [vmem:[%s20937_s0 + $0xbe] sm:$0x40]   ;;  %v7810_v18 = vsel %vm13_vm2, %v10903_v39, %v7806_v63 }
 0x391   :  { %v10896_v23 = vld [vmem:[%s20937_s0 + $0x7a0] sm:$0x20]   ;;  %v7779_v41 = vsel %vm17_vm3, %v10895_v28, %v7775_v59  ;;  %v10907_v28 = vld [vmem:[%s20937_s0 + $0xdd] sm:$0x80]   ;;  %v7814_v53 = vsel %vm17_vm3, %v10904_v6, %v7810_v18 }
 0x392   :  { %v10897_v54 = vld [vmem:[%s20937_s0 + $0x7bf] sm:$0x40]   ;;  %v7783_v44 = vsel %vm21_vm4, %v10896_v23, %v7779_v41  ;;  %v10926_v60 = vld [vmem:[%s20937_s0 + $0x504] sm:$0x1]   ;;  %v7818_v47 = vsel %vm21_vm4, %v10905_v57, %v7814_v53 }
 0x393   :  { %v10898_v48 = vld [vmem:[%s20937_s0 + $0x7de] sm:$0x80]   ;;  %v7787_v8 = vsel %vm25_vm5, %v10897_v54, %v7783_v44  ;;  %v10927_v23 = vld [vmem:[%s20937_s0 + $0x523] sm:$0x2]   ;;  %v19560_v54 = vpop.permute.xlu0 %6292  }
 0x394   :  { %v10882_v49 = vld [vmem:[%s20937_s0 + $0x305] sm:$0x1]   ;;  %v7791_v56 = vsel %vm29_vm6, %v10898_v48, %v7787_v8  ;;  %v7856_v48 = vsel %vm25_vm5, %v10914_v1, %v7852_v15  ;;  %v7906_v3 = vsel %vm5_vm0, %v10927_v23, %v10926_v60  ;;  %v10929_v59 = vld [vmem:[%s20937_s0 + $0x561] sm:$0x8]   ;;  %10517 = vst.msk [vmem:[%s20938_s1 + $0x10] sm:$0xff] %vm6155_vm11, %v19560_v54   ;;  %v8185_v54 = vsel %vm5_vm0, %v10998_v2, %v10997_v42 }
 0x395   :  { %v10883_v43 = vld [vmem:[%s20937_s0 + $0x324] sm:$0x2]   ;;  %7792 = vrot.lane.b32.xlu1 %v7791_v56, %s11241_s8  ;;  %v7860_v55 = vsel %vm29_vm6, %v10915_v58, %v7856_v48  ;;  %v7910_v37 = vsel %vm9_vm1, %v10928_v25, %v7906_v3  ;;  %v10918_v41 = vld [vmem:[%s20937_s0 + $0x123] sm:$0x2]   ;;  %v11012_v2 = vld [vmem:[%s20937_s0 + $0x2bd] sm:$0x40]  }
 0x396   :  { %v10884_v62 = vld [vmem:[%s20937_s0 + $0x343] sm:$0x4]   ;;  %v7732_v5 = vsel %vm5_vm0, %v10883_v43, %v10882_v49  ;;  %v10930_v49 = vld [vmem:[%s20937_s0 + $0x580] sm:$0x10]   ;;  %v7822_v43 = vsel %vm25_vm5, %v10906_v9, %v7818_v47  ;;  %v7871_v46 = vsel %vm5_vm0, %v10918_v41, %v10917_v51 }
 0x397   :  { %v10885_v30 = vld [vmem:[%s20937_s0 + $0x362] sm:$0x8]   ;;  %v7736_v12 = vsel %vm9_vm1, %v10884_v62, %v7732_v5  ;;  %v7914_v62 = vsel %vm13_vm2, %v10929_v59, %v7910_v37  ;;  %v10919_v5 = vld [vmem:[%s20937_s0 + $0x142] sm:$0x4]   ;;  %v19675_v17 = vpop.permute.xlu0 %6362  }
 0x398   :  { %v10886_v16 = vld [vmem:[%s20937_s0 + $0x381] sm:$0x10]   ;;  %v7740_v11 = vsel %vm13_vm2, %v10885_v30, %v7736_v12  ;;  %v19638_v30 = vpop.permute.xlu1 %6397   ;;  %v10920_v44 = vld [vmem:[%s20937_s0 + $0x161] sm:$0x8]   ;;  %v7875_v10 = vsel %vm9_vm1, %v10919_v5, %v7871_v46  ;;  %10535 = vst.msk [vmem:[%s20938_s1 + $0x18] sm:$0xff] %vm6155_vm11, %v19675_v17  }
 0x399   :  { %v10887_v35 = vld [vmem:[%s20937_s0 + $0x3a0] sm:$0x20]   ;;  %v7744_v24 = vsel %vm17_vm3, %v10886_v16, %v7740_v11  ;;  %7861 = vrot.lane.b32.xlu1 %v7860_v55, %s11242_s12  ;;  %v7826_v16 = vsel %vm29_vm6, %v10907_v28, %v7822_v43  ;;  %v10921_v12 = vld [vmem:[%s20937_s0 + $0x180] sm:$0x10]   ;;  %v7879_v31 = vsel %vm13_vm2, %v10920_v44, %v7875_v10  ;;  %10544 = vst.msk [vmem:[%s20938_s1 + $0x38] sm:$0xff] %vm6155_vm11, %v19638_v30  }
 0x39a   :  { %v10888_v0 = vld [vmem:[%s20937_s0 + $0x3bf] sm:$0x40]   ;;  %v7748_v33 = vsel %vm21_vm4, %v10887_v35, %v7744_v24  ;;  %v7918_v35 = vsel %vm17_vm3, %v10930_v49, %v7914_v62  ;;  %v10923_v8 = vld [vmem:[%s20937_s0 + $0x1be] sm:$0x40]   ;;  %v7883_v1 = vsel %vm17_vm3, %v10921_v12, %v7879_v31  ;;  %v11000_v30 = vld [vmem:[%s20937_s0 + $0x560] sm:$0x8]  }
 0x39b   :  { %v10889_v20 = vld [vmem:[%s20937_s0 + $0x3de] sm:$0x80]   ;;  %v7752_v34 = vsel %vm25_vm5, %v10888_v0, %v7748_v33  ;;  %v10922_v0 = vld [vmem:[%s20937_s0 + $0x19f] sm:$0x20]   ;;  %v19739_v55 = vpop.permute.xlu0 %6432   ;;  %v11001_v17 = vld [vmem:[%s20937_s0 + $0x57f] sm:$0x10]  }
 0x39c   :  { %v7756_v19 = vsel %vm29_vm6, %v10889_v20, %v7752_v34  ;;  %v7922_v20 = vsel %vm21_vm4, %v10931_v38, %v7918_v35  ;;  %v10924_v11 = vld [vmem:[%s20937_s0 + $0x1dd] sm:$0x80]   ;;  %v7887_v50 = vsel %vm21_vm4, %v10922_v0, %v7883_v1  ;;  %v19701_v39 = vpop.permute.xlu1 %6466   ;;  %v10979_v1 = vld [vmem:[%s20937_s0 + $0x403] sm:$0x1]   ;;  %6435 = vst.msk [vmem:[%s20938_s1] sm:$0xff] %vm6434_vm12, %v19739_v55  }
 0x39d   :  { %7757 = vrot.lane.b32.xlu0 %v7756_v19, %s11241_s8  ;;  %v7926_v14 = vsel %vm25_vm5, %v10932_v52, %v7922_v20  ;;  %v10945_v56 = vld [vmem:[%s20937_s0 + $0x623] sm:$0x2]   ;;  %v7891_v6 = vsel %vm25_vm5, %v10923_v8, %v7887_v50  ;;  %v10981_v50 = vld [vmem:[%s20937_s0 + $0x441] sm:$0x4]   ;;  %10561 = vst.msk [vmem:[%s20938_s1 + $0x20] sm:$0xff] %vm6434_vm12, %v19701_v39  }
 0x39e   :  { %v10946_v24 = vld [vmem:[%s20937_s0 + $0x642] sm:$0x4]   ;;  %v7930_v40 = vsel %vm29_vm6, %v10933_v45, %v7926_v14  ;;  %v7976_v33 = vsel %vm5_vm0, %v10945_v56, %v10944_v26  ;;  %v7895_v28 = vsel %vm29_vm6, %v10924_v11, %v7891_v6  ;;  %v11069_v39 = vld [vmem:[%s20937_s0 + $0x521] sm:$0x2]  }
 0x39f   :  { %v10947_v29 = vld [vmem:[%s20937_s0 + $0x661] sm:$0x8]   ;;  %7931 = vrot.lane.b32.xlu1 %v7930_v40, %s11242_s12  ;;  %v7980_v34 = vsel %vm9_vm1, %v10946_v24, %v7976_v33  ;;  %v10980_v33 = vld [vmem:[%s20937_s0 + $0x422] sm:$0x2]   ;;  %v11070_v55 = vld [vmem:[%s20937_s0 + $0x540] sm:$0x4]  }
 0x3a0   :  { %v10948_v27 = vld [vmem:[%s20937_s0 + $0x680] sm:$0x10]   ;;  %v7984_v19 = vsel %vm13_vm2, %v10947_v29, %v7980_v34  ;;  %v19777_v10 = vpop.permute.xlu1 %6536   ;;  %v10982_v34 = vld [vmem:[%s20937_s0 + $0x460] sm:$0x8]  }
 0x3a1   :  { %7827 = vrot.lane.b32.xlu0 %v7826_v16, %s11242_s12  ;;  %v10949_v58 = vld [vmem:[%s20937_s0 + $0x69f] sm:$0x20]   ;;  %v7988_v15 = vsel %vm17_vm3, %v10948_v27, %v7984_v19  ;;  %10579 = vst.msk [vmem:[%s20938_s1 + $0x28] sm:$0xff] %vm6434_vm12, %v19777_v10  }
 0x3a2   :  { %v10950_v21 = vld [vmem:[%s20937_s0 + $0x6be] sm:$0x40]   ;;  %v7992_v53 = vsel %vm21_vm4, %v10949_v58, %v7988_v15  ;;  %v10971_v15 = vld [vmem:[%s20937_s0 + $0x3] sm:$0x1]  }
 0x3a3   :  { %v10951_v32 = vld [vmem:[%s20937_s0 + $0x6dd] sm:$0x80]   ;;  %v7996_v47 = vsel %vm25_vm5, %v10950_v21, %v7992_v53  ;;  %v8115_v21 = vsel %vm5_vm0, %v10980_v33, %v10979_v1 }
 0x3a4   :  { %v10935_v61 = vld [vmem:[%s20937_s0 + $0x204] sm:$0x1]   ;;  %v8000_v62 = vsel %vm29_vm6, %v10951_v32, %v7996_v47  ;;  %v10983_v32 = vld [vmem:[%s20937_s0 + $0x47f] sm:$0x10]   ;;  %v8119_v19 = vsel %vm9_vm1, %v10981_v50, %v8115_v21 }
 0x3a5   :  { %v10936_v36 = vld [vmem:[%s20937_s0 + $0x223] sm:$0x2]   ;;  %7896 = vrot.lane.b32.xlu0 %v7895_v28, %s11242_s12  ;;  %8001 = vrot.lane.b32.xlu1 %v8000_v62, %s11242_s12  ;;  %v8123_v28 = vsel %vm13_vm2, %v10982_v34, %v8119_v19  ;;  %v11016_v21 = vld [vmem:[%s20937_s0 + $0x622] sm:$0x2]  }
 0x3a6   :  { %v7941_v7 = vsel %vm5_vm0, %v10936_v36, %v10935_v61  ;;  %v10937_v63 = vld [vmem:[%s20937_s0 + $0x242] sm:$0x4]   ;;  %v19815_v61 = vpop.permute.xlu0 %6501   ;;  %v8127_v53 = vsel %vm17_vm3, %v10983_v32, %v8123_v28  ;;  %v11018_v19 = vld [vmem:[%s20937_s0 + $0x660] sm:$0x8]  }
 0x3a7   :  { %v10938_v57 = vld [vmem:[%s20937_s0 + $0x261] sm:$0x8]   ;;  %v7945_v18 = vsel %vm9_vm1, %v10937_v63, %v7941_v7  ;;  %v10984_v7 = vld [vmem:[%s20937_s0 + $0x49e] sm:$0x20]   ;;  %10570 = vst.msk [vmem:[%s20938_s1 + $0x8] sm:$0xff] %vm6434_vm12, %v19815_v61  }
 0x3a8   :  { %v10939_v9 = vld [vmem:[%s20937_s0 + $0x280] sm:$0x10]   ;;  %v7949_v3 = vsel %vm13_vm2, %v10938_v57, %v7945_v18  ;;  %v10985_v63 = vld [vmem:[%s20937_s0 + $0x4bd] sm:$0x40]  }
 0x3a9   :  { %v10940_v60 = vld [vmem:[%s20937_s0 + $0x29f] sm:$0x20]   ;;  %v7953_v37 = vsel %vm17_vm3, %v10939_v9, %v7949_v3  ;;  %v10986_v57 = vld [vmem:[%s20937_s0 + $0x4dc] sm:$0x80]  }
 0x3aa   :  { %v10941_v23 = vld [vmem:[%s20937_s0 + $0x2be] sm:$0x40]   ;;  %v7957_v51 = vsel %vm21_vm4, %v10940_v60, %v7953_v37  ;;  %v10972_v18 = vld [vmem:[%s20937_s0 + $0x22] sm:$0x2]   ;;  %v8131_v37 = vsel %vm21_vm4, %v10984_v7, %v8127_v53  ;;  %v19908_v13 = vpop.permute.xlu0 %6571  }
 0x3ab   :  { %v10942_v48 = vld [vmem:[%s20937_s0 + $0x2dd] sm:$0x80]   ;;  %v7961_v46 = vsel %vm25_vm5, %v10941_v23, %v7957_v51  ;;  %v10973_v60 = vld [vmem:[%s20937_s0 + $0x41] sm:$0x4]   ;;  %v19841_v23 = vpop.permute.xlu1 %6606   ;;  %v8081_v3 = vsel %vm5_vm0, %v10972_v18, %v10971_v15  ;;  %10588 = vst.msk [vmem:[%s20938_s1 + $0x10] sm:$0xff] %vm6434_vm12, %v19908_v13  }
 0x3ac   :  { %v10962_v25 = vld [vmem:[%s20937_s0 + $0x704] sm:$0x1]   ;;  %v7965_v8 = vsel %vm29_vm6, %v10942_v48, %v7961_v46  ;;  %v10999_v51 = vld [vmem:[%s20937_s0 + $0x541] sm:$0x4]   ;;  %10597 = vst.msk [vmem:[%s20938_s1 + $0x30] sm:$0xff] %vm6434_vm12, %v19841_v23  }
 0x3ad   :  { %v10963_v59 = vld [vmem:[%s20937_s0 + $0x723] sm:$0x2]   ;;  %7966 = vrot.lane.b32.xlu0 %v7965_v8, %s11242_s12  ;;  %v11004_v46 = vld [vmem:[%s20937_s0 + $0x5dc] sm:$0x80]  }
 0x3ae   :  { %v10964_v49 = vld [vmem:[%s20937_s0 + $0x742] sm:$0x4]   ;;  %v8046_v38 = vsel %vm5_vm0, %v10963_v59, %v10962_v25  ;;  %v10974_v25 = vld [vmem:[%s20937_s0 + $0x60] sm:$0x8]   ;;  %v19971_v50 = vpop.permute.xlu0 %6641  }
 0x3af   :  { %v10965_v52 = vld [vmem:[%s20937_s0 + $0x761] sm:$0x8]   ;;  %v8050_v41 = vsel %vm9_vm1, %v10964_v49, %v8046_v38  ;;  %v10975_v59 = vld [vmem:[%s20937_s0 + $0x7f] sm:$0x10]   ;;  %v8085_v38 = vsel %vm9_vm1, %v10973_v60, %v8081_v3  ;;  %10606 = vst.msk [vmem:[%s20938_s1 + $0x18] sm:$0xff] %vm6434_vm12, %v19971_v50  }
 0x3b0   :  { %v10966_v45 = vld [vmem:[%s20937_s0 + $0x780] sm:$0x10]   ;;  %v8054_v44 = vsel %vm13_vm2, %v10965_v52, %v8050_v41  ;;  %v10976_v49 = vld [vmem:[%s20937_s0 + $0x9e] sm:$0x20]   ;;  %v8089_v62 = vsel %vm13_vm2, %v10974_v25, %v8085_v38  ;;  %v11073_v50 = vld [vmem:[%s20937_s0 + $0x59d] sm:$0x20]  }
 0x3b1   :  { %v10967_v43 = vld [vmem:[%s20937_s0 + $0x79f] sm:$0x20]   ;;  %v8058_v11 = vsel %vm17_vm3, %v10966_v45, %v8054_v44  ;;  %v10977_v52 = vld [vmem:[%s20937_s0 + $0xbd] sm:$0x40]   ;;  %v8093_v22 = vsel %vm17_vm3, %v10975_v59, %v8089_v62 }
 0x3b2   :  { %v10968_v5 = vld [vmem:[%s20937_s0 + $0x7be] sm:$0x40]   ;;  %v8062_v24 = vsel %vm21_vm4, %v10967_v43, %v8058_v11  ;;  %v10978_v45 = vld [vmem:[%s20937_s0 + $0xdc] sm:$0x80]   ;;  %v8135_v43 = vsel %vm25_vm5, %v10985_v63, %v8131_v37 }
 0x3b3   :  { %v10969_v16 = vld [vmem:[%s20937_s0 + $0x7dd] sm:$0x80]   ;;  %v8066_v27 = vsel %vm25_vm5, %v10968_v5, %v8062_v24  ;;  %v8139_v4 = vsel %vm29_vm6, %v10986_v57, %v8135_v43  ;;  %v11002_v41 = vld [vmem:[%s20937_s0 + $0x59e] sm:$0x20]   ;;  %v8097_v5 = vsel %vm21_vm4, %v10976_v49, %v8093_v22 }
 0x3b4   :  { %v10953_v35 = vld [vmem:[%s20937_s0 + $0x304] sm:$0x1]   ;;  %v8070_v36 = vsel %vm29_vm6, %v10969_v16, %v8066_v27  ;;  %v8189_v16 = vsel %vm9_vm1, %v10999_v51, %v8185_v54  ;;  %v10988_v44 = vld [vmem:[%s20937_s0 + $0x103] sm:$0x1]  }
 0x3b5   :  { %v10954_v12 = vld [vmem:[%s20937_s0 + $0x323] sm:$0x2]   ;;  %8071 = vrot.lane.b32.xlu1 %v8070_v36, %s11242_s12  ;;  %v10990_v8 = vld [vmem:[%s20937_s0 + $0x141] sm:$0x4]  }
 0x3b6   :  { %v10955_v0 = vld [vmem:[%s20937_s0 + $0x342] sm:$0x4]   ;;  %v8011_v26 = vsel %vm5_vm0, %v10954_v12, %v10953_v35  ;;  %v11003_v35 = vld [vmem:[%s20937_s0 + $0x5bd] sm:$0x40]   ;;  %v8101_v12 = vsel %vm25_vm5, %v10977_v52, %v8097_v5  ;;  %v20047_v5 = vpop.permute.xlu0 %6711  }
 0x3b7   :  { %v10956_v20 = vld [vmem:[%s20937_s0 + $0x361] sm:$0x8]   ;;  %v8015_v29 = vsel %vm9_vm1, %v10955_v0, %v8011_v26  ;;  %v8193_v0 = vsel %vm13_vm2, %v11000_v30, %v8189_v16  ;;  %v10991_v11 = vld [vmem:[%s20937_s0 + $0x160] sm:$0x8]   ;;  %v19945_v26 = vpop.permute.xlu1 %6676   ;;  %6714 = vst.msk [vmem:[%s20938_s1] sm:$0xff] %vm6713_vm13, %v20047_v5  }
 0x3b8   :  { %v10957_v14 = vld [vmem:[%s20937_s0 + $0x380] sm:$0x10]   ;;  %v8019_v58 = vsel %vm13_vm2, %v10956_v20, %v8015_v29  ;;  %v10989_v20 = vld [vmem:[%s20937_s0 + $0x122] sm:$0x2]   ;;  %10615 = vst.msk [vmem:[%s20938_s1 + $0x38] sm:$0xff] %vm6434_vm12, %v19945_v26  }
 0x3b9   :  { %v10958_v31 = vld [vmem:[%s20937_s0 + $0x39f] sm:$0x20]   ;;  %v8023_v6 = vsel %vm17_vm3, %v10957_v14, %v8019_v58  ;;  %8140 = vrot.lane.b32.xlu1 %v8139_v4, %s11243_s10  ;;  %v8105_v14 = vsel %vm29_vm6, %v10978_v45, %v8101_v12  ;;  %v10992_v24 = vld [vmem:[%s20937_s0 + $0x17f] sm:$0x10]   ;;  %v11072_v26 = vld [vmem:[%s20937_s0 + $0x57e] sm:$0x10]  }
 0x3ba   :  { %v10959_v56 = vld [vmem:[%s20937_s0 + $0x3be] sm:$0x40]   ;;  %v8027_v9 = vsel %vm21_vm4, %v10958_v31, %v8023_v6  ;;  %v8197_v31 = vsel %vm17_vm3, %v11001_v17, %v8193_v0  ;;  %v10993_v29 = vld [vmem:[%s20937_s0 + $0x19e] sm:$0x20]   ;;  %v11141_v5 = vld [vmem:[%s20937_s0 + $0x53f] sm:$0x4]  }
 0x3bb   :  { %v10960_v40 = vld [vmem:[%s20937_s0 + $0x3dd] sm:$0x80]   ;;  %v8031_v48 = vsel %vm25_vm5, %v10959_v56, %v8027_v9  ;;  %v8150_v56 = vsel %vm5_vm0, %v10989_v20, %v10988_v44  ;;  %v8201_v1 = vsel %vm21_vm4, %v11002_v41, %v8197_v31  ;;  %v10995_v27 = vld [vmem:[%s20937_s0 + $0x1dc] sm:$0x80]   ;;  %v20009_v59 = vpop.permute.xlu1 %6745  }
 0x3bc   :  { %v8035_v47 = vsel %vm29_vm6, %v10960_v40, %v8031_v48  ;;  %v10994_v40 = vld [vmem:[%s20937_s0 + $0x1bd] sm:$0x40]   ;;  %v8154_v33 = vsel %vm9_vm1, %v10990_v8, %v8150_v56  ;;  %v8205_v34 = vsel %vm25_vm5, %v11003_v35, %v8201_v1  ;;  %10632 = vst.msk [vmem:[%s20938_s1 + $0x20] sm:$0xff] %vm6713_vm13, %v20009_v59  }
 0x3bd   :  { %8036 = vrot.lane.b32.xlu0 %v8035_v47, %s11242_s12  ;;  %v11015_v58 = vld [vmem:[%s20937_s0 + $0x603] sm:$0x1]   ;;  %v8158_v32 = vsel %vm13_vm2, %v10991_v11, %v8154_v33  ;;  %v8209_v63 = vsel %vm29_vm6, %v11004_v46, %v8205_v34 }
 0x3be   :  { %v8255_v36 = vsel %vm5_vm0, %v11016_v21, %v11015_v58  ;;  %v11017_v6 = vld [vmem:[%s20937_s0 + $0x641] sm:$0x4]   ;;  %v8162_v57 = vsel %vm17_vm3, %v10992_v24, %v8158_v32  ;;  %8210 = vrot.lane.b32.xlu1 %v8209_v63, %s11243_s10  ;;  %v11050_v63 = vld [vmem:[%s20937_s0 + $0x402] sm:$0x1]  }
 0x3bf   :  { %v11019_v7 = vld [vmem:[%s20937_s0 + $0x67f] sm:$0x10]   ;;  %v8259_v9 = vsel %vm9_vm1, %v11017_v6, %v8255_v36  ;;  %v8166_v60 = vsel %vm21_vm4, %v10993_v29, %v8162_v57  ;;  %v11051_v57 = vld [vmem:[%s20937_s0 + $0x421] sm:$0x2]  }
 0x3c0   :  { %v11020_v28 = vld [vmem:[%s20937_s0 + $0x69e] sm:$0x20]   ;;  %v8263_v48 = vsel %vm13_vm2, %v11018_v19, %v8259_v9  ;;  %v8170_v49 = vsel %vm25_vm5, %v10994_v40, %v8166_v60  ;;  %v11052_v9 = vld [vmem:[%s20937_s0 + $0x440] sm:$0x4]   ;;  %v8394_v60 = vsel %vm5_vm0, %v11051_v57, %v11050_v63 }
 0x3c1   :  { %8106 = vrot.lane.b32.xlu0 %v8105_v14, %s11243_s10  ;;  %v11021_v15 = vld [vmem:[%s20937_s0 + $0x6bd] sm:$0x40]   ;;  %v8267_v47 = vsel %vm17_vm3, %v11019_v7, %v8263_v48  ;;  %v8174_v43 = vsel %vm29_vm6, %v10995_v27, %v8170_v49  ;;  %v20085_v27 = vpop.permute.xlu1 %6815   ;;  %v11053_v48 = vld [vmem:[%s20937_s0 + $0x45f] sm:$0x8]  }
 0x3c2   :  { %v11022_v18 = vld [vmem:[%s20937_s0 + $0x6dc] sm:$0x80]   ;;  %v8271_v62 = vsel %vm21_vm4, %v11020_v28, %v8267_v47  ;;  %v20111_v28 = vpop.permute.xlu0 %6780   ;;  %v8398_v47 = vsel %vm9_vm1, %v11052_v9, %v8394_v60  ;;  %v11066_v63 = vld [vmem:[%s20937_s0 + $0x1db] sm:$0x80]   ;;  %10650 = vst.msk [vmem:[%s20938_s1 + $0x28] sm:$0xff] %vm6713_vm13, %v20085_v27  }
 0x3c3   :  { %v11006_v53 = vld [vmem:[%s20937_s0 + $0x203] sm:$0x1]   ;;  %v8275_v22 = vsel %vm25_vm5, %v11021_v15, %v8271_v62  ;;  %v11043_v62 = vld [vmem:[%s20937_s0 + $0x21] sm:$0x2]   ;;  %10641 = vst.msk [vmem:[%s20938_s1 + $0x8] sm:$0xff] %vm6713_vm13, %v20111_v28  }
 0x3c4   :  { %v11007_v3 = vld [vmem:[%s20937_s0 + $0x222] sm:$0x2]   ;;  %v8279_v16 = vsel %vm29_vm6, %v11022_v18, %v8275_v22  ;;  %v11088_v60 = vld [vmem:[%s20937_s0 + $0x640] sm:$0x4]  }
 0x3c5   :  { %v11008_v25 = vld [vmem:[%s20937_s0 + $0x241] sm:$0x4]   ;;  %v8220_v37 = vsel %vm5_vm0, %v11007_v3, %v11006_v53  ;;  %8175 = vrot.lane.b32.xlu0 %v8174_v43, %s11243_s10  ;;  %8280 = vrot.lane.b32.xlu1 %v8279_v16, %s11243_s10  ;;  %v11054_v53 = vld [vmem:[%s20937_s0 + $0x47e] sm:$0x10]   ;;  %v8402_v43 = vsel %vm13_vm2, %v11053_v48, %v8398_v47 }
 0x3c6   :  { %v11009_v38 = vld [vmem:[%s20937_s0 + $0x260] sm:$0x8]   ;;  %v8224_v42 = vsel %vm9_vm1, %v11008_v25, %v8220_v37  ;;  %v11055_v3 = vld [vmem:[%s20937_s0 + $0x49d] sm:$0x20]   ;;  %v8406_v22 = vsel %vm17_vm3, %v11054_v53, %v8402_v43  ;;  %v20215_v10 = vpop.permute.xlu0 %6850  }
 0x3c7   :  { %v11010_v52 = vld [vmem:[%s20937_s0 + $0x27f] sm:$0x10]   ;;  %v8228_v54 = vsel %vm13_vm2, %v11009_v38, %v8224_v42  ;;  %v11056_v37 = vld [vmem:[%s20937_s0 + $0x4bc] sm:$0x40]   ;;  %v8410_v16 = vsel %vm21_vm4, %v11055_v3, %v8406_v22  ;;  %10659 = vst.msk [vmem:[%s20938_s1 + $0x10] sm:$0xff] %vm6713_vm13, %v20215_v10  }
 0x3c8   :  { %v11011_v45 = vld [vmem:[%s20937_s0 + $0x29e] sm:$0x20]   ;;  %v8232_v35 = vsel %vm17_vm3, %v11010_v52, %v8228_v54  ;;  %v11057_v38 = vld [vmem:[%s20937_s0 + $0x4db] sm:$0x80]   ;;  %v11144_v10 = vld [vmem:[%s20937_s0 + $0x59c] sm:$0x20]  }
 0x3c9   :  { %v11013_v51 = vld [vmem:[%s20937_s0 + $0x2dc] sm:$0x80]   ;;  %v8236_v20 = vsel %vm21_vm4, %v11011_v45, %v8232_v35  ;;  %v11042_v52 = vld [vmem:[%s20937_s0 + $0x2] sm:$0x1]  }
 0x3ca   :  { %v11033_v4 = vld [vmem:[%s20937_s0 + $0x703] sm:$0x1]   ;;  %v8240_v56 = vsel %vm25_vm5, %v11012_v2, %v8236_v20  ;;  %v11044_v42 = vld [vmem:[%s20937_s0 + $0x40] sm:$0x4]   ;;  %v8360_v54 = vsel %vm5_vm0, %v11043_v62, %v11042_v52  ;;  %v20279_v48 = vpop.permute.xlu0 %6920  }
 0x3cb   :  { %v11034_v30 = vld [vmem:[%s20937_s0 + $0x722] sm:$0x2]   ;;  %v8244_v58 = vsel %vm29_vm6, %v11013_v51, %v8240_v56  ;;  %v11045_v2 = vld [vmem:[%s20937_s0 + $0x5f] sm:$0x8]   ;;  %v20149_v51 = vpop.permute.xlu1 %6885   ;;  %v8364_v35 = vsel %vm9_vm1, %v11044_v42, %v8360_v54  ;;  %10677 = vst.msk [vmem:[%s20938_s1 + $0x18] sm:$0xff] %vm6713_vm13, %v20279_v48  }
 0x3cc   :  { %v11035_v17 = vld [vmem:[%s20937_s0 + $0x741] sm:$0x4]   ;;  %v8325_v46 = vsel %vm5_vm0, %v11034_v30, %v11033_v4  ;;  %8245 = vrot.lane.b32.xlu0 %v8244_v58, %s11243_s10  ;;  %v11046_v30 = vld [vmem:[%s20937_s0 + $0x7e] sm:$0x10]   ;;  %10668 = vst.msk [vmem:[%s20938_s1 + $0x30] sm:$0xff] %vm6713_vm13, %v20149_v51  }
 0x3cd   :  { %v11036_v41 = vld [vmem:[%s20937_s0 + $0x760] sm:$0x8]   ;;  %v8329_v8 = vsel %vm9_vm1, %v11035_v17, %v8325_v46  ;;  %v11047_v17 = vld [vmem:[%s20937_s0 + $0x9d] sm:$0x20]  }
 0x3ce   :  { %v11037_v44 = vld [vmem:[%s20937_s0 + $0x77f] sm:$0x10]   ;;  %v8333_v24 = vsel %vm13_vm2, %v11036_v41, %v8329_v8  ;;  %v11048_v41 = vld [vmem:[%s20937_s0 + $0xbc] sm:$0x40]  }
 0x3cf   :  { %v11038_v12 = vld [vmem:[%s20937_s0 + $0x79e] sm:$0x20]   ;;  %v8337_v21 = vsel %vm17_vm3, %v11037_v44, %v8333_v24  ;;  %v11049_v46 = vld [vmem:[%s20937_s0 + $0xdb] sm:$0x80]  }
 0x3d0   :  { %v11039_v0 = vld [vmem:[%s20937_s0 + $0x7bd] sm:$0x40]   ;;  %v8341_v19 = vsel %vm21_vm4, %v11038_v12, %v8337_v21  ;;  %v11068_v44 = vld [vmem:[%s20937_s0 + $0x502] sm:$0x1]   ;;  %v8414_v12 = vsel %vm25_vm5, %v11056_v37, %v8410_v16 }
 0x3d1   :  { %v11040_v11 = vld [vmem:[%s20937_s0 + $0x7dc] sm:$0x80]   ;;  %v8345_v15 = vsel %vm25_vm5, %v11039_v0, %v8341_v19  ;;  %v8368_v0 = vsel %vm13_vm2, %v11045_v2, %v8364_v35  ;;  %v11071_v20 = vld [vmem:[%s20937_s0 + $0x55f] sm:$0x8]   ;;  %v8418_v61 = vsel %vm29_vm6, %v11057_v38, %v8414_v12  ;;  %v8464_v13 = vsel %vm5_vm0, %v11069_v39, %v11068_v44 }
 0x3d2   :  { %v11024_v14 = vld [vmem:[%s20937_s0 + $0x303] sm:$0x1]   ;;  %v8349_v25 = vsel %vm29_vm6, %v11040_v11, %v8345_v15  ;;  %v8372_v23 = vsel %vm17_vm3, %v11046_v30, %v8368_v0  ;;  %v11074_v8 = vld [vmem:[%s20937_s0 + $0x5bc] sm:$0x40]  }
 0x3d3   :  { %v11025_v31 = vld [vmem:[%s20937_s0 + $0x322] sm:$0x2]   ;;  %8350 = vrot.lane.b32.xlu1 %v8349_v25, %s11243_s10  ;;  %v8376_v11 = vsel %vm21_vm4, %v11047_v17, %v8372_v23  ;;  %v11059_v56 = vld [vmem:[%s20937_s0 + $0x102] sm:$0x1]   ;;  %v20343_v23 = vpop.permute.xlu0 %6990  }
 0x3d4   :  { %v8290_v29 = vsel %vm5_vm0, %v11025_v31, %v11024_v14  ;;  %v11026_v40 = vld [vmem:[%s20937_s0 + $0x341] sm:$0x4]   ;;  %v8468_v14 = vsel %vm9_vm1, %v11070_v55, %v8464_v13  ;;  %v11075_v31 = vld [vmem:[%s20937_s0 + $0x5db] sm:$0x80]   ;;  %6993 = vst.msk [vmem:[%s20938_s1] sm:$0xff] %vm6992_vm14, %v20343_v23  }
 0x3d5   :  { %v11027_v1 = vld [vmem:[%s20937_s0 + $0x360] sm:$0x8]   ;;  %v8294_v34 = vsel %vm9_vm1, %v11026_v40, %v8290_v29  ;;  %v11060_v24 = vld [vmem:[%s20937_s0 + $0x121] sm:$0x2]   ;;  %v20241_v29 = vpop.permute.xlu1 %6955   ;;  %v8380_v40 = vsel %vm25_vm5, %v11048_v41, %v8376_v11  ;;  %v11130_v23 = vld [vmem:[%s20937_s0 + $0x101] sm:$0x1]  }
 0x3d6   :  { %v11028_v33 = vld [vmem:[%s20937_s0 + $0x37f] sm:$0x10]   ;;  %v8298_v7 = vsel %vm13_vm2, %v11027_v1, %v8294_v34  ;;  %v8472_v1 = vsel %vm13_vm2, %v11071_v20, %v8468_v14  ;;  %v11061_v58 = vld [vmem:[%s20937_s0 + $0x140] sm:$0x4]   ;;  %10686 = vst.msk [vmem:[%s20938_s1 + $0x38] sm:$0xff] %vm6713_vm13, %v20241_v29  }
 0x3d7   :  { %v11029_v32 = vld [vmem:[%s20937_s0 + $0x39e] sm:$0x20]   ;;  %v8302_v18 = vsel %vm17_vm3, %v11028_v33, %v8298_v7  ;;  %8419 = vrot.lane.b32.xlu1 %v8418_v61, %s11244_s19  ;;  %v8429_v33 = vsel %vm5_vm0, %v11060_v24, %v11059_v56  ;;  %v11062_v21 = vld [vmem:[%s20937_s0 + $0x15f] sm:$0x8]   ;;  %v11145_v29 = vld [vmem:[%s20937_s0 + $0x5bb] sm:$0x40]  }
 0x3d8   :  { %v11030_v36 = vld [vmem:[%s20937_s0 + $0x3bd] sm:$0x40]   ;;  %v8306_v49 = vsel %vm21_vm4, %v11029_v32, %v8302_v18  ;;  %v11063_v34 = vld [vmem:[%s20937_s0 + $0x17e] sm:$0x10]   ;;  %v8384_v32 = vsel %vm29_vm6, %v11049_v46, %v8380_v40 }
 0x3d9   :  { %v11031_v6 = vld [vmem:[%s20937_s0 + $0x3dc] sm:$0x80]   ;;  %v8310_v45 = vsel %vm25_vm5, %v11030_v36, %v8306_v49  ;;  %v8476_v36 = vsel %vm17_vm3, %v11072_v26, %v8472_v1  ;;  %v11064_v19 = vld [vmem:[%s20937_s0 + $0x19d] sm:$0x20]   ;;  %v20317_v17 = vpop.permute.xlu1 %7024  }
 0x3da   :  { %v8314_v4 = vsel %vm29_vm6, %v11031_v6, %v8310_v45  ;;  %v8433_v6 = vsel %vm9_vm1, %v11061_v58, %v8429_v33  ;;  %v11065_v7 = vld [vmem:[%s20937_s0 + $0x1bc] sm:$0x40]   ;;  %v8480_v57 = vsel %vm21_vm4, %v11073_v50, %v8476_v36  ;;  %10703 = vst.msk [vmem:[%s20938_s1 + $0x20] sm:$0xff] %vm6992_vm14, %v20317_v17  }
 0x3db   :  { %8315 = vrot.lane.b32.xlu0 %v8314_v4, %s11243_s10  ;;  %v8437_v9 = vsel %vm13_vm2, %v11062_v21, %v8433_v6  ;;  %v11086_v15 = vld [vmem:[%s20937_s0 + $0x602] sm:$0x1]   ;;  %v8484_v53 = vsel %vm25_vm5, %v11074_v8, %v8480_v57 }
 0x3dc   :  { %v11087_v18 = vld [vmem:[%s20937_s0 + $0x621] sm:$0x2]   ;;  %v8441_v3 = vsel %vm17_vm3, %v11063_v34, %v8437_v9  ;;  %v8488_v38 = vsel %vm29_vm6, %v11075_v31, %v8484_v53 }
 0x3dd   :  { %v8534_v25 = vsel %vm5_vm0, %v11087_v18, %v11086_v15  ;;  %v11089_v49 = vld [vmem:[%s20937_s0 + $0x65f] sm:$0x8]   ;;  %v8445_v52 = vsel %vm21_vm4, %v11064_v19, %v8441_v3  ;;  %8489 = vrot.lane.b32.xlu1 %v8488_v38, %s11244_s19  ;;  %v20381_v6 = vpop.permute.xlu1 %7094   ;;  %v11122_v38 = vld [vmem:[%s20937_s0 + $0x420] sm:$0x2]  }
 0x3de   :  { %v11090_v47 = vld [vmem:[%s20937_s0 + $0x67e] sm:$0x10]   ;;  %v8538_v45 = vsel %vm9_vm1, %v11088_v60, %v8534_v25  ;;  %v8449_v2 = vsel %vm25_vm5, %v11065_v7, %v8445_v52  ;;  %v11123_v52 = vld [vmem:[%s20937_s0 + $0x43f] sm:$0x4]   ;;  %10721 = vst.msk [vmem:[%s20938_s1 + $0x28] sm:$0xff] %vm6992_vm14, %v20381_v6  }
 0x3df   :  { %8385 = vrot.lane.b32.xlu0 %v8384_v32, %s11244_s19  ;;  %v11091_v37 = vld [vmem:[%s20937_s0 + $0x69d] sm:$0x20]   ;;  %v8542_v4 = vsel %vm13_vm2, %v11089_v49, %v8538_v45  ;;  %v8453_v41 = vsel %vm29_vm6, %v11066_v63, %v8449_v2  ;;  %v11121_v49 = vld [vmem:[%s20937_s0 + $0x401] sm:$0x1]  }
 0x3e0   :  { %v11092_v43 = vld [vmem:[%s20937_s0 + $0x6bc] sm:$0x40]   ;;  %v8546_v16 = vsel %vm17_vm3, %v11090_v47, %v8542_v4  ;;  %v11124_v45 = vld [vmem:[%s20937_s0 + $0x45e] sm:$0x8]   ;;  %v8673_v2 = vsel %vm5_vm0, %v11122_v38, %v11121_v49 }
 0x3e1   :  { %v11093_v62 = vld [vmem:[%s20937_s0 + $0x6db] sm:$0x80]   ;;  %v8550_v0 = vsel %vm21_vm4, %v11091_v37, %v8546_v16  ;;  %v11125_v4 = vld [vmem:[%s20937_s0 + $0x47d] sm:$0x10]  }
 0x3e2   :  { %v11077_v42 = vld [vmem:[%s20937_s0 + $0x202] sm:$0x1]   ;;  %v8554_v13 = vsel %vm25_vm5, %v11092_v43, %v8550_v0  ;;  %v7060_v43 = vpop.permute.xlu0 %7059   ;;  %v11128_v16 = vld [vmem:[%s20937_s0 + $0x4da] sm:$0x80]  }
 0x3e3   :  { %v11078_v22 = vld [vmem:[%s20937_s0 + $0x221] sm:$0x2]   ;;  %8454 = vrot.lane.b32.xlu0 %v8453_v41, %s11244_s19  ;;  %v8558_v31 = vsel %vm29_vm6, %v11093_v62, %v8554_v13  ;;  %v8677_v41 = vsel %vm9_vm1, %v11123_v52, %v8673_v2  ;;  %10712 = vst.msk [vmem:[%s20938_s1 + $0x8] sm:$0xff] %vm6992_vm14, %v7060_v43   ;;  %v11159_v38 = vld [vmem:[%s20937_s0 + $0x63f] sm:$0x4]  }
 0x3e4   :  { %v11079_v54 = vld [vmem:[%s20937_s0 + $0x240] sm:$0x4]   ;;  %v8499_v35 = vsel %vm5_vm0, %v11078_v22, %v11077_v42  ;;  %8559 = vrot.lane.b32.xlu1 %v8558_v31, %s11244_s19  ;;  %v11126_v22 = vld [vmem:[%s20937_s0 + $0x49c] sm:$0x20]  }
 0x3e5   :  { %v11080_v30 = vld [vmem:[%s20937_s0 + $0x25f] sm:$0x8]   ;;  %v8503_v39 = vsel %vm9_vm1, %v11079_v54, %v8499_v35  ;;  %v11127_v54 = vld [vmem:[%s20937_s0 + $0x4bb] sm:$0x40]  }
 0x3e6   :  { %v11081_v46 = vld [vmem:[%s20937_s0 + $0x27e] sm:$0x10]   ;;  %v8507_v26 = vsel %vm13_vm2, %v11080_v30, %v8503_v39  ;;  %v11113_v35 = vld [vmem:[%s20937_s0 + $0x1] sm:$0x1]  }
 0x3e7   :  { %v11082_v44 = vld [vmem:[%s20937_s0 + $0x29d] sm:$0x20]   ;;  %v8511_v56 = vsel %vm17_vm3, %v11081_v46, %v8507_v26  ;;  %v11114_v46 = vld [vmem:[%s20937_s0 + $0x20] sm:$0x2]  }
 0x3e8   :  { %v11083_v12 = vld [vmem:[%s20937_s0 + $0x2bc] sm:$0x40]   ;;  %v8515_v58 = vsel %vm21_vm4, %v11082_v44, %v8511_v56  ;;  %v8639_v0 = vsel %vm5_vm0, %v11114_v46, %v11113_v35  ;;  %v11115_v39 = vld [vmem:[%s20937_s0 + $0x3f] sm:$0x4]  }
 0x3e9   :  { %v11084_v55 = vld [vmem:[%s20937_s0 + $0x2db] sm:$0x80]   ;;  %v8519_v19 = vsel %vm25_vm5, %v11083_v12, %v8515_v58  ;;  %v8681_v12 = vsel %vm13_vm2, %v11124_v45, %v8677_v41  ;;  %v11160_v52 = vld [vmem:[%s20937_s0 + $0x65e] sm:$0x8]  }
 0x3ea   :  { %v11104_v20 = vld [vmem:[%s20937_s0 + $0x702] sm:$0x1]   ;;  %v8523_v18 = vsel %vm29_vm6, %v11084_v55, %v8519_v19  ;;  %v11116_v55 = vld [vmem:[%s20937_s0 + $0x5e] sm:$0x8]   ;;  %v8685_v26 = vsel %vm17_vm3, %v11125_v4, %v8681_v12 }
 0x3eb   :  { %v11105_v61 = vld [vmem:[%s20937_s0 + $0x721] sm:$0x2]   ;;  %8524 = vrot.lane.b32.xlu0 %v8523_v18, %s11244_s19  ;;  %v8689_v31 = vsel %vm21_vm4, %v11126_v22, %v8685_v26  ;;  %v11161_v4 = vld [vmem:[%s20937_s0 + $0x67d] sm:$0x10]  }
 0x3ec   :  { %v8604_v50 = vsel %vm5_vm0, %v11105_v61, %v11104_v20  ;;  %v11106_v8 = vld [vmem:[%s20937_s0 + $0x740] sm:$0x4]   ;;  %v11117_v20 = vld [vmem:[%s20937_s0 + $0x7d] sm:$0x10]   ;;  %v7165_v61 = vpop.permute.xlu1 %7164  }
 0x3ed   :  { %v11107_v11 = vld [vmem:[%s20937_s0 + $0x75f] sm:$0x8]   ;;  %v8608_v24 = vsel %vm9_vm1, %v11106_v8, %v8604_v50  ;;  %v8643_v50 = vsel %vm9_vm1, %v11115_v39, %v8639_v0  ;;  %v11118_v8 = vld [vmem:[%s20937_s0 + $0x9c] sm:$0x20]   ;;  %10739 = vst.msk [vmem:[%s20938_s1 + $0x30] sm:$0xff] %vm6992_vm14, %v7165_v61  }
 0x3ee   :  { %v11108_v14 = vld [vmem:[%s20937_s0 + $0x77e] sm:$0x10]   ;;  %v8612_v21 = vsel %vm13_vm2, %v11107_v11, %v8608_v24  ;;  %v11119_v11 = vld [vmem:[%s20937_s0 + $0xbb] sm:$0x40]   ;;  %v8647_v56 = vsel %vm13_vm2, %v11116_v55, %v8643_v50 }
 0x3ef   :  { %v11109_v40 = vld [vmem:[%s20937_s0 + $0x79d] sm:$0x20]   ;;  %v8616_v7 = vsel %vm17_vm3, %v11108_v14, %v8612_v21  ;;  %v11120_v14 = vld [vmem:[%s20937_s0 + $0xda] sm:$0x80]   ;;  %v8651_v58 = vsel %vm17_vm3, %v11117_v20, %v8647_v56 }
 0x3f0   :  { %v11110_v1 = vld [vmem:[%s20937_s0 + $0x7bc] sm:$0x40]   ;;  %v8620_v60 = vsel %vm21_vm4, %v11109_v40, %v8616_v7  ;;  %v11139_v24 = vld [vmem:[%s20937_s0 + $0x501] sm:$0x1]   ;;  %v8655_v28 = vsel %vm21_vm4, %v11118_v8, %v8651_v58  ;;  %v7235_v6 = vpop.permute.xlu1 %7234  }
 0x3f1   :  { %v11111_v33 = vld [vmem:[%s20937_s0 + $0x7db] sm:$0x80]   ;;  %v8624_v47 = vsel %vm25_vm5, %v11110_v1, %v8620_v60  ;;  %v11140_v40 = vld [vmem:[%s20937_s0 + $0x520] sm:$0x2]   ;;  %v7130_v1 = vpop.permute.xlu0 %7129   ;;  %v8659_v48 = vsel %vm25_vm5, %v11119_v11, %v8655_v28  ;;  %10757 = vst.msk [vmem:[%s20938_s1 + $0x38] sm:$0xff] %vm6992_vm14, %v7235_v6  }
 0x3f2   :  { %v11095_v34 = vld [vmem:[%s20937_s0 + $0x302] sm:$0x1]   ;;  %v8628_v62 = vsel %vm29_vm6, %v11111_v33, %v8624_v47  ;;  %v8693_v33 = vsel %vm25_vm5, %v11127_v54, %v8689_v31  ;;  %v8743_v59 = vsel %vm5_vm0, %v11140_v40, %v11139_v24  ;;  %v11142_v21 = vld [vmem:[%s20937_s0 + $0x55e] sm:$0x8]   ;;  %10730 = vst.msk [vmem:[%s20938_s1 + $0x10] sm:$0xff] %vm6992_vm14, %v7130_v1   ;;  %v8663_v19 = vsel %vm29_vm6, %v11120_v14, %v8659_v48 }
 0x3f3   :  { %v11096_v32 = vld [vmem:[%s20937_s0 + $0x321] sm:$0x2]   ;;  %8629 = vrot.lane.b32.xlu1 %v8628_v62, %s11244_s19  ;;  %v8697_v27 = vsel %vm29_vm6, %v11128_v16, %v8693_v33  ;;  %v8747_v51 = vsel %vm9_vm1, %v11141_v5, %v8743_v59  ;;  %v11162_v22 = vld [vmem:[%s20937_s0 + $0x69c] sm:$0x20]  }
 0x3f4   :  { %v11097_v36 = vld [vmem:[%s20937_s0 + $0x340] sm:$0x4]   ;;  %v8569_v63 = vsel %vm5_vm0, %v11096_v32, %v11095_v34  ;;  %v11143_v34 = vld [vmem:[%s20937_s0 + $0x57d] sm:$0x10]   ;;  %v8751_v17 = vsel %vm13_vm2, %v11142_v21, %v8747_v51  ;;  %v7304_v46 = vpop.permute.xlu1 %7303  }
 0x3f5   :  { %v11098_v57 = vld [vmem:[%s20937_s0 + $0x35f] sm:$0x8]   ;;  %v8573_v53 = vsel %vm9_vm1, %v11097_v36, %v8569_v63  ;;  %v11131_v32 = vld [vmem:[%s20937_s0 + $0x120] sm:$0x2]   ;;  %v8755_v7 = vsel %vm17_vm3, %v11143_v34, %v8751_v17  ;;  %v7200_v45 = vpop.permute.xlu0 %7199  }
 0x3f6   :  { %v11099_v9 = vld [vmem:[%s20937_s0 + $0x37e] sm:$0x10]   ;;  %v8577_v37 = vsel %vm13_vm2, %v11098_v57, %v8573_v53  ;;  %v11132_v36 = vld [vmem:[%s20937_s0 + $0x13f] sm:$0x4]   ;;  %v8708_v57 = vsel %vm5_vm0, %v11131_v32, %v11130_v23  ;;  %v8759_v18 = vsel %vm21_vm4, %v11144_v10, %v8755_v7  ;;  %10748 = vst.msk [vmem:[%s20938_s1 + $0x18] sm:$0xff] %vm6992_vm14, %v7200_v45  }
 0x3f7   :  { %v11100_v15 = vld [vmem:[%s20937_s0 + $0x39d] sm:$0x20]   ;;  %v8581_v42 = vsel %vm17_vm3, %v11099_v9, %v8577_v37  ;;  %8698 = vrot.lane.b32.xlu1 %v8697_v27, %s11245_s4  ;;  %v11146_v63 = vld [vmem:[%s20937_s0 + $0x5da] sm:$0x80]   ;;  %v8712_v60 = vsel %vm9_vm1, %v11132_v36, %v8708_v57  ;;  %v8763_v49 = vsel %vm25_vm5, %v11145_v29, %v8759_v18 }
 0x3f8   :  { %v11101_v3 = vld [vmem:[%s20937_s0 + $0x3bc] sm:$0x40]   ;;  %v8585_v30 = vsel %vm21_vm4, %v11100_v15, %v8581_v42  ;;  %v11133_v9 = vld [vmem:[%s20937_s0 + $0x15e] sm:$0x8]   ;;  %v8767_v43 = vsel %vm29_vm6, %v11146_v63, %v8763_v49 }
 0x3f9   :  { %v11102_v25 = vld [vmem:[%s20937_s0 + $0x3db] sm:$0x80]   ;;  %v8589_v44 = vsel %vm25_vm5, %v11101_v3, %v8585_v30  ;;  %v11134_v15 = vld [vmem:[%s20937_s0 + $0x17d] sm:$0x10]   ;;  %v8716_v47 = vsel %vm13_vm2, %v11133_v9, %v8712_v60  ;;  %v7270_v1 = vpop.permute.xlu0 %7269  }
 0x3fa   :  { %v8593_v13 = vsel %vm29_vm6, %v11102_v25, %v8589_v44  ;;  %v11135_v53 = vld [vmem:[%s20937_s0 + $0x19c] sm:$0x20]   ;;  %v8720_v62 = vsel %vm17_vm3, %v11134_v15, %v8716_v47 }
 0x3fb   :  { %8594 = vrot.lane.b32.xlu0 %v8593_v13, %s11244_s19  ;;  %v11136_v3 = vld [vmem:[%s20937_s0 + $0x1bb] sm:$0x40]   ;;  %8768 = vrot.lane.b32.xlu1 %v8767_v43, %s11245_s4  ;;  %v8724_v54 = vsel %vm21_vm4, %v11135_v53, %v8720_v62 }
 0x3fc   :  { %v11157_v25 = vld [vmem:[%s20937_s0 + $0x601] sm:$0x1]   ;;  %v8728_v44 = vsel %vm25_vm5, %v11136_v3, %v8724_v54 }
 0x3fd   :  { %v11158_v37 = vld [vmem:[%s20937_s0 + $0x620] sm:$0x2]   ;;  %v7339_v47 = vpop.permute.xlu0 %7338  }
 0x3fe   :  { %v11137_v42 = vld [vmem:[%s20937_s0 + $0x1da] sm:$0x80]   ;;  %v8813_v2 = vsel %vm5_vm0, %v11158_v37, %v11157_v25 }
 0x3ff   :  { %8664 = vrot.lane.b32.xlu0 %v8663_v19, %s11245_s4  ;;  %v8817_v30 = vsel %vm9_vm1, %v11159_v38, %v8813_v2  ;;  %v11163_v41 = vld [vmem:[%s20937_s0 + $0x6bb] sm:$0x40]   ;;  %v8732_v61 = vsel %vm29_vm6, %v11137_v42, %v8728_v44  ;;  %v7374_v19 = vpop.permute.xlu1 %7373  }
 0x400   :  { %v11148_v16 = vld [vmem:[%s20937_s0 + $0x201] sm:$0x1]   ;;  %v8821_v12 = vsel %vm13_vm2, %v11160_v52, %v8817_v30 }
 0x401   :  { %v11149_v35 = vld [vmem:[%s20937_s0 + $0x220] sm:$0x2]   ;;  %v8825_v13 = vsel %vm17_vm3, %v11161_v4, %v8821_v12  ;;  %v7409_v2 = vpop.permute.xlu0 %7408  }
 0x402   :  { %v8778_v0 = vsel %vm5_vm0, %v11149_v35, %v11148_v16  ;;  %v11150_v39 = vld [vmem:[%s20937_s0 + $0x23f] sm:$0x4]   ;;  %v8829_v14 = vsel %vm21_vm4, %v11162_v22, %v8825_v13 }
 0x403   :  { %v11151_v55 = vld [vmem:[%s20937_s0 + $0x25e] sm:$0x8]   ;;  %v8782_v50 = vsel %vm9_vm1, %v11150_v39, %v8778_v0  ;;  %8733 = vrot.lane.b32.xlu0 %v8732_v61, %s11245_s4  ;;  %v8833_v33 = vsel %vm25_vm5, %v11163_v41, %v8829_v14  ;;  %v7444_v43 = vpop.permute.xlu1 %7443  }
 0x404   :  { %v11152_v20 = vld [vmem:[%s20937_s0 + $0x27d] sm:$0x10]   ;;  %v8786_v31 = vsel %vm13_vm2, %v11151_v55, %v8782_v50 }
 0x405   :  { %v11164_v26 = vld [vmem:[%s20937_s0 + $0x6da] sm:$0x80]   ;;  %v8790_v58 = vsel %vm17_vm3, %v11152_v20, %v8786_v31  ;;  %v7479_v22 = vpop.permute.xlu0 %7478  }
 0x406   :  { %v11153_v8 = vld [vmem:[%s20937_s0 + $0x29c] sm:$0x20]   ;;  %v8837_v27 = vsel %vm29_vm6, %v11164_v26, %v8833_v33 }
 0x407   :  { %v11154_v11 = vld [vmem:[%s20937_s0 + $0x2bb] sm:$0x40]   ;;  %v8794_v28 = vsel %vm21_vm4, %v11153_v8, %v8790_v58  ;;  %8838 = vrot.lane.b32.xlu1 %v8837_v27, %s11245_s4  ;;  %v7514_v4 = vpop.permute.xlu1 %7513  }
 0x408   :  { %v11175_v56 = vld [vmem:[%s20937_s0 + $0x701] sm:$0x1]   ;;  %v8798_v17 = vsel %vm25_vm5, %v11154_v11, %v8794_v28 }
 0x409   :  { %v11176_v24 = vld [vmem:[%s20937_s0 + $0x720] sm:$0x2]   ;;  %v7549_v30 = vpop.permute.xlu0 %7548  }
 0x40a   :  { %v11177_v40 = vld [vmem:[%s20937_s0 + $0x73f] sm:$0x4]   ;;  %v8883_v5 = vsel %vm5_vm0, %v11176_v24, %v11175_v56 }
 0x40b   :  { %v11155_v59 = vld [vmem:[%s20937_s0 + $0x2da] sm:$0x80]   ;;  %v8887_v51 = vsel %vm9_vm1, %v11177_v40, %v8883_v5  ;;  %v7583_v54 = vpop.permute.xlu1 %7582  }
 0x40c   :  { %v11178_v21 = vld [vmem:[%s20937_s0 + $0x75e] sm:$0x8]   ;;  %v8802_v7 = vsel %vm29_vm6, %v11155_v59, %v8798_v17 }
 0x40d   :  { %v11179_v34 = vld [vmem:[%s20937_s0 + $0x77d] sm:$0x10]   ;;  %v8891_v23 = vsel %vm13_vm2, %v11178_v21, %v8887_v51  ;;  %8803 = vrot.lane.b32.xlu0 %v8802_v7, %s11245_s4  ;;  %v7618_v16 = vpop.permute.xlu0 %7617  }
 0x40e   :  { %v11180_v10 = vld [vmem:[%s20937_s0 + $0x79c] sm:$0x20]   ;;  %v8895_v63 = vsel %vm17_vm3, %v11179_v34, %v8891_v23 }
 0x40f   :  { %v11181_v29 = vld [vmem:[%s20937_s0 + $0x7bb] sm:$0x40]   ;;  %v8899_v18 = vsel %vm21_vm4, %v11180_v10, %v8895_v63  ;;  %v7653_v41 = vpop.permute.xlu1 %7652  }
 0x410   :  { %v11166_v48 = vld [vmem:[%s20937_s0 + $0x301] sm:$0x1]   ;;  %v8903_v3 = vsel %vm25_vm5, %v11181_v29, %v8899_v18 }
 0x411   :  { %v11167_v32 = vld [vmem:[%s20937_s0 + $0x320] sm:$0x2]  }
 0x412   :  { %v11168_v36 = vld [vmem:[%s20937_s0 + $0x33f] sm:$0x4]   ;;  %v8848_v9 = vsel %vm5_vm0, %v11167_v32, %v11166_v48  ;;  %vm7271_vm0 = vcmask 228544  }
 0x413   :  { %v11169_v6 = vld [vmem:[%s20937_s0 + $0x35e] sm:$0x8]   ;;  %v8852_v60 = vsel %vm9_vm1, %v11168_v36, %v8848_v9  ;;  %10774 = vst.msk [vmem:[%s20938_s1 + $0x20] sm:$0xff] %vm7271_vm0, %v7304_v46   ;;  %7272 = vst.msk [vmem:[%s20938_s1] sm:$0xff] %vm7271_vm0, %v7270_v1   ;;  %vm7550_vm1 = vcmask 195744   ;;  %v7723_v35 = vpop.permute.xlu1 %7722   ;;  %v7688_v46 = vpop.permute.xlu0 %7687  }
 0x414   :  { %v11182_v57 = vld [vmem:[%s20937_s0 + $0x7da] sm:$0x80]   ;;  %v8856_v25 = vsel %vm13_vm2, %v11169_v6, %v8852_v60  ;;  %10792 = vst.msk [vmem:[%s20938_s1 + $0x28] sm:$0xff] %vm7271_vm0, %v7374_v19   ;;  %10783 = vst.msk [vmem:[%s20938_s1 + $0x8] sm:$0xff] %vm7271_vm0, %v7339_v47   ;;  %vm7829_vm2 = vcmask 162944  }
 0x415   :  { %v11170_v15 = vld [vmem:[%s20937_s0 + $0x37d] sm:$0x10]   ;;  %v8907_v37 = vsel %vm29_vm6, %v11182_v57, %v8903_v3  ;;  %10810 = vst.msk [vmem:[%s20938_s1 + $0x30] sm:$0xff] %vm7271_vm0, %v7444_v43   ;;  %10801 = vst.msk [vmem:[%s20938_s1 + $0x10] sm:$0xff] %vm7271_vm0, %v7409_v2  }
 0x416   :  { %v11171_v53 = vld [vmem:[%s20937_s0 + $0x39c] sm:$0x20]   ;;  %v8860_v38 = vsel %vm17_vm3, %v11170_v15, %v8856_v25  ;;  %8908 = vrot.lane.b32.xlu1 %v8907_v37, %s11245_s4  ;;  %10828 = vst.msk [vmem:[%s20938_s1 + $0x38] sm:$0xff] %vm7271_vm0, %v7514_v4   ;;  %10819 = vst.msk [vmem:[%s20938_s1 + $0x18] sm:$0xff] %vm7271_vm0, %v7479_v22   ;;  %vm8108_vm3 = vcmask 130144  }
 0x417   :  { %v11172_v49 = vld [vmem:[%s20937_s0 + $0x3bb] sm:$0x40]   ;;  %v8864_v45 = vsel %vm21_vm4, %v11171_v53, %v8860_v38  ;;  %10845 = vst.msk [vmem:[%s20938_s1 + $0x20] sm:$0xff] %vm7550_vm1, %v7583_v54   ;;  %7551 = vst.msk [vmem:[%s20938_s1] sm:$0xff] %vm7550_vm1, %v7549_v30   ;;  %v7793_v44 = vpop.permute.xlu1 %7792   ;;  %v7758_v12 = vpop.permute.xlu0 %7757   ;;  %vm8387_vm4 = vcmask 97344  }
 0x418   :  { %v11173_v52 = vld [vmem:[%s20937_s0 + $0x3da] sm:$0x80]   ;;  %v8868_v62 = vsel %vm25_vm5, %v11172_v49, %v8864_v45  ;;  %10863 = vst.msk [vmem:[%s20938_s1 + $0x28] sm:$0xff] %vm7550_vm1, %v7653_v41   ;;  %10854 = vst.msk [vmem:[%s20938_s1 + $0x8] sm:$0xff] %vm7550_vm1, %v7618_v16   ;;  %vm8666_vm5 = vcmask 64544  }
 0x419   :  { %v8872_v42 = vsel %vm29_vm6, %v11173_v52, %v8868_v62  ;;  %10881 = vst.msk [vmem:[%s20938_s1 + $0x30] sm:$0xff] %vm7550_vm1, %v7723_v35   ;;  %10872 = vst.msk [vmem:[%s20938_s1 + $0x10] sm:$0xff] %vm7550_vm1, %v7688_v46  }
 0x41a   :  { %8873 = vrot.lane.b32.xlu0 %v8872_v42, %s11245_s4  ;;  %10899 = vst.msk [vmem:[%s20938_s1 + $0x38] sm:$0xff] %vm7550_vm1, %v7793_v44   ;;  %10890 = vst.msk [vmem:[%s20938_s1 + $0x18] sm:$0xff] %vm7550_vm1, %v7758_v12  }
 0x41b   :  { %v7862_v0 = vpop.permute.xlu1 %7861   ;;  %v7828_v39 = vpop.permute.xlu0 %7827  }
 0x41c   :  { %10916 = vst.msk [vmem:[%s20938_s1 + $0x20] sm:$0xff] %vm7829_vm2, %v7862_v0   ;;  %7830 = vst.msk [vmem:[%s20938_s1] sm:$0xff] %vm7829_vm2, %v7828_v39  }
 0x41f   :  { %v7932_v55 = vpop.permute.xlu1 %7931   ;;  %v7897_v20 = vpop.permute.xlu0 %7896  }
 0x420   :  { %10934 = vst.msk [vmem:[%s20938_s1 + $0x28] sm:$0xff] %vm7829_vm2, %v7932_v55   ;;  %10925 = vst.msk [vmem:[%s20938_s1 + $0x8] sm:$0xff] %vm7829_vm2, %v7897_v20  }
 0x423   :  { %v8002_v61 = vpop.permute.xlu1 %8001   ;;  %v7967_v13 = vpop.permute.xlu0 %7966  }
 0x424   :  { %10952 = vst.msk [vmem:[%s20938_s1 + $0x30] sm:$0xff] %vm7829_vm2, %v8002_v61   ;;  %10943 = vst.msk [vmem:[%s20938_s1 + $0x10] sm:$0xff] %vm7829_vm2, %v7967_v13  }
 0x427   :  { %v8072_v26 = vpop.permute.xlu1 %8071  }
 0x428   :  { %10970 = vst.msk [vmem:[%s20938_s1 + $0x38] sm:$0xff] %vm7829_vm2, %v8072_v26  }
 0x42b   :  { %v8141_v8 = vpop.permute.xlu1 %8140  }
 0x42c   :  { %10987 = vst.msk [vmem:[%s20938_s1 + $0x20] sm:$0xff] %vm8108_vm3, %v8141_v8  }
 0x42f   :  { %v8037_v50 = vpop.permute.xlu0 %8036  }
 0x430   :  { %10961 = vst.msk [vmem:[%s20938_s1 + $0x18] sm:$0xff] %vm7829_vm2, %v8037_v50   ;;  %v8211_v14 = vpop.permute.xlu1 %8210  }
 0x431   :  { %11005 = vst.msk [vmem:[%s20938_s1 + $0x28] sm:$0xff] %vm8108_vm3, %v8211_v14  }
 0x433   :  { %v8107_v11 = vpop.permute.xlu0 %8106  }
 0x434   :  { %8109 = vst.msk [vmem:[%s20938_s1] sm:$0xff] %vm8108_vm3, %v8107_v11  }
 0x437   :  { %v8176_v31 = vpop.permute.xlu0 %8175   ;;  %v8281_v56 = vpop.permute.xlu1 %8280  }
 0x438   :  { %10996 = vst.msk [vmem:[%s20938_s1 + $0x8] sm:$0xff] %vm8108_vm3, %v8176_v31   ;;  %11023 = vst.msk [vmem:[%s20938_s1 + $0x30] sm:$0xff] %vm8108_vm3, %v8281_v56  }
 0x43e   :  { %v8246_v24 = vpop.permute.xlu0 %8245  }
 0x43f   :  { %11014 = vst.msk [vmem:[%s20938_s1 + $0x10] sm:$0xff] %vm8108_vm3, %v8246_v24  }
 0x445   :  { %v8351_v40 = vpop.permute.xlu1 %8350  }
 0x446   :  { %11041 = vst.msk [vmem:[%s20938_s1 + $0x38] sm:$0xff] %vm8108_vm3, %v8351_v40  }
 0x449   :  { %v8420_v33 = vpop.permute.xlu1 %8419  }
 0x44a   :  { %11058 = vst.msk [vmem:[%s20938_s1 + $0x20] sm:$0xff] %vm8387_vm4, %v8420_v33  }
 0x44d   :  { %v8316_v1 = vpop.permute.xlu0 %8315  }
 0x44e   :  { %11032 = vst.msk [vmem:[%s20938_s1 + $0x18] sm:$0xff] %vm8108_vm3, %v8316_v1  }
 0x44f   :  { %v8490_v59 = vpop.permute.xlu1 %8489  }
 0x450   :  { %11076 = vst.msk [vmem:[%s20938_s1 + $0x28] sm:$0xff] %vm8387_vm4, %v8490_v59  }
 0x451   :  { %v8386_v58 = vpop.permute.xlu0 %8385  }
 0x452   :  { %8388 = vst.msk [vmem:[%s20938_s1] sm:$0xff] %vm8387_vm4, %v8386_v58  }
 0x455   :  { %v8455_v5 = vpop.permute.xlu0 %8454  }
 0x456   :  { %11067 = vst.msk [vmem:[%s20938_s1 + $0x8] sm:$0xff] %vm8387_vm4, %v8455_v5   ;;  %v8560_v21 = vpop.permute.xlu1 %8559  }
 0x457   :  { %11094 = vst.msk [vmem:[%s20938_s1 + $0x30] sm:$0xff] %vm8387_vm4, %v8560_v21  }
 0x45d   :  { %v8525_v34 = vpop.permute.xlu0 %8524  }
 0x45e   :  { %11085 = vst.msk [vmem:[%s20938_s1 + $0x10] sm:$0xff] %vm8387_vm4, %v8525_v34  }
 0x465   :  { %v8630_v27 = vpop.permute.xlu1 %8629  }
 0x466   :  { %11112 = vst.msk [vmem:[%s20938_s1 + $0x38] sm:$0xff] %vm8387_vm4, %v8630_v27  }
 0x469   :  { %v8699_v51 = vpop.permute.xlu1 %8698  }
 0x46a   :  { %11129 = vst.msk [vmem:[%s20938_s1 + $0x20] sm:$0xff] %vm8666_vm5, %v8699_v51  }
 0x46d   :  { %v8595_v28 = vpop.permute.xlu0 %8594   ;;  %v8769_v29 = vpop.permute.xlu1 %8768  }
 0x46e   :  { %11103 = vst.msk [vmem:[%s20938_s1 + $0x18] sm:$0xff] %vm8387_vm4, %v8595_v28  }
 0x46f   :  { %11147 = vst.msk [vmem:[%s20938_s1 + $0x28] sm:$0xff] %vm8666_vm5, %v8769_v29  }
 0x471   :  { %v8665_v10 = vpop.permute.xlu0 %8664  }
 0x472   :  { %8667 = vst.msk [vmem:[%s20938_s1] sm:$0xff] %vm8666_vm5, %v8665_v10  }
 0x475   :  { %v8734_v48 = vpop.permute.xlu0 %8733  }
 0x476   :  { %11138 = vst.msk [vmem:[%s20938_s1 + $0x8] sm:$0xff] %vm8666_vm5, %v8734_v48  }
 0x479   :  { %v8839_v17 = vpop.permute.xlu1 %8838  }
 0x47a   :  { %11165 = vst.msk [vmem:[%s20938_s1 + $0x30] sm:$0xff] %vm8666_vm5, %v8839_v17  }
 0x47f   :  { %v8804_v23 = vpop.permute.xlu0 %8803  }
 0x480   :  { %11156 = vst.msk [vmem:[%s20938_s1 + $0x10] sm:$0xff] %vm8666_vm5, %v8804_v23  }
 0x488   :  { %v8909_v32 = vpop.permute.xlu1 %8908  }
 0x489   :  { %11183 = vst.msk [vmem:[%s20938_s1 + $0x38] sm:$0xff] %vm8666_vm5, %v8909_v32  }
 0x48c   :  { %v8874_v36 = vpop.permute.xlu0 %8873  }
 0x48d   :  { %11174 = vst.msk [vmem:[%s20938_s1 + $0x18] sm:$0xff] %vm8666_vm5, %v8874_v36  }

// kernel: tile.8
= control target key start
LH: loop header
LB: loop body
LE: loop exit
PB: predicated region body
PF: predicated region fallthrough
CT: control target
= control target key end

     0   :  { %s64_s0 = inlined_call_operand.vmem [shape: f32[4], index: 0, kind: input, shape index: {}]   ;;  %s65_s1 = inlined_call_operand.vmem [shape: f32[64,4], index: 1, kind: output, shape index: {}]  }
   0x1   :  { %v4_v0 = vld [vmem:[%s64_s0] ss:$0 sm:$0xff] }
   0x2   :  { %5 = vst [vmem:[%s65_s1] sm:$0xff] %v4_v0  ;;  %20 = vst [vmem:[%s65_s1 + $0x8] sm:$0xff] %v4_v0 }
   0x3   :  { %21 = vst [vmem:[%s65_s1 + $0x10] sm:$0xff] %v4_v0  ;;  %22 = vst [vmem:[%s65_s1 + $0x18] sm:$0xff] %v4_v0 }
   0x4   :  { %23 = vst [vmem:[%s65_s1 + $0x20] sm:$0xff] %v4_v0  ;;  %24 = vst [vmem:[%s65_s1 + $0x28] sm:$0xff] %v4_v0 }
   0x5   :  { %25 = vst [vmem:[%s65_s1 + $0x30] sm:$0xff] %v4_v0  ;;  %26 = vst [vmem:[%s65_s1 + $0x38] sm:$0xff] %v4_v0 }

// kernel: tile.9
= control target key start
LH: loop header
LB: loop body
LE: loop exit
PB: predicated region body
PF: predicated region fallthrough
CT: control target
= control target key end

     0   :  { %vm5_vm0 = vcmask 1041409   ;;  %s425_s14 = smov 124   ;;  %s426_s21 = smov 116   ;;  %vm7_vm1 = vcmask 31744   ;;  %vm17_vm2 = vcmask 1048544   ;;  %vm27_vm3 = vcmask 1015744   ;;  %s696_s0 = inlined_call_operand.vmem [shape: f32[64,4], index: 0, kind: input, shape index: {}]   ;;  %s697_s1 = inlined_call_operand.vmem [shape: f32[1,256], index: 1, kind: output, shape index: {}]  }
   0x1   :  { %v331_v0 = vld [vmem:[%s696_s0 + $0x1f] sm:$0x1]   ;;  %v335_v3 = vld [vmem:[%s696_s0 + $0x1d] sm:$0x1]   ;;  %v333_v6 = vld [vmem:[%s696_s0 + $0x1e] sm:$0x1]  }
   0x2   :  { %v332_v1 = vld [vmem:[%s696_s0 + $0x3e] sm:$0x2]   ;;  %v336_v4 = vld [vmem:[%s696_s0 + $0x3c] sm:$0x2]   ;;  %v334_v7 = vld [vmem:[%s696_s0 + $0x3d] sm:$0x2]  }
   0x3   :  { %v14_v2 = vsel %vm5_vm0, %v332_v1, %v331_v0  ;;  %v34_v5 = vsel %vm5_vm0, %v336_v4, %v335_v3  ;;  %v337_v8 = vld [vmem:[%s696_s0 + $0x1c] sm:$0x1]   ;;  %v24_v9 = vsel %vm5_vm0, %v334_v7, %v333_v6  ;;  %v339_v12 = vld [vmem:[%s696_s0 + $0x1b] sm:$0x1]   ;;  %v341_v14 = vld [vmem:[%s696_s0 + $0x1a] sm:$0x1]  }
   0x4   :  { %15 = vrot.lane.b32.xlu0 %v14_v2, %s425_s14  ;;  %35 = vrot.lane.b32.xlu1 %v34_v5, %s426_s21  ;;  %v338_v10 = vld [vmem:[%s696_s0 + $0x3b] sm:$0x2]   ;;  %v340_v13 = vld [vmem:[%s696_s0 + $0x3a] sm:$0x2]   ;;  %s427_s3 = smov 120   ;;  %s428_s4 = smov 112  }
   0x5   :  { %v44_v11 = vsel %vm5_vm0, %v338_v10, %v337_v8  ;;  %v342_v15 = vld [vmem:[%s696_s0 + $0x39] sm:$0x2]   ;;  %v54_v16 = vsel %vm5_vm0, %v340_v13, %v339_v12  ;;  %v343_v18 = vld [vmem:[%s696_s0 + $0x19] sm:$0x1]   ;;  %v345_v20 = vld [vmem:[%s696_s0 + $0x18] sm:$0x1]  }
   0x6   :  { %v64_v17 = vsel %vm5_vm0, %v342_v15, %v341_v14  ;;  %v344_v19 = vld [vmem:[%s696_s0 + $0x38] sm:$0x2]   ;;  %v346_v21 = vld [vmem:[%s696_s0 + $0x37] sm:$0x2]   ;;  %s429_s13 = smov 108   ;;  %s430_s14 = smov 104  }
   0x7   :  { %v74_v22 = vsel %vm5_vm0, %v344_v19, %v343_v18  ;;  %v84_v23 = vsel %vm5_vm0, %v346_v21, %v345_v20  ;;  %v347_v24 = vld [vmem:[%s696_s0 + $0x17] sm:$0x1]   ;;  %v349_v26 = vld [vmem:[%s696_s0 + $0x16] sm:$0x1]   ;;  %s431_s23 = smov 100   ;;  %s432_s24 = smov 96  }
   0x8   :  { %25 = vrot.lane.b32.xlu0 %v24_v9, %s427_s3  ;;  %45 = vrot.lane.b32.xlu1 %v44_v11, %s428_s4  ;;  %v348_v25 = vld [vmem:[%s696_s0 + $0x36] sm:$0x2]   ;;  %v350_v27 = vld [vmem:[%s696_s0 + $0x35] sm:$0x2]   ;;  %s433_s4 = smov 92   ;;  %s434_s5 = smov 88  }
   0x9   :  { %v94_v28 = vsel %vm5_vm0, %v348_v25, %v347_v24  ;;  %v104_v29 = vsel %vm5_vm0, %v350_v27, %v349_v26  ;;  %v351_v30 = vld [vmem:[%s696_s0 + $0x15] sm:$0x1]   ;;  %v353_v32 = vld [vmem:[%s696_s0 + $0x14] sm:$0x1]   ;;  %v355_v36 = vld [vmem:[%s696_s0 + $0x13] sm:$0x1]  }
   0xa   :  { %v352_v31 = vld [vmem:[%s696_s0 + $0x34] sm:$0x2]   ;;  %v354_v33 = vld [vmem:[%s696_s0 + $0x33] sm:$0x2]   ;;  %v356_v37 = vld [vmem:[%s696_s0 + $0x32] sm:$0x2]  }
   0xb   :  { %v114_v34 = vsel %vm5_vm0, %v352_v31, %v351_v30  ;;  %v124_v35 = vsel %vm5_vm0, %v354_v33, %v353_v32  ;;  %v357_v38 = vld [vmem:[%s696_s0 + $0x12] sm:$0x1]   ;;  %s436_s15 = smov 80   ;;  %v134_v40 = vsel %vm5_vm0, %v356_v37, %v355_v36  ;;  %v359_v42 = vld [vmem:[%s696_s0 + $0x11] sm:$0x1]   ;;  %s438_s29 = smov 72  }
   0xc   :  { %55 = vrot.lane.b32.xlu0 %v54_v16, %s429_s13  ;;  %65 = vrot.lane.b32.xlu1 %v64_v17, %s430_s14  ;;  %v358_v39 = vld [vmem:[%s696_s0 + $0x31] sm:$0x2]   ;;  %s435_s14 = smov 84   ;;  %v360_v43 = vld [vmem:[%s696_s0 + $0x30] sm:$0x2]   ;;  %s439_s9 = smov 68  }
   0xd   :  { %v144_v41 = vsel %vm5_vm0, %v358_v39, %v357_v38  ;;  %v361_v44 = vld [vmem:[%s696_s0 + $0x10] sm:$0x1]   ;;  %v2_v46 = vld [vmem:[%s696_s0] sm:$0x1]   ;;  %v154_v48 = vsel %vm5_vm0, %v360_v43, %v359_v42  ;;  %v363_v51 = vld [vmem:[%s696_s0 + $0xf] sm:$0x1]  }
   0xe   :  { %v362_v45 = vld [vmem:[%s696_s0 + $0x2f] sm:$0x2]   ;;  %v330_v47 = vld [vmem:[%s696_s0 + $0x1f] sm:$0x2]   ;;  %v364_v52 = vld [vmem:[%s696_s0 + $0x2e] sm:$0x2]  }
   0xf   :  { %v6_v49 = vsel %vm5_vm0, %v330_v47, %v2_v46  ;;  %v164_v50 = vsel %vm5_vm0, %v362_v45, %v361_v44  ;;  %v365_v53 = vld [vmem:[%s696_s0 + $0xe] sm:$0x1]   ;;  %s440_s10 = smov 64   ;;  %v174_v55 = vsel %vm5_vm0, %v364_v52, %v363_v51  ;;  %v367_v57 = vld [vmem:[%s696_s0 + $0xd] sm:$0x1]   ;;  %s441_s19 = smov 60  }
  0x10   :  { %75 = vrot.lane.b32.xlu0 %v74_v22, %s431_s23  ;;  %85 = vrot.lane.b32.xlu1 %v84_v23, %s432_s24  ;;  %s437_s24 = smov 76   ;;  %8 = vst.msk [vmem:[#allocation0] ss:$8 sm:$0x3] %vm7_vm1, %v6_v49   ;;  %v366_v54 = vld [vmem:[%s696_s0 + $0x2d] sm:$0x2]  }
  0x11   :  { %v184_v56 = vsel %vm5_vm0, %v366_v54, %v365_v53  ;;  %v368_v58 = vld [vmem:[%s696_s0 + $0x2c] sm:$0x2]   ;;  %v369_v59 = vld [vmem:[%s696_s0 + $0xc] sm:$0x1]   ;;  %s442_s20 = smov 56   ;;  %s444_s30 = smov 48  }
  0x12   :  { %v370_v60 = vld [vmem:[%s696_s0 + $0x2b] sm:$0x2]   ;;  %v194_v61 = vsel %vm5_vm0, %v368_v58, %v367_v57  ;;  %v371_v63 = vld [vmem:[%s696_s0 + $0xb] sm:$0x1]   ;;  %v373_v1 = vld [vmem:[%s696_s0 + $0xa] sm:$0x1]  }
  0x13   :  { %v204_v62 = vsel %vm5_vm0, %v370_v60, %v369_v59  ;;  %v372_v0 = vld [vmem:[%s696_s0 + $0x2a] sm:$0x2]   ;;  %v374_v2 = vld [vmem:[%s696_s0 + $0x29] sm:$0x2]   ;;  %v375_v5 = vld [vmem:[%s696_s0 + $0x9] sm:$0x1]  }
  0x14   :  { %95 = vrot.lane.b32.xlu0 %v94_v28, %s433_s4  ;;  %105 = vrot.lane.b32.xlu1 %v104_v29, %s434_s5  ;;  %v214_v3 = vsel %vm5_vm0, %v372_v0, %v371_v63  ;;  %v224_v4 = vsel %vm5_vm0, %v374_v2, %v373_v1  ;;  %v376_v6 = vld [vmem:[%s696_s0 + $0x28] sm:$0x2]   ;;  %v377_v7 = vld [vmem:[%s696_s0 + $0x8] sm:$0x1]   ;;  %s446_s11 = smov 40   ;;  %s448_s21 = smov 32  }
  0x15   :  { %v378_v8 = vld [vmem:[%s696_s0 + $0x27] sm:$0x2]   ;;  %v234_v9 = vsel %vm5_vm0, %v376_v6, %v375_v5  ;;  %v379_v11 = vld [vmem:[%s696_s0 + $0x7] sm:$0x1]   ;;  %v381_v13 = vld [vmem:[%s696_s0 + $0x6] sm:$0x1]  }
  0x16   :  { %v244_v10 = vsel %vm5_vm0, %v378_v8, %v377_v7  ;;  %v380_v12 = vld [vmem:[%s696_s0 + $0x26] sm:$0x2]   ;;  %v382_v14 = vld [vmem:[%s696_s0 + $0x25] sm:$0x2]   ;;  %v383_v17 = vld [vmem:[%s696_s0 + $0x5] sm:$0x1]  }
  0x17   :  { %v254_v15 = vsel %vm5_vm0, %v380_v12, %v379_v11  ;;  %v264_v16 = vsel %vm5_vm0, %v382_v14, %v381_v13  ;;  %v384_v18 = vld [vmem:[%s696_s0 + $0x24] sm:$0x2]   ;;  %v385_v19 = vld [vmem:[%s696_s0 + $0x4] sm:$0x1]   ;;  %s450_s2 = smov 24   ;;  %s452_s12 = smov 16  }
  0x18   :  { %115 = vrot.lane.b32.xlu0 %v114_v34, %s435_s14  ;;  %125 = vrot.lane.b32.xlu1 %v124_v35, %s436_s15  ;;  %v386_v20 = vld [vmem:[%s696_s0 + $0x23] sm:$0x2]   ;;  %v274_v21 = vsel %vm5_vm0, %v384_v18, %v383_v17  ;;  %v387_v23 = vld [vmem:[%s696_s0 + $0x3] sm:$0x1]   ;;  %s454_s17 = smov 8   ;;  %s455_s18 = smov 4  }
  0x19   :  { %v284_v22 = vsel %vm5_vm0, %v386_v20, %v385_v19  ;;  %v388_v24 = vld [vmem:[%s696_s0 + $0x22] sm:$0x2]   ;;  %v389_v25 = vld [vmem:[%s696_s0 + $0x2] sm:$0x1]   ;;  %v391_v29 = vld [vmem:[%s696_s0 + $0x1] sm:$0x1]  }
  0x1a   :  { %v390_v26 = vld [vmem:[%s696_s0 + $0x21] sm:$0x2]   ;;  %v294_v27 = vsel %vm5_vm0, %v388_v24, %v387_v23  ;;  %v392_v30 = vld [vmem:[%s696_s0 + $0x20] sm:$0x2]   ;;  %s453_s0 = smov 12   ;;  %vm37_vm4 = vcmask 982944  }
  0x1b   :  { %v304_v28 = vsel %vm5_vm0, %v390_v26, %v389_v25  ;;  %v314_v31 = vsel %vm5_vm0, %v392_v30, %v391_v29  ;;  %vm47_vm5 = vcmask 950144   ;;  %vm57_vm6 = vcmask 917344  }
  0x1c   :  { %135 = vrot.lane.b32.xlu0 %v134_v40, %s437_s24  ;;  %145 = vrot.lane.b32.xlu1 %v144_v41, %s438_s29  ;;  %s443_s29 = smov 52   ;;  %vm67_vm7 = vcmask 884544   ;;  %vm77_vm8 = vcmask 851744   ;;  %vm87_vm9 = vcmask 818944   ;;  %vm97_vm10 = vcmask 786144  }
  0x1d   :  { %vm107_vm11 = vcmask 753344   ;;  %vm117_vm12 = vcmask 720544   ;;  %vm127_vm13 = vcmask 687744   ;;  %vm137_vm14 = vcmask 654944  }
  0x1e   :  { %vm147_vm15 = vcmask 622144   ;;  %vm157_vm0 = vcmask 589344   ;;  %vm167_vm1 = vcmask 556544  }
  0x20   :  { %155 = vrot.lane.b32.xlu0 %v154_v48, %s439_s9  ;;  %165 = vrot.lane.b32.xlu1 %v164_v50, %s440_s10  ;;  %s445_s10 = smov 44  }
  0x24   :  { %175 = vrot.lane.b32.xlu0 %v174_v55, %s441_s19  ;;  %185 = vrot.lane.b32.xlu1 %v184_v56, %s442_s20  ;;  %s447_s20 = smov 36  }
  0x28   :  { %195 = vrot.lane.b32.xlu0 %v194_v61, %s443_s29  ;;  %205 = vrot.lane.b32.xlu1 %v204_v62, %s444_s30  ;;  %s449_s30 = smov 28  }
  0x2c   :  { %215 = vrot.lane.b32.xlu0 %v214_v3, %s445_s10  ;;  %225 = vrot.lane.b32.xlu1 %v224_v4, %s446_s11  ;;  %s451_s11 = smov 20  }
  0x30   :  { %235 = vrot.lane.b32.xlu0 %v234_v9, %s447_s20  ;;  %245 = vrot.lane.b32.xlu1 %v244_v10, %s448_s21 }
  0x34   :  { %255 = vrot.lane.b32.xlu0 %v254_v15, %s449_s30  ;;  %265 = vrot.lane.b32.xlu1 %v264_v16, %s450_s2 }
  0x38   :  { %275 = vrot.lane.b32.xlu0 %v274_v21, %s451_s11  ;;  %285 = vrot.lane.b32.xlu1 %v284_v22, %s452_s12 }
  0x3c   :  { %295 = vrot.lane.b32.xlu0 %v294_v27, %s453_s0  ;;  %305 = vrot.lane.b32.xlu1 %v304_v28, %s454_s17 }
  0x40   :  { %315 = vrot.lane.b32.xlu0 %v314_v31, %s455_s18 }
  0x76   :  { %v16_v32 = vpop.permute.xlu0 %15   ;;  %v36_v33 = vpop.permute.xlu1 %35  }
  0x77   :  { %18 = vst.msk [vmem:[#allocation0] ss:$8 sm:$0x3] %vm17_vm2, %v16_v32   ;;  %vm177_vm2 = vcmask 523744  }
  0x7a   :  { %v26_v34 = vpop.permute.xlu0 %25   ;;  %v46_v35 = vpop.permute.xlu1 %45  }
  0x7b   :  { %28 = vst.msk [vmem:[#allocation0] ss:$8 sm:$0x3] %vm27_vm3, %v26_v34   ;;  %vm187_vm3 = vcmask 490944  }
  0x7c   :  { %38 = vst.msk [vmem:[#allocation0] ss:$8 sm:$0x3] %vm37_vm4, %v36_v33   ;;  %vm197_vm4 = vcmask 458144  }
  0x7d   :  { %48 = vst.msk [vmem:[#allocation0] ss:$8 sm:$0x3] %vm47_vm5, %v46_v35   ;;  %vm207_vm5 = vcmask 425344  }
  0x7e   :  { %v56_v36 = vpop.permute.xlu0 %55   ;;  %v66_v37 = vpop.permute.xlu1 %65  }
  0x7f   :  { %58 = vst.msk [vmem:[#allocation0] ss:$8 sm:$0x3] %vm57_vm6, %v56_v36   ;;  %vm217_vm6 = vcmask 392544  }
  0x80   :  { %68 = vst.msk [vmem:[#allocation0] ss:$8 sm:$0x3] %vm67_vm7, %v66_v37   ;;  %vm227_vm7 = vcmask 359744  }
  0x82   :  { %v76_v38 = vpop.permute.xlu0 %75   ;;  %v86_v39 = vpop.permute.xlu1 %85  }
  0x83   :  { %78 = vst.msk [vmem:[#allocation0] ss:$8 sm:$0x3] %vm77_vm8, %v76_v38   ;;  %vm237_vm8 = vcmask 326944  }
  0x84   :  { %88 = vst.msk [vmem:[#allocation0] ss:$8 sm:$0x3] %vm87_vm9, %v86_v39   ;;  %vm247_vm9 = vcmask 294144  }
  0x86   :  { %v96_v40 = vpop.permute.xlu0 %95   ;;  %v106_v41 = vpop.permute.xlu1 %105  }
  0x87   :  { %98 = vst.msk [vmem:[#allocation0] ss:$8 sm:$0x3] %vm97_vm10, %v96_v40   ;;  %vm257_vm10 = vcmask 261344  }
  0x88   :  { %108 = vst.msk [vmem:[#allocation0] ss:$8 sm:$0x3] %vm107_vm11, %v106_v41   ;;  %vm267_vm11 = vcmask 228544  }
  0x8a   :  { %v116_v42 = vpop.permute.xlu0 %115   ;;  %v126_v43 = vpop.permute.xlu1 %125  }
  0x8b   :  { %118 = vst.msk [vmem:[#allocation0] ss:$8 sm:$0x3] %vm117_vm12, %v116_v42   ;;  %vm277_vm12 = vcmask 195744  }
  0x8c   :  { %128 = vst.msk [vmem:[#allocation0] ss:$8 sm:$0x3] %vm127_vm13, %v126_v43   ;;  %vm287_vm13 = vcmask 162944  }
  0x8e   :  { %v136_v44 = vpop.permute.xlu0 %135   ;;  %v146_v45 = vpop.permute.xlu1 %145  }
  0x8f   :  { %138 = vst.msk [vmem:[#allocation0] ss:$8 sm:$0x3] %vm137_vm14, %v136_v44   ;;  %vm297_vm14 = vcmask 130144  }
  0x90   :  { %148 = vst.msk [vmem:[#allocation0] ss:$8 sm:$0x3] %vm147_vm15, %v146_v45   ;;  %vm307_vm15 = vcmask 97344  }
  0x92   :  { %v156_v46 = vpop.permute.xlu0 %155   ;;  %v166_v47 = vpop.permute.xlu1 %165  }
  0x93   :  { %158 = vst.msk [vmem:[#allocation0] ss:$8 sm:$0x3] %vm157_vm0, %v156_v46   ;;  %vm317_vm0 = vcmask 64544  }
  0x94   :  { %168 = vst.msk [vmem:[#allocation0] ss:$8 sm:$0x3] %vm167_vm1, %v166_v47  }
  0x96   :  { %v176_v48 = vpop.permute.xlu0 %175   ;;  %v186_v49 = vpop.permute.xlu1 %185  }
  0x97   :  { %178 = vst.msk [vmem:[#allocation0] ss:$8 sm:$0x3] %vm177_vm2, %v176_v48  }
  0x98   :  { %188 = vst.msk [vmem:[#allocation0] ss:$8 sm:$0x3] %vm187_vm3, %v186_v49  }
  0x9a   :  { %v196_v50 = vpop.permute.xlu0 %195   ;;  %v206_v51 = vpop.permute.xlu1 %205  }
  0x9b   :  { %198 = vst.msk [vmem:[#allocation0] ss:$8 sm:$0x3] %vm197_vm4, %v196_v50  }
  0x9c   :  { %208 = vst.msk [vmem:[#allocation0] ss:$8 sm:$0x3] %vm207_vm5, %v206_v51  }
  0x9e   :  { %v216_v52 = vpop.permute.xlu0 %215   ;;  %v226_v53 = vpop.permute.xlu1 %225  }
  0x9f   :  { %218 = vst.msk [vmem:[#allocation0] ss:$8 sm:$0x3] %vm217_vm6, %v216_v52  }
  0xa0   :  { %228 = vst.msk [vmem:[#allocation0] ss:$8 sm:$0x3] %vm227_vm7, %v226_v53  }
  0xa2   :  { %v236_v54 = vpop.permute.xlu0 %235   ;;  %v246_v55 = vpop.permute.xlu1 %245  }
  0xa3   :  { %238 = vst.msk [vmem:[#allocation0] ss:$8 sm:$0x3] %vm237_vm8, %v236_v54  }
  0xa4   :  { %248 = vst.msk [vmem:[#allocation0] ss:$8 sm:$0x3] %vm247_vm9, %v246_v55  }
  0xa6   :  { %v256_v56 = vpop.permute.xlu0 %255   ;;  %v266_v57 = vpop.permute.xlu1 %265  }
  0xa7   :  { %258 = vst.msk [vmem:[#allocation0] ss:$8 sm:$0x3] %vm257_vm10, %v256_v56  }
  0xa8   :  { %268 = vst.msk [vmem:[#allocation0] ss:$8 sm:$0x3] %vm267_vm11, %v266_v57  }
  0xaa   :  { %v276_v58 = vpop.permute.xlu0 %275   ;;  %v286_v59 = vpop.permute.xlu1 %285  }
  0xab   :  { %278 = vst.msk [vmem:[#allocation0] ss:$8 sm:$0x3] %vm277_vm12, %v276_v58  }
  0xac   :  { %288 = vst.msk [vmem:[#allocation0] ss:$8 sm:$0x3] %vm287_vm13, %v286_v59  }
  0xae   :  { %v296_v60 = vpop.permute.xlu0 %295   ;;  %v306_v61 = vpop.permute.xlu1 %305  }
  0xaf   :  { %298 = vst.msk [vmem:[#allocation0] ss:$8 sm:$0x3] %vm297_vm14, %v296_v60  }
  0xb0   :  { %308 = vst.msk [vmem:[#allocation0] ss:$8 sm:$0x3] %vm307_vm15, %v306_v61  }
  0xb2   :  { %v316_v62 = vpop.permute.xlu0 %315  }
  0xb3   :  { %318 = vst.msk [vmem:[#allocation0] ss:$8 sm:$0x3] %vm317_vm0, %v316_v62  }
  0xba   :  { %v322_v63 = vld [vmem:[#allocation0] sm:$0x1]  ;;  %v326_v0 = vld [vmem:[#allocation0 + $0x8] sm:$0x1] }
  0xbb   :  { %324 = vst [vmem:[%s697_s1] sm:$0x1] %v322_v63  ;;  %393 = vst [vmem:[%s697_s1 + $0x1] sm:$0x1] %v326_v0 }

// kernel: upsample_forward_nhwc.1
= control target key start
LH: loop header
LB: loop body
LE: loop exit
PB: predicated region body
PF: predicated region fallthrough
CT: control target
= control target key end

     0   :  { %v35_v0 = vlaneseq  ;;  %s611_s25 = smov 64   ;;  %vm141_vm3 = vcmask 523264   ;;  %s832_s0 = inlined_call_operand.vmem [shape: f32[34,64], index: 0, kind: input, shape index: {}]   ;;  %s833_s1 = inlined_call_operand.vmem [shape: f32[128,128], index: 1, kind: input, shape index: {}]   ;;  %s834_s2 = inlined_call_operand.vmem [shape: f32[128,128], index: 2, kind: input, shape index: {}]   ;;  %s835_s3 = inlined_call_operand.vmem [shape: f32[1,256], index: 3, kind: input, shape index: {}]   ;;  %s836_s4 = inlined_call_operand.vmem [shape: f32[32,256], index: 4, kind: output, shape index: {}]  }
   0x1   :  { %v640_v1 = vld [vmem:[%s832_s0 + $0x1] sm:$0xff]  ;;  %v648_v3 = vld [vmem:[%s832_s0 + $0x11] sm:$0xff]  ;;  %v679_v15 = vld [vmem:[%s832_s0 + $0x9] sm:$0xff] }
   0x2   :  { %v406_v2 = vld [vmem:[%s832_s0 + $0x2] sm:$0xff]  ;;  %v408_v5 = vld [vmem:[%s832_s0 + $0x12] sm:$0xff]  ;;  %v654_v6 = vshrl.u32 %v35_v0, 7  ;;  %v407_v9 = vld [vmem:[%s832_s0 + $0xa] sm:$0xff] }
   0x3   :  { %v591_v4 = vpack.i.bf16 %v406_v2, %v640_v1  ;;  %v601_v7 = vpack.i.bf16 %v408_v5, %v648_v3  ;;  %v166_v8 = vld [vmem:[%s833_s1] sm:$0xff]  ;;  %v167_v12 = vld [vmem:[%s833_s1 + $0x8] sm:$0xff]  ;;  %v168_v19 = vld [vmem:[%s833_s1 + $0x10] sm:$0xff] }
   0x4   :  { %v37_v10 = vadd.s32 8, %v654_v6  ;;  %v39_v11 = vadd.s32 24, %v654_v6  ;;  %v267_v13 = vld [vmem:[%s834_s2] sm:$0xff]  ;;  %v268_v14 = vld [vmem:[%s834_s2 + $0x8] sm:$0xff]  ;;  %v526_v17 = vpack.c.bf16 %v167_v12, %v166_v8  ;;  %v169_v20 = vld [vmem:[%s833_s1 + $0x18] sm:$0xff]  ;;  %v38_v8 = vadd.s32 16, %v654_v6 }
   0x5   :  { %592 = vrot.lane.b32.xlu0 %v591_v4, %s611_s25  ;;  %602 = vrot.lane.b32.xlu1 %v601_v7, %s611_s25  ;;  %v684_v16 = vld [vmem:[%s832_s0 + $0x19] sm:$0xff]  ;;  %v558_v18 = vpack.c.bf16 %v268_v14, %v267_v13  ;;  %v269_v21 = vld [vmem:[%s834_s2 + $0x10] sm:$0xff]  ;;  %v530_v25 = vpack.c.bf16 %v169_v20, %v168_v19  ;;  %v49_v7 = vand.u32 15, %v654_v6 }
   0x6   :  { %v56_v22 = vand.u32 15, %v37_v10  ;;  %v409_v23 = vld [vmem:[%s832_s0 + $0x1a] sm:$0xff]  ;;  %v70_v24 = vand.u32 15, %v39_v11  ;;  %527 = vmatprep.subr.bf16.mxu0 %v526_v17  ;;  %v171_v29 = vld [vmem:[%s833_s1 + $0x28] sm:$0xff]  ;;  %v172_v38 = vld [vmem:[%s833_s1 + $0x30] sm:$0xff]  ;;  %v63_v12 = vand.u32 15, %v38_v8 }
   0x7   :  { %v270_v26 = vld [vmem:[%s834_s2 + $0x18] sm:$0xff]  ;;  %v170_v27 = vld [vmem:[%s833_s1 + $0x20] sm:$0xff]  ;;  %559 = vmatprep.subr.bf16.mxu1 %v558_v18  ;;  %v272_v31 = vld [vmem:[%s834_s2 + $0x28] sm:$0xff]  ;;  %529 = vmatpush3.bf16.msra.mxu0 %v526_v17  ;;  %vm93_vm2 = vcmp.gt.s32.totalorder %v49_v7, 0 }
   0x8   :  { %v562_v28 = vpack.c.bf16 %v270_v26, %v269_v21  ;;  %v271_v30 = vld [vmem:[%s834_s2 + $0x20] sm:$0xff]  ;;  %vm110_vm0 = vcmp.lt.s32.totalorder %v56_v22, 15  ;;  %vm112_vm1 = vcmp.lt.s32.totalorder %v70_v24, 15  ;;  %561 = vmatpush3.bf16.msra.mxu1 %v558_v18  ;;  %531 = vmatprep.subr.bf16.mxu0 %v530_v25  ;;  %v534_v36 = vpack.c.bf16 %v171_v29, %v170_v27  ;;  %v173_v39 = vld [vmem:[%s833_s1 + $0x38] sm:$0xff]  ;;  %v273_v40 = vld [vmem:[%s834_s2 + $0x30] sm:$0xff] }
   0x9   :  { %v122_v32 = vsel %vm110_vm0, %v407_v9, 0.0  ;;  %v124_v33 = vsel %vm112_vm1, %v409_v23, 0.0  ;;  %v566_v37 = vpack.c.bf16 %v272_v31, %v271_v30  ;;  %v274_v41 = vld [vmem:[%s834_s2 + $0x38] sm:$0xff]  ;;  %v538_v42 = vpack.c.bf16 %v173_v39, %v172_v38  ;;  %v174_v44 = vld [vmem:[%s833_s1 + $0x40] sm:$0xff]  ;;  %v175_v45 = vld [vmem:[%s833_s1 + $0x48] sm:$0xff] }
   0xa   :  { %563 = vmatprep.subr.bf16.mxu1 %v562_v28  ;;  %v596_v34 = vpack.i.bf16 %v122_v32, %v679_v15  ;;  %v606_v35 = vpack.i.bf16 %v124_v33, %v684_v16  ;;  %v570_v43 = vpack.c.bf16 %v274_v41, %v273_v40  ;;  %v275_v46 = vld [vmem:[%s834_s2 + $0x40] sm:$0xff]  ;;  %v276_v47 = vld [vmem:[%s834_s2 + $0x48] sm:$0xff]  ;;  %v542_v48 = vpack.c.bf16 %v175_v45, %v174_v44  ;;  %v176_v50 = vld [vmem:[%s833_s1 + $0x50] sm:$0xff] }
   0xb   :  { %533 = vmatpush3.bf16.msra.mxu0 %v530_v25  ;;  %v574_v49 = vpack.c.bf16 %v276_v47, %v275_v46  ;;  %v177_v51 = vld [vmem:[%s833_s1 + $0x58] sm:$0xff]  ;;  %v277_v52 = vld [vmem:[%s834_s2 + $0x50] sm:$0xff]  ;;  %v178_v56 = vld [vmem:[%s833_s1 + $0x60] sm:$0xff]  ;;  %vm95_vm4 = vcmp.gt.s32.totalorder %v63_v12, 0 }
   0xc   :  { %597 = vrot.lane.b32.xlu0 %v596_v34, %s611_s25  ;;  %607 = vrot.lane.b32.xlu1 %v606_v35, %s611_s25  ;;  %v278_v53 = vld [vmem:[%s834_s2 + $0x58] sm:$0xff]  ;;  %v546_v54 = vpack.c.bf16 %v177_v51, %v176_v50  ;;  %v179_v57 = vld [vmem:[%s833_s1 + $0x68] sm:$0xff] }
   0xd   :  { %565 = vmatpush3.bf16.msra.mxu1 %v562_v28  ;;  %535 = vmatprep.subr.bf16.mxu0 %v534_v36  ;;  %v578_v55 = vpack.c.bf16 %v278_v53, %v277_v52  ;;  %v279_v58 = vld [vmem:[%s834_s2 + $0x60] sm:$0xff]  ;;  %v280_v59 = vld [vmem:[%s834_s2 + $0x68] sm:$0xff]  ;;  %v550_v60 = vpack.c.bf16 %v179_v57, %v178_v56  ;;  %v180_v62 = vld [vmem:[%s833_s1 + $0x70] sm:$0xff] }
   0xe   :  { %567 = vmatprep.subr.bf16.mxu1 %v566_v37  ;;  %v582_v61 = vpack.c.bf16 %v280_v59, %v279_v58  ;;  %v181_v63 = vld [vmem:[%s833_s1 + $0x78] sm:$0xff]  ;;  %v281_v0 = vld [vmem:[%s834_s2 + $0x70] sm:$0xff]  ;;  %v19_v9 = vld [vmem:[%s832_s0] sm:$0xff] }
   0xf   :  { %537 = vmatpush3.bf16.msra.mxu0 %v534_v36  ;;  %v282_v2 = vld [vmem:[%s834_s2 + $0x78] sm:$0xff]  ;;  %v554_v4 = vpack.c.bf16 %v181_v63, %v180_v62  ;;  %v105_v11 = vsel %vm93_vm2, %v19_v9, 0.0  ;;  %v21_v20 = vld [vmem:[%s832_s0 + $0x10] sm:$0xff]  ;;  %v20_v26 = vld [vmem:[%s832_s0 + $0x8] sm:$0xff] }
  0x10   :  { %539 = vmatprep.subr.bf16.mxu0 %v538_v42  ;;  %v586_v5 = vpack.c.bf16 %v282_v2, %v281_v0  ;;  %v107_v23 = vsel %vm95_vm4, %v21_v20, 0.0  ;;  %v22_v32 = vld [vmem:[%s832_s0 + $0x18] sm:$0xff]  ;;  %v368_v38 = vld [vmem:[%s835_s3] sm:$0x3] }
  0x11   :  { %569 = vmatpush3.bf16.msra.mxu1 %v566_v37  ;;  %v376_v37 = vsub.s32 1, %v654_v6 }
  0x12   :  { %571 = vmatprep.subr.bf16.mxu1 %v570_v43 }
  0x13   :  { %541 = vmatpush3.bf16.msra.mxu0 %v538_v42  ;;  %v377_v39 = vrot.slane %v368_v38, %v376_v37 }
  0x14   :  { %543 = vmatprep.subr.bf16.mxu0 %v542_v48 }
  0x15   :  { %573 = vmatpush3.bf16.msra.mxu1 %v570_v43 }
  0x16   :  { %575 = vmatprep.subr.bf16.mxu1 %v574_v49 }
  0x17   :  { %545 = vmatpush3.bf16.msra.mxu0 %v542_v48 }
  0x18   :  { %547 = vmatprep.subr.bf16.mxu0 %v546_v54 }
  0x19   :  { %577 = vmatpush3.bf16.msra.mxu1 %v574_v49 }
  0x1a   :  { %579 = vmatprep.subr.bf16.mxu1 %v578_v55 }
  0x1b   :  { %549 = vmatpush3.bf16.msra.mxu0 %v546_v54 }
  0x1c   :  { %551 = vmatprep.subr.bf16.mxu0 %v550_v60 }
  0x1d   :  { %581 = vmatpush3.bf16.msra.mxu1 %v578_v55 }
  0x1e   :  { %583 = vmatprep.subr.bf16.mxu1 %v582_v61 }
  0x1f   :  { %553 = vmatpush3.bf16.msra.mxu0 %v550_v60 }
  0x20   :  { %555 = vmatprep.subr.bf16.mxu0 %v554_v4 }
  0x21   :  { %585 = vmatpush3.bf16.msra.mxu1 %v582_v61 }
  0x22   :  { %587 = vmatprep.subr.bf16.mxu1 %v586_v5 }
  0x23   :  { %557 = vmatpush3.bf16.msra.mxu0 %v554_v4 }
  0x25   :  { %589 = vmatpush3.bf16.msra.mxu1 %v586_v5 }
  0x77   :  { %v593_v10 = vpop.permute.xlu0 %592  ;;  %v603_v17 = vpop.permute.xlu1 %602 }
  0x78   :  { %v595_v13 = vunpack.i.h.bf16 %v593_v10  ;;  %v594_v14 = vunpack.i.l.bf16 %v593_v10  ;;  %v605_v21 = vunpack.i.h.bf16 %v603_v17  ;;  %v604_v22 = vunpack.i.l.bf16 %v603_v17 }
  0x7a   :  { %v142_v18 = vsel %vm141_vm3, %v105_v11, %v594_v14  ;;  %v162_v19 = vsel %vm141_vm3, %v640_v1, %v595_v13  ;;  %v144_v30 = vsel %vm141_vm3, %v107_v23, %v604_v22  ;;  %v164_v31 = vsel %vm141_vm3, %v648_v3, %v605_v21 }
  0x7b   :  { %482 = vmatprep.mubr.f32.mxu0 %v142_v18  ;;  %520 = vmatprep.mubr.f32.mxu1 %v162_v19  ;;  %v372_v3 = vsub.s32 0, %v654_v6 }
  0x7e   :  { %v598_v24 = vpop.permute.xlu0 %597  ;;  %v608_v25 = vpop.permute.xlu1 %607 }
  0x7f   :  { %v600_v27 = vunpack.i.h.bf16 %v598_v24  ;;  %v599_v28 = vunpack.i.l.bf16 %v598_v24  ;;  %v610_v29 = vunpack.i.h.bf16 %v608_v25  ;;  %v609_v1 = vunpack.i.l.bf16 %v608_v25 }
  0x81   :  { %v143_v33 = vsel %vm141_vm3, %v20_v26, %v599_v28  ;;  %v163_v34 = vsel %vm141_vm3, %v679_v15, %v600_v27  ;;  %v145_v35 = vsel %vm141_vm3, %v22_v32, %v609_v1  ;;  %v165_v36 = vsel %vm141_vm3, %v684_v16, %v610_v29 }
  0x82   :  { %483 = vmatmul.mubr.f32.vlgmr.msra.gmra.mrb[0].mxu0 %v143_v33  ;;  %521 = vmatmul.mubr.f32.vlgmr.msra.gmra.mrb[0].mxu1 %v163_v34  ;;  %v373_v15 = vrot.slane %v368_v38, %v372_v3 }
  0x83   :  { %485 = vmatprep.mubr.f32.mxu0 %v144_v30  ;;  %523 = vmatprep.mubr.f32.mxu1 %v164_v31 }
  0x86   :  { %486 = vmatmul.mubr.f32.gmra.mrb[2].mxu0 %v145_v35  ;;  %524 = vmatmul.mubr.f32.gmra.mrb[2].mxu1 %v165_v36 }
 0x155   :  { %v484_v40 = vpop.f32.mrb[0].mxu0  ;;  %v522_v41 = vpop.f32.mrb[0].mxu1 }
 0x156   :  { %v382_v42 = vadd.f32 %v484_v40, %v373_v15  ;;  %v383_v43 = vadd.f32 %v522_v41, %v377_v39  ;;  %v248_v44 = vpop.f32.mrb[1].mxu0  ;;  %v349_v45 = vpop.f32.mrb[1].mxu1 }
 0x157   :  { %v380_v46 = vadd.f32 %v373_v15, %v248_v44  ;;  %v381_v16 = vadd.f32 %v377_v39, %v349_v45 }
 0x158   :  { %390 = vst [vmem:[%s836_s4 + $0x10] sm:$0xff] %v382_v42  ;;  %391 = vst [vmem:[%s836_s4 + $0x18] sm:$0xff] %v383_v43 }
 0x159   :  { %388 = vst [vmem:[%s836_s4] sm:$0xff] %v380_v46  ;;  %389 = vst [vmem:[%s836_s4 + $0x8] sm:$0xff] %v381_v16  ;;  %v487_v6 = vpop.f32.mrb[2].mxu0  ;;  %v525_v47 = vpop.f32.mrb[2].mxu1 }
 0x15a   :  { %v386_v48 = vadd.f32 %v487_v6, %v373_v15  ;;  %v387_v49 = vadd.f32 %v525_v47, %v377_v39  ;;  %v258_v50 = vpop.f32.mrb[3].mxu0  ;;  %v359_v51 = vpop.f32.mrb[3].mxu1 }
 0x15b   :  { %v384_v52 = vadd.f32 %v373_v15, %v258_v50  ;;  %v385_v53 = vadd.f32 %v377_v39, %v359_v51 }
 0x15c   :  { %394 = vst [vmem:[%s836_s4 + $0x30] sm:$0xff] %v386_v48  ;;  %395 = vst [vmem:[%s836_s4 + $0x38] sm:$0xff] %v387_v49 }
 0x15d   :  { %392 = vst [vmem:[%s836_s4 + $0x20] sm:$0xff] %v384_v52  ;;  %393 = vst [vmem:[%s836_s4 + $0x28] sm:$0xff] %v385_v53 }

</bundles_post_ra>
